<compile_context>
chip_gen: v7x
topology: tpu7x:2x2x1
jax: 0.10.0
libtpu: 0.0.40
codegen_flags: <defaults>
</compile_context>

<pallas_src>
import functools

import jax
import jax.numpy as jnp
from jax import lax
from jax.experimental import pallas as pl
from jax.experimental.pallas import tpu as pltpu


# --------------------------------------------------------------------------- #
# Fused kernel: LeakyReLU -> Conv(k4,s2,p1) -> ReLU -> sub-pixel ConvT(k4,s2,p1)
#               -> BatchNorm (batch stats) -> skip concat.   Single grid step.
# --------------------------------------------------------------------------- #
def _unet_inner_kernel(xp_ref, wd_ref, wt_ref, g_ref, b_ref, out_ref, dp_ref,
                       *, N, Ho, Wo, Cin, inner_nc, outer_nc, eps):
    M = N * Ho * Wo                       # batch folded into the matmul M dimension
    C = Cin + outer_nc
    f32 = jnp.float32

    # Load the padded input once; LeakyReLU(0.2) + a SINGLE bf16 cast feed every
    # conv tap.  The skip concat later reads the original f32 values.
    xv = xp_ref[...]                                   # (N, 2, Ho+1, Wo+1, 2*Cin) f32
    lx = jnp.where(xv > 0, xv, 0.2 * xv).astype(jnp.bfloat16)
    wd = wd_ref[...]                                   # (4, 2, 2*Cin, inner)  bf16
    wt = wt_ref[...]                                   # (4, 4, inner, outer)  bf16

    # ---- down conv (k4,s2,p1): 8 MXU dots, taps are unit-stride slices ----
    acc_d = jnp.zeros((M, inner_nc), f32)
    for kh in range(4):
        qh, pr = divmod(kh, 2)                         # padded-row offset / parity
        for qw in range(2):                            # column-pair tap (kw = 2qw, 2qw+1)
            tap = lx[:, pr, qh:qh + Ho, qw:qw + Wo, :].reshape(M, 2 * Cin)
            acc_d = acc_d + jnp.dot(tap, wd[kh, qw], preferred_element_type=f32)
    d = jnp.maximum(acc_d, 0.0).astype(jnp.bfloat16)   # fused up-path ReLU, cast once

    # ---- stash zero-padded d in a bf16 VMEM scratch (never touches HBM) ----
    dp_ref[...] = jnp.zeros_like(dp_ref)               # single grid step: zeroed once
    dp_ref[:, 1:Ho + 1, 1:Wo + 1, :] = d.reshape(N, Ho, Wo, inner_nc)

    # ---- hoist the 9 distinct ConvT taps (3 row offsets x 3 col offsets) ----
    taps = [[dp_ref[:, dr:dr + Ho, dc:dc + Wo, :].reshape(M, inner_nc)
             for dc in range(3)] for dr in range(3)]

    # ---- ConvTranspose2d (k4,s2,p1) via sub-pixel (output-parity) decomposition ----
    accs = []
    for r in range(2):
        for s in range(2):
            p = 2 * r + s
            acc = jnp.zeros((M, outer_nc), f32)
            for a in range(2):
                for b in range(2):
                    acc = acc + jnp.dot(taps[r + a][s + b], wt[p, 2 * a + b],
                                        preferred_element_type=f32)
            accs.append(acc)

    # ---- BatchNorm2d (training-mode batch stats), centered two-pass variance ----
    count = 4.0 * M                                    # = N*H*W elements per channel
    mean = sum(jnp.sum(a, axis=0, keepdims=True) for a in accs) / count
    var = sum(jnp.sum((a - mean) * (a - mean), axis=0, keepdims=True)
              for a in accs) / count
    scale = g_ref[...] * lax.rsqrt(var + eps)          # (1, outer)
    shift = b_ref[...] - mean * scale

    # ---- normalize + skip concat into one lane-packed slab (N, Ho, Wo, 4*C) ----
    for r in range(2):
        for s in range(2):
            p = 2 * r + s
            z = (accs[p] * scale + shift).reshape(N, Ho, Wo, outer_nc)
            # skip: matching parity slice of the ORIGINAL x (exact f32, no activation)
            xs = xv[:, 1 - r, r:r + Ho, s:s + Wo,
                    (1 - s) * Cin:(1 - s) * Cin + Cin]
            out_ref[:, :, :, p * C:p * C + Cin] = xs
            out_ref[:, :, :, p * C + Cin:(p + 1) * C] = z


# ------------------------------ host-side wrappers --------------------------- #

def prepare_weights(Wd, Wt):
    """Hoisted, one-time weight re-layout (lane-friendly (K, N) tiles, bf16)."""
    inner_nc, Cin = Wd.shape[0], Wd.shape[1]
    # down conv: taps grouped by (kh, kw//2); K index j = (kw % 2)*Cin + ci
    wd_g = Wd.transpose(2, 3, 1, 0).reshape(4, 2, 2 * Cin, inner_nc)
    # transposed conv: 2x2 sub-kernel per output parity (r, s) and tap (a, b)
    wt_perm = Wt.transpose(2, 3, 0, 1)                  # (kh, kw, inner, outer)
    sel = ((3, 1), (2, 0))                              # kernel index per (parity, tap)
    wt_par = jnp.stack([
        jnp.stack([wt_perm[sel[r][a], sel[s][b]]
                   for a in range(2) for b in range(2)])
        for r in range(2) for s in range(2)])           # (4, 4, inner, outer)
    return wd_g.astype(jnp.bfloat16), wt_par.astype(jnp.bfloat16)


def unet_innermost_forward(x, wd_g, wt_par, gamma, beta, eps=1e-5):
    """x: [N, input_nc, H, W] -> [N, input_nc + outer_nc, H, W]."""
    N, Cin, H, W = x.shape
    Ho, Wo = H // 2, W // 2
    inner_nc = wd_g.shape[-1]
    outer_nc = wt_par.shape[-1]
    C = Cin + outer_nc

    # Boundary relayout only: NCHW -> padded NHWC, row-parity-split, column-paired,
    # as a SINGLE HBM array (every conv tap becomes a unit-stride in-kernel slice).
    xpad = jnp.pad(x.transpose(0, 2, 3, 1), ((0, 0), (1, 1), (1, 1), (0, 0)))
    xp = (xpad.reshape(N, Ho + 1, 2, Wo + 1, 2 * Cin)
              .transpose(0, 2, 1, 3, 4))                # (N, 2, Ho+1, Wo+1, 2*Cin)

    kern = functools.partial(_unet_inner_kernel, N=N, Ho=Ho, Wo=Wo, Cin=Cin,
                             inner_nc=inner_nc, outer_nc=outer_nc, eps=eps)
    out_k = pl.pallas_call(
        kern,
        out_shape=jax.ShapeDtypeStruct((N, Ho, Wo, 4 * C), jnp.float32),
        grid=(1,),
        in_specs=[
            pl.BlockSpec((N, 2, Ho + 1, Wo + 1, 2 * Cin), lambda i: (0, 0, 0, 0, 0)),
            pl.BlockSpec((4, 2, 2 * Cin, inner_nc), lambda i: (0, 0, 0, 0)),
            pl.BlockSpec((4, 4, inner_nc, outer_nc), lambda i: (0, 0, 0, 0)),
            pl.BlockSpec((1, outer_nc), lambda i: (0, 0)),
            pl.BlockSpec((1, outer_nc), lambda i: (0, 0)),
        ],
        out_specs=pl.BlockSpec((N, Ho, Wo, 4 * C), lambda i: (0, 0, 0, 0)),
        scratch_shapes=[pltpu.VMEM((N, Ho + 2, Wo + 2, inner_nc), jnp.bfloat16)],
        compiler_params=pltpu.CompilerParams(dimension_semantics=("arbitrary",)),
    )(xp, wd_g, wt_par, gamma, beta)

    # Single boundary relayout back to NCHW:
    # (N, Ho, Wo, [r, s, C]) -> (N, C, 2*Ho, 2*Wo).
    out = (out_k.reshape(N, Ho, Wo, 2, 2, C)
                .transpose(0, 5, 1, 3, 2, 4)
                .reshape(N, C, H, W))
    return out


# ------------------------------ reference (JAX) ----------------------------- #

def reference_forward(x, Wd, Wt, gamma, beta, eps=1e-5):
    """Mirrors the kernel's bf16-input / f32-accumulation matmul precision."""
    lx = jnp.where(x > 0, x, 0.2 * x).astype(jnp.bfloat16)
    d = lax.conv_general_dilated(lx, Wd.astype(jnp.bfloat16), window_strides=(2, 2),
                                 padding=((1, 1), (1, 1)),
                                 dimension_numbers=('NCHW', 'OIHW', 'NCHW'),
                                 preferred_element_type=jnp.float32)
    d = jnp.maximum(d, 0.0).astype(jnp.bfloat16)
    Wf = Wt[:, :, ::-1, ::-1].transpose(1, 0, 2, 3).astype(jnp.bfloat16)
    u = lax.conv_general_dilated(d, Wf, window_strides=(1, 1),
                                 padding=((2, 2), (2, 2)), lhs_dilation=(2, 2),
                                 dimension_numbers=('NCHW', 'OIHW', 'NCHW'),
                                 preferred_element_type=jnp.float32)
    mean = jnp.mean(u, axis=(0, 2, 3), keepdims=True)
    var = jnp.mean((u - mean) ** 2, axis=(0, 2, 3), keepdims=True)
    z = (u - mean) * lax.rsqrt(var + eps) * gamma.reshape(1, -1, 1, 1) \
        + beta.reshape(1, -1, 1, 1)
    return jnp.concatenate([x, z], axis=1)


# ----------------------------------- main ----------------------------------- #

if __name__ == "__main__":
    # innermost UnetSkipConnectionBlock(outer_nc=4, inner_nc=8, norm_layer=BatchNorm2d)
    N, outer_nc, inner_nc, H, W = 2, 4, 8, 16, 16
    input_nc = outer_nc   # input_nc=None -> outer_nc in the PyTorch module

    key = jax.random.PRNGKey(0)
    kx, kd, ku = jax.random.split(key, 3)
    x = jax.random.normal(kx, (N, input_nc, H, W), jnp.float32)
    # Conv2d weight [inner, input, 4, 4]; ConvTranspose2d weight [inner, outer, 4, 4]
    Wd = 0.05 * jax.random.normal(kd, (inner_nc, input_nc, 4, 4), jnp.float32)
    Wt = 0.05 * jax.random.normal(ku, (inner_nc, outer_nc, 4, 4), jnp.float32)
    # BatchNorm2d default init: weight=1, bias=0
    gamma = jnp.ones((1, outer_nc), jnp.float32)
    beta = jnp.zeros((1, outer_nc), jnp.float32)

    wd_g, wt_par = prepare_weights(Wd, Wt)             # hoisted weight relayout (once)

    fwd = jax.jit(unet_innermost_forward)
    out = jax.block_until_ready(fwd(x, wd_g, wt_par, gamma, beta))
    assert out.shape == (N, input_nc + outer_nc, H, W), out.shape

    ref = jax.block_until_ready(reference_forward(x, Wd, Wt, gamma, beta))
    err = float(jnp.max(jnp.abs(out - ref)))
    assert err < 2e-2, err

    print("KERNEL_OK")
</pallas_src>

<mosaic_0001>
module attributes {stable_mosaic.version = 11 : i64} {
  func.func @_unet_inner_kernel(%arg0: i32, %arg1: memref<2x2x9x9x8xf32, #tpu.memory_space<vmem>>, %arg2: memref<4x2x8x8xbf16, #tpu.memory_space<vmem>>, %arg3: memref<4x4x8x4xbf16, #tpu.memory_space<vmem>>, %arg4: memref<1x4xf32, #tpu.memory_space<vmem>>, %arg5: memref<1x4xf32, #tpu.memory_space<vmem>>, %arg6: memref<2x8x8x32xf32, #tpu.memory_space<vmem>>, %arg7: memref<2x10x10x8xbf16, #tpu.memory_space<vmem>>) attributes {dimension_semantics = [#tpu.dimension_semantics<arbitrary>], iteration_bounds = array<i64: 1>, scalar_prefetch = 0 : i64, scratch_operands = 1 : i64, tpu.core_type = #tpu.core_type<tc>, window_params = [{pipeline_mode = #tpu.pipeline_mode<synchronous>, transform_indices = @transform_0, window_bounds = array<i64: 2, 2, 9, 9, 8>}, {pipeline_mode = #tpu.pipeline_mode<synchronous>, transform_indices = @transform_1, window_bounds = array<i64: 4, 2, 8, 8>}, {pipeline_mode = #tpu.pipeline_mode<synchronous>, transform_indices = @transform_2, window_bounds = array<i64: 4, 4, 8, 4>}, {pipeline_mode = #tpu.pipeline_mode<synchronous>, transform_indices = @transform_3, window_bounds = array<i64: 1, 4>}, {pipeline_mode = #tpu.pipeline_mode<synchronous>, transform_indices = @transform_4, window_bounds = array<i64: 1, 4>}, {pipeline_mode = #tpu.pipeline_mode<synchronous>, transform_indices = @transform_5, window_bounds = array<i64: 2, 8, 8, 32>}]} {
    %c0 = arith.constant 0 : index
    %c0_0 = arith.constant 0 : index
    %c0_1 = arith.constant 0 : index
    %c0_2 = arith.constant 0 : index
    %c0_3 = arith.constant 0 : index
    %0 = vector.load %arg1[%c0, %c0_0, %c0_1, %c0_2, %c0_3] : memref<2x2x9x9x8xf32, #tpu.memory_space<vmem>>, vector<2x2x9x9x8xf32>
    %cst = arith.constant 0.000000e+00 : f32
    %1 = vector.broadcast %cst : f32 to vector<2x2x9x9x8xf32>
    %2 = arith.cmpf ogt, %0, %1 : vector<2x2x9x9x8xf32>
    %cst_4 = arith.constant 2.000000e-01 : f32
    %3 = vector.broadcast %cst_4 : f32 to vector<2x2x9x9x8xf32>
    %4 = arith.mulf %3, %0 : vector<2x2x9x9x8xf32>
    %5 = arith.select %2, %0, %4 : vector<2x2x9x9x8xi1>, vector<2x2x9x9x8xf32>
    %6 = arith.truncf %5 : vector<2x2x9x9x8xf32> to vector<2x2x9x9x8xbf16>
    %c0_5 = arith.constant 0 : index
    %c0_6 = arith.constant 0 : index
    %c0_7 = arith.constant 0 : index
    %c0_8 = arith.constant 0 : index
    %7 = vector.load %arg2[%c0_5, %c0_6, %c0_7, %c0_8] : memref<4x2x8x8xbf16, #tpu.memory_space<vmem>>, vector<4x2x8x8xbf16>
    %c0_9 = arith.constant 0 : index
    %c0_10 = arith.constant 0 : index
    %c0_11 = arith.constant 0 : index
    %c0_12 = arith.constant 0 : index
    %8 = vector.load %arg3[%c0_9, %c0_10, %c0_11, %c0_12] : memref<4x4x8x4xbf16, #tpu.memory_space<vmem>>, vector<4x4x8x4xbf16>
    %cst_13 = arith.constant 0.000000e+00 : f32
    %9 = vector.broadcast %cst_13 : f32 to vector<128x8xf32>
    %10 = vector.extract_strided_slice %6 {offsets = [0, 0, 0, 0, 0], sizes = [2, 1, 8, 8, 8], strides = [1, 1, 1, 1, 1]} : vector<2x2x9x9x8xbf16> to vector<2x1x8x8x8xbf16>
    %11 = vector.shape_cast %10 : vector<2x1x8x8x8xbf16> to vector<2x8x8x8xbf16>
    %12 = vector.shape_cast %11 : vector<2x8x8x8xbf16> to vector<128x8xbf16>
    %13 = vector.extract_strided_slice %7 {offsets = [0, 0, 0, 0], sizes = [1, 1, 8, 8], strides = [1, 1, 1, 1]} : vector<4x2x8x8xbf16> to vector<1x1x8x8xbf16>
    %14 = vector.shape_cast %13 : vector<1x1x8x8xbf16> to vector<8x8xbf16>
    %cst_14 = arith.constant dense<0.000000e+00> : vector<128x8xf32>
    %15 = tpu.matmul %12, %14, %cst_14 {dimension_numbers = #tpu.dot_dimension_numbers<[1], [0], [0], [1], [0, 0, 1, 1], [], []>} : vector<128x8xbf16>, vector<8x8xbf16>, vector<128x8xf32> -> vector<128x8xf32>
    %16 = arith.addf %9, %15 : vector<128x8xf32>
    %17 = vector.extract_strided_slice %6 {offsets = [0, 0, 0, 1, 0], sizes = [2, 1, 8, 8, 8], strides = [1, 1, 1, 1, 1]} : vector<2x2x9x9x8xbf16> to vector<2x1x8x8x8xbf16>
    %18 = vector.shape_cast %17 : vector<2x1x8x8x8xbf16> to vector<2x8x8x8xbf16>
    %19 = vector.shape_cast %18 : vector<2x8x8x8xbf16> to vector<128x8xbf16>
    %20 = vector.extract_strided_slice %7 {offsets = [0, 1, 0, 0], sizes = [1, 1, 8, 8], strides = [1, 1, 1, 1]} : vector<4x2x8x8xbf16> to vector<1x1x8x8xbf16>
    %21 = vector.shape_cast %20 : vector<1x1x8x8xbf16> to vector<8x8xbf16>
    %cst_15 = arith.constant dense<0.000000e+00> : vector<128x8xf32>
    %22 = tpu.matmul %19, %21, %cst_15 {dimension_numbers = #tpu.dot_dimension_numbers<[1], [0], [0], [1], [0, 0, 1, 1], [], []>} : vector<128x8xbf16>, vector<8x8xbf16>, vector<128x8xf32> -> vector<128x8xf32>
    %23 = arith.addf %16, %22 : vector<128x8xf32>
    %24 = vector.extract_strided_slice %6 {offsets = [0, 1, 0, 0, 0], sizes = [2, 1, 8, 8, 8], strides = [1, 1, 1, 1, 1]} : vector<2x2x9x9x8xbf16> to vector<2x1x8x8x8xbf16>
    %25 = vector.shape_cast %24 : vector<2x1x8x8x8xbf16> to vector<2x8x8x8xbf16>
    %26 = vector.shape_cast %25 : vector<2x8x8x8xbf16> to vector<128x8xbf16>
    %27 = vector.extract_strided_slice %7 {offsets = [1, 0, 0, 0], sizes = [1, 1, 8, 8], strides = [1, 1, 1, 1]} : vector<4x2x8x8xbf16> to vector<1x1x8x8xbf16>
    %28 = vector.shape_cast %27 : vector<1x1x8x8xbf16> to vector<8x8xbf16>
    %cst_16 = arith.constant dense<0.000000e+00> : vector<128x8xf32>
    %29 = tpu.matmul %26, %28, %cst_16 {dimension_numbers = #tpu.dot_dimension_numbers<[1], [0], [0], [1], [0, 0, 1, 1], [], []>} : vector<128x8xbf16>, vector<8x8xbf16>, vector<128x8xf32> -> vector<128x8xf32>
    %30 = arith.addf %23, %29 : vector<128x8xf32>
    %31 = vector.extract_strided_slice %6 {offsets = [0, 1, 0, 1, 0], sizes = [2, 1, 8, 8, 8], strides = [1, 1, 1, 1, 1]} : vector<2x2x9x9x8xbf16> to vector<2x1x8x8x8xbf16>
    %32 = vector.shape_cast %31 : vector<2x1x8x8x8xbf16> to vector<2x8x8x8xbf16>
    %33 = vector.shape_cast %32 : vector<2x8x8x8xbf16> to vector<128x8xbf16>
    %34 = vector.extract_strided_slice %7 {offsets = [1, 1, 0, 0], sizes = [1, 1, 8, 8], strides = [1, 1, 1, 1]} : vector<4x2x8x8xbf16> to vector<1x1x8x8xbf16>
    %35 = vector.shape_cast %34 : vector<1x1x8x8xbf16> to vector<8x8xbf16>
    %cst_17 = arith.constant dense<0.000000e+00> : vector<128x8xf32>
    %36 = tpu.matmul %33, %35, %cst_17 {dimension_numbers = #tpu.dot_dimension_numbers<[1], [0], [0], [1], [0, 0, 1, 1], [], []>} : vector<128x8xbf16>, vector<8x8xbf16>, vector<128x8xf32> -> vector<128x8xf32>
    %37 = arith.addf %30, %36 : vector<128x8xf32>
    %38 = vector.extract_strided_slice %6 {offsets = [0, 0, 1, 0, 0], sizes = [2, 1, 8, 8, 8], strides = [1, 1, 1, 1, 1]} : vector<2x2x9x9x8xbf16> to vector<2x1x8x8x8xbf16>
    %39 = vector.shape_cast %38 : vector<2x1x8x8x8xbf16> to vector<2x8x8x8xbf16>
    %40 = vector.shape_cast %39 : vector<2x8x8x8xbf16> to vector<128x8xbf16>
    %41 = vector.extract_strided_slice %7 {offsets = [2, 0, 0, 0], sizes = [1, 1, 8, 8], strides = [1, 1, 1, 1]} : vector<4x2x8x8xbf16> to vector<1x1x8x8xbf16>
    %42 = vector.shape_cast %41 : vector<1x1x8x8xbf16> to vector<8x8xbf16>
    %cst_18 = arith.constant dense<0.000000e+00> : vector<128x8xf32>
    %43 = tpu.matmul %40, %42, %cst_18 {dimension_numbers = #tpu.dot_dimension_numbers<[1], [0], [0], [1], [0, 0, 1, 1], [], []>} : vector<128x8xbf16>, vector<8x8xbf16>, vector<128x8xf32> -> vector<128x8xf32>
    %44 = arith.addf %37, %43 : vector<128x8xf32>
    %45 = vector.extract_strided_slice %6 {offsets = [0, 0, 1, 1, 0], sizes = [2, 1, 8, 8, 8], strides = [1, 1, 1, 1, 1]} : vector<2x2x9x9x8xbf16> to vector<2x1x8x8x8xbf16>
    %46 = vector.shape_cast %45 : vector<2x1x8x8x8xbf16> to vector<2x8x8x8xbf16>
    %47 = vector.shape_cast %46 : vector<2x8x8x8xbf16> to vector<128x8xbf16>
    %48 = vector.extract_strided_slice %7 {offsets = [2, 1, 0, 0], sizes = [1, 1, 8, 8], strides = [1, 1, 1, 1]} : vector<4x2x8x8xbf16> to vector<1x1x8x8xbf16>
    %49 = vector.shape_cast %48 : vector<1x1x8x8xbf16> to vector<8x8xbf16>
    %cst_19 = arith.constant dense<0.000000e+00> : vector<128x8xf32>
    %50 = tpu.matmul %47, %49, %cst_19 {dimension_numbers = #tpu.dot_dimension_numbers<[1], [0], [0], [1], [0, 0, 1, 1], [], []>} : vector<128x8xbf16>, vector<8x8xbf16>, vector<128x8xf32> -> vector<128x8xf32>
    %51 = arith.addf %44, %50 : vector<128x8xf32>
    %52 = vector.extract_strided_slice %6 {offsets = [0, 1, 1, 0, 0], sizes = [2, 1, 8, 8, 8], strides = [1, 1, 1, 1, 1]} : vector<2x2x9x9x8xbf16> to vector<2x1x8x8x8xbf16>
    %53 = vector.shape_cast %52 : vector<2x1x8x8x8xbf16> to vector<2x8x8x8xbf16>
    %54 = vector.shape_cast %53 : vector<2x8x8x8xbf16> to vector<128x8xbf16>
    %55 = vector.extract_strided_slice %7 {offsets = [3, 0, 0, 0], sizes = [1, 1, 8, 8], strides = [1, 1, 1, 1]} : vector<4x2x8x8xbf16> to vector<1x1x8x8xbf16>
    %56 = vector.shape_cast %55 : vector<1x1x8x8xbf16> to vector<8x8xbf16>
    %cst_20 = arith.constant dense<0.000000e+00> : vector<128x8xf32>
    %57 = tpu.matmul %54, %56, %cst_20 {dimension_numbers = #tpu.dot_dimension_numbers<[1], [0], [0], [1], [0, 0, 1, 1], [], []>} : vector<128x8xbf16>, vector<8x8xbf16>, vector<128x8xf32> -> vector<128x8xf32>
    %58 = arith.addf %51, %57 : vector<128x8xf32>
    %59 = vector.extract_strided_slice %6 {offsets = [0, 1, 1, 1, 0], sizes = [2, 1, 8, 8, 8], strides = [1, 1, 1, 1, 1]} : vector<2x2x9x9x8xbf16> to vector<2x1x8x8x8xbf16>
    %60 = vector.shape_cast %59 : vector<2x1x8x8x8xbf16> to vector<2x8x8x8xbf16>
    %61 = vector.shape_cast %60 : vector<2x8x8x8xbf16> to vector<128x8xbf16>
    %62 = vector.extract_strided_slice %7 {offsets = [3, 1, 0, 0], sizes = [1, 1, 8, 8], strides = [1, 1, 1, 1]} : vector<4x2x8x8xbf16> to vector<1x1x8x8xbf16>
    %63 = vector.shape_cast %62 : vector<1x1x8x8xbf16> to vector<8x8xbf16>
    %cst_21 = arith.constant dense<0.000000e+00> : vector<128x8xf32>
    %64 = tpu.matmul %61, %63, %cst_21 {dimension_numbers = #tpu.dot_dimension_numbers<[1], [0], [0], [1], [0, 0, 1, 1], [], []>} : vector<128x8xbf16>, vector<8x8xbf16>, vector<128x8xf32> -> vector<128x8xf32>
    %65 = arith.addf %58, %64 : vector<128x8xf32>
    %cst_22 = arith.constant 0.000000e+00 : f32
    %66 = vector.broadcast %cst_22 : f32 to vector<128x8xf32>
    %67 = arith.maximumf %65, %66 : vector<128x8xf32>
    %68 = arith.truncf %67 : vector<128x8xf32> to vector<128x8xbf16>
    %cst_23 = arith.constant 0.000000e+00 : bf16
    %69 = vector.broadcast %cst_23 : bf16 to vector<2x10x10x8xbf16>
    %c0_24 = arith.constant 0 : index
    %c0_25 = arith.constant 0 : index
    %c0_26 = arith.constant 0 : index
    %c0_27 = arith.constant 0 : index
    %70 = vector.load %arg7[%c0_24, %c0_25, %c0_26, %c0_27] : memref<2x10x10x8xbf16, #tpu.memory_space<vmem>>, vector<2x10x10x8xbf16>
    tpu.vector_store %arg7[%c0_24, %c0_25, %c0_26, %c0_27], %69 {strides = array<i32>} : memref<2x10x10x8xbf16, #tpu.memory_space<vmem>>, vector<2x10x10x8xbf16>,
    %71 = vector.shape_cast %68 : vector<128x8xbf16> to vector<2x8x8x8xbf16>
    %c0_28 = arith.constant 0 : index
    %c1 = arith.constant 1 : index
    %c1_29 = arith.constant 1 : index
    %c0_30 = arith.constant 0 : index
    %72 = vector.load %arg7[%c0_28, %c1, %c1_29, %c0_30] : memref<2x10x10x8xbf16, #tpu.memory_space<vmem>>, vector<2x8x8x8xbf16>
    tpu.vector_store %arg7[%c0_28, %c1, %c1_29, %c0_30], %71 {strides = array<i32>} : memref<2x10x10x8xbf16, #tpu.memory_space<vmem>>, vector<2x8x8x8xbf16>,
    %c0_31 = arith.constant 0 : index
    %c0_32 = arith.constant 0 : index
    %c0_33 = arith.constant 0 : index
    %c0_34 = arith.constant 0 : index
    %73 = vector.load %arg7[%c0_31, %c0_32, %c0_33, %c0_34] : memref<2x10x10x8xbf16, #tpu.memory_space<vmem>>, vector<2x8x8x8xbf16>
    %74 = vector.shape_cast %73 : vector<2x8x8x8xbf16> to vector<128x8xbf16>
    %c0_35 = arith.constant 0 : index
    %c0_36 = arith.constant 0 : index
    %c1_37 = arith.constant 1 : index
    %c0_38 = arith.constant 0 : index
    %75 = vector.load %arg7[%c0_35, %c0_36, %c1_37, %c0_38] : memref<2x10x10x8xbf16, #tpu.memory_space<vmem>>, vector<2x8x8x8xbf16>
    %76 = vector.shape_cast %75 : vector<2x8x8x8xbf16> to vector<128x8xbf16>
    %c0_39 = arith.constant 0 : index
    %c0_40 = arith.constant 0 : index
    %c2 = arith.constant 2 : index
    %c0_41 = arith.constant 0 : index
    %77 = vector.load %arg7[%c0_39, %c0_40, %c2, %c0_41] : memref<2x10x10x8xbf16, #tpu.memory_space<vmem>>, vector<2x8x8x8xbf16>
    %78 = vector.shape_cast %77 : vector<2x8x8x8xbf16> to vector<128x8xbf16>
    %c0_42 = arith.constant 0 : index
    %c1_43 = arith.constant 1 : index
    %c0_44 = arith.constant 0 : index
    %c0_45 = arith.constant 0 : index
    %79 = vector.load %arg7[%c0_42, %c1_43, %c0_44, %c0_45] : memref<2x10x10x8xbf16, #tpu.memory_space<vmem>>, vector<2x8x8x8xbf16>
    %80 = vector.shape_cast %79 : vector<2x8x8x8xbf16> to vector<128x8xbf16>
    %c0_46 = arith.constant 0 : index
    %c1_47 = arith.constant 1 : index
    %c1_48 = arith.constant 1 : index
    %c0_49 = arith.constant 0 : index
    %81 = vector.load %arg7[%c0_46, %c1_47, %c1_48, %c0_49] : memref<2x10x10x8xbf16, #tpu.memory_space<vmem>>, vector<2x8x8x8xbf16>
    %82 = vector.shape_cast %81 : vector<2x8x8x8xbf16> to vector<128x8xbf16>
    %c0_50 = arith.constant 0 : index
    %c1_51 = arith.constant 1 : index
    %c2_52 = arith.constant 2 : index
    %c0_53 = arith.constant 0 : index
    %83 = vector.load %arg7[%c0_50, %c1_51, %c2_52, %c0_53] : memref<2x10x10x8xbf16, #tpu.memory_space<vmem>>, vector<2x8x8x8xbf16>
    %84 = vector.shape_cast %83 : vector<2x8x8x8xbf16> to vector<128x8xbf16>
    %c0_54 = arith.constant 0 : index
    %c2_55 = arith.constant 2 : index
    %c0_56 = arith.constant 0 : index
    %c0_57 = arith.constant 0 : index
    %85 = vector.load %arg7[%c0_54, %c2_55, %c0_56, %c0_57] : memref<2x10x10x8xbf16, #tpu.memory_space<vmem>>, vector<2x8x8x8xbf16>
    %86 = vector.shape_cast %85 : vector<2x8x8x8xbf16> to vector<128x8xbf16>
    %c0_58 = arith.constant 0 : index
    %c2_59 = arith.constant 2 : index
    %c1_60 = arith.constant 1 : index
    %c0_61 = arith.constant 0 : index
    %87 = vector.load %arg7[%c0_58, %c2_59, %c1_60, %c0_61] : memref<2x10x10x8xbf16, #tpu.memory_space<vmem>>, vector<2x8x8x8xbf16>
    %88 = vector.shape_cast %87 : vector<2x8x8x8xbf16> to vector<128x8xbf16>
    %c0_62 = arith.constant 0 : index
    %c2_63 = arith.constant 2 : index
    %c2_64 = arith.constant 2 : index
    %c0_65 = arith.constant 0 : index
    %89 = vector.load %arg7[%c0_62, %c2_63, %c2_64, %c0_65] : memref<2x10x10x8xbf16, #tpu.memory_space<vmem>>, vector<2x8x8x8xbf16>
    %90 = vector.shape_cast %89 : vector<2x8x8x8xbf16> to vector<128x8xbf16>
    %cst_66 = arith.constant 0.000000e+00 : f32
    %91 = vector.broadcast %cst_66 : f32 to vector<128x4xf32>
    %92 = vector.extract_strided_slice %8 {offsets = [0, 0, 0, 0], sizes = [1, 1, 8, 4], strides = [1, 1, 1, 1]} : vector<4x4x8x4xbf16> to vector<1x1x8x4xbf16>
    %93 = vector.shape_cast %92 : vector<1x1x8x4xbf16> to vector<8x4xbf16>
    %cst_67 = arith.constant dense<0.000000e+00> : vector<128x4xf32>
    %94 = tpu.matmul %74, %93, %cst_67 {dimension_numbers = #tpu.dot_dimension_numbers<[1], [0], [0], [1], [0, 0, 1, 1], [], []>} : vector<128x8xbf16>, vector<8x4xbf16>, vector<128x4xf32> -> vector<128x4xf32>
    %95 = arith.addf %91, %94 : vector<128x4xf32>
    %96 = vector.extract_strided_slice %8 {offsets = [0, 1, 0, 0], sizes = [1, 1, 8, 4], strides = [1, 1, 1, 1]} : vector<4x4x8x4xbf16> to vector<1x1x8x4xbf16>
    %97 = vector.shape_cast %96 : vector<1x1x8x4xbf16> to vector<8x4xbf16>
    %cst_68 = arith.constant dense<0.000000e+00> : vector<128x4xf32>
    %98 = tpu.matmul %76, %97, %cst_68 {dimension_numbers = #tpu.dot_dimension_numbers<[1], [0], [0], [1], [0, 0, 1, 1], [], []>} : vector<128x8xbf16>, vector<8x4xbf16>, vector<128x4xf32> -> vector<128x4xf32>
    %99 = arith.addf %95, %98 : vector<128x4xf32>
    %100 = vector.extract_strided_slice %8 {offsets = [0, 2, 0, 0], sizes = [1, 1, 8, 4], strides = [1, 1, 1, 1]} : vector<4x4x8x4xbf16> to vector<1x1x8x4xbf16>
    %101 = vector.shape_cast %100 : vector<1x1x8x4xbf16> to vector<8x4xbf16>
    %cst_69 = arith.constant dense<0.000000e+00> : vector<128x4xf32>
    %102 = tpu.matmul %80, %101, %cst_69 {dimension_numbers = #tpu.dot_dimension_numbers<[1], [0], [0], [1], [0, 0, 1, 1], [], []>} : vector<128x8xbf16>, vector<8x4xbf16>, vector<128x4xf32> -> vector<128x4xf32>
    %103 = arith.addf %99, %102 : vector<128x4xf32>
    %104 = vector.extract_strided_slice %8 {offsets = [0, 3, 0, 0], sizes = [1, 1, 8, 4], strides = [1, 1, 1, 1]} : vector<4x4x8x4xbf16> to vector<1x1x8x4xbf16>
    %105 = vector.shape_cast %104 : vector<1x1x8x4xbf16> to vector<8x4xbf16>
    %cst_70 = arith.constant dense<0.000000e+00> : vector<128x4xf32>
    %106 = tpu.matmul %82, %105, %cst_70 {dimension_numbers = #tpu.dot_dimension_numbers<[1], [0], [0], [1], [0, 0, 1, 1], [], []>} : vector<128x8xbf16>, vector<8x4xbf16>, vector<128x4xf32> -> vector<128x4xf32>
    %107 = arith.addf %103, %106 : vector<128x4xf32>
    %cst_71 = arith.constant 0.000000e+00 : f32
    %108 = vector.broadcast %cst_71 : f32 to vector<128x4xf32>
    %109 = vector.extract_strided_slice %8 {offsets = [1, 0, 0, 0], sizes = [1, 1, 8, 4], strides = [1, 1, 1, 1]} : vector<4x4x8x4xbf16> to vector<1x1x8x4xbf16>
    %110 = vector.shape_cast %109 : vector<1x1x8x4xbf16> to vector<8x4xbf16>
    %cst_72 = arith.constant dense<0.000000e+00> : vector<128x4xf32>
    %111 = tpu.matmul %76, %110, %cst_72 {dimension_numbers = #tpu.dot_dimension_numbers<[1], [0], [0], [1], [0, 0, 1, 1], [], []>} : vector<128x8xbf16>, vector<8x4xbf16>, vector<128x4xf32> -> vector<128x4xf32>
    %112 = arith.addf %108, %111 : vector<128x4xf32>
    %113 = vector.extract_strided_slice %8 {offsets = [1, 1, 0, 0], sizes = [1, 1, 8, 4], strides = [1, 1, 1, 1]} : vector<4x4x8x4xbf16> to vector<1x1x8x4xbf16>
    %114 = vector.shape_cast %113 : vector<1x1x8x4xbf16> to vector<8x4xbf16>
    %cst_73 = arith.constant dense<0.000000e+00> : vector<128x4xf32>
    %115 = tpu.matmul %78, %114, %cst_73 {dimension_numbers = #tpu.dot_dimension_numbers<[1], [0], [0], [1], [0, 0, 1, 1], [], []>} : vector<128x8xbf16>, vector<8x4xbf16>, vector<128x4xf32> -> vector<128x4xf32>
    %116 = arith.addf %112, %115 : vector<128x4xf32>
    %117 = vector.extract_strided_slice %8 {offsets = [1, 2, 0, 0], sizes = [1, 1, 8, 4], strides = [1, 1, 1, 1]} : vector<4x4x8x4xbf16> to vector<1x1x8x4xbf16>
    %118 = vector.shape_cast %117 : vector<1x1x8x4xbf16> to vector<8x4xbf16>
    %cst_74 = arith.constant dense<0.000000e+00> : vector<128x4xf32>
    %119 = tpu.matmul %82, %118, %cst_74 {dimension_numbers = #tpu.dot_dimension_numbers<[1], [0], [0], [1], [0, 0, 1, 1], [], []>} : vector<128x8xbf16>, vector<8x4xbf16>, vector<128x4xf32> -> vector<128x4xf32>
    %120 = arith.addf %116, %119 : vector<128x4xf32>
    %121 = vector.extract_strided_slice %8 {offsets = [1, 3, 0, 0], sizes = [1, 1, 8, 4], strides = [1, 1, 1, 1]} : vector<4x4x8x4xbf16> to vector<1x1x8x4xbf16>
    %122 = vector.shape_cast %121 : vector<1x1x8x4xbf16> to vector<8x4xbf16>
    %cst_75 = arith.constant dense<0.000000e+00> : vector<128x4xf32>
    %123 = tpu.matmul %84, %122, %cst_75 {dimension_numbers = #tpu.dot_dimension_numbers<[1], [0], [0], [1], [0, 0, 1, 1], [], []>} : vector<128x8xbf16>, vector<8x4xbf16>, vector<128x4xf32> -> vector<128x4xf32>
    %124 = arith.addf %120, %123 : vector<128x4xf32>
    %cst_76 = arith.constant 0.000000e+00 : f32
    %125 = vector.broadcast %cst_76 : f32 to vector<128x4xf32>
    %126 = vector.extract_strided_slice %8 {offsets = [2, 0, 0, 0], sizes = [1, 1, 8, 4], strides = [1, 1, 1, 1]} : vector<4x4x8x4xbf16> to vector<1x1x8x4xbf16>
    %127 = vector.shape_cast %126 : vector<1x1x8x4xbf16> to vector<8x4xbf16>
    %cst_77 = arith.constant dense<0.000000e+00> : vector<128x4xf32>
    %128 = tpu.matmul %80, %127, %cst_77 {dimension_numbers = #tpu.dot_dimension_numbers<[1], [0], [0], [1], [0, 0, 1, 1], [], []>} : vector<128x8xbf16>, vector<8x4xbf16>, vector<128x4xf32> -> vector<128x4xf32>
    %129 = arith.addf %125, %128 : vector<128x4xf32>
    %130 = vector.extract_strided_slice %8 {offsets = [2, 1, 0, 0], sizes = [1, 1, 8, 4], strides = [1, 1, 1, 1]} : vector<4x4x8x4xbf16> to vector<1x1x8x4xbf16>
    %131 = vector.shape_cast %130 : vector<1x1x8x4xbf16> to vector<8x4xbf16>
    %cst_78 = arith.constant dense<0.000000e+00> : vector<128x4xf32>
    %132 = tpu.matmul %82, %131, %cst_78 {dimension_numbers = #tpu.dot_dimension_numbers<[1], [0], [0], [1], [0, 0, 1, 1], [], []>} : vector<128x8xbf16>, vector<8x4xbf16>, vector<128x4xf32> -> vector<128x4xf32>
    %133 = arith.addf %129, %132 : vector<128x4xf32>
    %134 = vector.extract_strided_slice %8 {offsets = [2, 2, 0, 0], sizes = [1, 1, 8, 4], strides = [1, 1, 1, 1]} : vector<4x4x8x4xbf16> to vector<1x1x8x4xbf16>
    %135 = vector.shape_cast %134 : vector<1x1x8x4xbf16> to vector<8x4xbf16>
    %cst_79 = arith.constant dense<0.000000e+00> : vector<128x4xf32>
    %136 = tpu.matmul %86, %135, %cst_79 {dimension_numbers = #tpu.dot_dimension_numbers<[1], [0], [0], [1], [0, 0, 1, 1], [], []>} : vector<128x8xbf16>, vector<8x4xbf16>, vector<128x4xf32> -> vector<128x4xf32>
    %137 = arith.addf %133, %136 : vector<128x4xf32>
    %138 = vector.extract_strided_slice %8 {offsets = [2, 3, 0, 0], sizes = [1, 1, 8, 4], strides = [1, 1, 1, 1]} : vector<4x4x8x4xbf16> to vector<1x1x8x4xbf16>
    %139 = vector.shape_cast %138 : vector<1x1x8x4xbf16> to vector<8x4xbf16>
    %cst_80 = arith.constant dense<0.000000e+00> : vector<128x4xf32>
    %140 = tpu.matmul %88, %139, %cst_80 {dimension_numbers = #tpu.dot_dimension_numbers<[1], [0], [0], [1], [0, 0, 1, 1], [], []>} : vector<128x8xbf16>, vector<8x4xbf16>, vector<128x4xf32> -> vector<128x4xf32>
    %141 = arith.addf %137, %140 : vector<128x4xf32>
    %cst_81 = arith.constant 0.000000e+00 : f32
    %142 = vector.broadcast %cst_81 : f32 to vector<128x4xf32>
    %143 = vector.extract_strided_slice %8 {offsets = [3, 0, 0, 0], sizes = [1, 1, 8, 4], strides = [1, 1, 1, 1]} : vector<4x4x8x4xbf16> to vector<1x1x8x4xbf16>
    %144 = vector.shape_cast %143 : vector<1x1x8x4xbf16> to vector<8x4xbf16>
    %cst_82 = arith.constant dense<0.000000e+00> : vector<128x4xf32>
    %145 = tpu.matmul %82, %144, %cst_82 {dimension_numbers = #tpu.dot_dimension_numbers<[1], [0], [0], [1], [0, 0, 1, 1], [], []>} : vector<128x8xbf16>, vector<8x4xbf16>, vector<128x4xf32> -> vector<128x4xf32>
    %146 = arith.addf %142, %145 : vector<128x4xf32>
    %147 = vector.extract_strided_slice %8 {offsets = [3, 1, 0, 0], sizes = [1, 1, 8, 4], strides = [1, 1, 1, 1]} : vector<4x4x8x4xbf16> to vector<1x1x8x4xbf16>
    %148 = vector.shape_cast %147 : vector<1x1x8x4xbf16> to vector<8x4xbf16>
    %cst_83 = arith.constant dense<0.000000e+00> : vector<128x4xf32>
    %149 = tpu.matmul %84, %148, %cst_83 {dimension_numbers = #tpu.dot_dimension_numbers<[1], [0], [0], [1], [0, 0, 1, 1], [], []>} : vector<128x8xbf16>, vector<8x4xbf16>, vector<128x4xf32> -> vector<128x4xf32>
    %150 = arith.addf %146, %149 : vector<128x4xf32>
    %151 = vector.extract_strided_slice %8 {offsets = [3, 2, 0, 0], sizes = [1, 1, 8, 4], strides = [1, 1, 1, 1]} : vector<4x4x8x4xbf16> to vector<1x1x8x4xbf16>
    %152 = vector.shape_cast %151 : vector<1x1x8x4xbf16> to vector<8x4xbf16>
    %cst_84 = arith.constant dense<0.000000e+00> : vector<128x4xf32>
    %153 = tpu.matmul %88, %152, %cst_84 {dimension_numbers = #tpu.dot_dimension_numbers<[1], [0], [0], [1], [0, 0, 1, 1], [], []>} : vector<128x8xbf16>, vector<8x4xbf16>, vector<128x4xf32> -> vector<128x4xf32>
    %154 = arith.addf %150, %153 : vector<128x4xf32>
    %155 = vector.extract_strided_slice %8 {offsets = [3, 3, 0, 0], sizes = [1, 1, 8, 4], strides = [1, 1, 1, 1]} : vector<4x4x8x4xbf16> to vector<1x1x8x4xbf16>
    %156 = vector.shape_cast %155 : vector<1x1x8x4xbf16> to vector<8x4xbf16>
    %cst_85 = arith.constant dense<0.000000e+00> : vector<128x4xf32>
    %157 = tpu.matmul %90, %156, %cst_85 {dimension_numbers = #tpu.dot_dimension_numbers<[1], [0], [0], [1], [0, 0, 1, 1], [], []>} : vector<128x8xbf16>, vector<8x4xbf16>, vector<128x4xf32> -> vector<128x4xf32>
    %158 = arith.addf %154, %157 : vector<128x4xf32>
    %cst_86 = arith.constant dense<0.000000e+00> : vector<4xf32>
    %159 = vector.multi_reduction <add>, %107, %cst_86 [0] : vector<128x4xf32> to vector<4xf32>
    %160 = vector.shape_cast %159 : vector<4xf32> to vector<1x4xf32>
    %cst_87 = arith.constant 0.000000e+00 : f32
    %161 = vector.broadcast %cst_87 : f32 to vector<1x4xf32>
    %162 = arith.addf %161, %160 : vector<1x4xf32>
    %cst_88 = arith.constant dense<0.000000e+00> : vector<4xf32>
    %163 = vector.multi_reduction <add>, %124, %cst_88 [0] : vector<128x4xf32> to vector<4xf32>
    %164 = vector.shape_cast %163 : vector<4xf32> to vector<1x4xf32>
    %165 = arith.addf %162, %164 : vector<1x4xf32>
    %cst_89 = arith.constant dense<0.000000e+00> : vector<4xf32>
    %166 = vector.multi_reduction <add>, %141, %cst_89 [0] : vector<128x4xf32> to vector<4xf32>
    %167 = vector.shape_cast %166 : vector<4xf32> to vector<1x4xf32>
    %168 = arith.addf %165, %167 : vector<1x4xf32>
    %cst_90 = arith.constant dense<0.000000e+00> : vector<4xf32>
    %169 = vector.multi_reduction <add>, %158, %cst_90 [0] : vector<128x4xf32> to vector<4xf32>
    %170 = vector.shape_cast %169 : vector<4xf32> to vector<1x4xf32>
    %171 = arith.addf %168, %170 : vector<1x4xf32>
    %cst_91 = arith.constant 5.120000e+02 : f32
    %172 = vector.broadcast %cst_91 : f32 to vector<1x4xf32>
    %173 = arith.divf %171, %172 : vector<1x4xf32>
    %174 = vector.broadcast %173 : vector<1x4xf32> to vector<128x4xf32>
    %175 = arith.subf %107, %174 : vector<128x4xf32>
    %176 = vector.broadcast %173 : vector<1x4xf32> to vector<128x4xf32>
    %177 = arith.subf %107, %176 : vector<128x4xf32>
    %178 = arith.mulf %175, %177 : vector<128x4xf32>
    %cst_92 = arith.constant dense<0.000000e+00> : vector<4xf32>
    %179 = vector.multi_reduction <add>, %178, %cst_92 [0] : vector<128x4xf32> to vector<4xf32>
    %180 = vector.shape_cast %179 : vector<4xf32> to vector<1x4xf32>
    %cst_93 = arith.constant 0.000000e+00 : f32
    %181 = vector.broadcast %cst_93 : f32 to vector<1x4xf32>
    %182 = arith.addf %181, %180 : vector<1x4xf32>
    %183 = vector.broadcast %173 : vector<1x4xf32> to vector<128x4xf32>
    %184 = arith.subf %124, %183 : vector<128x4xf32>
    %185 = vector.broadcast %173 : vector<1x4xf32> to vector<128x4xf32>
    %186 = arith.subf %124, %185 : vector<128x4xf32>
    %187 = arith.mulf %184, %186 : vector<128x4xf32>
    %cst_94 = arith.constant dense<0.000000e+00> : vector<4xf32>
    %188 = vector.multi_reduction <add>, %187, %cst_94 [0] : vector<128x4xf32> to vector<4xf32>
    %189 = vector.shape_cast %188 : vector<4xf32> to vector<1x4xf32>
    %190 = arith.addf %182, %189 : vector<1x4xf32>
    %191 = vector.broadcast %173 : vector<1x4xf32> to vector<128x4xf32>
    %192 = arith.subf %141, %191 : vector<128x4xf32>
    %193 = vector.broadcast %173 : vector<1x4xf32> to vector<128x4xf32>
    %194 = arith.subf %141, %193 : vector<128x4xf32>
    %195 = arith.mulf %192, %194 : vector<128x4xf32>
    %cst_95 = arith.constant dense<0.000000e+00> : vector<4xf32>
    %196 = vector.multi_reduction <add>, %195, %cst_95 [0] : vector<128x4xf32> to vector<4xf32>
    %197 = vector.shape_cast %196 : vector<4xf32> to vector<1x4xf32>
    %198 = arith.addf %190, %197 : vector<1x4xf32>
    %199 = vector.broadcast %173 : vector<1x4xf32> to vector<128x4xf32>
    %200 = arith.subf %158, %199 : vector<128x4xf32>
    %201 = vector.broadcast %173 : vector<1x4xf32> to vector<128x4xf32>
    %202 = arith.subf %158, %201 : vector<128x4xf32>
    %203 = arith.mulf %200, %202 : vector<128x4xf32>
    %cst_96 = arith.constant dense<0.000000e+00> : vector<4xf32>
    %204 = vector.multi_reduction <add>, %203, %cst_96 [0] : vector<128x4xf32> to vector<4xf32>
    %205 = vector.shape_cast %204 : vector<4xf32> to vector<1x4xf32>
    %206 = arith.addf %198, %205 : vector<1x4xf32>
    %cst_97 = arith.constant 5.120000e+02 : f32
    %207 = vector.broadcast %cst_97 : f32 to vector<1x4xf32>
    %208 = arith.divf %206, %207 : vector<1x4xf32>
    %c0_98 = arith.constant 0 : index
    %c0_99 = arith.constant 0 : index
    %209 = vector.load %arg4[%c0_98, %c0_99] : memref<1x4xf32, #tpu.memory_space<vmem>>, vector<1x4xf32>
    %cst_100 = arith.constant 9.99999974E-6 : f32
    %210 = vector.broadcast %cst_100 : f32 to vector<1x4xf32>
    %211 = arith.addf %208, %210 : vector<1x4xf32>
    %212 = math.rsqrt %211 : vector<1x4xf32>
    %213 = arith.mulf %209, %212 : vector<1x4xf32>
    %c0_101 = arith.constant 0 : index
    %c0_102 = arith.constant 0 : index
    %214 = vector.load %arg5[%c0_101, %c0_102] : memref<1x4xf32, #tpu.memory_space<vmem>>, vector<1x4xf32>
    %215 = arith.mulf %173, %213 : vector<1x4xf32>
    %216 = arith.subf %214, %215 : vector<1x4xf32>
    %217 = vector.broadcast %213 : vector<1x4xf32> to vector<128x4xf32>
    %218 = arith.mulf %107, %217 : vector<128x4xf32>
    %219 = vector.broadcast %216 : vector<1x4xf32> to vector<128x4xf32>
    %220 = arith.addf %218, %219 : vector<128x4xf32>
    %221 = vector.shape_cast %220 : vector<128x4xf32> to vector<2x8x8x4xf32>
    %222 = vector.extract_strided_slice %0 {offsets = [0, 1, 0, 0, 4], sizes = [2, 1, 8, 8, 4], strides = [1, 1, 1, 1, 1]} : vector<2x2x9x9x8xf32> to vector<2x1x8x8x4xf32>
    %223 = vector.shape_cast %222 : vector<2x1x8x8x4xf32> to vector<2x8x8x4xf32>
    %c0_103 = arith.constant 0 : index
    %c0_104 = arith.constant 0 : index
    %c0_105 = arith.constant 0 : index
    %c0_106 = arith.constant 0 : index
    %224 = vector.load %arg6[%c0_103, %c0_104, %c0_105, %c0_106] : memref<2x8x8x32xf32, #tpu.memory_space<vmem>>, vector<2x8x8x4xf32>
    tpu.vector_store %arg6[%c0_103, %c0_104, %c0_105, %c0_106], %223 {strides = array<i32>} : memref<2x8x8x32xf32, #tpu.memory_space<vmem>>, vector<2x8x8x4xf32>,
    %c0_107 = arith.constant 0 : index
    %c0_108 = arith.constant 0 : index
    %c0_109 = arith.constant 0 : index
    %c4 = arith.constant 4 : index
    %225 = vector.load %arg6[%c0_107, %c0_108, %c0_109, %c4] : memref<2x8x8x32xf32, #tpu.memory_space<vmem>>, vector<2x8x8x4xf32>
    tpu.vector_store %arg6[%c0_107, %c0_108, %c0_109, %c4], %221 {strides = array<i32>} : memref<2x8x8x32xf32, #tpu.memory_space<vmem>>, vector<2x8x8x4xf32>,
    %226 = vector.broadcast %213 : vector<1x4xf32> to vector<128x4xf32>
    %227 = arith.mulf %124, %226 : vector<128x4xf32>
    %228 = vector.broadcast %216 : vector<1x4xf32> to vector<128x4xf32>
    %229 = arith.addf %227, %228 : vector<128x4xf32>
    %230 = vector.shape_cast %229 : vector<128x4xf32> to vector<2x8x8x4xf32>
    %231 = vector.extract_strided_slice %0 {offsets = [0, 1, 0, 1, 0], sizes = [2, 1, 8, 8, 4], strides = [1, 1, 1, 1, 1]} : vector<2x2x9x9x8xf32> to vector<2x1x8x8x4xf32>
    %232 = vector.shape_cast %231 : vector<2x1x8x8x4xf32> to vector<2x8x8x4xf32>
    %c0_110 = arith.constant 0 : index
    %c0_111 = arith.constant 0 : index
    %c0_112 = arith.constant 0 : index
    %c8 = arith.constant 8 : index
    %233 = vector.load %arg6[%c0_110, %c0_111, %c0_112, %c8] : memref<2x8x8x32xf32, #tpu.memory_space<vmem>>, vector<2x8x8x4xf32>
    tpu.vector_store %arg6[%c0_110, %c0_111, %c0_112, %c8], %232 {strides = array<i32>} : memref<2x8x8x32xf32, #tpu.memory_space<vmem>>, vector<2x8x8x4xf32>,
    %c0_113 = arith.constant 0 : index
    %c0_114 = arith.constant 0 : index
    %c0_115 = arith.constant 0 : index
    %c12 = arith.constant 12 : index
    %234 = vector.load %arg6[%c0_113, %c0_114, %c0_115, %c12] : memref<2x8x8x32xf32, #tpu.memory_space<vmem>>, vector<2x8x8x4xf32>
    tpu.vector_store %arg6[%c0_113, %c0_114, %c0_115, %c12], %230 {strides = array<i32>} : memref<2x8x8x32xf32, #tpu.memory_space<vmem>>, vector<2x8x8x4xf32>,
    %235 = vector.broadcast %213 : vector<1x4xf32> to vector<128x4xf32>
    %236 = arith.mulf %141, %235 : vector<128x4xf32>
    %237 = vector.broadcast %216 : vector<1x4xf32> to vector<128x4xf32>
    %238 = arith.addf %236, %237 : vector<128x4xf32>
    %239 = vector.shape_cast %238 : vector<128x4xf32> to vector<2x8x8x4xf32>
    %240 = vector.extract_strided_slice %0 {offsets = [0, 0, 1, 0, 4], sizes = [2, 1, 8, 8, 4], strides = [1, 1, 1, 1, 1]} : vector<2x2x9x9x8xf32> to vector<2x1x8x8x4xf32>
    %241 = vector.shape_cast %240 : vector<2x1x8x8x4xf32> to vector<2x8x8x4xf32>
    %c0_116 = arith.constant 0 : index
    %c0_117 = arith.constant 0 : index
    %c0_118 = arith.constant 0 : index
    %c16 = arith.constant 16 : index
    %242 = vector.load %arg6[%c0_116, %c0_117, %c0_118, %c16] : memref<2x8x8x32xf32, #tpu.memory_space<vmem>>, vector<2x8x8x4xf32>
    tpu.vector_store %arg6[%c0_116, %c0_117, %c0_118, %c16], %241 {strides = array<i32>} : memref<2x8x8x32xf32, #tpu.memory_space<vmem>>, vector<2x8x8x4xf32>,
    %c0_119 = arith.constant 0 : index
    %c0_120 = arith.constant 0 : index
    %c0_121 = arith.constant 0 : index
    %c20 = arith.constant 20 : index
    %243 = vector.load %arg6[%c0_119, %c0_120, %c0_121, %c20] : memref<2x8x8x32xf32, #tpu.memory_space<vmem>>, vector<2x8x8x4xf32>
    tpu.vector_store %arg6[%c0_119, %c0_120, %c0_121, %c20], %239 {strides = array<i32>} : memref<2x8x8x32xf32, #tpu.memory_space<vmem>>, vector<2x8x8x4xf32>,
    %244 = vector.broadcast %213 : vector<1x4xf32> to vector<128x4xf32>
    %245 = arith.mulf %158, %244 : vector<128x4xf32>
    %246 = vector.broadcast %216 : vector<1x4xf32> to vector<128x4xf32>
    %247 = arith.addf %245, %246 : vector<128x4xf32>
    %248 = vector.shape_cast %247 : vector<128x4xf32> to vector<2x8x8x4xf32>
    %249 = vector.extract_strided_slice %0 {offsets = [0, 0, 1, 1, 0], sizes = [2, 1, 8, 8, 4], strides = [1, 1, 1, 1, 1]} : vector<2x2x9x9x8xf32> to vector<2x1x8x8x4xf32>
    %250 = vector.shape_cast %249 : vector<2x1x8x8x4xf32> to vector<2x8x8x4xf32>
    %c0_122 = arith.constant 0 : index
    %c0_123 = arith.constant 0 : index
    %c0_124 = arith.constant 0 : index
    %c24 = arith.constant 24 : index
    %251 = vector.load %arg6[%c0_122, %c0_123, %c0_124, %c24] : memref<2x8x8x32xf32, #tpu.memory_space<vmem>>, vector<2x8x8x4xf32>
    tpu.vector_store %arg6[%c0_122, %c0_123, %c0_124, %c24], %250 {strides = array<i32>} : memref<2x8x8x32xf32, #tpu.memory_space<vmem>>, vector<2x8x8x4xf32>,
    %c0_125 = arith.constant 0 : index
    %c0_126 = arith.constant 0 : index
    %c0_127 = arith.constant 0 : index
    %c28 = arith.constant 28 : index
    %252 = vector.load %arg6[%c0_125, %c0_126, %c0_127, %c28] : memref<2x8x8x32xf32, #tpu.memory_space<vmem>>, vector<2x8x8x4xf32>
    tpu.vector_store %arg6[%c0_125, %c0_126, %c0_127, %c28], %248 {strides = array<i32>} : memref<2x8x8x32xf32, #tpu.memory_space<vmem>>, vector<2x8x8x4xf32>,
    return
  }
  func.func @transform_0(%arg0: i32) -> (i32, i32, i32, i32, i32) {
    %c0_i32 = arith.constant 0 : i32
    %c0_i32_0 = arith.constant 0 : i32
    %c0_i32_1 = arith.constant 0 : i32
    %c0_i32_2 = arith.constant 0 : i32
    %c0_i32_3 = arith.constant 0 : i32
    %c0_i32_4 = arith.constant 0 : i32
    return %c0_i32, %c0_i32_0, %c0_i32_1, %c0_i32_2, %c0_i32_3 : i32, i32, i32, i32, i32
  }
  func.func @transform_1(%arg0: i32) -> (i32, i32, i32, i32) {
    %c0_i32 = arith.constant 0 : i32
    %c0_i32_0 = arith.constant 0 : i32
    %c0_i32_1 = arith.constant 0 : i32
    %c0_i32_2 = arith.constant 0 : i32
    %c0_i32_3 = arith.constant 0 : i32
    return %c0_i32, %c0_i32_0, %c0_i32_1, %c0_i32_2 : i32, i32, i32, i32
  }
  func.func @transform_2(%arg0: i32) -> (i32, i32, i32, i32) {
    %c0_i32 = arith.constant 0 : i32
    %c0_i32_0 = arith.constant 0 : i32
    %c0_i32_1 = arith.constant 0 : i32
    %c0_i32_2 = arith.constant 0 : i32
    %c0_i32_3 = arith.constant 0 : i32
    return %c0_i32, %c0_i32_0, %c0_i32_1, %c0_i32_2 : i32, i32, i32, i32
  }
  func.func @transform_3(%arg0: i32) -> (i32, i32) {
    %c0_i32 = arith.constant 0 : i32
    %c0_i32_0 = arith.constant 0 : i32
    %c0_i32_1 = arith.constant 0 : i32
    return %c0_i32, %c0_i32_0 : i32, i32
  }
  func.func @transform_4(%arg0: i32) -> (i32, i32) {
    %c0_i32 = arith.constant 0 : i32
    %c0_i32_0 = arith.constant 0 : i32
    %c0_i32_1 = arith.constant 0 : i32
    return %c0_i32, %c0_i32_0 : i32, i32
  }
  func.func @transform_5(%arg0: i32) -> (i32, i32, i32, i32) {
    %c0_i32 = arith.constant 0 : i32
    %c0_i32_0 = arith.constant 0 : i32
    %c0_i32_1 = arith.constant 0 : i32
    %c0_i32_2 = arith.constant 0 : i32
    %c0_i32_3 = arith.constant 0 : i32
    return %c0_i32, %c0_i32_0, %c0_i32_1, %c0_i32_2 : i32, i32, i32, i32
  }
}

</mosaic_0001>

<bundles_post_ra>
// kernel: unet_innermost_forward.1
= control target key start
LH: loop header
LB: loop body
LE: loop exit
PB: predicated region body
PF: predicated region fallthrough
CT: control target
= control target key end

     0   :  { %vm725_vm0 = vcmask 1043456   ;;  %vm449_vm11 = vsmask.f32 3328  ;;  %vm450_vm12 = vsmask.f32 7440  ;;  %vm700_vm13 = vcmask 64512   ;;  %s13489_s1 = inlined_call_operand.vmem [shape: bf16[4,2,8,8], index: 1, kind: input, shape index: {}]   ;;  %s13490_s0 = inlined_call_operand.vmem [shape: f32[2,2,9,9,8], index: 0, kind: input, shape index: {}]   ;;  %s13491_s2 = inlined_call_operand.vmem [shape: bf16[4,4,8,4], index: 2, kind: input, shape index: {}]   ;;  %s13492_s5 = inlined_call_operand.vmem [shape: f32[2,8,8,32], index: 5, kind: output, shape index: {}]   ;;  %s13493_s3 = inlined_call_operand.vmem [shape: f32[1,4], index: 3, kind: input, shape index: {}]   ;;  %s13494_s4 = inlined_call_operand.vmem [shape: f32[1,4], index: 4, kind: input, shape index: {}]  }
   0x1   :  { %v346_v0 = vld [vmem:[%s13489_s1 + $0x4] sm:$0xf]  ;;  %v22_v2 = vld [vmem:[%s13490_s0 + $0x8] sm:$0x1]  ;;  %v23_v4 = vld [vmem:[%s13490_s0 + $0x10] sm:$0xff]  ;;  %s8983_s9 = smov 124  }
   0x2   :  { %v21_v1 = vld [vmem:[%s13490_s0] sm:$0xff]  ;;  %8831 = vmatprep.subr.msk.bf16.mxu0 %vm725_vm0, %v346_v0  ;;  %v727_v3 = vsel %vm725_vm0, %v346_v0, 0  ;;  %v24_v5 = vld [vmem:[%s13490_s0 + $0x18] sm:$0x1]  ;;  %v26_v7 = vld [vmem:[%s13490_s0 + $0x28] sm:$0x1] }
   0x3   :  { %v25_v6 = vld [vmem:[%s13490_s0 + $0x20] sm:$0xff]  ;;  %vm93_vm1 = vcmp.gt.f32.partialorder %v21_v1, 0.0  ;;  %8096 = vmatpush3.bf16.msra.mxu0 %v727_v3  ;;  %v27_v8 = vld [vmem:[%s13490_s0 + $0x30] sm:$0xff]  ;;  %v28_v9 = vld [vmem:[%s13490_s0 + $0x38] sm:$0x1]  ;;  %vm94_vm2 = vcmp.gt.f32.partialorder %v22_v2, 0.0 }
   0x4   :  { %v29_v10 = vld [vmem:[%s13490_s0 + $0x40] sm:$0xff]  ;;  %v30_v11 = vld [vmem:[%s13490_s0 + $0x48] sm:$0x1]  ;;  %vm95_vm3 = vcmp.gt.f32.partialorder %v23_v4, 0.0  ;;  %vm96_vm4 = vcmp.gt.f32.partialorder %v24_v5, 0.0  ;;  %vm97_vm5 = vcmp.gt.f32.partialorder %v25_v6, 0.0  ;;  %vm9094_vm14 = vmor %vm449_vm11, %vm450_vm12 }
   0x5   :  { %vm98_vm6 = vcmp.gt.f32.partialorder %v26_v7, 0.0  ;;  %vm99_vm7 = vcmp.gt.f32.partialorder %v27_v8, 0.0  ;;  %vm100_vm8 = vcmp.gt.f32.partialorder %v28_v9, 0.0  ;;  %vm101_vm9 = vcmp.gt.f32.partialorder %v29_v10, 0.0  ;;  %v345_v12 = vld [vmem:[%s13489_s1] sm:$0xf] }
   0x6   :  { %vm102_vm10 = vcmp.gt.f32.partialorder %v30_v11, 0.0  ;;  %v165_v13 = vmul.f32 0.2, %v21_v1  ;;  %v166_v14 = vmul.f32 0.2, %v22_v2  ;;  %8832 = vmatprep.subr.msk.bf16.mxu0 %vm725_vm0, %v345_v12  ;;  %v9060_v15 = vsel %vm725_vm0, %v345_v12, 0 }
   0x7   :  { %v167_v16 = vmul.f32 0.2, %v23_v4  ;;  %v168_v17 = vmul.f32 0.2, %v24_v5  ;;  %v169_v18 = vmul.f32 0.2, %v25_v6 }
   0x8   :  { %v170_v19 = vmul.f32 0.2, %v26_v7  ;;  %v171_v20 = vmul.f32 0.2, %v27_v8  ;;  %v172_v21 = vmul.f32 0.2, %v28_v9  ;;  %v9063_v22 = vsel %vm93_vm1, %v21_v1, %v165_v13 }
   0x9   :  { %v173_v23 = vmul.f32 0.2, %v29_v10  ;;  %v174_v24 = vmul.f32 0.2, %v30_v11  ;;  %v238_v25 = vsel %vm94_vm2, %v22_v2, %v166_v14  ;;  %v9067_v26 = vsel %vm95_vm3, %v23_v4, %v167_v16  ;;  %s8984_s16 = smov 8   ;;  %s8985_s20 = smov 12  }
   0xa   :  { %v240_v27 = vsel %vm96_vm4, %v24_v5, %v168_v17  ;;  %v9071_v28 = vsel %vm97_vm5, %v25_v6, %v169_v18  ;;  %v242_v29 = vsel %vm98_vm6, %v26_v7, %v170_v19  ;;  %v9075_v30 = vsel %vm99_vm7, %v27_v8, %v171_v20  ;;  %v31_v8 = vld [vmem:[%s13490_s0 + $0x50] sm:$0xff]  ;;  %s8986_s19 = smov 24  }
   0xb   :  { %v244_v31 = vsel %vm100_vm8, %v28_v9, %v172_v21  ;;  %v9079_v32 = vsel %vm101_vm9, %v29_v10, %v173_v23  ;;  %v246_v33 = vsel %vm102_vm10, %v30_v11, %v174_v24  ;;  %v7759_v34 = vpack.c.bf16 %v9063_v22, %v9063_v22  ;;  %v32_v9 = vld [vmem:[%s13490_s0 + $0x58] sm:$0x1]  ;;  %v33_v21 = vld [vmem:[%s13490_s0 + $0x60] sm:$0xff]  ;;  %v34_v23 = vld [vmem:[%s13490_s0 + $0x68] sm:$0x1] }
   0xc   :  { %v7760_v35 = vpack.c.bf16 %v238_v25, %v238_v25  ;;  %v7761_v36 = vpack.c.bf16 %v9067_v26, %v9067_v26  ;;  %v7762_v37 = vpack.c.bf16 %v240_v27, %v240_v27  ;;  %v7763_v38 = vpack.c.bf16 %v9071_v28, %v9071_v28  ;;  %v35_v24 = vld [vmem:[%s13490_s0 + $0x70] sm:$0xff] }
   0xd   :  { %v7764_v39 = vpack.c.bf16 %v242_v29, %v242_v29  ;;  %v7765_v40 = vpack.c.bf16 %v9075_v30, %v9075_v30  ;;  %v7766_v41 = vpack.c.bf16 %v244_v31, %v244_v31  ;;  %v7767_v42 = vpack.c.bf16 %v9079_v32, %v9079_v32 }
   0xe   :  { %v7768_v43 = vpack.c.bf16 %v246_v33, %v246_v33  ;;  %v453_v44 = vshrl.u32 %v7759_v34, 16  ;;  %v456_v45 = vshll.u32 %v7759_v34, 16  ;;  %v462_v46 = vshll.u32 %v7760_v35, 16  ;;  %v36_v33 = vld [vmem:[%s13490_s0 + $0x78] sm:$0x1] }
   0xf   :  { %v467_v47 = vshrl.u32 %v7761_v36, 16  ;;  %v470_v48 = vshll.u32 %v7761_v36, 16  ;;  %v476_v49 = vshll.u32 %v7762_v37, 16  ;;  %v481_v50 = vshrl.u32 %v7763_v38, 16 }
  0x10   :  { %v455_v51 = vrot.slane %v453_v44, 4  ;;  %v458_v52 = vrot.slane %v456_v45, 5  ;;  %v464_v53 = vrot.slane %v462_v46, 5  ;;  %v484_v54 = vshll.u32 %v7763_v38, 16  ;;  %v9145_v46 = vld [vmem:[%s13489_s1 + $0x8] sm:$0xf] }
  0x11   :  { %v469_v55 = vrot.slane %v467_v47, 4  ;;  %v472_v56 = vrot.slane %v470_v48, 5  ;;  %v478_v57 = vrot.slane %v476_v49, 5  ;;  %v483_v58 = vrot.slane %v481_v50, 4 }
  0x12   :  { %v459_v59 = vor.u32 %v458_v52, %v455_v51  ;;  %v486_v60 = vrot.slane %v484_v54, 5  ;;  %v490_v61 = vshll.u32 %v7764_v39, 16  ;;  %v495_v62 = vshrl.u32 %v7765_v40, 16 }
  0x13   :  { %v473_v0 = vor.u32 %v472_v56, %v469_v55  ;;  %v498_v1 = vshll.u32 %v7765_v40, 16  ;;  %v504_v2 = vshll.u32 %v7766_v41, 16  ;;  %v509_v3 = vshrl.u32 %v7767_v42, 16 }
  0x14   :  { %v460_v4 = vrot.slane %v459_v59, 4  ;;  %v487_v5 = vor.u32 %v486_v60, %v483_v58  ;;  %v492_v6 = vrot.slane %v490_v61, 5  ;;  %v497_v7 = vrot.slane %v495_v62, 4  ;;  %v57_v58 = vld [vmem:[%s13490_s0 + $0x120] sm:$0xff]  ;;  %v58_v59 = vld [vmem:[%s13490_s0 + $0x128] sm:$0x1] }
  0x15   :  { %v474_v10 = vrot.slane %v473_v0, 4  ;;  %v500_v11 = vrot.slane %v498_v1, 5  ;;  %v506_v12 = vrot.slane %v504_v2, 5  ;;  %v511_v13 = vrot.slane %v509_v3, 4 }
  0x16   :  { %v465_v14 = vsel %vm9094_vm14, %v460_v4, %v464_v53  ;;  %v488_v16 = vrot.slane %v487_v5, 4  ;;  %v512_v17 = vshll.u32 %v7767_v42, 16  ;;  %v518_v18 = vshll.u32 %v7768_v43, 16  ;;  %v59_v4 = vld [vmem:[%s13490_s0 + $0x130] sm:$0xff] }
  0x17   :  { %v9108_v19 = vsel %vm9094_vm14, %v474_v10, %v478_v57  ;;  %v501_v20 = vor.u32 %v500_v11, %v497_v7  ;;  %vm103_vm15 = vcmp.gt.f32.partialorder %v31_v8, 0.0  ;;  %vm104_vm1 = vcmp.gt.f32.partialorder %v32_v9, 0.0  ;;  %v60_v11 = vld [vmem:[%s13490_s0 + $0x138] sm:$0x1] }
  0x18   :  { %13611 = vst [vmem:[#allocation3_spill] sm:$0xff] %v9108_v19  ;;  %v9121_v25 = vsel %vm9094_vm14, %v488_v16, %v492_v6  ;;  %v514_v27 = vrot.slane %v512_v17, 5  ;;  %v520_v29 = vrot.slane %v518_v18, 5  ;;  %v7327_v31 = vcombine.low %v465_v14, %v9108_v19  ;;  %v9534_v19 = vld [vmem:[%s13489_s1 + $0x10] sm:$0xf] }
  0x19   :  { %13612 = vst [vmem:[#allocation4_spill] sm:$0xff] %v9121_v25  ;;  %v502_v34 = vrot.slane %v501_v20, 4  ;;  %v175_v36 = vmul.f32 0.2, %v31_v8  ;;  %v176_v37 = vmul.f32 0.2, %v32_v9 }
  0x1a   :  { %v515_v38 = vor.u32 %v514_v27, %v511_v13  ;;  %8097 = vmatprep.mubr.msk.bf16.mxu0 %vm700_vm13, %v7327_v31  ;;  %vm105_vm2 = vcmp.gt.f32.partialorder %v33_v21, 0.0  ;;  %vm106_vm3 = vcmp.gt.f32.partialorder %v34_v23, 0.0  ;;  %vm107_vm4 = vcmp.gt.f32.partialorder %v35_v24, 0.0 }
  0x1b   :  { %v9132_v39 = vsel %vm9094_vm14, %v502_v34, %v506_v12  ;;  %v9135_v40 = vsel %vm103_vm15, %v31_v8, %v175_v36  ;;  %v248_v41 = vsel %vm104_vm1, %v32_v9, %v176_v37  ;;  %vm108_vm5 = vcmp.gt.f32.partialorder %v36_v33, 0.0 }
  0x1c   :  { %13613 = vst [vmem:[#allocation5_spill] sm:$0xff] %v9132_v39  ;;  %v516_v42 = vrot.slane %v515_v38, 4  ;;  %v7328_v43 = vcombine.low %v9121_v25, %v9132_v39  ;;  %v7769_v44 = vpack.c.bf16 %v9135_v40, %v9135_v40  ;;  %v7770_v45 = vpack.c.bf16 %v248_v41, %v248_v41 }
  0x1d   :  { %v177_v47 = vmul.f32 0.2, %v33_v21  ;;  %v178_v48 = vmul.f32 0.2, %v34_v23  ;;  %v179_v49 = vmul.f32 0.2, %v35_v24 }
  0x1e   :  { %v9149_v50 = vsel %vm9094_vm14, %v516_v42, %v520_v29  ;;  %8098 = vmatmul.mubr.msk.bf16.vlgmr.msra.gmra.mrb[0].mxu0 %vm700_vm13, %v7328_v43  ;;  %v523_v51 = vshrl.u32 %v7769_v44, 16  ;;  %v526_v52 = vshll.u32 %v7769_v44, 16  ;;  %v532_v53 = vshll.u32 %v7770_v45, 16  ;;  %v62_v29 = vld [vmem:[%s13490_s0 + $0x148] sm:$0x1]  ;;  %v63_v45 = vld [vmem:[%s13490_s0 + $0x150] sm:$0xff] }
  0x1f   :  { %13614 = vst [vmem:[#allocation6_spill] sm:$0xff] %v9149_v50  ;;  %8114 = vmatpush3.bf16.msra.mxu0 %v9060_v15  ;;  %v180_v55 = vmul.f32 0.2, %v36_v33  ;;  %v9156_v56 = vsel %vm105_vm2, %v33_v21, %v177_v47  ;;  %v250_v57 = vsel %vm106_vm3, %v34_v23, %v178_v48  ;;  %v9166_v0 = vsel %vm107_vm4, %v35_v24, %v179_v49  ;;  %v61_v21 = vld [vmem:[%s13490_s0 + $0x140] sm:$0xff] }
  0x20   :  { %v525_v60 = vrot.slane %v523_v51, 4  ;;  %v528_v61 = vrot.slane %v526_v52, 5  ;;  %v534_v62 = vrot.slane %v532_v53, 5  ;;  %13615 = vst [vmem:[#allocation7_spill] sm:$0xff] %v9166_v0  ;;  %8833 = vmatprep.subr.msk.bf16.mxu0 %vm725_vm0, %v9145_v46  ;;  %v7771_v1 = vpack.c.bf16 %v9156_v56, %v9156_v56 }
  0x21   :  { %v252_v15 = vsel %vm108_vm5, %v36_v33, %v180_v55  ;;  %v7772_v2 = vpack.c.bf16 %v250_v57, %v250_v57  ;;  %v7773_v3 = vpack.c.bf16 %v9166_v0, %v9166_v0  ;;  %vm129_vm6 = vcmp.gt.f32.partialorder %v57_v58, 0.0 }
  0x22   :  { %v529_v5 = vor.u32 %v528_v61, %v525_v60  ;;  %v7774_v6 = vpack.c.bf16 %v252_v15, %v252_v15  ;;  %vm130_vm7 = vcmp.gt.f32.partialorder %v58_v59, 0.0  ;;  %v537_v7 = vshrl.u32 %v7771_v1, 16 }
  0x23   :  { %v540_v8 = vshll.u32 %v7771_v1, 16  ;;  %v546_v9 = vshll.u32 %v7772_v2, 16  ;;  %v551_v10 = vshrl.u32 %v7773_v3, 16  ;;  %v554_v13 = vshll.u32 %v7773_v3, 16 }
  0x24   :  { %v530_v12 = vrot.slane %v529_v5, 4  ;;  %v560_v14 = vshll.u32 %v7774_v6, 16  ;;  %vm131_vm8 = vcmp.gt.f32.partialorder %v59_v4, 0.0  ;;  %v539_v16 = vrot.slane %v537_v7, 4  ;;  %v65_v6 = vld [vmem:[%s13490_s0 + $0x160] sm:$0xff] }
  0x25   :  { %v542_v17 = vrot.slane %v540_v8, 5  ;;  %v548_v18 = vrot.slane %v546_v9, 5  ;;  %v553_v20 = vrot.slane %v551_v10, 4  ;;  %v556_v24 = vrot.slane %v554_v13, 5 }
  0x26   :  { %v9186_v23 = vsel %vm9094_vm14, %v530_v12, %v534_v62  ;;  %v562_v27 = vrot.slane %v560_v14, 5  ;;  %vm132_vm9 = vcmp.gt.f32.partialorder %v60_v11, 0.0  ;;  %v201_v34 = vmul.f32 0.2, %v57_v58 }
  0x27   :  { %13616 = vst [vmem:[#allocation8_spill] sm:$0xff] %v9186_v23  ;;  %v7329_v31 = vcombine.low %v9149_v50, %v9186_v23  ;;  %v543_v33 = vor.u32 %v542_v17, %v539_v16  ;;  %v202_v36 = vmul.f32 0.2, %v58_v59  ;;  %v557_v37 = vor.u32 %v556_v24, %v553_v20 }
  0x28   :  { %v203_v38 = vmul.f32 0.2, %v59_v4  ;;  %v204_v41 = vmul.f32 0.2, %v60_v11  ;;  %vm133_vm10 = vcmp.gt.f32.partialorder %v61_v21, 0.0  ;;  %v9195_v43 = vsel %vm129_vm6, %v57_v58, %v201_v34 }
  0x29   :  { %8101 = vmatprep.mubr.msk.bf16.mxu0 %vm700_vm13, %v7329_v31  ;;  %v544_v42 = vrot.slane %v543_v33, 4  ;;  %v274_v44 = vsel %vm130_vm7, %v58_v59, %v202_v36  ;;  %vm134_vm11 = vcmp.gt.f32.partialorder %v62_v29, 0.0  ;;  %v558_v47 = vrot.slane %v557_v37, 4  ;;  %v64_v58 = vld [vmem:[%s13490_s0 + $0x158] sm:$0x1] }
  0x2a   :  { %v9202_v48 = vsel %vm131_vm8, %v59_v4, %v203_v38  ;;  %v276_v49 = vsel %vm132_vm9, %v60_v11, %v204_v41  ;;  %v7775_v51 = vpack.c.bf16 %v9195_v43, %v9195_v43  ;;  %v7776_v53 = vpack.c.bf16 %v274_v44, %v274_v44 }
  0x2b   :  { %13617 = vst [vmem:[#allocation9_spill] sm:$0xff] %v9202_v48  ;;  %v9209_v52 = vsel %vm9094_vm14, %v544_v42, %v548_v18  ;;  %v7777_v55 = vpack.c.bf16 %v9202_v48, %v9202_v48  ;;  %v7778_v57 = vpack.c.bf16 %v276_v49, %v276_v49  ;;  %v9218_v59 = vsel %vm9094_vm14, %v558_v47, %v562_v27 }
  0x2c   :  { %13618 = vst [vmem:[#allocation10_spill] sm:$0xff] %v9209_v52  ;;  %13619 = vst [vmem:[#allocation11_spill] sm:$0xff] %v9218_v59  ;;  %v565_v60 = vshrl.u32 %v7775_v51, 16  ;;  %v568_v61 = vshll.u32 %v7775_v51, 16  ;;  %vm135_vm12 = vcmp.gt.f32.partialorder %v63_v45, 0.0  ;;  %v7330_v62 = vcombine.low %v9209_v52, %v9218_v59  ;;  %v67_v51 = vld [vmem:[%s13490_s0 + $0x170] sm:$0xff] }
  0x2d   :  { %v574_v15 = vshll.u32 %v7776_v53, 16  ;;  %v579_v1 = vshrl.u32 %v7777_v55, 16  ;;  %v582_v2 = vshll.u32 %v7777_v55, 16  ;;  %v588_v5 = vshll.u32 %v7778_v57, 16  ;;  %v68_v53 = vld [vmem:[%s13490_s0 + $0x178] sm:$0x1] }
  0x2e   :  { %v567_v3 = vrot.slane %v565_v60, 4  ;;  %v570_v4 = vrot.slane %v568_v61, 5  ;;  %vm136_vm15 = vcmp.gt.f32.partialorder %v64_v58, 0.0  ;;  %8102 = vmatmul.mubr.msk.bf16.gmra.mrb[4].mxu0 %vm700_vm13, %v7330_v62  ;;  %v205_v10 = vmul.f32 0.2, %v61_v21 }
  0x2f   :  { %v576_v7 = vrot.slane %v574_v15, 5  ;;  %v581_v8 = vrot.slane %v579_v1, 4  ;;  %v584_v9 = vrot.slane %v582_v2, 5  ;;  %v590_v12 = vrot.slane %v588_v5, 5  ;;  %v69_v1 = vld [vmem:[%s13490_s0 + $0x180] sm:$0xff] }
  0x30   :  { %v571_v11 = vor.u32 %v570_v4, %v567_v3  ;;  %v206_v13 = vmul.f32 0.2, %v62_v29  ;;  %v207_v14 = vmul.f32 0.2, %v63_v45  ;;  %v208_v17 = vmul.f32 0.2, %v64_v58 }
  0x31   :  { %v585_v16 = vor.u32 %v584_v9, %v581_v8  ;;  %v9227_v18 = vsel %vm133_vm10, %v61_v21, %v205_v10  ;;  %vm137_vm1 = vcmp.gt.f32.partialorder %v65_v6, 0.0  ;;  %vm139_vm3 = vcmp.gt.f32.partialorder %v67_v51, 0.0 }
  0x32   :  { %13620 = vst [vmem:[#allocation12_spill] sm:$0xff] %v9227_v18  ;;  %v572_v20 = vrot.slane %v571_v11, 4  ;;  %v278_v24 = vsel %vm134_vm11, %v62_v29, %v206_v13  ;;  %v9231_v27 = vsel %vm135_vm12, %v63_v45, %v207_v14  ;;  %v7779_v31 = vpack.c.bf16 %v9227_v18, %v9227_v18  ;;  %v66_v29 = vld [vmem:[%s13490_s0 + $0x168] sm:$0x1] }
  0x33   :  { %13621 = vst [vmem:[#allocation13_spill] sm:$0xff] %v9231_v27  ;;  %v586_v33 = vrot.slane %v585_v16, 4  ;;  %v280_v34 = vsel %vm136_vm15, %v64_v58, %v208_v17  ;;  %v7780_v36 = vpack.c.bf16 %v278_v24, %v278_v24  ;;  %v7781_v37 = vpack.c.bf16 %v9231_v27, %v9231_v27  ;;  %v70_v11 = vld [vmem:[%s13490_s0 + $0x188] sm:$0x1] }
  0x34   :  { %v577_v21 = vsel %vm9094_vm14, %v572_v20, %v576_v7  ;;  %v7782_v38 = vpack.c.bf16 %v280_v34, %v280_v34  ;;  %v593_v41 = vshrl.u32 %v7779_v31, 16  ;;  %v596_v42 = vshll.u32 %v7779_v31, 16 }
  0x35   :  { %v9245_v44 = vsel %vm9094_vm14, %v586_v33, %v590_v12  ;;  %v602_v45 = vshll.u32 %v7780_v36, 16  ;;  %v607_v47 = vshrl.u32 %v7781_v37, 16  ;;  %v610_v49 = vshll.u32 %v7781_v37, 16  ;;  %v71_v33 = vld [vmem:[%s13490_s0 + $0x190] sm:$0xff]  ;;  %v72_v37 = vld [vmem:[%s13490_s0 + $0x198] sm:$0x1] }
  0x36   :  { %13622 = vst [vmem:[#allocation14_spill] sm:$0xff] %v9245_v44  ;;  %v7331_v55 = vcombine.low %v577_v21, %v9245_v44  ;;  %v595_v57 = vrot.slane %v593_v41, 4  ;;  %v598_v58 = vrot.slane %v596_v42, 5  ;;  %v616_v60 = vshll.u32 %v7782_v38, 16 }
  0x37   :  { %v604_v61 = vrot.slane %v602_v45, 5  ;;  %v609_v62 = vrot.slane %v607_v47, 4  ;;  %v612_v15 = vrot.slane %v610_v49, 5  ;;  %vm138_vm2 = vcmp.gt.f32.partialorder %v66_v29, 0.0 }
  0x38   :  { %8105 = vmatprep.mubr.msk.bf16.mxu0 %vm700_vm13, %v7331_v55  ;;  %v599_v2 = vor.u32 %v598_v58, %v595_v57  ;;  %v618_v3 = vrot.slane %v616_v60, 5  ;;  %vm140_vm4 = vcmp.gt.f32.partialorder %v68_v53, 0.0  ;;  %v209_v5 = vmul.f32 0.2, %v65_v6 }
  0x39   :  { %v613_v4 = vor.u32 %v612_v15, %v609_v62  ;;  %v210_v7 = vmul.f32 0.2, %v66_v29  ;;  %v211_v8 = vmul.f32 0.2, %v67_v51  ;;  %v212_v10 = vmul.f32 0.2, %v68_v53 }
  0x3a   :  { %v600_v9 = vrot.slane %v599_v2, 4  ;;  %vm141_vm5 = vcmp.gt.f32.partialorder %v69_v1, 0.0  ;;  %v9262_v13 = vsel %vm137_vm1, %v65_v6, %v209_v5  ;;  %vm142_vm6 = vcmp.gt.f32.partialorder %v70_v11, 0.0 }
  0x3b   :  { %v614_v12 = vrot.slane %v613_v4, 4  ;;  %13623 = vst [vmem:[#allocation15_spill] sm:$0xff] %v9262_v13  ;;  %v282_v14 = vsel %vm138_vm2, %v66_v29, %v210_v7  ;;  %v9265_v16 = vsel %vm139_vm3, %v67_v51, %v211_v8  ;;  %v284_v20 = vsel %vm140_vm4, %v68_v53, %v212_v10 }
  0x3c   :  { %13624 = vst [vmem:[#allocation16_spill] sm:$0xff] %v9265_v16  ;;  %v9269_v17 = vsel %vm9094_vm14, %v600_v9, %v604_v61  ;;  %v7783_v24 = vpack.c.bf16 %v9262_v13, %v9262_v13  ;;  %v7784_v31 = vpack.c.bf16 %v282_v14, %v282_v14  ;;  %v7785_v34 = vpack.c.bf16 %v9265_v16, %v9265_v16 }
  0x3d   :  { %13625 = vst [vmem:[#allocation17_spill] sm:$0xff] %v9269_v17  ;;  %v9278_v6 = vsel %vm9094_vm14, %v614_v12, %v618_v3  ;;  %v7786_v36 = vpack.c.bf16 %v284_v20, %v284_v20  ;;  %vm143_vm7 = vcmp.gt.f32.partialorder %v71_v33, 0.0  ;;  %vm144_vm8 = vcmp.gt.f32.partialorder %v72_v37, 0.0 }
  0x3e   :  { %13626 = vst [vmem:[#allocation18_spill] sm:$0xff] %v9278_v6  ;;  %v7332_v21 = vcombine.low %v9269_v17, %v9278_v6  ;;  %v621_v38 = vshrl.u32 %v7783_v24, 16  ;;  %v624_v41 = vshll.u32 %v7783_v24, 16  ;;  %v630_v42 = vshll.u32 %v7784_v31, 16 }
  0x3f   :  { %v635_v29 = vshrl.u32 %v7785_v34, 16  ;;  %v638_v45 = vshll.u32 %v7785_v34, 16  ;;  %v644_v47 = vshll.u32 %v7786_v36, 16  ;;  %v213_v53 = vmul.f32 0.2, %v69_v1 }
  0x40   :  { %8106 = vmatmul.mubr.msk.bf16.gmra.mrb[8].mxu0 %vm700_vm13, %v7332_v21  ;;  %v623_v49 = vrot.slane %v621_v38, 4  ;;  %v626_v51 = vrot.slane %v624_v41, 5  ;;  %v632_v55 = vrot.slane %v630_v42, 5  ;;  %v214_v60 = vmul.f32 0.2, %v70_v11 }
  0x41   :  { %v637_v57 = vrot.slane %v635_v29, 4  ;;  %v640_v58 = vrot.slane %v638_v45, 5  ;;  %v215_v62 = vmul.f32 0.2, %v71_v33  ;;  %v216_v15 = vmul.f32 0.2, %v72_v37 }
  0x42   :  { %v627_v61 = vor.u32 %v626_v51, %v623_v49  ;;  %v9289_v2 = vsel %vm141_vm5, %v69_v1, %v213_v53  ;;  %v646_v4 = vrot.slane %v644_v47, 5  ;;  %v286_v5 = vsel %vm142_vm6, %v70_v11, %v214_v60 }
  0x43   :  { %13627 = vst [vmem:[#allocation19_spill] sm:$0xff] %v9289_v2  ;;  %v641_v3 = vor.u32 %v640_v58, %v637_v57  ;;  %v7787_v7 = vpack.c.bf16 %v9289_v2, %v9289_v2  ;;  %v9295_v9 = vsel %vm143_vm7, %v71_v33, %v215_v62  ;;  %v288_v10 = vsel %vm144_vm8, %v72_v37, %v216_v15  ;;  %v45_v15 = vld [vmem:[%s13490_s0 + $0xc0] sm:$0xff] }
  0x44   :  { %v628_v8 = vrot.slane %v627_v61, 4  ;;  %13628 = vst [vmem:[#allocation20_spill] sm:$0xff] %v9295_v9  ;;  %v7788_v12 = vpack.c.bf16 %v286_v5, %v286_v5  ;;  %v7789_v20 = vpack.c.bf16 %v9295_v9, %v9295_v9  ;;  %v7790_v1 = vpack.c.bf16 %v288_v10, %v288_v10  ;;  %v41_v5 = vld [vmem:[%s13490_s0 + $0xa0] sm:$0xff] }
  0x45   :  { %v642_v14 = vrot.slane %v641_v3, 4  ;;  %v649_v24 = vshrl.u32 %v7787_v7, 16  ;;  %v652_v11 = vshll.u32 %v7787_v7, 16  ;;  %v7791_v61 = vpack.c.bf16 %v9067_v26, %v9063_v22  ;;  %v47_v3 = vld [vmem:[%s13490_s0 + $0xd0] sm:$0xff] }
  0x46   :  { %v9302_v31 = vsel %vm9094_vm14, %v628_v8, %v632_v55  ;;  %v658_v34 = vshll.u32 %v7788_v12, 16  ;;  %v663_v21 = vshrl.u32 %v7789_v20, 16  ;;  %v666_v37 = vshll.u32 %v7789_v20, 16  ;;  %v39_v22 = vld [vmem:[%s13490_s0 + $0x90] sm:$0xff] }
  0x47   :  { %13629 = vst [vmem:[#allocation21_spill] sm:$0xff] %v9302_v31  ;;  %v9306_v36 = vsel %vm9094_vm14, %v642_v14, %v646_v4  ;;  %v651_v33 = vrot.slane %v649_v24, 4  ;;  %v654_v41 = vrot.slane %v652_v11, 5  ;;  %v672_v42 = vshll.u32 %v7790_v1, 16 }
  0x48   :  { %13630 = vst [vmem:[#allocation22_spill] sm:$0xff] %v9306_v36  ;;  %v7333_v38 = vcombine.low %v9302_v31, %v9306_v36  ;;  %v665_v29 = vrot.slane %v663_v21, 4  ;;  %v668_v45 = vrot.slane %v666_v37, 5  ;;  %v660_v49 = vrot.slane %v658_v34, 5  ;;  %v348_v34 = vld [vmem:[%s13489_s1 + $0xc] sm:$0xf] }
  0x49   :  { %v655_v47 = vor.u32 %v654_v41, %v651_v33  ;;  %v674_v53 = vrot.slane %v672_v42, 5  ;;  %v189_v4 = vmul.f32 0.2, %v45_v15  ;;  %vm117_vm9 = vcmp.gt.f32.partialorder %v45_v15, 0.0  ;;  %v43_v33 = vld [vmem:[%s13490_s0 + $0xb0] sm:$0xff] }
  0x4a   :  { %8109 = vmatprep.mubr.msk.bf16.mxu0 %vm700_vm13, %v7333_v38  ;;  %v669_v51 = vor.u32 %v668_v45, %v665_v29  ;;  %vm119_vm10 = vcmp.gt.f32.partialorder %v47_v3, 0.0  ;;  %v191_v7 = vmul.f32 0.2, %v47_v3  ;;  %v7792_v8 = vpack.c.bf16 %v9075_v30, %v9071_v28  ;;  %v49_v29 = vld [vmem:[%s13490_s0 + $0xe0] sm:$0xff] }
  0x4b   :  { %v656_v55 = vrot.slane %v655_v47, 4  ;;  %v7793_v10 = vpack.c.bf16 %v9135_v40, %v9079_v32  ;;  %v183_v12 = vmul.f32 0.2, %v39_v22  ;;  %v9341_v14 = vsel %vm117_vm9, %v45_v15, %v189_v4 }
  0x4c   :  { %v670_v57 = vrot.slane %v669_v51, 4  ;;  %13633 = vst [vmem:[#allocation25_spill] sm:$0xff] %v9341_v14  ;;  %v9343_v20 = vsel %vm119_vm10, %v47_v3, %v191_v7  ;;  %v1023_v1 = vsel %vm725_vm0, %v9145_v46, 0  ;;  %vm111_vm11 = vcmp.gt.f32.partialorder %v39_v22, 0.0 }
  0x4d   :  { %v9313_v58 = vsel %vm9094_vm14, %v656_v55, %v660_v49  ;;  %13634 = vst [vmem:[#allocation26_spill] sm:$0xff] %v9343_v20  ;;  %v185_v24 = vmul.f32 0.2, %v41_v5  ;;  %vm113_vm12 = vcmp.gt.f32.partialorder %v41_v5, 0.0  ;;  %v9357_v46 = vsel %vm111_vm11, %v39_v22, %v183_v12  ;;  %v51_v55 = vld [vmem:[%s13490_s0 + $0xf0] sm:$0xff] }
  0x4e   :  { %13631 = vst [vmem:[#allocation23_spill] sm:$0xff] %v9313_v58  ;;  %v9317_v60 = vsel %vm9094_vm14, %v670_v57, %v674_v53  ;;  %v7807_v37 = vpack.c.bf16 %v9357_v46, %v9357_v46  ;;  %v187_v38 = vmul.f32 0.2, %v43_v33  ;;  %vm115_vm15 = vcmp.gt.f32.partialorder %v43_v33, 0.0 }
  0x4f   :  { %13632 = vst [vmem:[#allocation24_spill] sm:$0xff] %v9317_v60  ;;  %v7334_v62 = vcombine.low %v9313_v58, %v9317_v60  ;;  %v9359_v21 = vsel %vm113_vm12, %v41_v5, %v185_v24  ;;  %v7794_v42 = vpack.c.bf16 %v9166_v0, %v9156_v56  ;;  %v7795_v45 = vpack.c.bf16 %v9202_v48, %v9195_v43  ;;  %v53_v43 = vld [vmem:[%s13490_s0 + $0x100] sm:$0xff] }
  0x50   :  { %13635 = vst [vmem:[#allocation27_spill] sm:$0xff] %v9359_v21  ;;  %v7809_v41 = vpack.c.bf16 %v9359_v21, %v9359_v21  ;;  %v7796_v47 = vpack.c.bf16 %v9231_v27, %v9227_v18  ;;  %v7797_v49 = vpack.c.bf16 %v9265_v16, %v9262_v13  ;;  %v1187_v51 = vshrl.u32 %v7807_v37, 16  ;;  %v50_v27 = vld [vmem:[%s13490_s0 + $0xe8] sm:$0x1] }
  0x51   :  { %8110 = vmatmul.mubr.msk.bf16.gmra.mrb[12].mxu0 %vm700_vm13, %v7334_v62  ;;  %v9377_v53 = vsel %vm115_vm15, %v43_v33, %v187_v38  ;;  %v193_v15 = vmul.f32 0.2, %v49_v29  ;;  %v7813_v22 = vpack.c.bf16 %v9341_v14, %v9341_v14  ;;  %vm121_vm1 = vcmp.gt.f32.partialorder %v49_v29, 0.0  ;;  %v75_v33 = vld [vmem:[%s13490_s0 + $0x1b0] sm:$0xff] }
  0x52   :  { %8115 = vmatprep.mubr.msk.bf16.mxu0 %vm700_vm13, %v7791_v61  ;;  %v1190_v61 = vshll.u32 %v7807_v37, 16  ;;  %v1201_v62 = vshrl.u32 %v7809_v41, 16  ;;  %v7811_v4 = vpack.c.bf16 %v9377_v53, %v9377_v53  ;;  %v1204_v5 = vshll.u32 %v7809_v41, 16  ;;  %v77_v37 = vld [vmem:[%s13490_s0 + $0x1c0] sm:$0xff] }
  0x53   :  { %v9400_v12 = vrot.slane %v1187_v51, 4  ;;  %vm123_vm2 = vcmp.gt.f32.partialorder %v51_v55, 0.0  ;;  %v197_v24 = vmul.f32 0.2, %v53_v43  ;;  %v9414_v41 = vsel %vm121_vm1, %v49_v29, %v193_v15 }
  0x54   :  { %v9410_v38 = vrot.slane %v1190_v61, 5  ;;  %vm125_vm3 = vcmp.gt.f32.partialorder %v53_v43, 0.0  ;;  %v1229_v51 = vshrl.u32 %v7813_v22, 16  ;;  %v7817_v11 = vpack.c.bf16 %v9414_v41, %v9414_v41 }
  0x55   :  { %v1232_v54 = vshll.u32 %v7813_v22, 16  ;;  %v219_v7 = vmul.f32 0.2, %v75_v33  ;;  %v221_v3 = vmul.f32 0.2, %v77_v37  ;;  %v9420_v60 = vsel %vm125_vm3, %v53_v43, %v197_v24 }
  0x56   :  { %13636 = vst [vmem:[#allocation28_spill] sm:$0xff] %v9420_v60  ;;  %vm147_vm4 = vcmp.gt.f32.partialorder %v75_v33, 0.0  ;;  %vm149_vm5 = vcmp.gt.f32.partialorder %v77_v37, 0.0  ;;  %v9422_v61 = vrot.slane %v1204_v5, 5  ;;  %v7821_v15 = vpack.c.bf16 %v9420_v60, %v9420_v60 }
  0x57   :  { %v9433_v22 = vrot.slane %v1229_v51, 4  ;;  %v1257_v43 = vshrl.u32 %v7817_v11, 16  ;;  %v9436_v5 = vrot.slane %v1232_v54, 5  ;;  %v9440_v24 = vsel %vm149_vm5, %v77_v37, %v221_v3 }
  0x58   :  { %13637 = vst [vmem:[#allocation29_spill] sm:$0xff] %v9440_v24  ;;  %v1288_v36 = vshll.u32 %v7821_v15, 16  ;;  %v13641_v0 = vpack.c.bf16 %v9414_v41, %v9343_v20 }
  0x59   :  { %8116 = vmatmul.mubr.msk.bf16.vlgmr.msra.gmra.mrb[0].mxu0 %vm700_vm13, %v7792_v8  ;;  %v9398_v8 = vsel %vm725_vm0, %v348_v34, 0  ;;  %v9458_v37 = vrot.slane %v1257_v43, 4  ;;  %v9473_v43 = vld [vmem:[%s13490_s0 + $0x200] sm:$0xff] }
  0x5a   :  { %8132 = vmatpush3.bf16.msra.mxu0 %v1023_v1  ;;  %8119 = vmatprep.mubr.msk.bf16.mxu0 %vm700_vm13, %v7793_v10  ;;  %v195_v10 = vmul.f32 0.2, %v51_v55  ;;  %v7815_v1 = vpack.c.bf16 %v9343_v20, %v9343_v20  ;;  %v9487_v50 = vrot.slane %v1288_v36, 5  ;;  %vm157_vm10 = vcmp.gt.f32.partialorder %v9473_v43, 0.0 }
  0x5b   :  { %8834 = vmatprep.subr.msk.bf16.mxu0 %vm725_vm0, %v348_v34  ;;  %v9412_v34 = vrot.slane %v1201_v62, 4 }
  0x5c   :  { %v9418_v35 = vsel %vm123_vm2, %v51_v55, %v195_v10  ;;  %v1243_v57 = vshrl.u32 %v7815_v1, 16  ;;  %v1246_v29 = vshll.u32 %v7815_v1, 16  ;;  %v1260_v10 = vshll.u32 %v7817_v11, 16 }
  0x5d   :  { %v7819_v62 = vpack.c.bf16 %v9418_v35, %v9418_v35  ;;  %v9438_v1 = vsel %vm147_vm4, %v75_v33, %v219_v7  ;;  %v7825_v11 = vpack.c.bf16 %v9440_v24, %v9440_v24  ;;  %v1285_v33 = vshrl.u32 %v7821_v15, 16  ;;  %v83_v15 = vld [vmem:[%s13490_s0 + $0x1f0] sm:$0xff] }
  0x5e   :  { %v9450_v51 = vrot.slane %v1243_v57, 4  ;;  %v7823_v54 = vpack.c.bf16 %v9438_v1, %v9438_v1  ;;  %v9460_v31 = vrot.slane %v1260_v10, 5  ;;  %vm155_vm9 = vcmp.gt.f32.partialorder %v83_v15, 0.0 }
  0x5f   :  { %v1271_v3 = vshrl.u32 %v7819_v62, 16  ;;  %v1274_v7 = vshll.u32 %v7819_v62, 16  ;;  %v1313_v62 = vshrl.u32 %v7825_v11, 16  ;;  %v1316_v17 = vshll.u32 %v7825_v11, 16 }
  0x60   :  { %v1302_v44 = vshll.u32 %v7823_v54, 16  ;;  %v9479_v59 = vrot.slane %v1285_v33, 4  ;;  %v13638_v11 = vpack.c.bf16 %v9295_v9, %v9289_v2  ;;  %v13639_v33 = vpack.c.bf16 %v9359_v21, %v9357_v46  ;;  %v9529_v21 = vld [vmem:[%s13490_s0 + $0x220] sm:$0xff] }
  0x61   :  { %8120 = vmatmul.mubr.msk.bf16.gmra.mrb[4].mxu0 %vm700_vm13, %v7794_v42  ;;  %v1215_v42 = vshrl.u32 %v7811_v4, 16  ;;  %v9475_v10 = vrot.slane %v1271_v3, 4  ;;  %v9477_v57 = vrot.slane %v1274_v7, 5  ;;  %v40_v3 = vld [vmem:[%s13490_s0 + $0x98] sm:$0x1]  ;;  %vm161_vm2 = vcmp.gt.f32.partialorder %v9529_v21, 0.0 }
  0x62   :  { %8123 = vmatprep.mubr.msk.bf16.mxu0 %vm700_vm13, %v7795_v45  ;;  %v1218_v45 = vshll.u32 %v7811_v4, 16  ;;  %v48_v7 = vld [vmem:[%s13490_s0 + $0xd8] sm:$0x1]  ;;  %v227_v36 = vmul.f32 0.2, %v83_v15  ;;  %vm112_vm12 = vcmp.gt.f32.partialorder %v40_v3, 0.0 }
  0x63   :  { %v9429_v55 = vrot.slane %v1215_v42, 4  ;;  %v81_v42 = vld [vmem:[%s13490_s0 + $0x1e0] sm:$0xff]  ;;  %v184_v46 = vmul.f32 0.2, %v40_v3  ;;  %vm120_vm11 = vcmp.gt.f32.partialorder %v48_v7, 0.0  ;;  %vm122_vm4 = vcmp.gt.f32.partialorder %v50_v27, 0.0 }
  0x64   :  { %v9431_v4 = vrot.slane %v1218_v45, 5  ;;  %v225_v6 = vmul.f32 0.2, %v81_v42  ;;  %vm153_vm7 = vcmp.gt.f32.partialorder %v81_v42, 0.0  ;;  %v1299_v45 = vshrl.u32 %v7823_v54, 16 }
  0x65   :  { %v42_v54 = vld [vmem:[%s13490_s0 + $0xa8] sm:$0x1]  ;;  %v9539_v9 = vsel %vm155_vm9, %v83_v15, %v227_v36  ;;  %v13640_v15 = vpack.c.bf16 %v9341_v14, %v9377_v53 }
  0x66   :  { %v9491_v23 = vsel %vm153_vm7, %v81_v42, %v225_v6  ;;  %v9508_v42 = vrot.slane %v1313_v62, 4  ;;  %v229_v62 = vmul.f32 0.2, %v9473_v43  ;;  %v186_v25 = vmul.f32 0.2, %v42_v54 }
  0x67   :  { %vm114_vm1 = vcmp.gt.f32.partialorder %v42_v54, 0.0 }
  0x69   :  { %8124 = vmatmul.mubr.msk.bf16.gmra.mrb[8].mxu0 %vm700_vm13, %v7796_v47  ;;  %v79_v47 = vld [vmem:[%s13490_s0 + $0x1d0] sm:$0xff] }
  0x6a   :  { %8127 = vmatprep.mubr.msk.bf16.mxu0 %vm700_vm13, %v7797_v49  ;;  %v9456_v49 = vrot.slane %v1246_v29, 5  ;;  %v223_v58 = vmul.f32 0.2, %v79_v47  ;;  %vm151_vm6 = vcmp.gt.f32.partialorder %v79_v47, 0.0  ;;  %v46_v29 = vld [vmem:[%s13490_s0 + $0xc8] sm:$0x1] }
  0x6b   :  { %vm118_vm8 = vcmp.gt.f32.partialorder %v46_v29, 0.0  ;;  %v190_v6 = vmul.f32 0.2, %v46_v29 }
  0x6c   :  { %v9489_v39 = vsel %vm151_vm6, %v79_v47, %v223_v58  ;;  %v9504_v58 = vrot.slane %v1299_v45, 4  ;;  %v9506_v47 = vrot.slane %v1302_v44, 5  ;;  %v7829_v45 = vpack.c.bf16 %v9491_v23, %v9491_v23  ;;  %v87_v44 = vld [vmem:[%s13490_s0 + $0x210] sm:$0xff] }
  0x6d   :  { %vm159_vm15 = vcmp.gt.f32.partialorder %v87_v44, 0.0  ;;  %v231_v13 = vmul.f32 0.2, %v87_v44 }
  0x6e   :  { %v1341_v18 = vshrl.u32 %v7829_v45, 16 }
  0x71   :  { %8128 = vmatmul.mubr.msk.bf16.gmra.mrb[12].mxu0 %vm700_vm13, %v13638_v11  ;;  %v9510_v11 = vrot.slane %v1316_v17, 5  ;;  %v262_v17 = vsel %vm118_vm8, %v46_v29, %v190_v6  ;;  %v1235_v29 = vor.u32 %v9436_v5, %v9433_v22  ;;  %v192_v6 = vmul.f32 0.2, %v48_v7 }
  0x72   :  { %8133 = vmatprep.mubr.msk.bf16.mxu0 %vm700_vm13, %v13639_v33  ;;  %v7827_v33 = vpack.c.bf16 %v9489_v39, %v9489_v39  ;;  %v7814_v52 = vpack.c.bf16 %v262_v17, %v262_v17  ;;  %v44_v17 = vld [vmem:[%s13490_s0 + $0xb8] sm:$0x1]  ;;  %v1249_v5 = vor.u32 %v9456_v49, %v9450_v51 }
  0x73   :  { %v264_v22 = vsel %vm120_vm11, %v48_v7, %v192_v6  ;;  %v258_v7 = vsel %vm114_vm1, %v42_v54, %v186_v25  ;;  %vm116_vm3 = vcmp.gt.f32.partialorder %v44_v17, 0.0  ;;  %v188_v51 = vmul.f32 0.2, %v44_v17 }
  0x74   :  { %v1238_v2 = vshll.u32 %v7814_v52, 16  ;;  %v1327_v16 = vshrl.u32 %v7827_v33, 16  ;;  %v1330_v36 = vshll.u32 %v7827_v33, 16  ;;  %v256_v52 = vsel %vm112_vm12, %v40_v3, %v184_v46 }
  0x75   :  { %v7816_v48 = vpack.c.bf16 %v264_v22, %v264_v22  ;;  %v1236_v49 = vrot.slane %v1235_v29, 4  ;;  %v194_v6 = vmul.f32 0.2, %v50_v27  ;;  %v1344_v46 = vshll.u32 %v7829_v45, 16 }
  0x76   :  { %v1240_v33 = vrot.slane %v1238_v2, 5  ;;  %v233_v25 = vmul.f32 0.2, %v9529_v21  ;;  %v7808_v54 = vpack.c.bf16 %v256_v52, %v256_v52  ;;  %v7810_v29 = vpack.c.bf16 %v258_v7, %v258_v7 }
  0x77   :  { %v1252_v3 = vshll.u32 %v7816_v48, 16  ;;  %v9571_v14 = vrot.slane %v1327_v16, 4  ;;  %v9573_v2 = vrot.slane %v1330_v36, 5  ;;  %v9576_v48 = vsel %vm159_vm15, %v87_v44, %v231_v13 }
  0x78   :  { %v260_v45 = vsel %vm116_vm3, %v44_v17, %v188_v51  ;;  %v9589_v16 = vrot.slane %v1341_v18, 4  ;;  %v9591_v36 = vrot.slane %v1344_v46, 5  ;;  %v1207_v13 = vor.u32 %v9422_v61, %v9412_v34  ;;  %v54_v34 = vld [vmem:[%s13490_s0 + $0x108] sm:$0x1] }
  0x79   :  { %8134 = vmatmul.mubr.msk.bf16.vlgmr.msra.gmra.mrb[0].mxu0 %vm700_vm13, %v13640_v15  ;;  %v1250_v15 = vrot.slane %v1249_v5, 4  ;;  %v1254_v22 = vrot.slane %v1252_v3, 5  ;;  %v266_v5 = vsel %vm122_vm4, %v50_v27, %v194_v6  ;;  %v13644_v27 = vpack.c.bf16 %v9420_v60, %v9418_v35 }
  0x7a   :  { %8150 = vmatpush3.bf16.msra.mxu0 %v9398_v8  ;;  %8137 = vmatprep.mubr.msk.bf16.mxu0 %vm700_vm13, %v13641_v0  ;;  %v9566_v8 = vsel %vm157_vm10, %v9473_v43, %v229_v62  ;;  %v7831_v0 = vpack.c.bf16 %v9539_v9, %v9539_v9  ;;  %v1193_v43 = vor.u32 %v9410_v38, %v9400_v12  ;;  %v52_v12 = vld [vmem:[%s13490_s0 + $0xf8] sm:$0x1]  ;;  %v1196_v38 = vshll.u32 %v7808_v54, 16 }
  0x7b   :  { %8835 = vmatprep.subr.msk.bf16.mxu0 %vm725_vm0, %v9534_v19  ;;  %v9583_v62 = vsel %vm9094_vm14, %v1236_v49, %v1240_v33  ;;  %v9587_v52 = vsel %vm9094_vm14, %v1250_v15, %v1254_v22  ;;  %v7805_v18 = vpack.c.bf16 %v9566_v8, %v9539_v9  ;;  %v1210_v17 = vshll.u32 %v7810_v29, 16 }
  0x7c   :  { %13642 = vst [vmem:[#allocation30_spill] sm:$0xff] %v9583_v62  ;;  %13643 = vst [vmem:[#allocation31_spill] sm:$0xff] %v9587_v52  ;;  %v7812_v7 = vpack.c.bf16 %v260_v45, %v260_v45  ;;  %v13645_v61 = vpack.c.bf16 %v9440_v24, %v9438_v1  ;;  %v7833_v51 = vpack.c.bf16 %v9566_v8, %v9566_v8  ;;  %v1355_v49 = vshrl.u32 %v7831_v0, 16  ;;  %v76_v1 = vld [vmem:[%s13490_s0 + $0x1b8] sm:$0x1] }
  0x7d   :  { %v1358_v33 = vshll.u32 %v7831_v0, 16  ;;  %v7818_v6 = vpack.c.bf16 %v266_v5, %v266_v5  ;;  %v9618_v15 = vsel %vm161_vm2, %v9529_v21, %v233_v25  ;;  %v9622_v3 = vpack.c.bf16 %v9576_v48, %v9576_v48  ;;  %v78_v21 = vld [vmem:[%s13490_s0 + $0x1c8] sm:$0x1] }
  0x7e   :  { %13646 = vst [vmem:[#allocation32_spill] sm:$0xff] %v9618_v15  ;;  %v1194_v46 = vrot.slane %v1193_v43, 4  ;;  %v196_v54 = vmul.f32 0.2, %v52_v12  ;;  %v1208_v29 = vrot.slane %v1207_v13, 4  ;;  %v1221_v0 = vor.u32 %v9431_v4, %v9429_v55 }
  0x7f   :  { %vm124_vm5 = vcmp.gt.f32.partialorder %v52_v12, 0.0  ;;  %v198_v22 = vmul.f32 0.2, %v54_v34  ;;  %v1198_v25 = vrot.slane %v1196_v38, 5  ;;  %v1212_v45 = vrot.slane %v1210_v17, 5 }
  0x80   :  { %v1224_v5 = vshll.u32 %v7812_v7, 16  ;;  %vm126_vm6 = vcmp.gt.f32.partialorder %v54_v34, 0.0  ;;  %v9632_v43 = vrot.slane %v1355_v49, 4  ;;  %v220_v13 = vmul.f32 0.2, %v76_v1 }
  0x81   :  { %8138 = vmatmul.mubr.msk.bf16.gmra.mrb[4].mxu0 %vm700_vm13, %v13644_v27  ;;  %v1263_v27 = vor.u32 %v9460_v31, %v9458_v37  ;;  %v9636_v44 = vrot.slane %v1358_v33, 5  ;;  %v268_v55 = vsel %vm124_vm5, %v52_v12, %v196_v54  ;;  %vm148_vm7 = vcmp.gt.f32.partialorder %v76_v1, 0.0 }
  0x82   :  { %8141 = vmatprep.mubr.msk.bf16.mxu0 %vm700_vm13, %v13645_v61  ;;  %v1266_v61 = vshll.u32 %v7818_v6, 16  ;;  %v222_v4 = vmul.f32 0.2, %v78_v21  ;;  %v1369_v24 = vshrl.u32 %v7833_v51, 16  ;;  %v1372_v60 = vshll.u32 %v7833_v51, 16 }
  0x83   :  { %v270_v20 = vsel %vm126_vm6, %v54_v34, %v198_v22  ;;  %vm150_vm8 = vcmp.gt.f32.partialorder %v78_v21, 0.0  ;;  %v13647_v38 = vpack.c.bf16 %v9491_v23, %v9489_v39  ;;  %v1199_v17 = vsel %vm9094_vm14, %v1194_v46, %v1198_v25  ;;  %v82_v25 = vld [vmem:[%s13490_s0 + $0x1e8] sm:$0x1] }
  0x84   :  { %v9646_v31 = vsel %vm9094_vm14, %v1208_v29, %v1212_v45  ;;  %v1222_v37 = vrot.slane %v1221_v0, 4  ;;  %v1226_v12 = vrot.slane %v1224_v5, 5  ;;  %v1264_v7 = vrot.slane %v1263_v27, 4  ;;  %v80_v29 = vld [vmem:[%s13490_s0 + $0x1d8] sm:$0x1] }
  0x85   :  { %v1268_v51 = vrot.slane %v1266_v61, 5  ;;  %v7820_v34 = vpack.c.bf16 %v268_v55, %v268_v55  ;;  %v292_v49 = vsel %vm148_vm7, %v76_v1, %v220_v13  ;;  %v7806_v33 = vpack.c.bf16 %v9618_v15, %v9576_v48  ;;  %v86_v5 = vld [vmem:[%s13490_s0 + $0x208] sm:$0x1] }
  0x86   :  { %v9653_v6 = vpack.c.bf16 %v9618_v15, %v9618_v15  ;;  %v7822_v46 = vpack.c.bf16 %v270_v20, %v270_v20  ;;  %v294_v54 = vsel %vm150_vm8, %v78_v21, %v222_v4  ;;  %v9658_v0 = vrot.slane %v1369_v24, 4 }
  0x87   :  { %v7407_v45 = vcombine.low %v1199_v17, %v9646_v31  ;;  %v9670_v20 = vsel %vm9094_vm14, %v1222_v37, %v1226_v12  ;;  %v1277_v24 = vor.u32 %v9477_v57, %v9475_v10  ;;  %v7824_v21 = vpack.c.bf16 %v292_v49, %v292_v49 }
  0x88   :  { %v9682_v27 = vsel %vm9094_vm14, %v1264_v7, %v1268_v51  ;;  %v1280_v61 = vshll.u32 %v7820_v34, 16  ;;  %v1291_v13 = vor.u32 %v9487_v50, %v9479_v59  ;;  %v7826_v55 = vpack.c.bf16 %v294_v54, %v294_v54  ;;  %v88_v51 = vld [vmem:[%s13490_s0 + $0x218] sm:$0x1] }
  0x89   :  { %8142 = vmatmul.mubr.msk.bf16.gmra.mrb[8].mxu0 %vm700_vm13, %v13647_v38  ;;  %v1294_v4 = vshll.u32 %v7822_v46, 16  ;;  %v1305_v57 = vor.u32 %v9506_v47, %v9504_v58  ;;  %v224_v10 = vmul.f32 0.2, %v80_v29  ;;  %v226_v38 = vmul.f32 0.2, %v82_v25 }
  0x8a   :  { %8145 = vmatprep.mubr.msk.bf16.mxu0 %vm700_vm13, %v7805_v18  ;;  %v9660_v18 = vrot.slane %v1372_v60, 5  ;;  %v84_v60 = vld [vmem:[%s13490_s0 + $0x1f8] sm:$0x1]  ;;  %vm152_vm9 = vcmp.gt.f32.partialorder %v80_v29, 0.0  ;;  %vm154_vm10 = vcmp.gt.f32.partialorder %v82_v25, 0.0  ;;  %v1308_v12 = vshll.u32 %v7824_v21, 16 }
  0x8b   :  { %v228_v17 = vmul.f32 0.2, %v84_v60  ;;  %v230_v37 = vmul.f32 0.2, %v86_v5  ;;  %v1319_v7 = vor.u32 %v9510_v11, %v9508_v42  ;;  %vm156_vm11 = vcmp.gt.f32.partialorder %v84_v60, 0.0 }
  0x8c   :  { %vm158_vm12 = vcmp.gt.f32.partialorder %v86_v5, 0.0  ;;  %v1397_v50 = vshrl.u32 %v9653_v6, 16  ;;  %v7408_v59 = vcombine.low %v9670_v20, %v9583_v62  ;;  %v1278_v58 = vrot.slane %v1277_v24, 4  ;;  %v90_v24 = vld [vmem:[%s13490_s0 + $0x228] sm:$0x1] }
  0x8d   :  { %v1322_v47 = vshll.u32 %v7826_v55, 16  ;;  %v7409_v34 = vcombine.low %v9587_v52, %v9682_v27  ;;  %v1292_v49 = vrot.slane %v1291_v13, 4  ;;  %v296_v42 = vsel %vm152_vm9, %v80_v29, %v224_v10 }
  0x8e   :  { %v298_v11 = vsel %vm154_vm10, %v82_v25, %v226_v38  ;;  %v1296_v46 = vrot.slane %v1294_v4, 5  ;;  %v300_v54 = vsel %vm156_vm11, %v84_v60, %v228_v17  ;;  %v1306_v21 = vrot.slane %v1305_v57, 4  ;;  %v9719_v57 = vld [vmem:[%s13489_s1 + $0x14] sm:$0xf] }
  0x8f   :  { %v1310_v55 = vrot.slane %v1308_v12, 5  ;;  %v1320_v1 = vrot.slane %v1319_v7, 4  ;;  %v232_v22 = vmul.f32 0.2, %v88_v51  ;;  %v1324_v62 = vrot.slane %v1322_v47, 5 }
  0x90   :  { %v7828_v15 = vpack.c.bf16 %v296_v42, %v296_v42  ;;  %v7830_v52 = vpack.c.bf16 %v298_v11, %v298_v11  ;;  %vm160_vm15 = vcmp.gt.f32.partialorder %v88_v51, 0.0  ;;  %v1611_v29 = vsel %vm725_vm0, %v9534_v19, 0 }
  0x91   :  { %8146 = vmatmul.mubr.msk.bf16.gmra.mrb[12].mxu0 %vm700_vm13, %v7806_v33  ;;  %v1282_v33 = vrot.slane %v1280_v61, 5  ;;  %v7832_v25 = vpack.c.bf16 %v300_v54, %v300_v54  ;;  %v234_v13 = vmul.f32 0.2, %v90_v24  ;;  %v1400_v60 = vshll.u32 %v9653_v6, 16 }
  0x92   :  { %8151 = vmatprep.mubr.msk.bf16.mxu0 %vm700_vm13, %v7407_v45  ;;  %v302_v45 = vsel %vm158_vm12, %v86_v5, %v230_v37  ;;  %v9714_v4 = vsel %vm9094_vm14, %v1292_v49, %v1296_v46  ;;  %vm162_vm1 = vcmp.gt.f32.partialorder %v90_v24, 0.0  ;;  %v1311_v19 = vsel %vm9094_vm14, %v1306_v21, %v1310_v55 }
  0x93   :  { %v7834_v61 = vpack.c.bf16 %v302_v45, %v302_v45  ;;  %v9710_v5 = vsel %vm9094_vm14, %v1278_v58, %v1282_v33  ;;  %v1333_v6 = vor.u32 %v9573_v2, %v9571_v14  ;;  %v1347_v10 = vor.u32 %v9591_v36, %v9589_v16 }
  0x94   :  { %v304_v38 = vsel %vm160_vm15, %v88_v51, %v232_v22  ;;  %v9731_v17 = vsel %vm9094_vm14, %v1320_v1, %v1324_v62  ;;  %v1336_v37 = vshll.u32 %v7828_v15, 16  ;;  %v1350_v12 = vshll.u32 %v7830_v52, 16 }
  0x95   :  { %v1361_v7 = vor.u32 %v9636_v44, %v9632_v43  ;;  %v1375_v14 = vor.u32 %v9660_v18, %v9658_v0  ;;  %v1378_v2 = vshll.u32 %v7834_v61, 16  ;;  %v306_v16 = vsel %vm162_vm1, %v90_v24, %v234_v13 }
  0x96   :  { %v13648_v36 = vshrl.u32 %v9622_v3, 16  ;;  %v13649_v62 = vshll.u32 %v9622_v3, 16  ;;  %v1399_v52 = vrot.slane %v1397_v50, 4  ;;  %v7836_v1 = vpack.c.bf16 %v304_v38, %v304_v38 }
  0x97   :  { %v1402_v58 = vrot.slane %v1400_v60, 5  ;;  %v7410_v44 = vcombine.low %v9710_v5, %v9714_v4  ;;  %v1334_v43 = vrot.slane %v1333_v6, 4  ;;  %v1348_v0 = vrot.slane %v1347_v10, 4 }
  0x98   :  { %v1385_v22 = vrot.slane %v13648_v36, 4  ;;  %v1388_v15 = vrot.slane %v13649_v62, 5  ;;  %v7411_v18 = vcombine.low %v1311_v19, %v9731_v17  ;;  %v1338_v47 = vrot.slane %v1336_v37, 5 }
  0x99   :  { %8152 = vmatmul.mubr.msk.bf16.vlgmr.msra.gmra.mrb[0].mxu0 %vm700_vm13, %v7408_v59  ;;  %v1364_v59 = vshll.u32 %v7832_v25, 16  ;;  %v1352_v51 = vrot.slane %v1350_v12, 5  ;;  %v1362_v49 = vrot.slane %v1361_v7, 4  ;;  %v1376_v11 = vrot.slane %v1375_v14, 4 }
  0x9a   :  { %8168 = vmatpush3.bf16.msra.mxu0 %v1611_v29  ;;  %8155 = vmatprep.mubr.msk.bf16.mxu0 %vm700_vm13, %v7409_v34  ;;  %v7838_v34 = vpack.c.bf16 %v306_v16, %v306_v16  ;;  %v1380_v33 = vrot.slane %v1378_v2, 5  ;;  %v1389_v46 = vor.u32 %v1388_v15, %v1385_v22  ;;  %v1392_v3 = vshll.u32 %v7836_v1, 16  ;;  %v37_v22 = vld [vmem:[%s13490_s0 + $0x80] sm:$0xff] }
  0x9b   :  { %8836 = vmatprep.subr.msk.bf16.mxu0 %vm725_vm0, %v9719_v57  ;;  %v1366_v42 = vrot.slane %v1364_v59, 5  ;;  %v7856_v50 = vpack.c.bf16 %v9539_v9, %v9491_v23  ;;  %v7857_v54 = vpack.c.bf16 %v9576_v48, %v9566_v8  ;;  %v9755_v45 = vsel %vm9094_vm14, %v1334_v43, %v1338_v47  ;;  %v13653_v43 = vld [vmem:[#allocation13_spill] sm:$0xff]  ;;  %v92_v8 = vld [vmem:[%s13490_s0 + $0x238] sm:$0x1] }
  0x9c   :  { %v9759_v24 = vsel %vm9094_vm14, %v1348_v0, %v1352_v51  ;;  %v1403_v21 = vor.u32 %v1402_v58, %v1399_v52  ;;  %v1406_v55 = vshll.u32 %v7838_v34, 16  ;;  %v9767_v25 = vsel %vm9094_vm14, %v1376_v11, %v1380_v33  ;;  %v13654_v0 = vld [vmem:[#allocation15_spill] sm:$0xff]  ;;  %v13655_v51 = vld [vmem:[#allocation16_spill] sm:$0xff] }
  0x9d   :  { %v9763_v29 = vsel %vm9094_vm14, %v1362_v49, %v1366_v42  ;;  %v7479_v61 = vcombine.low %v9646_v31, %v9670_v20  ;;  %v1390_v13 = vrot.slane %v1389_v46, 4  ;;  %v1394_v60 = vrot.slane %v1392_v3, 5  ;;  %v13656_v34 = vld [vmem:[#allocation19_spill] sm:$0xff] }
  0x9e   :  { %v7412_v19 = vcombine.low %v9755_v45, %v9759_v24  ;;  %v7481_v6 = vcombine.low %v9682_v27, %v9710_v5  ;;  %v7413_v10 = vcombine.low %v9763_v29, %v9767_v25  ;;  %v1404_v38 = vrot.slane %v1403_v21, 4 }
  0x9f   :  { %v1408_v37 = vrot.slane %v1406_v55, 5  ;;  %v7483_v12 = vcombine.low %v9731_v17, %v9755_v45  ;;  %v9781_v7 = vsel %vm9094_vm14, %v1390_v13, %v1394_v60  ;;  %v7484_v59 = vcombine.low %v9759_v24, %v9763_v29  ;;  %v13657_v55 = vld [vmem:[#allocation20_spill] sm:$0xff]  ;;  %v354_v24 = vld [vmem:[%s13491_s2 + $0x4] sm:$0xf] }
  0xa0   :  { %v7485_v14 = vcombine.low %v9767_v25, %v9781_v7  ;;  %v7839_v36 = vpack.c.bf16 %v9071_v28, %v9067_v26  ;;  %v7840_v62 = vpack.c.bf16 %v9079_v32, %v9075_v30  ;;  %v7841_v15 = vpack.c.bf16 %v9156_v56, %v9135_v40  ;;  %v351_v26 = vld [vmem:[%s13489_s1 + $0x18] sm:$0xf]  ;;  %v13650_v30 = vld [vmem:[#allocation7_spill] sm:$0xff]  ;;  %v13651_v40 = vld [vmem:[#allocation9_spill] sm:$0xff]  ;;  %8839 = vmatprep.subr.msk.bf16.mxu1 %vm725_vm0, %v354_v24 }
  0xa1   :  { %8156 = vmatmul.mubr.msk.bf16.gmra.mrb[4].mxu0 %vm700_vm13, %v7410_v44  ;;  %v9791_v2 = vsel %vm9094_vm14, %v1404_v38, %v1408_v37  ;;  %v181_v52 = vmul.f32 0.2, %v37_v22  ;;  %v1795_v1 = vsel %vm725_vm0, %v9719_v57, 0  ;;  %vm109_vm2 = vcmp.gt.f32.partialorder %v37_v22, 0.0  ;;  %v13652_v56 = vld [vmem:[#allocation12_spill] sm:$0xff]  ;;  %v73_v57 = vld [vmem:[%s13490_s0 + $0x1a0] sm:$0xff] }
  0xa2   :  { %8159 = vmatprep.mubr.msk.bf16.mxu0 %vm700_vm13, %v7411_v18  ;;  %v7414_v16 = vcombine.low %v9781_v7, %v9791_v2  ;;  %v7843_v58 = vpack.c.bf16 %v13652_v56, %v13651_v40  ;;  %v38_v44 = vld [vmem:[%s13490_s0 + $0x88] sm:$0x1]  ;;  %v7844_v18 = vpack.c.bf16 %v13654_v0, %v13653_v43  ;;  %v7845_v49 = vpack.c.bf16 %v13656_v34, %v13655_v51  ;;  %v13658_v38 = vld [vmem:[#allocation3_spill] sm:$0xff] }
  0xa3   :  { %v253_v28 = vsel %vm109_vm2, %v37_v22, %v181_v52  ;;  %v217_v42 = vmul.f32 0.2, %v73_v57  ;;  %vm145_vm3 = vcmp.gt.f32.partialorder %v73_v57, 0.0  ;;  %v182_v11 = vmul.f32 0.2, %v38_v44  ;;  %v13659_v37 = vld [vmem:[#allocation4_spill] sm:$0xff] }
  0xa4   :  { %v7842_v32 = vpack.c.bf16 %v253_v28, %v13650_v30  ;;  %v7847_v47 = vpack.c.bf16 %v253_v28, %v253_v28  ;;  %vm110_vm4 = vcmp.gt.f32.partialorder %v38_v44, 0.0  ;;  %v13661_v52 = vld [vmem:[#allocation10_spill] sm:$0xff]  ;;  %v1947_v40 = vsel %vm725_vm0, %v351_v26, 0  ;;  %v13666_v51 = vld [vmem:[#allocation11_spill] sm:$0xff] }
  0xa5   :  { %v289_v3 = vsel %vm145_vm3, %v73_v57, %v217_v42  ;;  %v254_v21 = vsel %vm110_vm4, %v38_v44, %v182_v11  ;;  %v13663_v57 = vld [vmem:[#allocation5_spill] sm:$0xff]  ;;  %v13664_v44 = vld [vmem:[#allocation6_spill] sm:$0xff]  ;;  %vm164_vm9 = vcmp.gt.f32.partialorder %v92_v8, 0.0  ;;  %vm2270_vm10 = vcmask 60416   ;;  %v362_v25 = vld [vmem:[%s13491_s2 + $0x24] sm:$0xf] }
  0xa6   :  { %v1733_v33 = vshrl.u32 %v7847_v47, 16  ;;  %v1736_v46 = vshll.u32 %v7847_v47, 16  ;;  %v7846_v13 = vpack.c.bf16 %v289_v3, %v13657_v55  ;;  %v13665_v43 = vcombine.low %v13663_v57, %v13664_v44  ;;  %v13667_v11 = vld [vmem:[#allocation17_spill] sm:$0xff]  ;;  %v9992_v7 = vld [vmem:[%s13491_s2] sm:$0xf] }
  0xa7   :  { %v13676_v57 = vld [vmem:[#allocation25_spill] sm:$0xff]  ;;  %vm2272_vm11 = vcmask 57344   ;;  %v8982_v45 = vmov 0   ;;  %v3772_v29 = vsel %vm725_vm0, %v354_v24, 0  ;;  %vm2514_vm12 = vsmask.f32 7938 }
  0xa8   :  { %v1735_v60 = vrot.slane %v1733_v33, 4  ;;  %v13668_v33 = vld [vmem:[#allocation14_spill] sm:$0xff]  ;;  %2278 = vst.msk [vmem:[#allocation2 + $0x18] sm:$0xf] %vm2270_vm10, %v8982_v45  ;;  %2271 = vst.msk [vmem:[#allocation2] sm:$0xf] %vm2270_vm10, %v8982_v45  ;;  %8240 = vmatpush3.bf16.msra.mxu1 %v3772_v29 }
  0xa9   :  { %8160 = vmatmul.mubr.msk.bf16.gmra.mrb[8].mxu0 %vm700_vm13, %v7412_v19  ;;  %v1738_v19 = vrot.slane %v1736_v46, 5  ;;  %v7447_v46 = vcombine.low %v13668_v33, %v13667_v11  ;;  %v13680_v11 = vld [vmem:[#allocation32_spill] sm:$0xff]  ;;  %2279 = vst.msk [vmem:[#allocation2 + $0x1c] sm:$0x1] %vm2272_vm11, %v8982_v45  ;;  %2273 = vst.msk [vmem:[#allocation2 + $0x4] sm:$0x1] %vm2272_vm11, %v8982_v45  ;;  %8840 = vmatprep.subr.msk.bf16.mxu1 %vm725_vm0, %v9992_v7 }
  0xaa   :  { %8163 = vmatprep.mubr.msk.bf16.mxu0 %vm700_vm13, %v7413_v10  ;;  %v7848_v10 = vpack.c.bf16 %v254_v21, %v254_v21  ;;  %2274 = vst.msk [vmem:[#allocation2 + $0x8] sm:$0xf] %vm2270_vm10, %v8982_v45  ;;  %2276 = vst.msk [vmem:[#allocation2 + $0x10] sm:$0xf] %vm2270_vm10, %v8982_v45  ;;  %vm2520_vm15 = vsmask.f32 256 }
  0xab   :  { %2275 = vst.msk [vmem:[#allocation2 + $0xc] sm:$0x1] %vm2272_vm11, %v8982_v45  ;;  %2277 = vst.msk [vmem:[#allocation2 + $0x14] sm:$0x1] %vm2272_vm11, %v8982_v45  ;;  %vm2919_vm3 = vcmask 1042432   ;;  %vm2920_vm4 = vcmask 1046532  }
  0xac   :  { %v1742_v22 = vshll.u32 %v7848_v10, 16  ;;  %v13671_v10 = vld [vmem:[#allocation23_spill] sm:$0xff]  ;;  %2280 = vst.msk [vmem:[#allocation2 + $0x20] sm:$0xf] %vm2270_vm10, %v8982_v45  ;;  %2282 = vst.msk [vmem:[#allocation2 + $0x28] sm:$0xf] %vm2270_vm10, %v8982_v45 }
  0xad   :  { %2281 = vst.msk [vmem:[#allocation2 + $0x24] sm:$0x1] %vm2272_vm11, %v8982_v45  ;;  %2283 = vst.msk [vmem:[#allocation2 + $0x2c] sm:$0x1] %vm2272_vm11, %v8982_v45 }
  0xae   :  { %2284 = vst.msk [vmem:[#allocation2 + $0x30] sm:$0xf] %vm2270_vm10, %v8982_v45  ;;  %2286 = vst.msk [vmem:[#allocation2 + $0x38] sm:$0xf] %vm2270_vm10, %v8982_v45 }
  0xaf   :  { %2285 = vst.msk [vmem:[#allocation2 + $0x34] sm:$0x1] %vm2272_vm11, %v8982_v45  ;;  %2287 = vst.msk [vmem:[#allocation2 + $0x3c] sm:$0x1] %vm2272_vm11, %v8982_v45 }
  0xb0   :  { %2288 = vst.msk [vmem:[#allocation2 + $0x40] sm:$0xf] %vm2270_vm10, %v8982_v45  ;;  %2290 = vst.msk [vmem:[#allocation2 + $0x48] sm:$0xf] %vm2270_vm10, %v8982_v45 }
  0xb1   :  { %8164 = vmatmul.mubr.msk.bf16.gmra.mrb[12].mxu0 %vm700_vm13, %v7414_v16  ;;  %v13660_v16 = vcombine.low %v13658_v38, %v13659_v37  ;;  %v13672_v38 = vld [vmem:[#allocation22_spill] sm:$0xff]  ;;  %2289 = vst.msk [vmem:[#allocation2 + $0x44] sm:$0x1] %vm2272_vm11, %v8982_v45  ;;  %2291 = vst.msk [vmem:[#allocation2 + $0x4c] sm:$0x1] %vm2272_vm11, %v8982_v45 }
  0xb2   :  { %8169 = vmatprep.mubr.msk.bf16.mxu0 %vm700_vm13, %v7839_v36  ;;  %v1739_v36 = vor.u32 %v1738_v19, %v1735_v60  ;;  %v13670_v60 = vld [vmem:[#allocation18_spill] sm:$0xff]  ;;  %v7449_v37 = vcombine.low %v13672_v38, %v13671_v10  ;;  %2292 = vst.msk [vmem:[#allocation2 + $0x50] sm:$0xf] %vm2270_vm10, %v8982_v45  ;;  %2294 = vst.msk [vmem:[#allocation2 + $0x58] sm:$0xf] %vm2270_vm10, %v8982_v45 }
  0xb3   :  { %2293 = vst.msk [vmem:[#allocation2 + $0x54] sm:$0x1] %vm2272_vm11, %v8982_v45  ;;  %2295 = vst.msk [vmem:[#allocation2 + $0x5c] sm:$0x1] %vm2272_vm11, %v8982_v45 }
  0xb4   :  { %v1740_v30 = vrot.slane %v1739_v36, 4  ;;  %2296 = vst.msk [vmem:[#allocation2 + $0x60] sm:$0xf] %vm2270_vm10, %v8982_v45  ;;  %2298 = vst.msk [vmem:[#allocation2 + $0x68] sm:$0xf] %vm2270_vm10, %v8982_v45 }
  0xb5   :  { %2297 = vst.msk [vmem:[#allocation2 + $0x64] sm:$0x1] %vm2272_vm11, %v8982_v45  ;;  %2299 = vst.msk [vmem:[#allocation2 + $0x6c] sm:$0x1] %vm2272_vm11, %v8982_v45 }
  0xb6   :  { %2300 = vst.msk [vmem:[#allocation2 + $0x70] sm:$0xf] %vm2270_vm10, %v8982_v45  ;;  %2302 = vst.msk [vmem:[#allocation2 + $0x78] sm:$0xf] %vm2270_vm10, %v8982_v45 }
  0xb7   :  { %2301 = vst.msk [vmem:[#allocation2 + $0x74] sm:$0x1] %vm2272_vm11, %v8982_v45  ;;  %2303 = vst.msk [vmem:[#allocation2 + $0x7c] sm:$0x1] %vm2272_vm11, %v8982_v45 }
  0xb8   :  { %2304 = vst.msk [vmem:[#allocation2 + $0x80] sm:$0xf] %vm2270_vm10, %v8982_v45  ;;  %2306 = vst.msk [vmem:[#allocation2 + $0x88] sm:$0xf] %vm2270_vm10, %v8982_v45 }
  0xb9   :  { %8170 = vmatmul.mubr.msk.bf16.vlgmr.msra.gmra.mrb[0].mxu0 %vm700_vm13, %v7840_v62  ;;  %v74_v62 = vld [vmem:[%s13490_s0 + $0x1a8] sm:$0x1]  ;;  %2305 = vst.msk [vmem:[#allocation2 + $0x84] sm:$0x1] %vm2272_vm11, %v8982_v45  ;;  %2307 = vst.msk [vmem:[#allocation2 + $0x8c] sm:$0x1] %vm2272_vm11, %v8982_v45 }
  0xba   :  { %8186 = vmatpush3.bf16.msra.mxu0 %v1795_v1  ;;  %8173 = vmatprep.mubr.msk.bf16.mxu0 %vm700_vm13, %v7841_v15  ;;  %v7849_v15 = vpack.c.bf16 %v289_v3, %v289_v3  ;;  %v13662_v1 = vld [vmem:[#allocation8_spill] sm:$0xff]  ;;  %v218_v56 = vmul.f32 0.2, %v74_v62  ;;  %vm146_vm5 = vcmp.gt.f32.partialorder %v74_v62, 0.0  ;;  %2308 = vst.msk [vmem:[#allocation2 + $0x90] sm:$0xf] %vm2270_vm10, %v8982_v45  ;;  %vm10018_vm1 = vmand %vm2270_vm10, %vm2514_vm12 }
  0xbb   :  { %8837 = vmatprep.subr.msk.bf16.mxu0 %vm725_vm0, %v351_v26  ;;  %v7445_v28 = vcombine.low %v13662_v1, %v13661_v52  ;;  %v13674_v52 = vld [vmem:[#allocation27_spill] sm:$0xff]  ;;  %2309 = vst.msk [vmem:[#allocation2 + $0x94] sm:$0x1] %vm2272_vm11, %v8982_v45  ;;  %2311 = vst.msk [vmem:[#allocation2 + $0x9c] sm:$0x1] %vm2272_vm11, %v8982_v45  ;;  %vm7274_vm12 = vcmask 261344  }
  0xbc   :  { %v1747_v0 = vshrl.u32 %v7849_v15, 16  ;;  %v290_v26 = vsel %vm146_vm5, %v74_v62, %v218_v56  ;;  %v13673_v62 = vld [vmem:[#allocation24_spill] sm:$0xff]  ;;  %v7851_v1 = vpack.c.bf16 %v9377_v53, %v13674_v52  ;;  %v13675_v56 = vld [vmem:[#allocation26_spill] sm:$0xff]  ;;  %2310 = vst.msk [vmem:[#allocation2 + $0x98] sm:$0xf] %vm2270_vm10, %v8982_v45  ;;  %vm10024_vm2 = vmand %vm2272_vm11, %vm2520_vm15  ;;  %vm7176_vm10 = vcmask 228545  }
  0xbd   :  { %v7850_v3 = vpack.c.bf16 %v290_v26, %v290_v26  ;;  %v13677_v44 = vpack.c.bf16 %v13675_v56, %v13676_v57  ;;  %v9999_v52 = vld [vmem:[%s13491_s2 + $0x20] sm:$0xf]  ;;  %vm10494_vm5 = vmor %vm2919_vm3, %vm2920_vm4  ;;  %vm7178_vm11 = vcmask 221376  }
  0xbf   :  { %v1756_v55 = vshll.u32 %v7850_v3, 16 }
  0xc1   :  { %8174 = vmatmul.mubr.msk.bf16.gmra.mrb[4].mxu0 %vm700_vm13, %v7842_v32  ;;  %v1744_v32 = vrot.slane %v1742_v22, 5  ;;  %v1758_v36 = vrot.slane %v1756_v55, 5  ;;  %v236_v55 = vmul.f32 0.2, %v92_v8 }
  0xc2   :  { %8177 = vmatprep.mubr.msk.bf16.mxu0 %vm700_vm13, %v7843_v58  ;;  %v352_v58 = vld [vmem:[%s13489_s1 + $0x1c] sm:$0xf] }
  0xc3   :  { %v1745_v47 = vsel %vm9094_vm14, %v1740_v30, %v1744_v32  ;;  %v7853_v30 = vpack.c.bf16 %v9418_v35, %v9414_v41  ;;  %v91_v35 = vld [vmem:[%s13490_s0 + $0x230] sm:$0xff]  ;;  %v56_v41 = vld [vmem:[%s13490_s0 + $0x118] sm:$0x1] }
  0xc4   :  { %v7446_v34 = vcombine.low %v13666_v51, %v1745_v47  ;;  %v235_v26 = vmul.f32 0.2, %v91_v35  ;;  %vm163_vm7 = vcmp.gt.f32.partialorder %v91_v35, 0.0  ;;  %v200_v51 = vmul.f32 0.2, %v56_v41 }
  0xc5   :  { %vm128_vm8 = vcmp.gt.f32.partialorder %v56_v41, 0.0 }
  0xc9   :  { %8178 = vmatmul.mubr.msk.bf16.gmra.mrb[8].mxu0 %vm700_vm13, %v7844_v18  ;;  %v1750_v18 = vshll.u32 %v7849_v15, 16 }
  0xca   :  { %8181 = vmatprep.mubr.msk.bf16.mxu0 %vm700_vm13, %v7845_v49  ;;  %v1749_v49 = vrot.slane %v1747_v0, 4 }
  0xcb   :  { %v1752_v42 = vrot.slane %v1750_v18, 5  ;;  %v13679_v18 = vld [vmem:[#allocation29_spill] sm:$0xff] }
  0xcc   :  { %v7855_v47 = vpack.c.bf16 %v9489_v39, %v13679_v18 }
  0xcd   :  { %v1753_v21 = vor.u32 %v1752_v42, %v1749_v49  ;;  %v307_v49 = vsel %vm163_vm7, %v91_v35, %v235_v26  ;;  %v272_v42 = vsel %vm128_vm8, %v56_v41, %v200_v51  ;;  %vm6821_vm7 = vcmask 130144  }
  0xce   :  { %v7858_v33 = vpack.c.bf16 %v307_v49, %v13680_v11  ;;  %v7861_v48 = vpack.c.bf16 %v307_v49, %v307_v49  ;;  %v2531_v11 = vld [vmem:[#allocation2 + $0x18] sm:$0xf]  ;;  %vm6934_vm8 = vcmask 162944  }
  0xd0   :  { %v2083_v10 = vshrl.u32 %v7861_v48, 16  ;;  %v2086_v31 = vshll.u32 %v7861_v48, 16 }
  0xd1   :  { %8182 = vmatmul.mubr.msk.bf16.gmra.mrb[12].mxu0 %vm700_vm13, %v7846_v13  ;;  %v13669_v13 = vld [vmem:[#allocation21_spill] sm:$0xff] }
  0xd2   :  { %8187 = vmatprep.mubr.msk.bf16.mxu0 %vm700_vm13, %v13660_v16  ;;  %v7448_v19 = vcombine.low %v13670_v60, %v13669_v13  ;;  %v1754_v16 = vrot.slane %v1753_v21, 4  ;;  %v7860_v21 = vpack.c.bf16 %v272_v42, %v272_v42  ;;  %v13681_v13 = vld [vmem:[#allocation30_spill] sm:$0xff]  ;;  %v13682_v60 = vld [vmem:[#allocation31_spill] sm:$0xff] }
  0xd4   :  { %v1759_v22 = vsel %vm9094_vm14, %v1754_v16, %v1758_v36  ;;  %v2078_v9 = vshll.u32 %v7860_v21, 16  ;;  %v2088_v16 = vrot.slane %v2086_v31, 5 }
  0xd5   :  { %v7450_v15 = vcombine.low %v13673_v62, %v1759_v22 }
  0xd9   :  { %8188 = vmatmul.mubr.msk.bf16.vlgmr.msra.gmra.mrb[0].mxu0 %vm700_vm13, %v13665_v43  ;;  %v13678_v43 = vld [vmem:[#allocation28_spill] sm:$0xff] }
  0xda   :  { %8204 = vmatpush3.bf16.msra.mxu0 %v1947_v40  ;;  %8191 = vmatprep.mubr.msk.bf16.mxu0 %vm700_vm13, %v7445_v28  ;;  %v55_v28 = vld [vmem:[%s13490_s0 + $0x110] sm:$0xff]  ;;  %v2131_v40 = vsel %vm725_vm0, %v352_v58, 0 }
  0xdb   :  { %8838 = vmatprep.subr.msk.bf16.mxu0 %vm725_vm0, %v352_v58  ;;  %v199_v32 = vmul.f32 0.2, %v55_v28  ;;  %vm127_vm6 = vcmp.gt.f32.partialorder %v55_v28, 0.0 }
  0xdd   :  { %v271_v53 = vsel %vm127_vm6, %v55_v28, %v199_v32  ;;  %v2631_v28 = vld [vmem:[#allocation2 + $0x4] sm:$0x1]  ;;  %vm6725_vm6 = vcmask 90176  }
  0xde   :  { %v7854_v0 = vpack.c.bf16 %v271_v53, %v13678_v43  ;;  %v7859_v58 = vpack.c.bf16 %v271_v53, %v271_v53  ;;  %v2657_v32 = vshll.u32 %v2631_v28, 16 }
  0xe0   :  { %v2069_v39 = vshrl.u32 %v7859_v58, 16 }
  0xe1   :  { %8192 = vmatmul.mubr.msk.bf16.gmra.mrb[4].mxu0 %vm700_vm13, %v7446_v34  ;;  %v2072_v34 = vshll.u32 %v7859_v58, 16 }
  0xe2   :  { %8195 = vmatprep.mubr.msk.bf16.mxu0 %vm700_vm13, %v7447_v46  ;;  %v2071_v46 = vrot.slane %v2069_v39, 4 }
  0xe3   :  { %v2074_v3 = vrot.slane %v2072_v34, 5 }
  0xe5   :  { %v2075_v23 = vor.u32 %v2074_v3, %v2071_v46 }
  0xe9   :  { %8196 = vmatmul.mubr.msk.bf16.gmra.mrb[8].mxu0 %vm700_vm13, %v7448_v19  ;;  %v13683_v19 = vcombine.low %v13681_v13, %v13682_v60 }
  0xea   :  { %8199 = vmatprep.mubr.msk.bf16.mxu0 %vm700_vm13, %v7449_v37  ;;  %v2085_v37 = vrot.slane %v2083_v10, 4 }
  0xec   :  { %v2089_v22 = vor.u32 %v2088_v16, %v2085_v37 }
  0xee   :  { %v2090_v5 = vrot.slane %v2089_v22, 4 }
  0xf1   :  { %8200 = vmatmul.mubr.msk.bf16.gmra.mrb[12].mxu0 %vm700_vm13, %v7450_v15 }
  0xf2   :  { %8205 = vmatprep.mubr.msk.bf16.mxu0 %vm700_vm13, %v7851_v1  ;;  %v2623_v1 = vld [vmem:[#allocation2 + $0x50] sm:$0xf] }
  0xf3   :  { %v2763_v56 = vshll.u32 %v2623_v1, 16 }
  0xf5   :  { %v10009_v41 = vrot.slane %v2763_v56, 5 }
  0xf9   :  { %8206 = vmatmul.mubr.msk.bf16.vlgmr.msra.gmra.mrb[0].mxu0 %vm700_vm13, %v13677_v44 }
  0xfa   :  { %8222 = vmatpush3.bf16.msra.mxu0 %v2131_v40  ;;  %8209 = vmatprep.mubr.msk.bf16.mxu0 %vm700_vm13, %v7853_v30  ;;  %v2760_v40 = vshrl.u32 %v2623_v1, 16 }
  0xfb   :  { %8847 = vmatprep.subr.msk.bf16.mxu0 %vm725_vm0, %v362_v25 }
  0xfc   :  { %v10007_v35 = vrot.slane %v2760_v40, 4 }
 0x101   :  { %8210 = vmatmul.mubr.msk.bf16.gmra.mrb[4].mxu0 %vm700_vm13, %v7854_v0 }
 0x102   :  { %8213 = vmatprep.mubr.msk.bf16.mxu0 %vm700_vm13, %v7855_v47  ;;  %v10005_v47 = vrot.slane %v2657_v32, 5 }
 0x109   :  { %8214 = vmatmul.mubr.msk.bf16.gmra.mrb[8].mxu0 %vm700_vm13, %v7856_v50  ;;  %v2076_v50 = vrot.slane %v2075_v23, 4  ;;  %v2766_v23 = vor.u32 %v10009_v41, %v10007_v35 }
 0x10a   :  { %8217 = vmatprep.mubr.msk.bf16.mxu0 %vm700_vm13, %v7857_v54  ;;  %v2080_v54 = vrot.slane %v2078_v9, 5 }
 0x10c   :  { %v2081_v20 = vsel %vm9094_vm14, %v2076_v50, %v2080_v54  ;;  %v2516_v54 = vld [vmem:[#allocation2 + $0x8] sm:$0xf] }
 0x10d   :  { %v7482_v38 = vcombine.low %v9714_v4, %v2081_v20 }
 0x111   :  { %8218 = vmatmul.mubr.msk.bf16.gmra.mrb[12].mxu0 %vm700_vm13, %v7858_v33  ;;  %v2534_v33 = vld [vmem:[#allocation2 + $0x1c] sm:$0x1] }
 0x112   :  { %8223 = vmatprep.mubr.msk.bf16.mxu0 %vm700_vm13, %v7479_v61  ;;  %v308_v61 = vsel %vm164_vm9, %v92_v8, %v236_v55  ;;  %v2522_v55 = vld [vmem:[#allocation2 + $0xc] sm:$0x1]  ;;  %vm7015_vm9 = vcmask 195744  }
 0x113   :  { %v7862_v36 = vpack.c.bf16 %v308_v61, %v308_v61 }
 0x115   :  { %v2092_v27 = vshll.u32 %v7862_v36, 16  ;;  %v2537_v36 = vld [vmem:[#allocation2 + $0x20] sm:$0xf] }
 0x119   :  { %8224 = vmatmul.mubr.msk.bf16.vlgmr.msra.gmra.mrb[0].mxu0 %vm700_vm13, %v13683_v19 }
 0x11a   :  { %8227 = vmatprep.mubr.msk.bf16.mxu0 %vm700_vm13, %v7481_v6  ;;  %v2094_v6 = vrot.slane %v2092_v27, 5 }
 0x11c   :  { %v2095_v4 = vsel %vm9094_vm14, %v2090_v5, %v2094_v6 }
 0x11d   :  { %v7486_v17 = vcombine.low %v9791_v2, %v2095_v4  ;;  %v2540_v4 = vld [vmem:[#allocation2 + $0x24] sm:$0x1] }
 0x121   :  { %8228 = vmatmul.mubr.msk.bf16.gmra.mrb[4].mxu0 %vm700_vm13, %v7482_v38 }
 0x122   :  { %8231 = vmatprep.mubr.msk.bf16.mxu0 %vm700_vm13, %v7483_v12  ;;  %v4908_v12 = vsel %vm725_vm0, %v362_v25, 0 }
 0x123   :  { %8384 = vmatpush3.bf16.msra.mxu0 %v4908_v12 }
 0x124   :  { %8848 = vmatprep.subr.msk.bf16.mxu0 %vm725_vm0, %v9999_v52 }
 0x129   :  { %8232 = vmatmul.mubr.msk.bf16.gmra.mrb[8].mxu0 %vm700_vm13, %v7484_v59  ;;  %v2615_v59 = vld [vmem:[#allocation2] sm:$0xf] }
 0x12a   :  { %8235 = vmatprep.mubr.msk.bf16.mxu0 %vm700_vm13, %v7485_v14  ;;  %v2648_v14 = vshrl.u32 %v2615_v59, 16  ;;  %v2651_v2 = vshll.u32 %v2615_v59, 16 }
 0x12c   :  { %v2650_v62 = vrot.slane %v2648_v14, 4  ;;  %v2653_v15 = vrot.slane %v2651_v2, 5  ;;  %v2525_v14 = vld [vmem:[#allocation2 + $0x10] sm:$0xf]  ;;  %v2528_v2 = vld [vmem:[#allocation2 + $0x14] sm:$0x1] }
 0x12e   :  { %v2654_v30 = vor.u32 %v2653_v15, %v2650_v62 }
 0x130   :  { %v10003_v43 = vrot.slane %v2654_v30, 4 }
 0x131   :  { %8236 = vmatmul.mubr.msk.bf16.gmra.mrb[12].mxu0 %vm700_vm13, %v7486_v17 }
 0x132   :  { %v2660_v21 = vsel %vm9094_vm14, %v10003_v43, %v10005_v47 }
 0x1ec   :  { %v8225_v57 = vpop.f32.mrb[0].mxu0 }
 0x1ed   :  { %v2248_v44 = vmax.f32 %v8225_v57, 0.0  ;;  %v2167_v53 = vpop.f32.mrb[1].mxu0 }
 0x1ee   :  { %v2246_v0 = vmax.f32 %v2167_v53, 0.0  ;;  %v8226_v18 = vpop.f32.mrb[2].mxu0 }
 0x1ef   :  { %v7865_v58 = vpack.c.bf16 %v2248_v44, %v2248_v44  ;;  %v2249_v26 = vmax.f32 %v8226_v18, 0.0  ;;  %v2170_v51 = vpop.f32.mrb[3].mxu0 }
 0x1f0   :  { %v7863_v39 = vpack.c.bf16 %v2246_v0, %v2246_v0  ;;  %v2247_v34 = vmax.f32 %v2170_v51, 0.0 }
 0x1f1   :  { %v2369_v49 = vshrl.u32 %v7865_v58, 16  ;;  %v7866_v42 = vpack.c.bf16 %v2249_v26, %v2249_v26  ;;  %v2372_v8 = vshll.u32 %v7865_v58, 16  ;;  %v10044_v58 = vld [vmem:[#allocation2 + $0x54] sm:$0x1] }
 0x1f2   :  { %v2353_v46 = vshrl.u32 %v7863_v39, 16  ;;  %v7864_v3 = vpack.c.bf16 %v2247_v34, %v2247_v34  ;;  %v2356_v50 = vshll.u32 %v7863_v39, 16  ;;  %v10048_v39 = vsel %vm725_vm0, %v9992_v7, 0 }
 0x1f3   :  { %v2371_v9 = vrot.slane %v2369_v49, 7  ;;  %v2377_v13 = vshrl.u32 %v7866_v42, 16  ;;  %v2380_v10 = vshll.u32 %v7866_v42, 16  ;;  %v2769_v34 = vshll.u32 %v10044_v58, 16  ;;  %v2555_v42 = vld [vmem:[#allocation2 + $0x38] sm:$0xf] }
 0x1f4   :  { %v2355_v19 = vrot.slane %v2353_v46, 7  ;;  %v2361_v31 = vshrl.u32 %v7864_v3, 16  ;;  %v2364_v20 = vshll.u32 %v7864_v3, 16  ;;  %v8229_v61 = vpop.f32.mrb[4].mxu0  ;;  %v2546_v46 = vld [vmem:[#allocation2 + $0x2c] sm:$0x1] }
 0x1f5   :  { %v2374_v38 = vor.u32 %v2372_v8, %v2371_v9  ;;  %v2375_v37 = vrot.slane %v2371_v9, 4  ;;  %v2379_v16 = vrot.slane %v2377_v13, 7  ;;  %v2252_v22 = vmax.f32 %v8229_v61, 0.0  ;;  %v2183_v27 = vpop.f32.mrb[5].mxu0 }
 0x1f6   :  { %v2358_v5 = vor.u32 %v2356_v50, %v2355_v19  ;;  %v2359_v6 = vrot.slane %v2355_v19, 4  ;;  %v2363_v17 = vrot.slane %v2361_v31, 7  ;;  %v2250_v45 = vmax.f32 %v2183_v27, 0.0  ;;  %v8230_v24 = vpop.f32.mrb[6].mxu0 }
 0x1f7   :  { %v2532_v29 = vsel %vm10018_vm1, %v2374_v38, %v2531_v11  ;;  %v2535_v25 = vsel %vm10024_vm2, %v2375_v37, %v2534_v33  ;;  %v2382_v12 = vor.u32 %v2380_v10, %v2379_v16  ;;  %v2383_v59 = vrot.slane %v2379_v16, 4  ;;  %v2186_v62 = vpop.f32.mrb[7].mxu0  ;;  %v2558_v11 = vld [vmem:[#allocation2 + $0x3c] sm:$0x1]  ;;  %v2543_v33 = vld [vmem:[#allocation2 + $0x28] sm:$0xf] }
 0x1f8   :  { %2533 = vst [vmem:[#allocation2 + $0x18] sm:$0xf] %v2532_v29  ;;  %2536 = vst [vmem:[#allocation2 + $0x1c] sm:$0x1] %v2535_v25  ;;  %v2517_v15 = vsel %vm10018_vm1, %v2358_v5, %v2516_v54  ;;  %v2523_v1 = vsel %vm10024_vm2, %v2359_v6, %v2522_v55  ;;  %v2366_v28 = vor.u32 %v2364_v20, %v2363_v17  ;;  %v2367_v30 = vrot.slane %v2363_v17, 4 }
 0x1f9   :  { %2518 = vst [vmem:[#allocation2 + $0x8] sm:$0xf] %v2517_v15  ;;  %2524 = vst [vmem:[#allocation2 + $0xc] sm:$0x1] %v2523_v1  ;;  %v2538_v32 = vsel %vm10018_vm1, %v2382_v12, %v2537_v36  ;;  %v2541_v40 = vsel %vm10024_vm2, %v2383_v59, %v2540_v4  ;;  %v7869_v56 = vpack.c.bf16 %v2252_v22, %v2252_v22  ;;  %v2253_v0 = vmax.f32 %v8230_v24, 0.0 }
 0x1fa   :  { %v7867_v57 = vpack.c.bf16 %v2250_v45, %v2250_v45  ;;  %2539 = vst [vmem:[#allocation2 + $0x20] sm:$0xf] %v2538_v32  ;;  %2542 = vst [vmem:[#allocation2 + $0x24] sm:$0x1] %v2541_v40  ;;  %v2526_v44 = vsel %vm10018_vm1, %v2366_v28, %v2525_v14  ;;  %v2529_v53 = vsel %vm10024_vm2, %v2367_v30, %v2528_v2  ;;  %v2251_v18 = vmax.f32 %v2186_v62, 0.0 }
 0x1fb   :  { %2527 = vst [vmem:[#allocation2 + $0x10] sm:$0xf] %v2526_v44  ;;  %2530 = vst [vmem:[#allocation2 + $0x14] sm:$0x1] %v2529_v53  ;;  %v2401_v26 = vshrl.u32 %v7869_v56, 16  ;;  %v2404_v49 = vshll.u32 %v7869_v56, 16  ;;  %v7870_v3 = vpack.c.bf16 %v2253_v0, %v2253_v0 }
 0x1fc   :  { %v2385_v51 = vshrl.u32 %v7867_v57, 16  ;;  %v7868_v9 = vpack.c.bf16 %v2251_v18, %v2251_v18  ;;  %v8233_v8 = vpop.f32.mrb[8].mxu0  ;;  %v10054_v50 = vrot.slane %v2766_v23, 4  ;;  %v2388_v13 = vshll.u32 %v7867_v57, 16  ;;  %v2561_v6 = vld [vmem:[#allocation2 + $0x40] sm:$0xf] }
 0x1fd   :  { %v2403_v54 = vrot.slane %v2401_v26, 7  ;;  %v2256_v7 = vmax.f32 %v8233_v8, 0.0  ;;  %v2199_v19 = vpop.f32.mrb[9].mxu0  ;;  %v2409_v10 = vshrl.u32 %v7870_v3, 16  ;;  %v2412_v31 = vshll.u32 %v7870_v3, 16 }
 0x1fe   :  { %v2387_v55 = vrot.slane %v2385_v51, 7  ;;  %v2393_v20 = vshrl.u32 %v7868_v9, 16  ;;  %v2396_v61 = vshll.u32 %v7868_v9, 16  ;;  %v8234_v38 = vpop.f32.mrb[10].mxu0  ;;  %v2254_v23 = vmax.f32 %v2199_v19, 0.0 }
 0x1ff   :  { %v2406_v37 = vor.u32 %v2404_v49, %v2403_v54  ;;  %v2407_v16 = vrot.slane %v2403_v54, 4  ;;  %v2202_v27 = vpop.f32.mrb[11].mxu0  ;;  %v2411_v5 = vrot.slane %v2409_v10, 7  ;;  %v7873_v41 = vpack.c.bf16 %v2256_v7, %v2256_v7  ;;  %v2564_v29 = vld [vmem:[#allocation2 + $0x44] sm:$0x1] }
 0x200   :  { %v2390_v36 = vor.u32 %v2388_v13, %v2387_v55  ;;  %v2391_v22 = vrot.slane %v2387_v55, 4  ;;  %v2395_v35 = vrot.slane %v2393_v20, 7  ;;  %v2549_v25 = vld [vmem:[#allocation2 + $0x30] sm:$0xf]  ;;  %v2552_v12 = vld [vmem:[#allocation2 + $0x34] sm:$0x1]  ;;  %v7871_v28 = vpack.c.bf16 %v2254_v23, %v2254_v23 }
 0x201   :  { %v2556_v4 = vsel %vm10018_vm1, %v2406_v37, %v2555_v42  ;;  %v2559_v17 = vsel %vm10024_vm2, %v2407_v16, %v2558_v11  ;;  %v2414_v59 = vor.u32 %v2412_v31, %v2411_v5  ;;  %v2415_v14 = vrot.slane %v2411_v5, 4  ;;  %v10064_v32 = vld [vmem:[#allocation2 + $0x8] sm:$0xf]  ;;  %v2582_v26 = vld [vmem:[#allocation2 + $0x6c] sm:$0x1] }
 0x202   :  { %v2544_v45 = vsel %vm10018_vm1, %v2390_v36, %v2543_v33  ;;  %v2547_v24 = vsel %vm10024_vm2, %v2391_v22, %v2546_v46  ;;  %2557 = vst [vmem:[#allocation2 + $0x38] sm:$0xf] %v2556_v4  ;;  %2560 = vst [vmem:[#allocation2 + $0x3c] sm:$0x1] %v2559_v17  ;;  %v2398_v2 = vor.u32 %v2396_v61, %v2395_v35  ;;  %v2399_v62 = vrot.slane %v2395_v35, 4 }
 0x203   :  { %2545 = vst [vmem:[#allocation2 + $0x28] sm:$0xf] %v2544_v45  ;;  %2548 = vst [vmem:[#allocation2 + $0x2c] sm:$0x1] %v2547_v24  ;;  %v2433_v15 = vshrl.u32 %v7873_v41, 16  ;;  %v2436_v1 = vshll.u32 %v7873_v41, 16  ;;  %v2562_v40 = vsel %vm10018_vm1, %v2414_v59, %v2561_v6  ;;  %v2565_v56 = vsel %vm10024_vm2, %v2415_v14, %v2564_v29 }
 0x204   :  { %v2257_v30 = vmax.f32 %v8234_v38, 0.0  ;;  %v2550_v57 = vsel %vm10018_vm1, %v2398_v2, %v2549_v25  ;;  %v2553_v44 = vsel %vm10024_vm2, %v2399_v62, %v2552_v12  ;;  %v2579_v53 = vld [vmem:[#allocation2 + $0x68] sm:$0xf]  ;;  %v8237_v0 = vpop.f32.mrb[12].mxu0  ;;  %2563 = vst [vmem:[#allocation2 + $0x40] sm:$0xf] %v2562_v40 }
 0x205   :  { %2566 = vst [vmem:[#allocation2 + $0x44] sm:$0x1] %v2565_v56  ;;  %2551 = vst [vmem:[#allocation2 + $0x30] sm:$0xf] %v2550_v57  ;;  %v2435_v18 = vrot.slane %v2433_v15, 7  ;;  %v2417_v51 = vshrl.u32 %v7871_v28, 16 }
 0x206   :  { %2554 = vst [vmem:[#allocation2 + $0x34] sm:$0x1] %v2553_v44  ;;  %v2420_v49 = vshll.u32 %v7871_v28, 16  ;;  %v7874_v42 = vpack.c.bf16 %v2257_v30, %v2257_v30  ;;  %v2215_v11 = vpop.f32.mrb[13].mxu0  ;;  %v2255_v33 = vmax.f32 %v2202_v27, 0.0  ;;  %v2260_v46 = vmax.f32 %v8237_v0, 0.0 }
 0x207   :  { %v2258_v3 = vmax.f32 %v2215_v11, 0.0  ;;  %v8238_v9 = vpop.f32.mrb[14].mxu0  ;;  %v2662_v8 = vshrl.u32 %v10064_v32, 16  ;;  %v2438_v54 = vor.u32 %v2436_v1, %v2435_v18  ;;  %v2439_v55 = vrot.slane %v2435_v18, 4  ;;  %v2567_v10 = vld [vmem:[#allocation2 + $0x58] sm:$0xf] }
 0x208   :  { %v2419_v13 = vrot.slane %v2417_v51, 7  ;;  %v2441_v7 = vshrl.u32 %v7874_v42, 16  ;;  %v2218_v19 = vpop.f32.mrb[15].mxu0  ;;  %v2570_v31 = vld [vmem:[#allocation2 + $0x5c] sm:$0x1]  ;;  %v2444_v20 = vshll.u32 %v7874_v42, 16  ;;  %v7872_v61 = vpack.c.bf16 %v2255_v33, %v2255_v33 }
 0x209   :  { %v7877_v38 = vpack.c.bf16 %v2260_v46, %v2260_v46  ;;  %v7875_v37 = vpack.c.bf16 %v2258_v3, %v2258_v3  ;;  %v2580_v16 = vsel %vm10018_vm1, %v2438_v54, %v2579_v53  ;;  %v2583_v36 = vsel %vm10024_vm2, %v2439_v55, %v2582_v26  ;;  %v2585_v5 = vld [vmem:[#allocation2 + $0x70] sm:$0xf]  ;;  %v2588_v35 = vld [vmem:[#allocation2 + $0x74] sm:$0x1]  ;;  %v2573_v24 = vld [vmem:[#allocation2 + $0x60] sm:$0xf] }
 0x20a   :  { %v2422_v22 = vor.u32 %v2420_v49, %v2419_v13  ;;  %v2423_v27 = vrot.slane %v2419_v13, 4  ;;  %2581 = vst [vmem:[#allocation2 + $0x68] sm:$0xf] %v2580_v16  ;;  %2584 = vst [vmem:[#allocation2 + $0x6c] sm:$0x1] %v2583_v36  ;;  %v2443_v6 = vrot.slane %v2441_v7, 7 }
 0x20b   :  { %v2425_v41 = vshrl.u32 %v7872_v61, 16  ;;  %v2428_v23 = vshll.u32 %v7872_v61, 16  ;;  %v2465_v4 = vshrl.u32 %v7877_v38, 16  ;;  %v2576_v29 = vld [vmem:[#allocation2 + $0x64] sm:$0x1]  ;;  %v2468_v25 = vshll.u32 %v7877_v38, 16 }
 0x20c   :  { %v2568_v17 = vsel %vm10018_vm1, %v2422_v22, %v2567_v10  ;;  %v2571_v45 = vsel %vm10024_vm2, %v2423_v27, %v2570_v31  ;;  %v2449_v12 = vshrl.u32 %v7875_v37, 16  ;;  %v2446_v59 = vor.u32 %v2444_v20, %v2443_v6  ;;  %v2603_v15 = vld [vmem:[#allocation2 + $0x88] sm:$0xf]  ;;  %v2606_v1 = vld [vmem:[#allocation2 + $0x8c] sm:$0x1] }
 0x20d   :  { %2569 = vst [vmem:[#allocation2 + $0x58] sm:$0xf] %v2568_v17  ;;  %2572 = vst [vmem:[#allocation2 + $0x5c] sm:$0x1] %v2571_v45  ;;  %v2447_v14 = vrot.slane %v2443_v6, 4  ;;  %v2427_v2 = vrot.slane %v2425_v41, 7 }
 0x20e   :  { %v2467_v62 = vrot.slane %v2465_v4, 7  ;;  %v2451_v28 = vrot.slane %v2449_v12, 7  ;;  %v2452_v30 = vshll.u32 %v7875_v37, 16  ;;  %v2261_v40 = vmax.f32 %v8238_v9, 0.0  ;;  %v2591_v18 = vld [vmem:[#allocation2 + $0x78] sm:$0xf] }
 0x20f   :  { %v2259_v56 = vmax.f32 %v2218_v19, 0.0  ;;  %v2586_v57 = vsel %vm10018_vm1, %v2446_v59, %v2585_v5  ;;  %v2589_v44 = vsel %vm10024_vm2, %v2447_v14, %v2588_v35  ;;  %v2430_v53 = vor.u32 %v2428_v23, %v2427_v2  ;;  %v2594_v26 = vld [vmem:[#allocation2 + $0x7c] sm:$0x1]  ;;  %v10091_v54 = vld [vmem:[#allocation2 + $0xc] sm:$0x1] }
 0x210   :  { %v2431_v0 = vrot.slane %v2427_v2, 4  ;;  %2587 = vst [vmem:[#allocation2 + $0x70] sm:$0xf] %v2586_v57  ;;  %2590 = vst [vmem:[#allocation2 + $0x74] sm:$0x1] %v2589_v44  ;;  %v2470_v51 = vor.u32 %v2468_v25, %v2467_v62  ;;  %v2471_v49 = vrot.slane %v2467_v62, 4  ;;  %v2454_v42 = vor.u32 %v2452_v30, %v2451_v28 }
 0x211   :  { %v2455_v11 = vrot.slane %v2451_v28, 4  ;;  %v2574_v33 = vsel %vm10018_vm1, %v2430_v53, %v2573_v24  ;;  %v7878_v3 = vpack.c.bf16 %v2261_v40, %v2261_v40  ;;  %v7876_v9 = vpack.c.bf16 %v2259_v56, %v2259_v56  ;;  %v10101_v10 = vld [vmem:[#allocation2 + $0x10] sm:$0xf]  ;;  %v10103_v38 = vld [vmem:[#allocation2 + $0x18] sm:$0xf] }
 0x212   :  { %v2577_v46 = vsel %vm10024_vm2, %v2431_v0, %v2576_v29  ;;  %2575 = vst [vmem:[#allocation2 + $0x60] sm:$0xf] %v2574_v33  ;;  %v2604_v55 = vsel %vm10018_vm1, %v2470_v51, %v2603_v15  ;;  %v2607_v13 = vsel %vm10024_vm2, %v2471_v49, %v2606_v1  ;;  %v2592_v7 = vsel %vm10018_vm1, %v2454_v42, %v2591_v18  ;;  %v2609_v16 = vld [vmem:[#allocation2 + $0x90] sm:$0xf]  ;;  %v2612_v36 = vld [vmem:[#allocation2 + $0x94] sm:$0x1] }
 0x213   :  { %2578 = vst [vmem:[#allocation2 + $0x64] sm:$0x1] %v2577_v46  ;;  %v2595_v19 = vsel %vm10024_vm2, %v2455_v11, %v2594_v26  ;;  %2605 = vst [vmem:[#allocation2 + $0x88] sm:$0xf] %v2604_v55  ;;  %v2473_v31 = vshrl.u32 %v7878_v3, 16  ;;  %v2476_v20 = vshll.u32 %v7878_v3, 16 }
 0x214   :  { %2608 = vst [vmem:[#allocation2 + $0x8c] sm:$0x1] %v2607_v13  ;;  %2593 = vst [vmem:[#allocation2 + $0x78] sm:$0xf] %v2592_v7  ;;  %v2457_v61 = vshrl.u32 %v7876_v9, 16  ;;  %v10107_v37 = vrot.slane %v2769_v34, 5 }
 0x215   :  { %2596 = vst [vmem:[#allocation2 + $0x7c] sm:$0x1] %v2595_v19  ;;  %v2460_v22 = vshll.u32 %v7876_v9, 16  ;;  %v2597_v27 = vld [vmem:[#allocation2 + $0x80] sm:$0xf]  ;;  %v2664_v5 = vrot.slane %v2662_v8, 4 }
 0x216   :  { %v2665_v6 = vshll.u32 %v10064_v32, 16  ;;  %v2671_v35 = vshll.u32 %v10091_v54, 16  ;;  %v2475_v41 = vrot.slane %v2473_v31, 7  ;;  %v2459_v23 = vrot.slane %v2457_v61, 7  ;;  %v10113_v4 = vld [vmem:[#allocation2 + $0x14] sm:$0x1] }
 0x217   :  { %v2676_v17 = vshrl.u32 %v10101_v10, 16  ;;  %v2679_v58 = vshll.u32 %v10101_v10, 16  ;;  %v2600_v34 = vld [vmem:[#allocation2 + $0x84] sm:$0x1]  ;;  %v2690_v29 = vshrl.u32 %v10103_v38, 16  ;;  %v10120_v8 = vsel %vm725_vm0, %v9999_v52, 0 }
 0x218   :  { %v2667_v45 = vrot.slane %v2665_v6, 5  ;;  %v2673_v24 = vrot.slane %v2671_v35, 5  ;;  %v2478_v25 = vor.u32 %v2476_v20, %v2475_v41  ;;  %v2479_v12 = vrot.slane %v2475_v41, 4  ;;  %v10122_v2 = vld [vmem:[#allocation2 + $0x1c] sm:$0x1] }
 0x219   :  { %v2462_v59 = vor.u32 %v2460_v22, %v2459_v23  ;;  %v2463_v14 = vrot.slane %v2459_v23, 4  ;;  %v2678_v15 = vrot.slane %v2676_v17, 4  ;;  %v2681_v1 = vrot.slane %v2679_v58, 5  ;;  %v10125_v30 = vld [vmem:[#allocation2 + $0x8] sm:$0xf] }
 0x21a   :  { %v2668_v62 = vor.u32 %v2667_v45, %v2664_v5  ;;  %v2685_v28 = vshll.u32 %v10113_v4, 16  ;;  %v2610_v40 = vsel %vm10018_vm1, %v2478_v25, %v2609_v16  ;;  %v2613_v52 = vsel %vm10024_vm2, %v2479_v12, %v2612_v36  ;;  %v3002_v26 = vld [vmem:[#allocation2 + $0xc] sm:$0x1]  ;;  %v10137_v49 = vld [vmem:[#allocation2 + $0x10] sm:$0xf] }
 0x21b   :  { %v2598_v56 = vsel %vm10018_vm1, %v2462_v59, %v2597_v27  ;;  %v2601_v57 = vsel %vm10024_vm2, %v2463_v14, %v2600_v34  ;;  %2611 = vst [vmem:[#allocation2 + $0x90] sm:$0xf] %v2610_v40  ;;  %2614 = vst [vmem:[#allocation2 + $0x94] sm:$0x1] %v2613_v52  ;;  %v2682_v53 = vor.u32 %v2681_v1, %v2678_v15  ;;  %v2692_v0 = vrot.slane %v2690_v29, 4 }
 0x21c   :  { %2599 = vst [vmem:[#allocation2 + $0x80] sm:$0xf] %v2598_v56  ;;  %2602 = vst [vmem:[#allocation2 + $0x84] sm:$0x1] %v2601_v57  ;;  %v2669_v44 = vrot.slane %v2668_v62, 4  ;;  %v2693_v18 = vshll.u32 %v10103_v38, 16  ;;  %v2772_v60 = vsel %vm9094_vm14, %v10054_v50, %v10107_v37 }
 0x21d   :  { %v2699_v51 = vshll.u32 %v10122_v2, 16  ;;  %v3003_v42 = vld [vmem:[#allocation2 + $0x14] sm:$0x1]  ;;  %v3019_v48 = vshrl.u32 %v10125_v30, 16  ;;  %v2683_v33 = vrot.slane %v2682_v53, 4  ;;  %v3022_v3 = vshll.u32 %v10125_v30, 16 }
 0x21e   :  { %v2674_v11 = vsel %vm9094_vm14, %v2669_v44, %v2673_v24  ;;  %v2695_v46 = vrot.slane %v2693_v18, 5  ;;  %v10147_v9 = vld [vmem:[#allocation2 + $0x18] sm:$0xf]  ;;  %v2687_v13 = vrot.slane %v2685_v28, 5  ;;  %v3028_v19 = vshll.u32 %v3002_v26, 16 }
 0x21f   :  { %v10154_v55 = vcombine.low %v2660_v21, %v2674_v11  ;;  %v3021_v7 = vrot.slane %v3019_v48, 4  ;;  %v2701_v20 = vrot.slane %v2699_v51, 5  ;;  %v3024_v61 = vrot.slane %v3022_v3, 5  ;;  %v3004_v36 = vld [vmem:[#allocation2 + $0x1c] sm:$0x1] }
 0x220   :  { %v2696_v31 = vor.u32 %v2695_v46, %v2692_v0  ;;  %v3033_v16 = vshrl.u32 %v10137_v49, 16  ;;  %v2688_v22 = vsel %vm9094_vm14, %v2683_v33, %v2687_v13  ;;  %v3036_v27 = vshll.u32 %v10137_v49, 16  ;;  %v10162_v47 = vld [vmem:[#allocation2 + $0x20] sm:$0xf]  ;;  %v3005_v58 = vld [vmem:[#allocation2 + $0x24] sm:$0x1] }
 0x221   :  { %13688 = vst [vmem:[#allocation7_spill] sm:$0xff] %v10154_v55  ;;  %8241 = vmatprep.mubr.msk.bf16.mxu1 %vm700_vm13, %v10154_v55  ;;  %v3042_v43 = vshll.u32 %v3003_v42, 16  ;;  %v3047_v21 = vshrl.u32 %v10147_v9, 16  ;;  %v3025_v6 = vor.u32 %v3024_v61, %v3021_v7  ;;  %v3050_v41 = vshll.u32 %v10147_v9, 16  ;;  %v10169_v59 = vld [vmem:[#allocation2 + $0x20] sm:$0xf] }
 0x222   :  { %v2697_v5 = vrot.slane %v2696_v31, 4  ;;  %v3035_v35 = vrot.slane %v3033_v16, 4  ;;  %v3030_v23 = vrot.slane %v3028_v19, 5  ;;  %v3038_v17 = vrot.slane %v3036_v27, 5  ;;  %v10174_v28 = vld [vmem:[#allocation2 + $0x28] sm:$0xf] }
 0x223   :  { %v3049_v34 = vrot.slane %v3047_v21, 4  ;;  %v3056_v45 = vshll.u32 %v3004_v36, 16  ;;  %v3026_v29 = vrot.slane %v3025_v6, 4  ;;  %v3052_v25 = vrot.slane %v3050_v41, 5  ;;  %v2635_v40 = vld [vmem:[#allocation2 + $0x24] sm:$0x1] }
 0x224   :  { %v2702_v24 = vsel %vm9094_vm14, %v2697_v5, %v2701_v20  ;;  %v3061_v12 = vshrl.u32 %v10162_v47, 16  ;;  %v3039_v62 = vor.u32 %v3038_v17, %v3035_v35  ;;  %v3044_v15 = vrot.slane %v3042_v43, 5  ;;  %v10179_v53 = vld [vmem:[%s13491_s2 + $0x8] sm:$0xf]  ;;  %v2636_v26 = vld [vmem:[#allocation2 + $0x2c] sm:$0x1] }
 0x225   :  { %v10171_v14 = vcombine.low %v2688_v22, %v2702_v24  ;;  %v3064_v1 = vshll.u32 %v10162_v47, 16  ;;  %v3053_v52 = vor.u32 %v3052_v25, %v3049_v34  ;;  %v3058_v56 = vrot.slane %v3056_v45, 5  ;;  %v10189_v3 = vld [vmem:[#allocation2 + $0x38] sm:$0xf]  ;;  %v10193_v20 = vld [vmem:[#allocation2 + $0x30] sm:$0xf] }
 0x226   :  { %v3063_v57 = vrot.slane %v3061_v12, 4  ;;  %v3070_v44 = vshll.u32 %v3005_v58, 16  ;;  %v3040_v0 = vrot.slane %v3039_v62, 4  ;;  %v2704_v51 = vshrl.u32 %v10169_v59, 16  ;;  %v2637_v61 = vld [vmem:[#allocation2 + $0x34] sm:$0x1] }
 0x227   :  { %13689 = vst [vmem:[#allocation9_spill] sm:$0xff] %v10171_v14  ;;  %8242 = vmatmul.mubr.msk.bf16.vlgmr.msra.gmra.mrb[0].mxu1 %vm700_vm13, %v10171_v14  ;;  %v3066_v18 = vrot.slane %v3064_v1, 5  ;;  %v2707_v42 = vshll.u32 %v10169_v59, 16  ;;  %v3031_v48 = vsel %vm9094_vm14, %v3026_v29, %v3030_v23  ;;  %v3054_v11 = vrot.slane %v3053_v52, 4  ;;  %v2638_v6 = vld [vmem:[#allocation2 + $0x3c] sm:$0x1] }
 0x228   :  { %8258 = vmatpush3.bf16.msra.mxu1 %v10048_v39  ;;  %v2713_v33 = vshll.u32 %v2635_v40, 16  ;;  %v2718_v46 = vshrl.u32 %v10174_v28, 16  ;;  %v3045_v13 = vsel %vm9094_vm14, %v3040_v0, %v3044_v15  ;;  %v2706_v19 = vrot.slane %v2704_v51, 4  ;;  %v10207_v58 = vld [vmem:[#allocation2 + $0x28] sm:$0xf] }
 0x229   :  { %v3067_v7 = vor.u32 %v3066_v18, %v3063_v57  ;;  %v2709_v31 = vrot.slane %v2707_v42, 5  ;;  %8841 = vmatprep.subr.msk.bf16.mxu1 %vm725_vm0, %v10179_v53  ;;  %v10197_v39 = vcombine.low %v3031_v48, %v3045_v13  ;;  %v3059_v16 = vsel %vm9094_vm14, %v3054_v11, %v3058_v56  ;;  %v10211_v25 = vld [vmem:[#allocation2 + $0x30] sm:$0xf]  ;;  %v3006_v40 = vld [vmem:[#allocation2 + $0x2c] sm:$0x1] }
 0x22a   :  { %v3072_v36 = vrot.slane %v3070_v44, 5  ;;  %v2720_v22 = vrot.slane %v2718_v46, 4  ;;  %v2721_v21 = vshll.u32 %v10174_v28, 16  ;;  %v2727_v5 = vshll.u32 %v2636_v26, 16  ;;  %v10219_v0 = vld [vmem:[%s13491_s2 + $0x28] sm:$0xf] }
 0x22b   :  { %13690 = vst [vmem:[#allocation12_spill] sm:$0xff] %v10197_v39  ;;  %v3068_v27 = vrot.slane %v3067_v7, 4  ;;  %v2710_v43 = vor.u32 %v2709_v31, %v2706_v19  ;;  %8385 = vmatprep.mubr.msk.bf16.mxu0 %vm700_vm13, %v10197_v39  ;;  %v2732_v35 = vshrl.u32 %v10193_v20, 16  ;;  %v2735_v41 = vshll.u32 %v10193_v20, 16  ;;  %v3007_v46 = vld [vmem:[#allocation2 + $0x34] sm:$0x1] }
 0x22c   :  { %v2741_v23 = vshll.u32 %v2637_v61, 16  ;;  %v2746_v17 = vshrl.u32 %v10189_v3, 16  ;;  %v2715_v24 = vrot.slane %v2713_v33, 5  ;;  %v2723_v29 = vrot.slane %v2721_v21, 5  ;;  %v10235_v21 = vld [vmem:[#allocation2 + $0x40] sm:$0xf] }
 0x22d   :  { %v3073_v34 = vsel %vm9094_vm14, %v3068_v27, %v3072_v36  ;;  %v2711_v45 = vrot.slane %v2710_v43, 4  ;;  %v2729_v62 = vrot.slane %v2727_v5, 5  ;;  %v2734_v15 = vrot.slane %v2732_v35, 4  ;;  %v10303_v37 = vld [vmem:[#allocation2 + $0x70] sm:$0xf] }
 0x22e   :  { %v10213_v12 = vcombine.low %v3059_v16, %v3073_v34  ;;  %v2737_v1 = vrot.slane %v2735_v41, 5  ;;  %v2724_v52 = vor.u32 %v2723_v29, %v2720_v22  ;;  %v2743_v56 = vrot.slane %v2741_v23, 5  ;;  %v10229_v16 = vld [vmem:[#allocation2 + $0x38] sm:$0xf]  ;;  %v3008_v41 = vld [vmem:[#allocation2 + $0x3c] sm:$0x1] }
 0x22f   :  { %v2748_v57 = vrot.slane %v2746_v17, 4  ;;  %v2749_v44 = vshll.u32 %v10189_v3, 16  ;;  %v2755_v26 = vshll.u32 %v2638_v6, 16  ;;  %v3075_v51 = vshrl.u32 %v10207_v58, 16  ;;  %v3009_v34 = vld [vmem:[#allocation2 + $0x44] sm:$0x1] }
 0x230   :  { %8386 = vmatmul.mubr.msk.bf16.vlgmr.msra.gmra.mrb[16].mxu0 %vm700_vm13, %v10213_v12  ;;  %v2738_v18 = vor.u32 %v2737_v1, %v2734_v15  ;;  %v3078_v42 = vshll.u32 %v10207_v58, 16  ;;  %v2716_v48 = vsel %vm9094_vm14, %v2711_v45, %v2715_v24  ;;  %v2725_v11 = vrot.slane %v2724_v52, 4  ;;  %v10366_v55 = vld [vmem:[#allocation2 + $0x88] sm:$0xf] }
 0x231   :  { %v2751_v33 = vrot.slane %v2749_v44, 5  ;;  %v3089_v13 = vshrl.u32 %v10211_v25, 16  ;;  %8402 = vmatpush3.bf16.msra.mxu0 %v10120_v8  ;;  %v3077_v19 = vrot.slane %v3075_v51, 4  ;;  %v3084_v61 = vshll.u32 %v3006_v40, 16  ;;  %v10247_v40 = vld [vmem:[#allocation2 + $0x58] sm:$0xf] }
 0x232   :  { %v2739_v7 = vrot.slane %v2738_v18, 4  ;;  %v3080_v31 = vrot.slane %v3078_v42, 5  ;;  %8849 = vmatprep.subr.msk.bf16.mxu0 %vm725_vm0, %v10219_v0  ;;  %v2730_v36 = vsel %vm9094_vm14, %v2725_v11, %v2729_v62  ;;  %v2757_v27 = vrot.slane %v2755_v26, 5  ;;  %v2640_v18 = vld [vmem:[#allocation2 + $0x5c] sm:$0x1] }
 0x233   :  { %v2752_v22 = vor.u32 %v2751_v33, %v2748_v57  ;;  %v3091_v43 = vrot.slane %v3089_v13, 4  ;;  %v10237_v5 = vcombine.low %v2716_v48, %v2730_v36  ;;  %v3092_v35 = vshll.u32 %v10211_v25, 16  ;;  %v10255_v11 = vld [vmem:[#allocation2 + $0x60] sm:$0xf] }
 0x234   :  { %v2744_v8 = vsel %vm9094_vm14, %v2739_v7, %v2743_v56  ;;  %v3081_v6 = vor.u32 %v3080_v31, %v3077_v19  ;;  %v3098_v17 = vshll.u32 %v3007_v46, 16  ;;  %v3103_v45 = vshrl.u32 %v10229_v16, 16 }
 0x235   :  { %13691 = vst [vmem:[#allocation13_spill] sm:$0xff] %v10237_v5  ;;  %v2753_v23 = vrot.slane %v2752_v22, 4  ;;  %v3106_v24 = vshll.u32 %v10229_v16, 16  ;;  %8245 = vmatprep.mubr.msk.bf16.mxu1 %vm700_vm13, %v10237_v5  ;;  %v3086_v62 = vrot.slane %v3084_v61, 5  ;;  %v3094_v15 = vrot.slane %v3092_v35, 5 }
 0x236   :  { %v3082_v29 = vrot.slane %v3081_v6, 4  ;;  %v3117_v1 = vshrl.u32 %v10235_v21, 16  ;;  %v3105_v56 = vrot.slane %v3103_v45, 4  ;;  %v3112_v44 = vshll.u32 %v3008_v41, 16  ;;  %v10262_v22 = vld [vmem:[#allocation2 + $0x68] sm:$0xf] }
 0x237   :  { %v2758_v52 = vsel %vm9094_vm14, %v2753_v23, %v2757_v27  ;;  %v3108_v57 = vrot.slane %v3106_v24, 5  ;;  %v3095_v42 = vor.u32 %v3094_v15, %v3091_v43  ;;  %v3100_v48 = vrot.slane %v3098_v17, 5  ;;  %v2641_v6 = vld [vmem:[#allocation2 + $0x64] sm:$0x1]  ;;  %v10267_v45 = vld [vmem:[#allocation2 + $0x58] sm:$0xf] }
 0x238   :  { %v10251_v26 = vcombine.low %v2744_v8, %v2758_v52  ;;  %v3087_v51 = vsel %vm9094_vm14, %v3082_v29, %v3086_v62  ;;  %v3119_v46 = vrot.slane %v3117_v1, 4  ;;  %v3120_v13 = vshll.u32 %v10235_v21, 16  ;;  %v2642_v15 = vld [vmem:[#allocation2 + $0x6c] sm:$0x1] }
 0x239   :  { %v3109_v33 = vor.u32 %v3108_v57, %v3105_v56  ;;  %v3126_v7 = vshll.u32 %v3009_v34, 16  ;;  %v3096_v19 = vrot.slane %v3095_v42, 4  ;;  %v2774_v31 = vshrl.u32 %v10247_v40, 16 }
 0x23a   :  { %13692 = vst [vmem:[#allocation15_spill] sm:$0xff] %v10251_v26  ;;  %8246 = vmatmul.mubr.msk.bf16.gmra.mrb[4].mxu1 %vm700_vm13, %v10251_v26  ;;  %v2777_v61 = vshll.u32 %v10247_v40, 16  ;;  %v2783_v36 = vshll.u32 %v2640_v18, 16  ;;  %v3114_v43 = vrot.slane %v3112_v44, 5  ;;  %v3122_v8 = vrot.slane %v3120_v13, 5 }
 0x23b   :  { %v3110_v27 = vrot.slane %v3109_v33, 4  ;;  %v2788_v35 = vshrl.u32 %v10255_v11, 16  ;;  %v3101_v41 = vsel %vm9094_vm14, %v3096_v19, %v3100_v48  ;;  %v3128_v23 = vrot.slane %v3126_v7, 5  ;;  %v3010_v48 = vld [vmem:[#allocation2 + $0x5c] sm:$0x1] }
 0x23c   :  { %v2776_v17 = vrot.slane %v2774_v31, 4  ;;  %v2779_v34 = vrot.slane %v2777_v61, 5  ;;  %v10269_v24 = vcombine.low %v3087_v51, %v3101_v41  ;;  %v3123_v29 = vor.u32 %v3122_v8, %v3119_v46  ;;  %v10279_v31 = vld [vmem:[#allocation2 + $0x60] sm:$0xf]  ;;  %v3011_v41 = vld [vmem:[#allocation2 + $0x64] sm:$0x1] }
 0x23d   :  { %v2785_v62 = vrot.slane %v2783_v36, 5  ;;  %v2790_v1 = vrot.slane %v2788_v35, 4  ;;  %v2791_v56 = vshll.u32 %v10255_v11, 16  ;;  %v2797_v57 = vshll.u32 %v2641_v6, 16 }
 0x23e   :  { %v2780_v52 = vor.u32 %v2779_v34, %v2776_v17  ;;  %v2802_v44 = vshrl.u32 %v10262_v22, 16  ;;  %8389 = vmatprep.mubr.msk.bf16.mxu0 %vm700_vm13, %v10269_v24  ;;  %v3115_v18 = vsel %vm9094_vm14, %v3110_v27, %v3114_v43  ;;  %v3124_v42 = vrot.slane %v3123_v29, 4  ;;  %v10288_v34 = vld [vmem:[#allocation2 + $0x68] sm:$0xf] }
 0x23f   :  { %v2805_v51 = vshll.u32 %v10262_v22, 16  ;;  %v3131_v33 = vshrl.u32 %v10267_v45, 16  ;;  %v2793_v13 = vrot.slane %v2791_v56, 5  ;;  %v2811_v19 = vshll.u32 %v2642_v15, 16 }
 0x240   :  { %v2781_v46 = vrot.slane %v2780_v52, 4  ;;  %v2804_v7 = vrot.slane %v2802_v44, 4  ;;  %v3129_v61 = vsel %vm9094_vm14, %v3124_v42, %v3128_v23  ;;  %v2799_v36 = vrot.slane %v2797_v57, 5 }
 0x241   :  { %v2807_v8 = vrot.slane %v2805_v51, 5  ;;  %v3133_v6 = vrot.slane %v3131_v33, 4  ;;  %v10283_v35 = vcombine.low %v3115_v18, %v3129_v61  ;;  %v2794_v43 = vor.u32 %v2793_v13, %v2790_v1  ;;  %v3012_v33 = vld [vmem:[#allocation2 + $0x6c] sm:$0x1] }
 0x242   :  { %v2786_v27 = vsel %vm9094_vm14, %v2781_v46, %v2785_v62  ;;  %v3134_v17 = vshll.u32 %v10267_v45, 16  ;;  %v3140_v15 = vshll.u32 %v3010_v48, 16  ;;  %v3145_v52 = vshrl.u32 %v10279_v31, 16  ;;  %v3013_v46 = vld [vmem:[#allocation2 + $0x74] sm:$0x1] }
 0x243   :  { %13693 = vst [vmem:[#allocation16_spill] sm:$0xff] %v10283_v35  ;;  %v10295_v23 = vcombine.low %v2772_v60, %v2786_v27  ;;  %v2808_v29 = vor.u32 %v2807_v8, %v2804_v7  ;;  %8390 = vmatmul.mubr.msk.bf16.gmra.mrb[20].mxu0 %vm700_vm13, %v10283_v35  ;;  %v2795_v62 = vrot.slane %v2794_v43, 4  ;;  %v2813_v1 = vrot.slane %v2811_v19, 5  ;;  %v10311_v8 = vld [vmem:[#allocation2 + $0x70] sm:$0xf] }
 0x244   :  { %v3136_v56 = vrot.slane %v3134_v17, 5  ;;  %v3148_v57 = vshll.u32 %v10279_v31, 16  ;;  %v3147_v18 = vrot.slane %v3145_v52, 4  ;;  %v3154_v50 = vshll.u32 %v3011_v41, 16 }
 0x245   :  { %13694 = vst [vmem:[#allocation19_spill] sm:$0xff] %v10295_v23  ;;  %8249 = vmatprep.mubr.msk.bf16.mxu1 %vm700_vm13, %v10295_v23  ;;  %v2809_v44 = vrot.slane %v2808_v29, 4  ;;  %v3159_v60 = vshrl.u32 %v10288_v34, 16  ;;  %v2800_v42 = vsel %vm9094_vm14, %v2795_v62, %v2799_v36  ;;  %v3142_v7 = vrot.slane %v3140_v15, 5  ;;  %v10316_v36 = vld [vmem:[#allocation2 + $0x78] sm:$0xf] }
 0x246   :  { %v3137_v51 = vor.u32 %v3136_v56, %v3133_v6  ;;  %v3150_v48 = vrot.slane %v3148_v57, 5  ;;  %v3162_v61 = vshll.u32 %v10288_v34, 16  ;;  %v3173_v17 = vshrl.u32 %v10303_v37, 16 }
 0x247   :  { %v2814_v13 = vsel %vm9094_vm14, %v2809_v44, %v2813_v1  ;;  %v3161_v19 = vrot.slane %v3159_v60, 4  ;;  %v3156_v6 = vrot.slane %v3154_v50, 5  ;;  %v3168_v52 = vshll.u32 %v3012_v33, 16  ;;  %v2643_v1 = vld [vmem:[#allocation2 + $0x74] sm:$0x1] }
 0x248   :  { %v10313_v27 = vcombine.low %v2800_v42, %v2814_v13  ;;  %v3138_v43 = vrot.slane %v3137_v51, 4  ;;  %v3151_v41 = vor.u32 %v3150_v48, %v3147_v18  ;;  %v3164_v29 = vrot.slane %v3162_v61, 5  ;;  %v2644_v51 = vld [vmem:[#allocation2 + $0x7c] sm:$0x1] }
 0x249   :  { %v3176_v62 = vshll.u32 %v10303_v37, 16  ;;  %v3175_v56 = vrot.slane %v3173_v17, 4  ;;  %v3182_v57 = vshll.u32 %v3013_v46, 16  ;;  %v2816_v44 = vshrl.u32 %v10311_v8, 16 }
 0x24a   :  { %13695 = vst [vmem:[#allocation20_spill] sm:$0xff] %v10313_v27  ;;  %8250 = vmatmul.mubr.msk.bf16.gmra.mrb[8].mxu1 %vm700_vm13, %v10313_v27  ;;  %v3152_v15 = vrot.slane %v3151_v41, 4  ;;  %v3143_v18 = vsel %vm9094_vm14, %v3138_v43, %v3142_v7  ;;  %v3165_v60 = vor.u32 %v3164_v29, %v3161_v19  ;;  %v2819_v50 = vshll.u32 %v10311_v8, 16  ;;  %v10328_v41 = vld [vmem:[#allocation2 + $0x80] sm:$0xf] }
 0x24b   :  { %v3178_v42 = vrot.slane %v3176_v62, 5  ;;  %v2818_v33 = vrot.slane %v2816_v44, 4  ;;  %v2825_v13 = vshll.u32 %v2643_v1, 16  ;;  %v2830_v61 = vshrl.u32 %v10316_v36, 16  ;;  %v10333_v62 = vld [vmem:[#allocation2 + $0x88] sm:$0xf] }
 0x24c   :  { %v3157_v48 = vsel %vm9094_vm14, %v3152_v15, %v3156_v6  ;;  %v3166_v17 = vrot.slane %v3165_v60, 4  ;;  %v2821_v23 = vrot.slane %v2819_v50, 5  ;;  %v3170_v7 = vrot.slane %v3168_v52, 5  ;;  %v10337_v44 = vld [vmem:[#allocation2 + $0x84] sm:$0x1] }
 0x24d   :  { %v10330_v46 = vcombine.low %v3143_v18, %v3157_v48  ;;  %v3179_v27 = vor.u32 %v3178_v42, %v3175_v56  ;;  %v2832_v19 = vrot.slane %v2830_v61, 4  ;;  %v2833_v43 = vshll.u32 %v10316_v36, 16  ;;  %13697 = vst [vmem:[#allocation4_spill] sm:$0xff] %v10337_v44  ;;  %v10342_v42 = vld [vmem:[#allocation2 + $0x8c] sm:$0x1] }
 0x24e   :  { %v2839_v29 = vshll.u32 %v2644_v51, 16  ;;  %v3184_v1 = vrot.slane %v3182_v57, 5  ;;  %v2822_v15 = vor.u32 %v2821_v23, %v2818_v33  ;;  %v2844_v18 = vshrl.u32 %v10328_v41, 16  ;;  %13698 = vst [vmem:[#allocation10_spill] sm:$0xff] %v10342_v42  ;;  %v10348_v57 = vld [vmem:[#allocation2 + $0x78] sm:$0xf] }
 0x24f   :  { %13696 = vst [vmem:[#allocation3_spill] sm:$0xff] %v10330_v46  ;;  %8393 = vmatprep.mubr.msk.bf16.mxu0 %vm700_vm13, %v10330_v46  ;;  %v3180_v6 = vrot.slane %v3179_v27, 4  ;;  %v3171_v56 = vsel %vm9094_vm14, %v3166_v17, %v3170_v7  ;;  %v2827_v52 = vrot.slane %v2825_v13, 5  ;;  %v2835_v60 = vrot.slane %v2833_v43, 5  ;;  %v10352_v13 = vld [vmem:[#allocation2 + $0x80] sm:$0xf] }
 0x250   :  { %v2847_v51 = vshll.u32 %v10328_v41, 16  ;;  %v2823_v48 = vrot.slane %v2822_v15, 4  ;;  %v2846_v27 = vrot.slane %v2844_v18, 4  ;;  %v2858_v23 = vshrl.u32 %v10333_v62, 16 }
 0x251   :  { %v3185_v50 = vsel %vm9094_vm14, %v3180_v6, %v3184_v1  ;;  %v2836_v61 = vor.u32 %v2835_v60, %v2832_v19  ;;  %v2841_v26 = vrot.slane %v2839_v29, 5  ;;  %v2853_v7 = vshll.u32 %v10337_v44, 16  ;;  %v3015_v44 = vld [vmem:[#allocation2 + $0x84] sm:$0x1] }
 0x252   :  { %v10350_v33 = vcombine.low %v3171_v56, %v3185_v50  ;;  %v2849_v17 = vrot.slane %v2847_v51, 5  ;;  %v2860_v43 = vrot.slane %v2858_v23, 4  ;;  %v2861_v5 = vshll.u32 %v10333_v62, 16 }
 0x253   :  { %v2867_v6 = vshll.u32 %v10342_v42, 16  ;;  %v2837_v1 = vrot.slane %v2836_v61, 4  ;;  %v3187_v18 = vshrl.u32 %v10348_v57, 16  ;;  %v3190_v19 = vshll.u32 %v10348_v57, 16  ;;  %v3014_v42 = vld [vmem:[#allocation2 + $0x7c] sm:$0x1] }
 0x254   :  { %13699 = vst [vmem:[#allocation8_spill] sm:$0xff] %v10350_v33  ;;  %8394 = vmatmul.mubr.msk.bf16.gmra.mrb[24].mxu0 %vm700_vm13, %v10350_v33  ;;  %v2850_v15 = vor.u32 %v2849_v17, %v2846_v27  ;;  %v2828_v29 = vsel %vm9094_vm14, %v2823_v48, %v2827_v52  ;;  %v2863_v56 = vrot.slane %v2861_v5, 5  ;;  %v3201_v60 = vshrl.u32 %v10352_v13, 16  ;;  %v10371_v48 = vld [vmem:[#allocation2 + $0x90] sm:$0xf] }
 0x255   :  { %v2842_v51 = vsel %vm9094_vm14, %v2837_v1, %v2841_v26  ;;  %v3189_v23 = vrot.slane %v3187_v18, 4  ;;  %v3192_v14 = vrot.slane %v3190_v19, 5  ;;  %v2855_v27 = vrot.slane %v2853_v7, 5 }
 0x256   :  { %v2851_v50 = vrot.slane %v2850_v15, 4  ;;  %v10368_v61 = vcombine.low %v2828_v29, %v2842_v51  ;;  %v2864_v17 = vor.u32 %v2863_v56, %v2860_v43  ;;  %v2869_v33 = vrot.slane %v2867_v6, 5 }
 0x257   :  { %v3193_v46 = vor.u32 %v3192_v14, %v3189_v23  ;;  %v3203_v52 = vrot.slane %v3201_v60, 4  ;;  %v3204_v5 = vshll.u32 %v10352_v13, 16  ;;  %v3215_v15 = vshrl.u32 %v10366_v55, 16 }
 0x258   :  { %13700 = vst [vmem:[#allocation5_spill] sm:$0xff] %v10368_v61  ;;  %8253 = vmatprep.mubr.msk.bf16.mxu1 %vm700_vm13, %v10368_v61  ;;  %v2856_v26 = vsel %vm9094_vm14, %v2851_v50, %v2855_v27  ;;  %v2865_v1 = vrot.slane %v2864_v17, 4  ;;  %v3218_v7 = vshll.u32 %v10366_v55, 16  ;;  %v3196_v43 = vshll.u32 %v3014_v42, 16  ;;  %v3016_v50 = vld [vmem:[#allocation2 + $0x8c] sm:$0x1] }
 0x259   :  { %v3206_v18 = vrot.slane %v3204_v5, 5  ;;  %v3210_v6 = vshll.u32 %v3015_v44, 16  ;;  %v3217_v19 = vrot.slane %v3215_v15, 4  ;;  %v3229_v56 = vshrl.u32 %v10371_v48, 16  ;;  %v3017_v27 = vld [vmem:[#allocation2 + $0x94] sm:$0x1] }
 0x25a   :  { %v2870_v14 = vsel %vm9094_vm14, %v2865_v1, %v2869_v33  ;;  %v3220_v29 = vrot.slane %v3218_v7, 5  ;;  %v3194_v51 = vrot.slane %v3193_v46, 4  ;;  %v8889_v17 = vld [vmem:[#allocation2] sm:$0xf]  ;;  %v3232_v44 = vshll.u32 %v10371_v48, 16 }
 0x25b   :  { %v10382_v60 = vcombine.low %v2856_v26, %v2870_v14  ;;  %v3207_v23 = vor.u32 %v3206_v18, %v3203_v52  ;;  %v7575_v61 = vcombine.low %v8889_v17, %v10064_v32  ;;  %v3231_v42 = vrot.slane %v3229_v56, 4 }
 0x25c   :  { %v3221_v35 = vor.u32 %v3220_v29, %v3217_v19  ;;  %v3198_v33 = vrot.slane %v3196_v43, 5  ;;  %v3212_v1 = vrot.slane %v3210_v6, 5  ;;  %v3224_v26 = vshll.u32 %v3016_v50, 16 }
 0x25d   :  { %13701 = vst [vmem:[#allocation6_spill] sm:$0xff] %v10382_v60  ;;  %8254 = vmatmul.mubr.msk.bf16.gmra.mrb[12].mxu1 %vm700_vm13, %v10382_v60  ;;  %v3208_v5 = vrot.slane %v3207_v23, 4  ;;  %v3234_v46 = vrot.slane %v3232_v44, 5  ;;  %v3238_v52 = vshll.u32 %v3017_v27, 16  ;;  %v10391_v15 = vcombine.low %v10147_v9, %v10162_v47  ;;  %v10491_v44 = vld [vmem:[#allocation2 + $0x20] sm:$0xf] }
 0x25e   :  { %8259 = vmatprep.mubr.msk.bf16.mxu1 %vm700_vm13, %v7575_v61  ;;  %v3199_v32 = vsel %vm9094_vm14, %v3194_v51, %v3198_v33  ;;  %v3222_v43 = vrot.slane %v3221_v35, 4  ;;  %v3226_v61 = vrot.slane %v3224_v26, 5  ;;  %v7576_v9 = vcombine.low %v10101_v10, %v10103_v38  ;;  %v356_v51 = vld [vmem:[%s13491_s2 + $0xc] sm:$0xf]  ;;  %v2872_v33 = vld [vmem:[#allocation2 + $0x8] sm:$0xe] }
 0x25f   :  { %v3213_v7 = vsel %vm9094_vm14, %v3208_v5, %v3212_v1  ;;  %v3235_v14 = vor.u32 %v3234_v46, %v3231_v42  ;;  %v3240_v19 = vrot.slane %v3238_v52, 5  ;;  %v4100_v47 = vsel %vm725_vm0, %v10179_v53, 0  ;;  %v10436_v53 = vld [vmem:[%s13491_s2 + $0x2c] sm:$0xf]  ;;  %v3358_v26 = vld [vmem:[#allocation2 + $0x28] sm:$0xf] }
 0x260   :  { %v10397_v18 = vcombine.low %v3199_v32, %v3213_v7  ;;  %v3227_v29 = vsel %vm9094_vm14, %v3222_v43, %v3226_v61  ;;  %v7577_v35 = vcombine.low %v10169_v59, %v10174_v28  ;;  %v7591_v10 = vcombine.low %v10125_v30, %v10137_v49  ;;  %v8890_v59 = vld [vmem:[#allocation2 + $0x50] sm:$0xf]  ;;  %v10503_v46 = vld [vmem:[%s13491_s2 + $0x14] sm:$0xf] }
 0x261   :  { %v3236_v6 = vrot.slane %v3235_v14, 4  ;;  %v7578_v38 = vcombine.low %v10193_v20, %v10189_v3  ;;  %v7579_v28 = vcombine.low %v8890_v59, %v10247_v40  ;;  %v5172_v30 = vsel %vm725_vm0, %v10219_v0, 0  ;;  %v10461_v0 = vld [vmem:[#allocation2 + $0x48] sm:$0xf]  ;;  %v3359_v14 = vld [vmem:[#allocation2 + $0x30] sm:$0xf] }
 0x262   :  { %8397 = vmatprep.mubr.msk.bf16.mxu0 %vm700_vm13, %v10397_v18  ;;  %v7593_v49 = vcombine.low %v10207_v58, %v10211_v25  ;;  %v7580_v3 = vcombine.low %v10255_v11, %v10262_v22  ;;  %v7581_v20 = vcombine.low %v10311_v8, %v10316_v36  ;;  %v10449_v58 = vcombine.low %v10229_v16, %v10235_v21  ;;  %v10680_v59 = vld [vmem:[#allocation2 + $0x3c] sm:$0x1] }
 0x263   :  { %v3241_v56 = vsel %vm9094_vm14, %v3236_v6, %v3240_v19  ;;  %v10454_v25 = vcombine.low %v10267_v45, %v10279_v31  ;;  %v7582_v16 = vcombine.low %v10328_v41, %v10333_v62  ;;  %v10467_v21 = vcombine.low %v10288_v34, %v10303_v37  ;;  %v10479_v45 = vld [vmem:[#allocation2 + $0x98] sm:$0xf]  ;;  %v2871_v31 = vld [vmem:[#allocation2] sm:$0xe]  ;;  %v3355_v34 = vld [vmem:[#allocation2 + $0x10] sm:$0xf] }
 0x264   :  { %v10414_v23 = vcombine.low %v3227_v29, %v3241_v56  ;;  %v3486_v40 = vshrl.u32 %v10461_v0, 16  ;;  %v3489_v11 = vshll.u32 %v10461_v0, 16  ;;  %v10474_v22 = vcombine.low %v10348_v57, %v10352_v13  ;;  %v8891_v37 = vld [vmem:[#allocation2 + $0x4] sm:$0x1]  ;;  %v3356_v57 = vld [vmem:[#allocation2 + $0x18] sm:$0xf] }
 0x265   :  { %8260 = vmatmul.mubr.msk.bf16.vlgmr.msra.gmra.mrb[0].mxu1 %vm700_vm13, %v7576_v9  ;;  %v2924_v8 = vrot.slane %v8891_v37, 5  ;;  %v2928_v62 = vrot.slane %v10091_v54, 5  ;;  %v3598_v13 = vshrl.u32 %v10479_v45, 16  ;;  %v3601_v50 = vshll.u32 %v10479_v45, 16  ;;  %v2873_v19 = vld [vmem:[#allocation2 + $0x10] sm:$0xe] }
 0x266   :  { %8276 = vmatpush3.bf16.msra.mxu1 %v4100_v47  ;;  %8263 = vmatprep.mubr.msk.bf16.mxu1 %vm700_vm13, %v7577_v35  ;;  %v10483_v36 = vrot.slane %v3486_v40, 4  ;;  %v10485_v41 = vrot.slane %v3489_v11, 5  ;;  %v7511_v27 = vrot.slane %v2871_v31, 9  ;;  %v3388_v17 = vshrl.u32 %v3355_v34, 16  ;;  %v2874_v35 = vld [vmem:[#allocation2 + $0x18] sm:$0xe] }
 0x267   :  { %8398 = vmatmul.mubr.msk.bf16.gmra.mrb[28].mxu0 %vm700_vm13, %v10414_v23  ;;  %8842 = vmatprep.subr.msk.bf16.mxu1 %vm725_vm0, %v356_v51  ;;  %v4264_v42 = vsel %vm725_vm0, %v356_v51, 0  ;;  %v2932_v1 = vrot.slane %v10113_v4, 5  ;;  %v2936_v54 = vrot.slane %v10122_v2, 5  ;;  %v10507_v52 = vcombine.low %v10366_v55, %v10371_v48  ;;  %v10544_v31 = vld [vmem:[#allocation2 + $0x60] sm:$0xf] }
 0x268   :  { %8403 = vmatprep.mubr.msk.bf16.mxu0 %vm700_vm13, %v7591_v10  ;;  %v3391_v32 = vshll.u32 %v3355_v34, 16  ;;  %v3402_v7 = vshrl.u32 %v3356_v57, 16  ;;  %v3405_v43 = vshll.u32 %v3356_v57, 16  ;;  %v7687_v4 = vcombine.low %v3355_v34, %v3356_v57  ;;  %v10552_v57 = vld [vmem:[#allocation2 + $0x68] sm:$0xf] }
 0x269   :  { %v3416_v2 = vshrl.u32 %v10491_v44, 16  ;;  %v10515_v61 = vsel %vm10494_vm5, %v7511_v27, %v2924_v8  ;;  %v7512_v6 = vrot.slane %v2872_v33, 9  ;;  %v10519_v55 = vrot.slane %v3388_v17, 4 }
 0x26a   :  { %v3419_v48 = vshll.u32 %v10491_v44, 16  ;;  %v3430_v9 = vshrl.u32 %v3358_v26, 16  ;;  %v3433_v47 = vshll.u32 %v3358_v26, 16  ;;  %v3444_v29 = vshrl.u32 %v3359_v14, 16 }
 0x26b   :  { %v10527_v56 = vsel %vm10494_vm5, %v7512_v6, %v2928_v62  ;;  %v10529_v51 = vrot.slane %v3391_v32, 5  ;;  %v7514_v34 = vrot.slane %v2874_v35, 9  ;;  %v5336_v33 = vsel %vm725_vm0, %v10436_v53, 0 }
 0x26c   :  { %13704 = vst [vmem:[#allocation11_spill] sm:$0xff] %v10527_v56  ;;  %v10546_v37 = vrot.slane %v3430_v9, 4  ;;  %v10548_v8 = vrot.slane %v3433_v47, 5  ;;  %v10550_v62 = vrot.slane %v3444_v29, 4  ;;  %v3517_v6 = vshll.u32 %v10552_v57, 16 }
 0x26d   :  { %8264 = vmatmul.mubr.msk.bf16.gmra.mrb[4].mxu1 %vm700_vm13, %v7578_v38  ;;  %v10533_v38 = vrot.slane %v3405_v43, 5  ;;  %v10633_v43 = vld [vmem:[#allocation2 + $0x1c] sm:$0x1] }
 0x26e   :  { %8267 = vmatprep.mubr.msk.bf16.mxu1 %vm700_vm13, %v7579_v28  ;;  %v10537_v28 = vrot.slane %v3416_v2, 4 }
 0x26f   :  { %8404 = vmatmul.mubr.msk.bf16.vlgmr.msra.gmra.mrb[16].mxu0 %vm700_vm13, %v10391_v15 }
 0x270   :  { %8407 = vmatprep.mubr.msk.bf16.mxu0 %vm700_vm13, %v7593_v49  ;;  %8420 = vmatpush3.bf16.msra.mxu0 %v5172_v30  ;;  %v7688_v30 = vcombine.low %v10491_v44, %v3358_v26  ;;  %v10562_v44 = vld [vmem:[#allocation2 + $0x70] sm:$0xf]  ;;  %v10568_v26 = vsel %vm10494_vm5, %v7514_v34, %v2936_v54 }
 0x271   :  { %8850 = vmatprep.subr.msk.bf16.mxu0 %vm725_vm0, %v10436_v53  ;;  %13706 = vst [vmem:[#allocation14_spill] sm:$0xff] %v10568_v26 }
 0x275   :  { %8268 = vmatmul.mubr.msk.bf16.gmra.mrb[8].mxu1 %vm700_vm13, %v7580_v3  ;;  %v10540_v3 = vld [vmem:[#allocation2 + $0x40] sm:$0xf] }
 0x276   :  { %8271 = vmatprep.mubr.msk.bf16.mxu1 %vm700_vm13, %v7581_v20  ;;  %v7513_v20 = vrot.slane %v2873_v19, 9  ;;  %v3472_v17 = vshrl.u32 %v10540_v3, 16  ;;  %v7690_v2 = vcombine.low %v10540_v3, %v10461_v0  ;;  %v10594_v19 = vld [vmem:[#allocation2 + $0x88] sm:$0xf] }
 0x277   :  { %8408 = vmatmul.mubr.msk.bf16.gmra.mrb[20].mxu0 %vm700_vm13, %v10449_v58  ;;  %v3570_v34 = vshrl.u32 %v10594_v19, 16 }
 0x278   :  { %8411 = vmatprep.mubr.msk.bf16.mxu0 %vm700_vm13, %v10454_v25  ;;  %v10556_v27 = vsel %vm10494_vm5, %v7513_v20, %v2932_v1  ;;  %v3500_v1 = vshrl.u32 %v10544_v31, 16  ;;  %v10596_v9 = vrot.slane %v3472_v17, 4  ;;  %v10608_v20 = vld [vmem:[#allocation2 + $0x90] sm:$0xf]  ;;  %v3573_v17 = vshll.u32 %v10594_v19, 16 }
 0x279   :  { %13705 = vst [vmem:[#allocation17_spill] sm:$0xff] %v10556_v27 }
 0x27d   :  { %8272 = vmatmul.mubr.msk.bf16.gmra.mrb[12].mxu1 %vm700_vm13, %v7582_v16  ;;  %v10542_v16 = vrot.slane %v3419_v48, 5  ;;  %v3528_v48 = vshrl.u32 %v10562_v44, 16 }
 0x27e   :  { %8277 = vmatprep.mubr.msk.bf16.mxu1 %vm700_vm13, %v7591_v10  ;;  %v10531_v10 = vrot.slane %v3402_v7, 4  ;;  %v10574_v7 = vld [vmem:[#allocation2 + $0x78] sm:$0xf] }
 0x27f   :  { %8412 = vmatmul.mubr.msk.bf16.gmra.mrb[24].mxu0 %vm700_vm13, %v10467_v21  ;;  %v3542_v29 = vshrl.u32 %v10574_v7, 16  ;;  %v3545_v35 = vshll.u32 %v10574_v7, 16 }
 0x280   :  { %8415 = vmatprep.mubr.msk.bf16.mxu0 %vm700_vm13, %v10474_v22 }
 0x285   :  { %8278 = vmatmul.mubr.msk.bf16.vlgmr.msra.gmra.mrb[0].mxu1 %vm700_vm13, %v10391_v15  ;;  %v3360_v15 = vld [vmem:[#allocation2 + $0x38] sm:$0xf] }
 0x286   :  { %8294 = vmatpush3.bf16.msra.mxu1 %v4264_v42  ;;  %8281 = vmatprep.mubr.msk.bf16.mxu1 %vm700_vm13, %v7593_v49  ;;  %v3447_v49 = vshll.u32 %v3359_v14, 16  ;;  %v3458_v40 = vshrl.u32 %v3360_v15, 16  ;;  %v3461_v11 = vshll.u32 %v3360_v15, 16  ;;  %v3475_v42 = vshll.u32 %v10540_v3, 16 }
 0x287   :  { %8416 = vmatmul.mubr.msk.bf16.gmra.mrb[28].mxu0 %vm700_vm13, %v10507_v52  ;;  %8843 = vmatprep.subr.msk.bf16.mxu1 %vm725_vm0, %v10503_v46  ;;  %v7689_v32 = vcombine.low %v3359_v14, %v3360_v15  ;;  %v3514_v14 = vshrl.u32 %v10552_v57, 16  ;;  %v3531_v15 = vshll.u32 %v10562_v44, 16 }
 0x288   :  { %8421 = vmatprep.mubr.msk.bf16.mxu0 %vm700_vm13, %v7687_v4  ;;  %v10579_v53 = vrot.slane %v3447_v49, 5  ;;  %v10581_v4 = vrot.slane %v3458_v40, 4  ;;  %v10583_v54 = vrot.slane %v3461_v11, 5  ;;  %v10598_v47 = vrot.slane %v3475_v42, 5  ;;  %v10616_v42 = vld [vmem:[#allocation2 + $0x14] sm:$0x1] }
 0x289   :  { %v10610_v40 = vrot.slane %v3514_v14, 4  ;;  %v7691_v11 = vcombine.low %v10544_v31, %v10552_v57  ;;  %v10628_v14 = vrot.slane %v3542_v29, 4  ;;  %v3584_v57 = vshrl.u32 %v10608_v20, 16 }
 0x28a   :  { %v10649_v29 = vrot.slane %v3570_v34, 4 }
 0x28b   :  { %v10675_v34 = vrot.slane %v3584_v57, 4  ;;  %v3478_v57 = vor.u32 %v10598_v47, %v10596_v9  ;;  %v10702_v47 = vld [vmem:[#allocation2 + $0x64] sm:$0x1] }
 0x28d   :  { %8282 = vmatmul.mubr.msk.bf16.gmra.mrb[4].mxu1 %vm700_vm13, %v10449_v58  ;;  %v3503_v58 = vshll.u32 %v10544_v31, 16  ;;  %v10630_v31 = vrot.slane %v3545_v35, 5  ;;  %v10651_v35 = vrot.slane %v3573_v17, 5  ;;  %v3411_v17 = vshll.u32 %v10633_v43, 16 }
 0x28e   :  { %8285 = vmatprep.mubr.msk.bf16.mxu1 %vm700_vm13, %v10454_v25  ;;  %v10586_v25 = vld [vmem:[#allocation2 + $0x80] sm:$0xf] }
 0x28f   :  { %8422 = vmatmul.mubr.msk.bf16.vlgmr.msra.gmra.mrb[16].mxu0 %vm700_vm13, %v7688_v30  ;;  %v10602_v30 = vrot.slane %v3500_v1, 4  ;;  %v10604_v0 = vrot.slane %v3503_v58, 5  ;;  %v3556_v49 = vshrl.u32 %v10586_v25, 16  ;;  %v3559_v3 = vshll.u32 %v10586_v25, 16 }
 0x290   :  { %8425 = vmatprep.mubr.msk.bf16.mxu0 %vm700_vm13, %v7689_v32  ;;  %8438 = vmatpush3.bf16.msra.mxu0 %v5336_v33  ;;  %v10618_v33 = vrot.slane %v3517_v6, 5  ;;  %v10620_v32 = vrot.slane %v3528_v48, 4  ;;  %v10622_v1 = vrot.slane %v3531_v15, 5  ;;  %v7692_v58 = vcombine.low %v10562_v44, %v10574_v7  ;;  %v10646_v15 = vld [vmem:[#allocation2 + $0x2c] sm:$0x1] }
 0x291   :  { %v3394_v6 = vor.u32 %v10529_v51, %v10519_v55  ;;  %v10639_v48 = vrot.slane %v3556_v49, 4  ;;  %v10641_v44 = vrot.slane %v3559_v3, 5  ;;  %v3397_v7 = vshll.u32 %v10616_v42, 16  ;;  %v10658_v51 = vld [vmem:[#allocation2 + $0x34] sm:$0x1] }
 0x292   :  { %v3587_v55 = vshll.u32 %v10608_v20, 16  ;;  %v3436_v49 = vor.u32 %v10548_v8, %v10546_v37  ;;  %v10673_v3 = vld [vmem:[#allocation2 + $0x4c] sm:$0x1]  ;;  %v3439_v37 = vshll.u32 %v10646_v15, 16  ;;  %v3453_v8 = vshll.u32 %v10658_v51, 16 }
 0x295   :  { %8286 = vmatmul.mubr.msk.bf16.gmra.mrb[8].mxu1 %vm700_vm13, %v10467_v21  ;;  %v7693_v21 = vcombine.low %v10586_v25, %v10594_v19  ;;  %v10663_v25 = vrot.slane %v3601_v50, 5  ;;  %v10667_v19 = vld [vmem:[#allocation2 + $0x24] sm:$0x1]  ;;  %v3395_v50 = vrot.slane %v3394_v6, 4  ;;  %v3492_v6 = vor.u32 %v10485_v41, %v10483_v36 }
 0x296   :  { %8289 = vmatprep.mubr.msk.bf16.mxu1 %vm700_vm13, %v10474_v22  ;;  %v10656_v22 = vrot.slane %v3598_v13, 4  ;;  %v3450_v13 = vor.u32 %v10579_v53, %v10550_v62  ;;  %v10686_v62 = vld [vmem:[#allocation2 + $0x44] sm:$0x1]  ;;  %v3464_v53 = vor.u32 %v10583_v54, %v10581_v4  ;;  %v3413_v4 = vrot.slane %v3411_v17, 5 }
 0x297   :  { %8426 = vmatmul.mubr.msk.bf16.gmra.mrb[20].mxu0 %vm700_vm13, %v7690_v2  ;;  %v3408_v2 = vor.u32 %v10533_v38, %v10531_v10  ;;  %v3399_v10 = vrot.slane %v3397_v7, 5  ;;  %v3422_v38 = vor.u32 %v10542_v16, %v10537_v28  ;;  %v3495_v7 = vshll.u32 %v10673_v3, 16 }
 0x298   :  { %8429 = vmatprep.mubr.msk.bf16.mxu0 %vm700_vm13, %v7691_v11  ;;  %v3425_v28 = vshll.u32 %v10667_v19, 16  ;;  %v3437_v16 = vrot.slane %v3436_v49, 4  ;;  %v3451_v60 = vrot.slane %v3450_v13, 4  ;;  %v3467_v54 = vshll.u32 %v10680_v59, 16  ;;  %v10706_v49 = vld [vmem:[#allocation2 + $0x6c] sm:$0x1] }
 0x299   :  { %v3409_v11 = vrot.slane %v3408_v2, 4  ;;  %v3400_v26 = vsel %vm9094_vm14, %v3395_v50, %v3399_v10  ;;  %v3481_v9 = vshll.u32 %v10686_v62, 16  ;;  %v3423_v36 = vrot.slane %v3422_v38, 4 }
 0x29a   :  { %v3441_v41 = vrot.slane %v3439_v37, 5  ;;  %v3455_v2 = vrot.slane %v3453_v8, 5  ;;  %v3465_v13 = vrot.slane %v3464_v53, 4  ;;  %v3479_v50 = vrot.slane %v3478_v57, 4 }
 0x29b   :  { %v3493_v17 = vrot.slane %v3492_v6, 4  ;;  %v3497_v10 = vrot.slane %v3495_v7, 5  ;;  %v3427_v27 = vrot.slane %v3425_v28, 5  ;;  %v3509_v37 = vshll.u32 %v10702_v47, 16 }
 0x29c   :  { %v3456_v38 = vsel %vm9094_vm14, %v3451_v60, %v3455_v2  ;;  %v3469_v8 = vrot.slane %v3467_v54, 5  ;;  %v3483_v56 = vrot.slane %v3481_v9, 5  ;;  %v4428_v53 = vsel %vm725_vm0, %v10503_v46, 0  ;;  %v3611_v60 = vld [vmem:[#allocation2 + $0x10] sm:$0xe] }
 0x29d   :  { %8290 = vmatmul.mubr.msk.bf16.gmra.mrb[12].mxu1 %vm700_vm13, %v10507_v52  ;;  %v3506_v52 = vor.u32 %v10604_v0, %v10602_v30  ;;  %v3520_v30 = vor.u32 %v10618_v33, %v10610_v40  ;;  %v3523_v0 = vshll.u32 %v10706_v49, 16  ;;  %v3428_v6 = vsel %vm9094_vm14, %v3423_v36, %v3427_v27  ;;  %v10749_v27 = vld [vmem:[%s13491_s2 + $0x10] sm:$0xf]  ;;  %v3614_v36 = vld [vmem:[#allocation2 + $0x28] sm:$0xe] }
 0x29e   :  { %8295 = vmatprep.mubr.msk.bf16.mxu1 %vm700_vm13, %v10197_v39  ;;  %v3442_v39 = vsel %vm9094_vm14, %v3437_v16, %v3441_v41  ;;  %v3470_v7 = vsel %vm9094_vm14, %v3465_v13, %v3469_v8  ;;  %v3484_v40 = vsel %vm9094_vm14, %v3479_v50, %v3483_v56  ;;  %v3498_v33 = vsel %vm9094_vm14, %v3493_v17, %v3497_v10  ;;  %v3613_v56 = vld [vmem:[#allocation2 + $0x20] sm:$0xe]  ;;  %v3615_v50 = vld [vmem:[#allocation2 + $0x30] sm:$0xe] }
 0x29f   :  { %8430 = vmatmul.mubr.msk.bf16.gmra.mrb[24].mxu0 %vm700_vm13, %v7692_v58  ;;  %v10720_v58 = vrot.slane %v3587_v55, 5  ;;  %v10726_v57 = vrot.slane %v3506_v52, 4  ;;  %v10736_v55 = vld [vmem:[#allocation2 + $0x7c] sm:$0x1]  ;;  %v10740_v46 = vcombine.low %v3428_v6, %v3442_v39  ;;  %v10742_v16 = vcombine.low %v3456_v38, %v3470_v7  ;;  %v3618_v6 = vld [vmem:[#allocation2 + $0x48] sm:$0xe] }
 0x2a0   :  { %8433 = vmatprep.mubr.msk.bf16.mxu0 %vm700_vm13, %v7693_v21  ;;  %v3414_v21 = vsel %vm9094_vm14, %v3409_v11, %v3413_v4  ;;  %v3612_v11 = vld [vmem:[#allocation2 + $0x18] sm:$0xe]  ;;  %v10744_v4 = vrot.slane %v3509_v37, 5  ;;  %v10753_v54 = vrot.slane %v3520_v30, 4  ;;  %v10755_v9 = vrot.slane %v3523_v0, 5 }
 0x2a1   :  { %v10738_v28 = vcombine.low %v3400_v26, %v3414_v21  ;;  %v7543_v26 = vrot.slane %v3611_v60, 9  ;;  %v10761_v41 = vcombine.low %v3484_v40, %v3498_v33  ;;  %v3661_v52 = vrot.slane %v10616_v42, 5  ;;  %v3616_v30 = vld [vmem:[#allocation2 + $0x38] sm:$0xe]  ;;  %v3617_v21 = vld [vmem:[#allocation2 + $0x40] sm:$0xe] }
 0x2a2   :  { %v7544_v13 = vrot.slane %v3612_v11, 9  ;;  %v13707_v17 = vcombine.low %v10608_v20, %v10479_v45  ;;  %v3548_v10 = vor.u32 %v10630_v31, %v10628_v14  ;;  %v3665_v38 = vrot.slane %v10633_v43, 5  ;;  %v3619_v7 = vld [vmem:[#allocation2 + $0x60] sm:$0xe]  ;;  %v10795_v40 = vld [vmem:[#allocation2 + $0x74] sm:$0x1] }
 0x2a3   :  { %v7545_v37 = vrot.slane %v3613_v56, 9  ;;  %v3669_v8 = vrot.slane %v10667_v19, 5  ;;  %v10783_v45 = vsel %vm10494_vm5, %v7543_v26, %v3661_v52  ;;  %v7546_v20 = vrot.slane %v3614_v36, 9  ;;  %v3620_v26 = vld [vmem:[#allocation2 + $0x68] sm:$0xe] }
 0x2a4   :  { %v3673_v0 = vrot.slane %v10646_v15, 5  ;;  %v10788_v43 = vsel %vm10494_vm5, %v7544_v13, %v3665_v38  ;;  %v3677_v60 = vrot.slane %v10658_v51, 5  ;;  %v7548_v11 = vrot.slane %v3616_v30, 9  ;;  %v10804_v36 = vld [vmem:[#allocation2 + $0x84] sm:$0x1] }
 0x2a5   :  { %8296 = vmatmul.mubr.msk.bf16.vlgmr.msra.gmra.mrb[0].mxu1 %vm700_vm13, %v10213_v12  ;;  %v10792_v19 = vsel %vm10494_vm5, %v7545_v37, %v3669_v8  ;;  %v3681_v56 = vrot.slane %v10680_v59, 5  ;;  %v7549_v13 = vrot.slane %v3617_v21, 9  ;;  %v7550_v37 = vrot.slane %v3618_v6, 9  ;;  %v3622_v30 = vld [vmem:[#allocation2 + $0x78] sm:$0xe] }
 0x2a6   :  { %8312 = vmatpush3.bf16.msra.mxu1 %v4428_v53  ;;  %8299 = vmatprep.mubr.msk.bf16.mxu1 %vm700_vm13, %v10269_v24  ;;  %v7547_v53 = vrot.slane %v3615_v50, 9  ;;  %v10801_v15 = vsel %vm10494_vm5, %v7546_v20, %v3673_v0  ;;  %v3685_v50 = vrot.slane %v10686_v62, 5  ;;  %v3689_v59 = vrot.slane %v10673_v3, 5  ;;  %v13708_v20 = vld [vmem:[#allocation16_spill] sm:$0xff]  ;;  %v3623_v6 = vld [vmem:[#allocation2 + $0x80] sm:$0xe] }
 0x2a7   :  { %8434 = vmatmul.mubr.msk.bf16.gmra.mrb[28].mxu0 %vm700_vm13, %v13707_v17  ;;  %8844 = vmatprep.subr.msk.bf16.mxu1 %vm725_vm0, %v10749_v27  ;;  %v3621_v17 = vld [vmem:[#allocation2 + $0x70] sm:$0xe]  ;;  %v10815_v38 = vsel %vm10494_vm5, %v7548_v11, %v3681_v56  ;;  %v7551_v8 = vrot.slane %v3619_v7, 9  ;;  %v10820_v0 = vld [vmem:[#allocation2 + $0x8c] sm:$0x1]  ;;  %v13709_v11 = vld [vmem:[#allocation3_spill] sm:$0xff]  ;;  %v13712_v31 = vor.u32 %v10622_v1, %v10620_v32  ;;  %v3604_v32 = vor.u32 %v10663_v25, %v10656_v22 }
 0x2a8   :  { %8439 = vmatprep.mubr.msk.bf16.mxu0 %vm700_vm13, %v10738_v28  ;;  %v10810_v52 = vsel %vm10494_vm5, %v7547_v53, %v3677_v60  ;;  %v10826_v62 = vsel %vm10494_vm5, %v7549_v13, %v3685_v50  ;;  %v3693_v53 = vrot.slane %v10702_v47, 5  ;;  %v7552_v60 = vrot.slane %v3620_v26, 9  ;;  %v3624_v51 = vld [vmem:[#allocation2 + $0x88] sm:$0xe]  ;;  %v10839_v13 = vld [vmem:[#allocation2 + $0x94] sm:$0x1] }
 0x2a9   :  { %v10833_v3 = vsel %vm10494_vm5, %v7550_v37, %v3689_v59  ;;  %v3697_v7 = vrot.slane %v10706_v49, 5  ;;  %v7553_v56 = vrot.slane %v3621_v17, 9  ;;  %v3701_v21 = vrot.slane %v10795_v40, 5  ;;  %v3625_v49 = vld [vmem:[#allocation2 + $0x90] sm:$0xe] }
 0x2aa   :  { %v10845_v26 = vsel %vm10494_vm5, %v7551_v8, %v3693_v53  ;;  %v7554_v50 = vrot.slane %v3622_v30, 9  ;;  %v3705_v37 = vrot.slane %v10736_v55, 5  ;;  %v3386_v17 = vld [vmem:[#allocation2 + $0x9c] sm:$0x1]  ;;  %v7555_v47 = vrot.slane %v3623_v6, 9 }
 0x2ab   :  { %v10852_v59 = vsel %vm10494_vm5, %v7552_v60, %v3697_v7  ;;  %v10856_v33 = vsel %vm10494_vm5, %v7553_v56, %v3701_v21  ;;  %v3709_v8 = vrot.slane %v10804_v36, 5  ;;  %v3626_v53 = vld [vmem:[#allocation2 + $0x98] sm:$0xe]  ;;  %v7556_v39 = vrot.slane %v3624_v51, 9 }
 0x2ac   :  { %v10863_v42 = vsel %vm10494_vm5, %v7554_v50, %v3705_v37  ;;  %v3713_v2 = vrot.slane %v10820_v0, 5  ;;  %v7557_v6 = vrot.slane %v3625_v49, 9  ;;  %v3717_v7 = vrot.slane %v10839_v13, 5 }
 0x2ad   :  { %8300 = vmatmul.mubr.msk.bf16.gmra.mrb[4].mxu1 %vm700_vm13, %v13708_v20  ;;  %v10870_v21 = vsel %vm10494_vm5, %v7555_v47, %v3709_v8  ;;  %v3562_v56 = vor.u32 %v10641_v44, %v10639_v48  ;;  %v7558_v51 = vrot.slane %v3626_v53, 9  ;;  %v3721_v37 = vrot.slane %v3386_v17, 5  ;;  %v13710_v44 = vld [vmem:[#allocation8_spill] sm:$0xff] }
 0x2ae   :  { %8303 = vmatprep.mubr.msk.bf16.mxu1 %vm700_vm13, %v13709_v11  ;;  %v10877_v50 = vsel %vm10494_vm5, %v7556_v39, %v3713_v2  ;;  %v3537_v30 = vshll.u32 %v10795_v40, 16  ;;  %v3576_v60 = vor.u32 %v10651_v35, %v10649_v29  ;;  %v10886_v49 = vsel %vm10494_vm5, %v7557_v6, %v3717_v7 }
 0x2af   :  { %8440 = vmatmul.mubr.msk.bf16.vlgmr.msra.gmra.mrb[16].mxu0 %vm700_vm13, %v10740_v46  ;;  %v7749_v47 = vcombine.low %v10870_v21, %v10877_v50  ;;  %v3526_v48 = vsel %vm9094_vm14, %v10753_v54, %v10755_v9  ;;  %v3549_v39 = vrot.slane %v3548_v10, 4  ;;  %v3565_v29 = vshll.u32 %v10804_v36, 16  ;;  %v8930_v21 = vld [vmem:[%s13490_s0 + $0x200] sm:$0xff]  ;;  %v8931_v50 = vld [vmem:[%s13490_s0 + $0x1f0] sm:$0xff] }
 0x2b0   :  { %8443 = vmatprep.mubr.msk.bf16.mxu0 %vm700_vm13, %v10742_v16  ;;  %v10900_v35 = vsel %vm10494_vm5, %v7558_v51, %v3721_v37  ;;  %v13711_v2 = vsel %vm9094_vm14, %v10726_v57, %v10744_v4  ;;  %v3579_v54 = vshll.u32 %v10820_v0, 16  ;;  %v3535_v9 = vrot.slane %v13712_v31, 4  ;;  %v2875_v37 = vld [vmem:[#allocation2 + $0x20] sm:$0xe] }
 0x2b1   :  { %v10907_v40 = vcombine.low %v13711_v2, %v3526_v48  ;;  %v7750_v14 = vcombine.low %v10886_v49, %v10900_v35  ;;  %v13713_v10 = vshll.u32 %v10736_v55, 16  ;;  %v3563_v4 = vrot.slane %v3562_v56, 4  ;;  %v2876_v55 = vld [vmem:[#allocation2 + $0x28] sm:$0xe]  ;;  %v8892_v48 = vld [vmem:[#allocation2 + $0x2c] sm:$0x1] }
 0x2b2   :  { %v3539_v36 = vrot.slane %v3537_v30, 5  ;;  %v3577_v8 = vrot.slane %v3576_v60, 4  ;;  %v3590_v0 = vor.u32 %v10720_v58, %v10675_v34  ;;  %v3567_v6 = vrot.slane %v3565_v29, 5  ;;  %v13714_v2 = vld [vmem:[#allocation11_spill] sm:$0xff]  ;;  %v8933_v49 = vld [vmem:[%s13490_s0 + $0x210] sm:$0xff] }
 0x2b3   :  { %v3553_v57 = vrot.slane %v13713_v10, 5  ;;  %v3607_v1 = vshll.u32 %v3386_v17, 16  ;;  %v3581_v7 = vrot.slane %v3579_v54, 5  ;;  %v3593_v60 = vshll.u32 %v10839_v13, 16  ;;  %v8934_v35 = vld [vmem:[%s13490_s0 + $0x98] sm:$0x1] }
 0x2b4   :  { %v3540_v56 = vsel %vm9094_vm14, %v3535_v9, %v3539_v36  ;;  %v3568_v30 = vsel %vm9094_vm14, %v3563_v4, %v3567_v6  ;;  %v3591_v58 = vrot.slane %v3590_v0, 4  ;;  %v3605_v22 = vrot.slane %v3604_v32, 4  ;;  %v8893_v9 = vld [vmem:[#allocation2 + $0x24] sm:$0x1]  ;;  %v2877_v36 = vld [vmem:[#allocation2 + $0x30] sm:$0xe] }
 0x2b5   :  { %8304 = vmatmul.mubr.msk.bf16.gmra.mrb[8].mxu1 %vm700_vm13, %v13710_v44  ;;  %v3554_v53 = vsel %vm9094_vm14, %v3549_v39, %v3553_v57  ;;  %v3582_v34 = vsel %vm9094_vm14, %v3577_v8, %v3581_v7  ;;  %v3609_v25 = vrot.slane %v3607_v1, 5  ;;  %v7516_v17 = vrot.slane %v2876_v55, 9  ;;  %v2879_v8 = vld [vmem:[#allocation2 + $0x50] sm:$0xe]  ;;  %v2880_v0 = vld [vmem:[#allocation2 + $0x58] sm:$0xe] }
 0x2b6   :  { %8307 = vmatprep.mubr.msk.bf16.mxu1 %vm700_vm13, %v10397_v18  ;;  %v10934_v51 = vcombine.low %v3540_v56, %v3554_v53  ;;  %v2944_v39 = vrot.slane %v8892_v48, 5  ;;  %v10940_v29 = vcombine.low %v3568_v30, %v3582_v34  ;;  %v13715_v13 = vcombine.low %v10515_v61, %v13714_v2  ;;  %v2878_v32 = vld [vmem:[#allocation2 + $0x38] sm:$0xe]  ;;  %v8894_v56 = vld [vmem:[#allocation2 + $0x34] sm:$0x1] }
 0x2b7   :  { %8444 = vmatmul.mubr.msk.bf16.gmra.mrb[20].mxu0 %vm700_vm13, %v10761_v41  ;;  %v3595_v54 = vrot.slane %v3593_v60, 5  ;;  %v7515_v31 = vrot.slane %v2875_v37, 9  ;;  %v2940_v10 = vrot.slane %v8893_v9, 5  ;;  %v3610_v4 = vsel %vm9094_vm14, %v3605_v22, %v3609_v25  ;;  %v359_v30 = vld [vmem:[%s13491_s2 + $0x18] sm:$0xf]  ;;  %v13716_v60 = vld [vmem:[#allocation17_spill] sm:$0xff] }
 0x2b8   :  { %8447 = vmatprep.mubr.msk.bf16.mxu0 %vm700_vm13, %v10907_v40  ;;  %v2945_v61 = vsel %vm10494_vm5, %v7516_v17, %v2944_v39  ;;  %v4528_v53 = vsel %vm725_vm0, %v10749_v27, 0  ;;  %v7517_v55 = vrot.slane %v2877_v36, 9  ;;  %v2948_v63 = vrot.slane %v8894_v56, 5  ;;  %v13717_v34 = vld [vmem:[#allocation14_spill] sm:$0xff]  ;;  %v8895_v37 = vld [vmem:[#allocation2 + $0x54] sm:$0x1] }
 0x2b9   :  { %v3596_v57 = vsel %vm9094_vm14, %v3591_v58, %v3595_v54  ;;  %v2941_v6 = vsel %vm10494_vm5, %v7515_v31, %v2940_v10  ;;  %v13718_v58 = vcombine.low %v13716_v60, %v13717_v34  ;;  %v7519_v27 = vrot.slane %v2879_v8, 9  ;;  %v8896_v17 = vld [vmem:[#allocation2 + $0x5c] sm:$0x1]  ;;  %v2881_v10 = vld [vmem:[#allocation2 + $0x60] sm:$0xe] }
 0x2ba   :  { %v10960_v1 = vcombine.low %v3596_v57, %v3610_v4  ;;  %v7625_v7 = vcombine.low %v2941_v6, %v2945_v61  ;;  %v2956_v22 = vrot.slane %v8895_v37, 5  ;;  %v7520_v25 = vrot.slane %v2880_v0, 9  ;;  %v8897_v2 = vld [vmem:[#allocation2 + $0x3c] sm:$0x1]  ;;  %v2884_v4 = vld [vmem:[#allocation2 + $0x78] sm:$0xe] }
 0x2bb   :  { %v2960_v48 = vrot.slane %v8896_v17, 5  ;;  %v7518_v39 = vrot.slane %v2878_v32, 9  ;;  %v2949_v54 = vsel %vm10494_vm5, %v7517_v55, %v2948_v63  ;;  %v2882_v36 = vld [vmem:[#allocation2 + $0x68] sm:$0xe]  ;;  %v7521_v0 = vrot.slane %v2881_v10, 9 }
 0x2bc   :  { %v2957_v31 = vsel %vm10494_vm5, %v7519_v27, %v2956_v22  ;;  %v2883_v32 = vld [vmem:[#allocation2 + $0x70] sm:$0xe]  ;;  %v8899_v55 = vld [vmem:[#allocation2 + $0x7c] sm:$0x1]  ;;  %v7522_v63 = vrot.slane %v2882_v36, 9  ;;  %vm5931_vm14 = vcmask 31744  }
 0x2bd   :  { %8308 = vmatmul.mubr.msk.bf16.gmra.mrb[12].mxu1 %vm700_vm13, %v10414_v23  ;;  %v2961_v9 = vsel %vm10494_vm5, %v7520_v25, %v2960_v48  ;;  %v2976_v56 = vrot.slane %v8899_v55, 5  ;;  %v8900_v60 = vld [vmem:[#allocation2 + $0x6c] sm:$0x1]  ;;  %v8901_v27 = vld [vmem:[#allocation2 + $0x74] sm:$0x1] }
 0x2be   :  { %8313 = vmatprep.mubr.msk.bf16.mxu1 %vm700_vm13, %v13715_v13  ;;  %v2952_v13 = vrot.slane %v8897_v2, 5  ;;  %v7627_v8 = vcombine.low %v2957_v31, %v2961_v9  ;;  %v2968_v34 = vrot.slane %v8900_v60, 5  ;;  %v2972_v37 = vrot.slane %v8901_v27, 5  ;;  %v2885_v17 = vld [vmem:[#allocation2 + $0x80] sm:$0xe]  ;;  %v13719_v9 = vld [vmem:[#allocation4_spill] sm:$0xff] }
 0x2bf   :  { %8448 = vmatmul.mubr.msk.bf16.gmra.mrb[24].mxu0 %vm700_vm13, %v10934_v51  ;;  %v7525_v31 = vrot.slane %v2885_v17, 9  ;;  %v2980_v10 = vrot.slane %v13719_v9, 5  ;;  %v13723_v55 = vld [vmem:[#allocation13_spill] sm:$0xff]  ;;  %v3245_v9 = vld [vmem:[#allocation2 + $0x20] sm:$0xe] }
 0x2c0   :  { %8451 = vmatprep.mubr.msk.bf16.mxu0 %vm700_vm13, %v10940_v29  ;;  %v2953_v57 = vsel %vm10494_vm5, %v7518_v39, %v2952_v13  ;;  %v2969_v48 = vsel %vm10494_vm5, %v7522_v63, %v2968_v34  ;;  %v2886_v13 = vld [vmem:[#allocation2 + $0x88] sm:$0xe]  ;;  %v13725_v63 = vld [vmem:[#allocation19_spill] sm:$0xff]  ;;  %v13727_v60 = vld [vmem:[#allocation5_spill] sm:$0xff] }
 0x2c1   :  { %v7626_v61 = vcombine.low %v2949_v54, %v2953_v57  ;;  %v7526_v57 = vrot.slane %v2886_v13, 9  ;;  %v2981_v36 = vsel %vm10494_vm5, %v7525_v31, %v2980_v10  ;;  %v13728_v34 = vld [vmem:[#allocation6_spill] sm:$0xff]  ;;  %v8903_v13 = vld [vmem:[#allocation2 + $0xc] sm:$0x1]  ;;  %v3247_v10 = vld [vmem:[#allocation2 + $0x30] sm:$0xe] }
 0x2c5   :  { %8314 = vmatmul.mubr.msk.bf16.vlgmr.msra.gmra.mrb[16].mxu1 %vm700_vm13, %v13718_v58  ;;  %v7523_v58 = vrot.slane %v2883_v32, 9  ;;  %v360_v32 = vld [vmem:[%s13491_s2 + $0x1c] sm:$0xf] }
 0x2c6   :  { %8330 = vmatpush3.bf16.msra.mxu1 %v4528_v53  ;;  %8317 = vmatprep.mubr.msk.bf16.mxu1 %vm700_vm13, %v7625_v7  ;;  %v8898_v53 = vld [vmem:[#allocation2 + $0x64] sm:$0x1]  ;;  %v7524_v7 = vrot.slane %v2884_v4, 9  ;;  %v13720_v4 = vld [vmem:[#allocation10_spill] sm:$0xff]  ;;  %v4792_v27 = vsel %vm725_vm0, %v360_v32, 0 }
 0x2c7   :  { %8452 = vmatmul.mubr.msk.bf16.gmra.mrb[28].mxu0 %vm700_vm13, %v10960_v1  ;;  %8845 = vmatprep.subr.msk.bf16.mxu1 %vm725_vm0, %v359_v30  ;;  %v2964_v6 = vrot.slane %v8898_v53, 5  ;;  %v2973_v2 = vsel %vm10494_vm5, %v7523_v58, %v2972_v37  ;;  %v13721_v53 = vld [vmem:[#allocation7_spill] sm:$0xff]  ;;  %v13729_v58 = vld [vmem:[#allocation12_spill] sm:$0xff]  ;;  %v366_v37 = vld [vmem:[%s13491_s2 + $0x34] sm:$0xf] }
 0x2c8   :  { %v2977_v25 = vsel %vm10494_vm5, %v7524_v7, %v2976_v56  ;;  %v13722_v7 = vld [vmem:[#allocation9_spill] sm:$0xff]  ;;  %v13724_v56 = vld [vmem:[#allocation15_spill] sm:$0xff] }
 0x2c9   :  { %v2965_v22 = vsel %vm10494_vm5, %v7521_v0, %v2964_v6  ;;  %v7629_v54 = vcombine.low %v2973_v2, %v2977_v25  ;;  %v4628_v6 = vsel %vm725_vm0, %v359_v30, 0  ;;  %v13726_v30 = vld [vmem:[#allocation20_spill] sm:$0xff] }
 0x2ca   :  { %v7628_v39 = vcombine.low %v2965_v22, %v2969_v48  ;;  %v3243_v22 = vld [vmem:[#allocation2 + $0x10] sm:$0xe]  ;;  %v3242_v25 = vld [vmem:[#allocation2 + $0x8] sm:$0xe]  ;;  %v8902_v48 = vld [vmem:[#allocation2 + $0x14] sm:$0x1] }
 0x2cb   :  { %v7528_v17 = vrot.slane %v3243_v22, 9  ;;  %v7527_v2 = vrot.slane %v3242_v25, 9  ;;  %v3249_v25 = vld [vmem:[#allocation2 + $0x40] sm:$0xe] }
 0x2cd   :  { %8318 = vmatmul.mubr.msk.bf16.gmra.mrb[20].mxu1 %vm700_vm13, %v7626_v61  ;;  %v2984_v61 = vrot.slane %v13720_v4, 5  ;;  %v3244_v4 = vld [vmem:[#allocation2 + $0x18] sm:$0xe] }
 0x2ce   :  { %8321 = vmatprep.mubr.msk.bf16.mxu1 %vm700_vm13, %v7627_v8 }
 0x2cf   :  { %v2985_v8 = vsel %vm10494_vm5, %v7526_v57, %v2984_v61 }
 0x2d0   :  { %v7630_v0 = vcombine.low %v2981_v36, %v2985_v8  ;;  %v7530_v36 = vrot.slane %v3245_v9, 9  ;;  %v8904_v8 = vld [vmem:[#allocation2 + $0x24] sm:$0x1]  ;;  %v7534_v9 = vrot.slane %v3249_v25, 9 }
 0x2d5   :  { %8322 = vmatmul.mubr.msk.bf16.gmra.mrb[24].mxu1 %vm700_vm13, %v7628_v39  ;;  %v3296_v39 = vrot.slane %v8902_v48, 5  ;;  %v3251_v48 = vld [vmem:[#allocation2 + $0x60] sm:$0xe] }
 0x2d6   :  { %8325 = vmatprep.mubr.msk.bf16.mxu1 %vm700_vm13, %v7629_v54  ;;  %v3292_v54 = vrot.slane %v8903_v13, 5 }
 0x2d7   :  { %v3297_v31 = vsel %vm10494_vm5, %v7528_v17, %v3296_v39 }
 0x2d8   :  { %v3293_v57 = vsel %vm10494_vm5, %v7527_v2, %v3292_v54  ;;  %v5452_v2 = vsel %vm725_vm0, %v366_v37, 0  ;;  %v3248_v54 = vld [vmem:[#allocation2 + $0x38] sm:$0xe] }
 0x2d9   :  { %v11044_v61 = vcombine.low %v3293_v57, %v3297_v31 }
 0x2dd   :  { %8326 = vmatmul.mubr.msk.bf16.gmra.mrb[28].mxu1 %vm700_vm13, %v7630_v0  ;;  %v3304_v0 = vrot.slane %v8904_v8, 5  ;;  %v7536_v8 = vrot.slane %v3251_v48, 9 }
 0x2de   :  { %8331 = vmatprep.mubr.msk.bf16.mxu1 %vm700_vm13, %v13721_v53  ;;  %v3246_v53 = vld [vmem:[#allocation2 + $0x28] sm:$0xe] }
 0x2e5   :  { %8332 = vmatmul.mubr.msk.bf16.vlgmr.msra.gmra.mrb[16].mxu1 %vm700_vm13, %v13722_v7 }
 0x2e6   :  { %8348 = vmatpush3.bf16.msra.mxu1 %v4628_v6  ;;  %8335 = vmatprep.mubr.msk.bf16.mxu1 %vm700_vm13, %v13723_v55  ;;  %v7532_v6 = vrot.slane %v3247_v10, 9  ;;  %v7529_v55 = vrot.slane %v3244_v4, 9  ;;  %v8908_v10 = vld [vmem:[#allocation2 + $0x44] sm:$0x1]  ;;  %v3250_v4 = vld [vmem:[#allocation2 + $0x58] sm:$0xe] }
 0x2e7   :  { %8846 = vmatprep.subr.msk.bf16.mxu1 %vm725_vm0, %v360_v32  ;;  %v8905_v32 = vld [vmem:[#allocation2 + $0x34] sm:$0x1]  ;;  %v3320_v57 = vrot.slane %v8908_v10, 5  ;;  %v3254_v10 = vld [vmem:[#allocation2 + $0x78] sm:$0xe] }
 0x2e8   :  { %v3312_v7 = vrot.slane %v8905_v32, 5 }
 0x2ea   :  { %v3313_v22 = vsel %vm10494_vm5, %v7532_v6, %v3312_v7  ;;  %v8910_v6 = vld [vmem:[#allocation2 + $0x3c] sm:$0x1]  ;;  %v7535_v7 = vrot.slane %v3250_v4, 9 }
 0x2eb   :  { %v3316_v32 = vrot.slane %v8910_v6, 5  ;;  %v8915_v6 = vld [vmem:[#allocation2 + $0x7c] sm:$0x1] }
 0x2ed   :  { %8336 = vmatmul.mubr.msk.bf16.gmra.mrb[20].mxu1 %vm700_vm13, %v13724_v56  ;;  %v8906_v56 = vld [vmem:[#allocation2 + $0x1c] sm:$0x1] }
 0x2ee   :  { %8339 = vmatprep.mubr.msk.bf16.mxu1 %vm700_vm13, %v13725_v63  ;;  %v3300_v63 = vrot.slane %v8906_v56, 5 }
 0x2f0   :  { %v3301_v17 = vsel %vm10494_vm5, %v7529_v55, %v3300_v63  ;;  %v8911_v55 = vld [vmem:[#allocation2 + $0x5c] sm:$0x1]  ;;  %v3321_v63 = vsel %vm10494_vm5, %v7534_v9, %v3320_v57  ;;  %v8913_v57 = vld [vmem:[#allocation2 + $0x84] sm:$0x1] }
 0x2f1   :  { %v3324_v56 = vrot.slane %v8911_v55, 5  ;;  %v3344_v4 = vrot.slane %v8913_v57, 5 }
 0x2f3   :  { %v3325_v25 = vsel %vm10494_vm5, %v7535_v7, %v3324_v56  ;;  %v3257_v56 = vld [vmem:[#allocation2 + $0x90] sm:$0xe] }
 0x2f5   :  { %8340 = vmatmul.mubr.msk.bf16.gmra.mrb[24].mxu1 %vm700_vm13, %v13726_v30  ;;  %v7531_v30 = vrot.slane %v3246_v53, 9  ;;  %v7533_v53 = vrot.slane %v3248_v54, 9 }
 0x2f6   :  { %8343 = vmatprep.mubr.msk.bf16.mxu1 %vm700_vm13, %v13727_v60  ;;  %v8907_v60 = vld [vmem:[#allocation2 + $0x2c] sm:$0x1] }
 0x2fd   :  { %8344 = vmatmul.mubr.msk.bf16.gmra.mrb[28].mxu1 %vm700_vm13, %v13728_v34  ;;  %v3308_v34 = vrot.slane %v8907_v60, 5  ;;  %v3253_v60 = vld [vmem:[#allocation2 + $0x70] sm:$0xe] }
 0x2fe   :  { %8349 = vmatprep.mubr.msk.bf16.mxu1 %vm700_vm13, %v13729_v58 }
 0x2ff   :  { %v3309_v13 = vsel %vm10494_vm5, %v7531_v30, %v3308_v34  ;;  %v3317_v34 = vsel %vm10494_vm5, %v7533_v53, %v3316_v32  ;;  %v7539_v53 = vrot.slane %v3254_v10, 9  ;;  %v3340_v32 = vrot.slane %v8915_v6, 5 }
 0x300   :  { %v11061_v31 = vcombine.low %v3309_v13, %v3313_v22  ;;  %v7658_v22 = vcombine.low %v3317_v34, %v3321_v63  ;;  %v8912_v13 = vld [vmem:[#allocation2 + $0x74] sm:$0x1]  ;;  %v3256_v34 = vld [vmem:[#allocation2 + $0x88] sm:$0xe] }
 0x301   :  { %v3336_v54 = vrot.slane %v8912_v13, 5 }
 0x305   :  { %8350 = vmatmul.mubr.msk.bf16.vlgmr.msra.gmra.mrb[16].mxu1 %vm700_vm13, %v10213_v12 }
 0x306   :  { %8366 = vmatpush3.bf16.msra.mxu1 %v4792_v27  ;;  %8353 = vmatprep.mubr.msk.bf16.mxu1 %vm700_vm13, %v10269_v24  ;;  %v3305_v27 = vsel %vm10494_vm5, %v7530_v36, %v3304_v0  ;;  %v365_v36 = vld [vmem:[%s13491_s2 + $0x30] sm:$0xf]  ;;  %v8909_v0 = vld [vmem:[#allocation2 + $0x64] sm:$0x1] }
 0x307   :  { %8851 = vmatprep.subr.msk.bf16.mxu1 %vm725_vm0, %v366_v37  ;;  %v11056_v39 = vcombine.low %v3301_v17, %v3305_v27  ;;  %v3328_v37 = vrot.slane %v8909_v0, 5  ;;  %v3255_v27 = vld [vmem:[#allocation2 + $0x80] sm:$0xe]  ;;  %v3252_v17 = vld [vmem:[#allocation2 + $0x68] sm:$0xe] }
 0x308   :  { %v7540_v9 = vrot.slane %v3255_v27, 9  ;;  %v8914_v0 = vld [vmem:[#allocation2 + $0x6c] sm:$0x1] }
 0x309   :  { %v3329_v30 = vsel %vm10494_vm5, %v7536_v8, %v3328_v37  ;;  %v7537_v8 = vrot.slane %v3252_v17, 9  ;;  %v3332_v37 = vrot.slane %v8914_v0, 5  ;;  %v8916_v17 = vld [vmem:[#allocation2 + $0x94] sm:$0x1]  ;;  %v367_v0 = vld [vmem:[%s13491_s2 + $0x38] sm:$0xf] }
 0x30a   :  { %v7659_v48 = vcombine.low %v3325_v25, %v3329_v30  ;;  %v3345_v55 = vsel %vm10494_vm5, %v7540_v9, %v3344_v4  ;;  %v7542_v25 = vrot.slane %v3257_v56, 9  ;;  %v3352_v13 = vrot.slane %v8916_v17, 5 }
 0x30b   :  { %v3333_v63 = vsel %vm10494_vm5, %v7537_v8, %v3332_v37  ;;  %v5552_v8 = vsel %vm725_vm0, %v365_v36, 0  ;;  %v5652_v5 = vsel %vm725_vm0, %v367_v0, 0 }
 0x30c   :  { %v3353_v9 = vsel %vm10494_vm5, %v7542_v25, %v3352_v13 }
 0x30d   :  { %8354 = vmatmul.mubr.msk.bf16.gmra.mrb[20].mxu1 %vm700_vm13, %v13708_v20 }
 0x30e   :  { %8357 = vmatprep.mubr.msk.bf16.mxu1 %vm700_vm13, %v13709_v11 }
 0x315   :  { %8358 = vmatmul.mubr.msk.bf16.gmra.mrb[24].mxu1 %vm700_vm13, %v13710_v44 }
 0x316   :  { %8361 = vmatprep.mubr.msk.bf16.mxu1 %vm700_vm13, %v10397_v18 }
 0x31d   :  { %8362 = vmatmul.mubr.msk.bf16.gmra.mrb[28].mxu1 %vm700_vm13, %v10414_v23 }
 0x31e   :  { %8367 = vmatprep.mubr.msk.bf16.mxu1 %vm700_vm13, %v11044_v61 }
 0x325   :  { %8368 = vmatmul.mubr.msk.bf16.vlgmr.msra.gmra.mrb[16].mxu1 %vm700_vm13, %v11056_v39 }
 0x326   :  { %8456 = vmatpush3.bf16.msra.mxu1 %v5452_v2  ;;  %8371 = vmatprep.mubr.msk.bf16.mxu1 %vm700_vm13, %v11061_v31  ;;  %v7538_v2 = vrot.slane %v3253_v60, 9  ;;  %v3341_v60 = vsel %vm10494_vm5, %v7539_v53, %v3340_v32 }
 0x327   :  { %8852 = vmatprep.subr.msk.bf16.mxu1 %vm725_vm0, %v365_v36  ;;  %v7661_v27 = vcombine.low %v3341_v60, %v3345_v55 }
 0x328   :  { %v3337_v7 = vsel %vm10494_vm5, %v7538_v2, %v3336_v54  ;;  %v7541_v2 = vrot.slane %v3256_v34, 9  ;;  %v8917_v54 = vld [vmem:[#allocation2 + $0x8c] sm:$0x1] }
 0x329   :  { %v7660_v30 = vcombine.low %v3333_v63, %v3337_v7  ;;  %v3348_v10 = vrot.slane %v8917_v54, 5 }
 0x32b   :  { %v3349_v57 = vsel %vm10494_vm5, %v7541_v2, %v3348_v10 }
 0x32c   :  { %v7662_v4 = vcombine.low %v3349_v57, %v3353_v9 }
 0x32d   :  { %8372 = vmatmul.mubr.msk.bf16.gmra.mrb[20].mxu1 %vm700_vm13, %v7658_v22 }
 0x32e   :  { %8375 = vmatprep.mubr.msk.bf16.mxu1 %vm700_vm13, %v7659_v48 }
 0x335   :  { %8376 = vmatmul.mubr.msk.bf16.gmra.mrb[24].mxu1 %vm700_vm13, %v7660_v30 }
 0x336   :  { %8379 = vmatprep.mubr.msk.bf16.mxu1 %vm700_vm13, %v7661_v27 }
 0x33d   :  { %8380 = vmatmul.mubr.msk.bf16.gmra.mrb[28].mxu1 %vm700_vm13, %v7662_v4 }
 0x33e   :  { %8457 = vmatprep.mubr.msk.bf16.mxu1 %vm700_vm13, %v11044_v61  ;;  %v368_v61 = vld [vmem:[%s13491_s2 + $0x3c] sm:$0xf] }
 0x33f   :  { %v5816_v55 = vsel %vm725_vm0, %v368_v61, 0 }
 0x345   :  { %8458 = vmatmul.mubr.msk.bf16.vlgmr.msra.gmra.mrb[32].mxu1 %vm700_vm13, %v11056_v39 }
 0x346   :  { %8474 = vmatpush3.bf16.msra.mxu1 %v5552_v8  ;;  %8461 = vmatprep.mubr.msk.bf16.mxu1 %vm700_vm13, %v11061_v31 }
 0x347   :  { %8853 = vmatprep.subr.msk.bf16.mxu1 %vm725_vm0, %v367_v0 }
 0x34d   :  { %8462 = vmatmul.mubr.msk.bf16.gmra.mrb[36].mxu1 %vm700_vm13, %v7658_v22 }
 0x34e   :  { %8465 = vmatprep.mubr.msk.bf16.mxu1 %vm700_vm13, %v7659_v48 }
 0x355   :  { %8466 = vmatmul.mubr.msk.bf16.gmra.mrb[40].mxu1 %vm700_vm13, %v7660_v30 }
 0x356   :  { %8469 = vmatprep.mubr.msk.bf16.mxu1 %vm700_vm13, %v7661_v27 }
 0x35d   :  { %8470 = vmatmul.mubr.msk.bf16.gmra.mrb[44].mxu1 %vm700_vm13, %v7662_v4 }
 0x35e   :  { %8475 = vmatprep.mubr.msk.bf16.mxu1 %vm700_vm13, %v13729_v58 }
 0x365   :  { %8476 = vmatmul.mubr.msk.bf16.vlgmr.msra.gmra.mrb[32].mxu1 %vm700_vm13, %v10213_v12 }
 0x366   :  { %8492 = vmatpush3.bf16.msra.mxu1 %v5652_v5  ;;  %8479 = vmatprep.mubr.msk.bf16.mxu1 %vm700_vm13, %v10269_v24 }
 0x367   :  { %8854 = vmatprep.subr.msk.bf16.mxu1 %vm725_vm0, %v368_v61  ;;  %vm6562_vm0 = vcmask 64544  }
 0x36d   :  { %8480 = vmatmul.mubr.msk.bf16.gmra.mrb[36].mxu1 %vm700_vm13, %v13708_v20 }
 0x36e   :  { %8483 = vmatprep.mubr.msk.bf16.mxu1 %vm700_vm13, %v13709_v11 }
 0x375   :  { %8484 = vmatmul.mubr.msk.bf16.gmra.mrb[40].mxu1 %vm700_vm13, %v13710_v44 }
 0x376   :  { %8487 = vmatprep.mubr.msk.bf16.mxu1 %vm700_vm13, %v10397_v18 }
 0x378   :  { %v11131_v58 = vpop.f32.mrb[0].mxu1 }
 0x379   :  { %v11133_v12 = vpop.f32.mrb[1].mxu1  ;;  %v5935_v18 = vsel %vm5931_vm14, %v11131_v58, 0.0 }
 0x37a   :  { %13730 = vst [vmem:[#allocation21_spill] sm:$0xff] %v11133_v12  ;;  %v11135_v24 = vpop.f32.mrb[2].mxu1  ;;  %v5932_v20 = vsel %vm5931_vm14, %v11133_v12, 0.0 }
 0x37b   :  { %13731 = vst [vmem:[#allocation18_spill] sm:$0xff] %v11135_v24  ;;  %v11137_v39 = vpop.f32.mrb[3].mxu1  ;;  %v5937_v36 = vsel %vm5931_vm14, %v11135_v24, 0.0 }
 0x37c   :  { %13732 = vst [vmem:[#allocation23_spill] sm:$0xff] %v11137_v39  ;;  %v5933_v11 = vsel %vm5931_vm14, %v11137_v39, 0.0 }
 0x37d   :  { %v5934_v31 = vadd.f32 %v5933_v11, %v5932_v20  ;;  %8488 = vmatmul.mubr.msk.bf16.gmra.mrb[44].mxu1 %vm700_vm13, %v10414_v23 }
 0x37e   :  { %8493 = vmatprep.mubr.msk.bf16.mxu1 %vm700_vm13, %v10738_v28 }
 0x37f   :  { %v5936_v44 = vadd.f32 %v5935_v18, %v5934_v31 }
 0x380   :  { %v11151_v22 = vpop.f32.mrb[4].mxu1 }
 0x381   :  { %13733 = vst [vmem:[#allocation22_spill] sm:$0xff] %v11151_v22  ;;  %v11153_v48 = vpop.f32.mrb[5].mxu1  ;;  %v5938_v37 = vadd.f32 %v5937_v36, %v5936_v44  ;;  %v5943_v25 = vsel %vm5931_vm14, %v11151_v22, 0.0 }
 0x382   :  { %13734 = vst [vmem:[#allocation24_spill] sm:$0xff] %v11153_v48  ;;  %v11155_v53 = vpop.f32.mrb[16].mxu0  ;;  %v5939_v23 = vsel %vm5931_vm14, %v11153_v48, 0.0  ;;  %v11159_v6 = vpop.f32.mrb[6].mxu1 }
 0x383   :  { %v11161_v32 = vpop.f32.mrb[17].mxu0  ;;  %v5940_v7 = vadd.f32 %v5939_v23, %v5938_v37  ;;  %v11163_v28 = vpop.f32.mrb[7].mxu1  ;;  %v6011_v2 = vsel %vm5931_vm14, %v11155_v53, 0.0 }
 0x384   :  { %13735 = vst [vmem:[#allocation27_spill] sm:$0xff] %v11163_v28  ;;  %v11166_v56 = vpop.f32.mrb[18].mxu0  ;;  %v5941_v63 = vsel %vm5931_vm14, %v11163_v28, 0.0  ;;  %v6008_v34 = vsel %vm5931_vm14, %v11161_v32, 0.0 }
 0x385   :  { %v11170_v30 = vpop.f32.mrb[19].mxu0  ;;  %v5942_v60 = vadd.f32 %v5941_v63, %v5940_v7  ;;  %8494 = vmatmul.mubr.msk.bf16.vlgmr.msra.gmra.mrb[32].mxu1 %vm700_vm13, %v10740_v46  ;;  %v5945_v46 = vsel %vm5931_vm14, %v11159_v6, 0.0  ;;  %v6013_v4 = vsel %vm5931_vm14, %v11166_v56, 0.0 }
 0x386   :  { %v6009_v27 = vsel %vm5931_vm14, %v11170_v30, 0.0  ;;  %8510 = vmatpush3.bf16.msra.mxu1 %v5816_v55  ;;  %8497 = vmatprep.mubr.msk.bf16.mxu1 %vm700_vm13, %v10742_v16 }
 0x387   :  { %v6010_v17 = vadd.f32 %v6009_v27, %v6008_v34  ;;  %v5944_v13 = vadd.f32 %v5943_v25, %v5942_v60 }
 0x388   :  { %v11186_v54 = vpop.f32.mrb[8].mxu1 }
 0x389   :  { %13736 = vst [vmem:[#allocation26_spill] sm:$0xff] %v11186_v54  ;;  %v6012_v10 = vadd.f32 %v6011_v2, %v6010_v17  ;;  %v11188_v9 = vpop.f32.mrb[9].mxu1  ;;  %v5946_v57 = vadd.f32 %v5945_v46, %v5944_v13  ;;  %v5951_v55 = vsel %vm5931_vm14, %v11186_v54, 0.0 }
 0x38a   :  { %v11192_v8 = vpop.f32.mrb[20].mxu0  ;;  %v5947_v16 = vsel %vm5931_vm14, %v11188_v9, 0.0  ;;  %v11196_v0 = vpop.f32.mrb[10].mxu1 }
 0x38b   :  { %13737 = vst [vmem:[#allocation25_spill] sm:$0xff] %v11196_v0  ;;  %v11198_v5 = vpop.f32.mrb[21].mxu0  ;;  %v6014_v61 = vadd.f32 %v6013_v4, %v6012_v10  ;;  %v5948_v20 = vadd.f32 %v5947_v16, %v5946_v57  ;;  %v11200_v11 = vpop.f32.mrb[11].mxu1  ;;  %v6019_v34 = vsel %vm5931_vm14, %v11192_v8, 0.0  ;;  %v5953_v27 = vsel %vm5931_vm14, %v11196_v0, 0.0 }
 0x38c   :  { %v6015_v31 = vsel %vm5931_vm14, %v11198_v5, 0.0  ;;  %v11204_v18 = vpop.f32.mrb[22].mxu0  ;;  %v5949_v44 = vsel %vm5931_vm14, %v11200_v11, 0.0 }
 0x38d   :  { %v6016_v36 = vadd.f32 %v6015_v31, %v6014_v61  ;;  %v11208_v37 = vpop.f32.mrb[23].mxu0  ;;  %v5950_v23 = vadd.f32 %v5949_v44, %v5948_v20  ;;  %8498 = vmatmul.mubr.msk.bf16.gmra.mrb[36].mxu1 %vm700_vm13, %v10761_v41  ;;  %v6021_v2 = vsel %vm5931_vm14, %v11204_v18, 0.0 }
 0x38e   :  { %v6017_v7 = vsel %vm5931_vm14, %v11208_v37, 0.0  ;;  %8501 = vmatprep.mubr.msk.bf16.mxu1 %vm700_vm13, %v10907_v40 }
 0x38f   :  { %v6018_v63 = vadd.f32 %v6017_v7, %v6016_v36  ;;  %v5952_v60 = vadd.f32 %v5951_v55, %v5950_v23 }
 0x390   :  { %v11222_v25 = vpop.f32.mrb[12].mxu1 }
 0x391   :  { %13738 = vst [vmem:[#allocation28_spill] sm:$0xff] %v11222_v25  ;;  %v6020_v41 = vadd.f32 %v6019_v34, %v6018_v63  ;;  %v11224_v17 = vpop.f32.mrb[13].mxu1  ;;  %v5954_v13 = vadd.f32 %v5953_v27, %v5952_v60  ;;  %v5959_v63 = vsel %vm5931_vm14, %v11222_v25, 0.0 }
 0x392   :  { %13739 = vst [vmem:[#allocation29_spill] sm:$0xff] %v11224_v17  ;;  %v11228_v46 = vpop.f32.mrb[24].mxu0  ;;  %v5955_v40 = vsel %vm5931_vm14, %v11224_v17, 0.0  ;;  %v11232_v10 = vpop.f32.mrb[14].mxu1 }
 0x393   :  { %13740 = vst [vmem:[#allocation32_spill] sm:$0xff] %v11228_v46  ;;  %13741 = vst [vmem:[#allocation30_spill] sm:$0xff] %v11232_v10  ;;  %v11234_v57 = vpop.f32.mrb[25].mxu0  ;;  %v6022_v4 = vadd.f32 %v6021_v2, %v6020_v41  ;;  %v5956_v16 = vadd.f32 %v5955_v40, %v5954_v13  ;;  %v11236_v61 = vpop.f32.mrb[15].mxu1  ;;  %v6027_v27 = vsel %vm5931_vm14, %v11228_v46, 0.0  ;;  %v5961_v41 = vsel %vm5931_vm14, %v11232_v10, 0.0 }
 0x394   :  { %13742 = vst [vmem:[#allocation31_spill] sm:$0xff] %v11236_v61  ;;  %v6023_v20 = vsel %vm5931_vm14, %v11234_v57, 0.0  ;;  %v11240_v31 = vpop.f32.mrb[26].mxu0  ;;  %v5957_v44 = vsel %vm5931_vm14, %v11236_v61, 0.0 }
 0x395   :  { %13743 = vst [vmem:[#allocation16_spill] sm:$0xff] %v11240_v31  ;;  %v6024_v36 = vadd.f32 %v6023_v20, %v6022_v4  ;;  %v11244_v23 = vpop.f32.mrb[27].mxu0  ;;  %v5958_v7 = vadd.f32 %v5957_v44, %v5956_v16  ;;  %8502 = vmatmul.mubr.msk.bf16.gmra.mrb[40].mxu1 %vm700_vm13, %v10934_v51  ;;  %v6029_v51 = vsel %vm5931_vm14, %v11240_v31, 0.0 }
 0x396   :  { %13744 = vst [vmem:[#allocation3_spill] sm:$0xff] %v11244_v23  ;;  %v6025_v55 = vsel %vm5931_vm14, %v11244_v23, 0.0  ;;  %8505 = vmatprep.mubr.msk.bf16.mxu1 %vm700_vm13, %v10940_v29 }
 0x397   :  { %v6026_v60 = vadd.f32 %v6025_v55, %v6024_v36  ;;  %v5960_v34 = vadd.f32 %v5959_v63, %v5958_v7  ;;  %v13749_v55 = vcombine.low %v10783_v45, %v10788_v43  ;;  %v13751_v45 = vcombine.low %v10810_v52, %v10815_v38  ;;  %v8918_v43 = vld [vmem:[%s13490_s0 + $0xb0] sm:$0xff] }
 0x398   :  { %6438 = vrot.lane.b32.xlu1 %v8918_v43, %s8983_s9  ;;  %v13752_v52 = vcombine.low %v10826_v62, %v10833_v3  ;;  %v13753_v38 = vcombine.low %v10845_v26, %v10852_v59  ;;  %v8924_v62 = vld [vmem:[%s13490_s0 + $0x100] sm:$0xff]  ;;  %v8925_v3 = vld [vmem:[%s13490_s0 + $0xf0] sm:$0xff]  ;;  %v13754_v26 = vcombine.low %v10856_v33, %v10863_v42 }
 0x399   :  { %v6028_v13 = vadd.f32 %v6027_v27, %v6026_v60  ;;  %v11258_v2 = vadd.f32 %v5961_v41, %v5960_v34  ;;  %v8926_v59 = vld [vmem:[%s13490_s0 + $0x1c0] sm:$0xff]  ;;  %v8929_v33 = vld [vmem:[%s13490_s0 + $0x1d0] sm:$0xff] }
 0x39a   :  { %v11262_v40 = vpop.f32.mrb[28].mxu0  ;;  %v8928_v42 = vld [vmem:[%s13490_s0 + $0x1e0] sm:$0xff] }
 0x39b   :  { %13745 = vst [vmem:[#allocation8_spill] sm:$0xff] %v11262_v40  ;;  %v11264_v4 = vpop.f32.mrb[29].mxu0  ;;  %v6030_v16 = vadd.f32 %v6029_v51, %v6028_v13  ;;  %v6035_v60 = vsel %vm5931_vm14, %v11262_v40, 0.0  ;;  %v8919_v13 = vld [vmem:[%s13490_s0 + $0x90] sm:$0xff]  ;;  %v8922_v51 = vld [vmem:[%s13490_s0 + $0xe0] sm:$0xff] }
 0x39c   :  { %13746 = vst [vmem:[#allocation11_spill] sm:$0xff] %v11264_v4  ;;  %v6031_v29 = vsel %vm5931_vm14, %v11264_v4, 0.0  ;;  %v11268_v20 = vpop.f32.mrb[30].mxu0  ;;  %6434 = vrot.lane.b32.xlu0 %v8919_v13, %s8983_s9 }
 0x39d   :  { %13747 = vst [vmem:[#allocation17_spill] sm:$0xff] %v11268_v20  ;;  %v6032_v44 = vadd.f32 %v6031_v29, %v6030_v16  ;;  %v11270_v36 = vpop.f32.mrb[31].mxu0  ;;  %8506 = vmatmul.mubr.msk.bf16.gmra.mrb[44].mxu1 %vm700_vm13, %v10960_v1  ;;  %v6037_v27 = vsel %vm5931_vm14, %v11268_v20, 0.0  ;;  %v13750_v1 = vcombine.low %v10792_v19, %v10801_v15  ;;  %v8920_v19 = vld [vmem:[%s13490_s0 + $0xc0] sm:$0xff]  ;;  %v8923_v16 = vld [vmem:[%s13490_s0 + $0xd0] sm:$0xff] }
 0x39e   :  { %13748 = vst [vmem:[#allocation14_spill] sm:$0xff] %v11270_v36  ;;  %v6033_v7 = vsel %vm5931_vm14, %v11270_v36, 0.0  ;;  %8511 = vmatprep.mubr.msk.bf16.mxu1 %vm700_vm13, %v13749_v55  ;;  %6440 = vrot.lane.b32.xlu1 %v8920_v19, %s8983_s9  ;;  %v8921_v15 = vld [vmem:[%s13490_s0 + $0xa0] sm:$0xff]  ;;  %v8927_v29 = vld [vmem:[%s13490_s0 + $0x1b0] sm:$0xff]  ;;  %v8938_v55 = vld [vmem:[%s13490_s0 + $0xd8] sm:$0x1] }
 0x39f   :  { %v6034_v63 = vadd.f32 %v6033_v7, %v6032_v44  ;;  %v8936_v44 = vld [vmem:[%s13490_s0 + $0xb8] sm:$0x1]  ;;  %v8937_v7 = vld [vmem:[%s13490_s0 + $0xc8] sm:$0x1] }
 0x3a0   :  { %6436 = vrot.lane.b32.xlu0 %v8921_v15, %s8983_s9 }
 0x3a1   :  { %v6036_v34 = vadd.f32 %v6035_v60, %v6034_v63  ;;  %v8939_v63 = vld [vmem:[%s13490_s0 + $0xe8] sm:$0x1]  ;;  %v8940_v60 = vld [vmem:[%s13490_s0 + $0xf8] sm:$0x1] }
 0x3a2   :  { %6444 = vrot.lane.b32.xlu1 %v8922_v51, %s8983_s9 }
 0x3a3   :  { %v11284_v41 = vadd.f32 %v6037_v27, %v6036_v34  ;;  %v8941_v34 = vld [vmem:[%s13490_s0 + $0x108] sm:$0x1]  ;;  %v8942_v27 = vld [vmem:[%s13490_s0 + $0x1b8] sm:$0x1] }
 0x3a4   :  { %6442 = vrot.lane.b32.xlu0 %v8923_v16, %s8983_s9 }
 0x3a5   :  { %8512 = vmatmul.mubr.msk.bf16.vlgmr.msra.gmra.mrb[32].mxu1 %vm700_vm13, %v13750_v1  ;;  %v8943_v1 = vld [vmem:[%s13490_s0 + $0x1c8] sm:$0x1] }
 0x3a6   :  { %8515 = vmatprep.mubr.msk.bf16.mxu1 %vm700_vm13, %v13751_v45  ;;  %6448 = vrot.lane.b32.xlu1 %v8924_v62, %s8983_s9  ;;  %v8944_v45 = vld [vmem:[%s13490_s0 + $0x1d8] sm:$0x1] }
 0x3a8   :  { %6446 = vrot.lane.b32.xlu0 %v8925_v3, %s8983_s9 }
 0x3aa   :  { %6452 = vrot.lane.b32.xlu1 %v8926_v59, %s8983_s9 }
 0x3ac   :  { %6450 = vrot.lane.b32.xlu0 %v8927_v29, %s8983_s9 }
 0x3ad   :  { %8516 = vmatmul.mubr.msk.bf16.gmra.mrb[36].mxu1 %vm700_vm13, %v13752_v52 }
 0x3ae   :  { %8519 = vmatprep.mubr.msk.bf16.mxu1 %vm700_vm13, %v13753_v38  ;;  %6456 = vrot.lane.b32.xlu1 %v8928_v42, %s8983_s9 }
 0x3b0   :  { %6454 = vrot.lane.b32.xlu0 %v8929_v33, %s8983_s9 }
 0x3b2   :  { %6460 = vrot.lane.b32.xlu1 %v8930_v21, %s8983_s9 }
 0x3b4   :  { %6458 = vrot.lane.b32.xlu0 %v8931_v50, %s8983_s9 }
 0x3b5   :  { %8520 = vmatmul.mubr.msk.bf16.gmra.mrb[40].mxu1 %vm700_vm13, %v13754_v26 }
 0x3b6   :  { %8523 = vmatprep.mubr.msk.bf16.mxu1 %vm700_vm13, %v7749_v47  ;;  %v11373_v47 = vld [vmem:[%s13490_s0 + $0x220] sm:$0xff] }
 0x3b7   :  { %6464 = vrot.lane.b32.xlu1 %v11373_v47, %s8983_s9 }
 0x3b8   :  { %6462 = vrot.lane.b32.xlu0 %v8933_v49, %s8983_s9 }
 0x3bb   :  { %6629 = vrot.lane.b32.xlu1 %v8934_v35, %s8984_s16 }
 0x3bc   :  { %6627 = vrot.lane.b32.xlu0 %v8919_v13, %s8984_s16 }
 0x3bd   :  { %8524 = vmatmul.mubr.msk.bf16.gmra.mrb[44].mxu1 %vm700_vm13, %v7750_v14  ;;  %v8935_v14 = vld [vmem:[%s13490_s0 + $0xa8] sm:$0x1]  ;;  %vm6723_vm13 = vcmask 97345  }
 0x3bf   :  { %6633 = vrot.lane.b32.xlu1 %v8935_v14, %s8984_s16 }
 0x3c0   :  { %6631 = vrot.lane.b32.xlu0 %v8921_v15, %s8984_s16 }
 0x3c3   :  { %6637 = vrot.lane.b32.xlu1 %v8936_v44, %s8984_s16 }
 0x3c4   :  { %6635 = vrot.lane.b32.xlu0 %v8918_v43, %s8984_s16  ;;  %v8945_v43 = vld [vmem:[%s13490_s0 + $0x1e8] sm:$0x1] }
 0x3c7   :  { %6641 = vrot.lane.b32.xlu1 %v8937_v7, %s8984_s16 }
 0x3c8   :  { %6639 = vrot.lane.b32.xlu0 %v8920_v19, %s8984_s16  ;;  %v8946_v19 = vld [vmem:[%s13490_s0 + $0x1f8] sm:$0x1] }
 0x3cb   :  { %6645 = vrot.lane.b32.xlu1 %v8938_v55, %s8984_s16 }
 0x3cc   :  { %6643 = vrot.lane.b32.xlu0 %v8923_v16, %s8984_s16 }
 0x3cf   :  { %6649 = vrot.lane.b32.xlu1 %v8939_v63, %s8984_s16  ;;  %v8949_v63 = vld [vmem:[%s13490_s0 + $0x228] sm:$0x1] }
 0x3d0   :  { %6647 = vrot.lane.b32.xlu0 %v8922_v51, %s8984_s16 }
 0x3d3   :  { %6653 = vrot.lane.b32.xlu1 %v8940_v60, %s8984_s16 }
 0x3d4   :  { %6651 = vrot.lane.b32.xlu0 %v8925_v3, %s8984_s16 }
 0x3d7   :  { %6657 = vrot.lane.b32.xlu1 %v8941_v34, %s8984_s16 }
 0x3d8   :  { %6655 = vrot.lane.b32.xlu0 %v8924_v62, %s8984_s16  ;;  %v8947_v62 = vld [vmem:[%s13490_s0 + $0x208] sm:$0x1] }
 0x3db   :  { %6661 = vrot.lane.b32.xlu1 %v8942_v27, %s8984_s16 }
 0x3dc   :  { %6659 = vrot.lane.b32.xlu0 %v8927_v29, %s8984_s16 }
 0x3df   :  { %6665 = vrot.lane.b32.xlu1 %v8943_v1, %s8984_s16 }
 0x3e0   :  { %6663 = vrot.lane.b32.xlu0 %v8926_v59, %s8984_s16 }
 0x3e3   :  { %6669 = vrot.lane.b32.xlu1 %v8944_v45, %s8984_s16 }
 0x3e4   :  { %6667 = vrot.lane.b32.xlu0 %v8929_v33, %s8984_s16  ;;  %v8948_v33 = vld [vmem:[%s13490_s0 + $0x218] sm:$0x1] }
 0x3e7   :  { %6673 = vrot.lane.b32.xlu1 %v8945_v43, %s8984_s16 }
 0x3e8   :  { %6671 = vrot.lane.b32.xlu0 %v8928_v42, %s8984_s16 }
 0x3eb   :  { %6677 = vrot.lane.b32.xlu1 %v8946_v19, %s8984_s16 }
 0x3ec   :  { %6675 = vrot.lane.b32.xlu0 %v8931_v50, %s8984_s16 }
 0x3ef   :  { %6681 = vrot.lane.b32.xlu1 %v8947_v62, %s8984_s16 }
 0x3f0   :  { %6679 = vrot.lane.b32.xlu0 %v8930_v21, %s8984_s16 }
 0x3f3   :  { %6685 = vrot.lane.b32.xlu1 %v8948_v33, %s8984_s16 }
 0x3f4   :  { %6683 = vrot.lane.b32.xlu0 %v8933_v49, %s8984_s16 }
 0x3f7   :  { %6689 = vrot.lane.b32.xlu1 %v8949_v63, %s8984_s16 }
 0x3f8   :  { %v11441_v13 = vpop.f32.mrb[16].mxu1  ;;  %6687 = vrot.lane.b32.xlu0 %v11373_v47, %s8984_s16 }
 0x3f9   :  { %13755 = vst [vmem:[#allocation4_spill] sm:$0xff] %v11441_v13  ;;  %v11448_v15 = vpop.f32.mrb[17].mxu1  ;;  %v5973_v26 = vsel %vm5931_vm14, %v11441_v13, 0.0 }
 0x3fa   :  { %13756 = vst [vmem:[#allocation10_spill] sm:$0xff] %v11448_v15  ;;  %v11450_v52 = vpop.f32.mrb[18].mxu1  ;;  %v5970_v51 = vsel %vm5931_vm14, %v11448_v15, 0.0 }
 0x3fb   :  { %13757 = vst [vmem:[#allocation7_spill] sm:$0xff] %v11450_v52  ;;  %v11452_v38 = vpop.f32.mrb[19].mxu1  ;;  %v5975_v29 = vsel %vm5931_vm14, %v11450_v52, 0.0 }
 0x3fc   :  { %13758 = vst [vmem:[#allocation9_spill] sm:$0xff] %v11452_v38  ;;  %v5971_v16 = vsel %vm5931_vm14, %v11452_v38, 0.0 }
 0x3fd   :  { %v5972_v3 = vadd.f32 %v5971_v16, %v5970_v51 }
 0x3ff   :  { %v5974_v59 = vadd.f32 %v5973_v26, %v5972_v3 }
 0x400   :  { %v11467_v42 = vpop.f32.mrb[20].mxu1 }
 0x401   :  { %v11474_v50 = vpop.f32.mrb[21].mxu1  ;;  %v5976_v21 = vadd.f32 %v5975_v29, %v5974_v59  ;;  %v5981_v60 = vsel %vm5931_vm14, %v11467_v42, 0.0 }
 0x402   :  { %v5977_v35 = vsel %vm5931_vm14, %v11474_v50, 0.0  ;;  %v11478_v14 = vpop.f32.mrb[22].mxu1 }
 0x403   :  { %v5978_v44 = vadd.f32 %v5977_v35, %v5976_v21  ;;  %v11480_v7 = vpop.f32.mrb[23].mxu1  ;;  %v5983_v27 = vsel %vm5931_vm14, %v11478_v14, 0.0  ;;  %v5963_v21 = vrot.slane %v11258_v2, 4 }
 0x404   :  { %v5979_v55 = vsel %vm5931_vm14, %v11480_v7, 0.0 }
 0x405   :  { %v5980_v49 = vadd.f32 %v5979_v55, %v5978_v44 }
 0x407   :  { %v5982_v34 = vadd.f32 %v5981_v60, %v5980_v49  ;;  %v6039_v49 = vrot.slane %v11284_v41, 4 }
 0x408   :  { %v11494_v1 = vpop.f32.mrb[24].mxu1 }
 0x409   :  { %v11496_v45 = vpop.f32.mrb[25].mxu1  ;;  %v5984_v43 = vadd.f32 %v5983_v27, %v5982_v34  ;;  %v5989_v26 = vsel %vm5931_vm14, %v11494_v1, 0.0 }
 0x40a   :  { %v5985_v19 = vsel %vm5931_vm14, %v11496_v45, 0.0  ;;  %v11500_v51 = vpop.f32.mrb[26].mxu1 }
 0x40b   :  { %v5986_v16 = vadd.f32 %v5985_v19, %v5984_v43  ;;  %v11502_v47 = vpop.f32.mrb[27].mxu1  ;;  %v5991_v29 = vsel %vm5931_vm14, %v11500_v51, 0.0  ;;  %v5964_v43 = vadd.f32 %v5963_v21, %v11258_v2 }
 0x40c   :  { %v5987_v62 = vsel %vm5931_vm14, %v11502_v47, 0.0 }
 0x40d   :  { %v5988_v3 = vadd.f32 %v5987_v62, %v5986_v16  ;;  %v6040_v62 = vadd.f32 %v6039_v49, %v11284_v41 }
 0x40f   :  { %v5990_v59 = vadd.f32 %v5989_v26, %v5988_v3 }
 0x410   :  { %v11510_v33 = vpop.f32.mrb[28].mxu1 }
 0x411   :  { %v11513_v35 = vpop.f32.mrb[29].mxu1  ;;  %v5992_v44 = vadd.f32 %v5991_v29, %v5990_v59  ;;  %v5997_v16 = vsel %vm5931_vm14, %v11510_v33, 0.0  ;;  %v5965_v59 = vrot.slane %v5964_v43, 2 }
 0x412   :  { %v5993_v55 = vsel %vm5931_vm14, %v11513_v35, 0.0  ;;  %v11517_v63 = vpop.f32.mrb[30].mxu1 }
 0x413   :  { %v5994_v60 = vadd.f32 %v5993_v55, %v5992_v44  ;;  %v11520_v34 = vpop.f32.mrb[31].mxu1  ;;  %v5999_v26 = vsel %vm5931_vm14, %v11517_v63, 0.0  ;;  %v6041_v44 = vrot.slane %v6040_v62, 2  ;;  %v5966_v20 = vadd.f32 %v5965_v59, %v5964_v43 }
 0x414   :  { %v5995_v27 = vsel %vm5931_vm14, %v11520_v34, 0.0 }
 0x415   :  { %v5996_v19 = vadd.f32 %v5995_v27, %v5994_v60  ;;  %v6042_v36 = vadd.f32 %v6041_v44, %v6040_v62  ;;  %v5967_v31 = vrot.slane %v5966_v20, 1 }
 0x417   :  { %v5998_v3 = vadd.f32 %v5997_v16, %v5996_v19  ;;  %v6043_v21 = vrot.slane %v6042_v36, 1  ;;  %v5968_v27 = vadd.f32 %v5967_v31, %v5966_v20 }
 0x419   :  { %v6000_v29 = vadd.f32 %v5999_v26, %v5998_v3  ;;  %v6044_v23 = vadd.f32 %v6043_v21, %v6042_v36 }
 0x41b   :  { %v6001_v55 = vrot.slane %v6000_v29, 4 }
 0x41d   :  { %v6002_v40 = vadd.f32 %v6001_v55, %v6000_v29 }
 0x41f   :  { %v6003_v4 = vrot.slane %v6002_v40, 2 }
 0x421   :  { %v6004_v2 = vadd.f32 %v6003_v4, %v6002_v40 }
 0x423   :  { %v6005_v60 = vrot.slane %v6004_v2, 1 }
 0x425   :  { %v6006_v46 = vadd.f32 %v6005_v60, %v6004_v2 }
 0x427   :  { %v6007_v41 = vadd.f32 %v6006_v46, %v5968_v27 }
 0x429   :  { %v11530_v49 = vadd.f32 %v6044_v23, %v6007_v41 }
 0x478   :  { %v11532_v19 = vpop.f32.mrb[32].mxu1 }
 0x479   :  { %13759 = vst [vmem:[#allocation13_spill] sm:$0xff] %v11532_v19  ;;  %v11534_v16 = vpop.f32.mrb[33].mxu1  ;;  %v6049_v46 = vsel %vm5931_vm14, %v11532_v19, 0.0 }
 0x47a   :  { %13760 = vst [vmem:[#allocation15_spill] sm:$0xff] %v11534_v16  ;;  %v11536_v3 = vpop.f32.mrb[34].mxu1  ;;  %v6046_v62 = vsel %vm5931_vm14, %v11534_v16, 0.0 }
 0x47b   :  { %13761 = vst [vmem:[#allocation19_spill] sm:$0xff] %v11536_v3  ;;  %v11538_v43 = vpop.f32.mrb[35].mxu1  ;;  %v6051_v4 = vsel %vm5931_vm14, %v11536_v3, 0.0  ;;  %v11706_v3 = vld [vmem:[%s13490_s0 + $0x170] sm:$0xff] }
 0x47c   :  { %13762 = vst [vmem:[#allocation20_spill] sm:$0xff] %v11538_v43  ;;  %v6047_v40 = vsel %vm5931_vm14, %v11538_v43, 0.0 }
 0x47d   :  { %v6048_v31 = vadd.f32 %v6047_v40, %v6046_v62 }
 0x47f   :  { %v6050_v23 = vadd.f32 %v6049_v46, %v6048_v31  ;;  %v11571_v46 = vld [vmem:[%s13490_s0 + $0x20] sm:$0xff] }
 0x480   :  { %v11548_v20 = vpop.f32.mrb[36].mxu1  ;;  %6888 = vrot.lane.b32.xlu1 %v11571_v46, %s8985_s20 }
 0x481   :  { %13763 = vst [vmem:[#allocation5_spill] sm:$0xff] %v11548_v20  ;;  %v11550_v36 = vpop.f32.mrb[37].mxu1  ;;  %v6052_v26 = vadd.f32 %v6051_v4, %v6050_v23  ;;  %v6057_v60 = vsel %vm5931_vm14, %v11548_v20, 0.0  ;;  %v11578_v23 = vld [vmem:[%s13490_s0 + $0x10] sm:$0xff]  ;;  %v11637_v20 = vld [vmem:[%s13490_s0 + $0x80] sm:$0xff] }
 0x482   :  { %13764 = vst [vmem:[#allocation6_spill] sm:$0xff] %v11550_v36  ;;  %v6053_v59 = vsel %vm5931_vm14, %v11550_v36, 0.0  ;;  %v11554_v29 = vpop.f32.mrb[38].mxu1  ;;  %6886 = vrot.lane.b32.xlu0 %v11578_v23, %s8985_s20 }
 0x483   :  { %13765 = vst [vmem:[#allocation12_spill] sm:$0xff] %v11554_v29  ;;  %v6054_v44 = vadd.f32 %v6053_v59, %v6052_v26  ;;  %v11556_v55 = vpop.f32.mrb[39].mxu1  ;;  %v6059_v41 = vsel %vm5931_vm14, %v11554_v29, 0.0 }
 0x484   :  { %13766 = vst [vmem:[#allocation33_spill] sm:$0xff] %v11556_v55  ;;  %v6055_v2 = vsel %vm5931_vm14, %v11556_v55, 0.0  ;;  %v11662_v55 = vld [vmem:[%s13490_s0 + $0x130] sm:$0xff] }
 0x485   :  { %v6056_v21 = vadd.f32 %v6055_v2, %v6054_v44 }
 0x487   :  { %v6058_v27 = vadd.f32 %v6057_v60, %v6056_v21  ;;  %v11593_v60 = vld [vmem:[%s13490_s0 + $0x40] sm:$0xff] }
 0x488   :  { %v11564_v62 = vpop.f32.mrb[40].mxu1  ;;  %6892 = vrot.lane.b32.xlu1 %v11593_v60, %s8985_s20 }
 0x489   :  { %13767 = vst [vmem:[#allocation34_spill] sm:$0xff] %v11564_v62  ;;  %v11566_v40 = vpop.f32.mrb[41].mxu1  ;;  %v6060_v31 = vadd.f32 %v6059_v41, %v6058_v27  ;;  %v11600_v27 = vld [vmem:[%s13490_s0 + $0x30] sm:$0xff]  ;;  %v6065_v41 = vsel %vm5931_vm14, %v11564_v62, 0.0 }
 0x48a   :  { %13768 = vst [vmem:[#allocation35_spill] sm:$0xff] %v11566_v40  ;;  %v6061_v4 = vsel %vm5931_vm14, %v11566_v40, 0.0  ;;  %v11584_v26 = vpop.f32.mrb[42].mxu1  ;;  %6890 = vrot.lane.b32.xlu0 %v11600_v27, %s8985_s20  ;;  %v11615_v40 = vld [vmem:[%s13490_s0 + $0x60] sm:$0xff] }
 0x48b   :  { %13769 = vst [vmem:[#allocation36_spill] sm:$0xff] %v11584_v26  ;;  %v6062_v59 = vadd.f32 %v6061_v4, %v6060_v31  ;;  %v11586_v44 = vpop.f32.mrb[43].mxu1  ;;  %v6067_v4 = vsel %vm5931_vm14, %v11584_v26, 0.0 }
 0x48c   :  { %13770 = vst [vmem:[#allocation37_spill] sm:$0xff] %v11586_v44  ;;  %v6063_v2 = vsel %vm5931_vm14, %v11586_v44, 0.0  ;;  %6896 = vrot.lane.b32.xlu1 %v11615_v40, %s8985_s20 }
 0x48d   :  { %v6064_v21 = vadd.f32 %v6063_v2, %v6062_v59 }
 0x48f   :  { %v6066_v31 = vadd.f32 %v6065_v41, %v6064_v21  ;;  %v11622_v21 = vld [vmem:[%s13490_s0 + $0x50] sm:$0xff] }
 0x490   :  { %v11608_v59 = vpop.f32.mrb[44].mxu1  ;;  %6894 = vrot.lane.b32.xlu0 %v11622_v21, %s8985_s20  ;;  %6900 = vrot.lane.b32.xlu1 %v11637_v20, %s8985_s20 }
 0x491   :  { %13771 = vst [vmem:[#allocation38_spill] sm:$0xff] %v11608_v59  ;;  %v11610_v2 = vpop.f32.mrb[45].mxu1  ;;  %v6068_v44 = vadd.f32 %v6067_v4, %v6066_v31 }
 0x492   :  { %13772 = vst [vmem:[#allocation39_spill] sm:$0xff] %v11610_v2  ;;  %v6069_v41 = vsel %vm5931_vm14, %v11610_v2, 0.0  ;;  %v11628_v31 = vpop.f32.mrb[46].mxu1  ;;  %v11644_v2 = vld [vmem:[%s13490_s0 + $0x70] sm:$0xff] }
 0x493   :  { %13773 = vst [vmem:[#allocation40_spill] sm:$0xff] %v11628_v31  ;;  %v6070_v4 = vadd.f32 %v6069_v41, %v6068_v44  ;;  %v11630_v26 = vpop.f32.mrb[47].mxu1  ;;  %v6073_v44 = vsel %vm5931_vm14, %v11608_v59, 0.0  ;;  %v6075_v41 = vsel %vm5931_vm14, %v11628_v31, 0.0  ;;  %v6435_v31 = vpop.permute.xlu0 %6434  ;;  %v11684_v59 = vld [vmem:[%s13490_s0 + $0x150] sm:$0xff] }
 0x494   :  { %13774 = vst [vmem:[#allocation41_spill] sm:$0xff] %v11630_v26  ;;  %v6071_v62 = vsel %vm5931_vm14, %v11630_v26, 0.0  ;;  %6898 = vrot.lane.b32.xlu0 %v11644_v2, %s8985_s20  ;;  %v11655_v26 = vld [vmem:[%s13490_s0 + $0x140] sm:$0xff]  ;;  %6482 = vst.msk [vmem:[%s13492_s5] sm:$0xff] %vm5931_vm14, %v6435_v31 }
 0x495   :  { %v6072_v29 = vadd.f32 %v6071_v62, %v6070_v4  ;;  %6904 = vrot.lane.b32.xlu1 %v11655_v26, %s8985_s20 }
 0x497   :  { %v6074_v62 = vadd.f32 %v6073_v44, %v6072_v29  ;;  %v6439_v44 = vpop.permute.xlu1 %6438  ;;  %v6437_v31 = vpop.permute.xlu0 %6436 }
 0x498   :  { %6902 = vrot.lane.b32.xlu0 %v11662_v55, %s8985_s20  ;;  %6484 = vst.msk [vmem:[%s13492_s5 + $0x10] sm:$0xff] %vm5931_vm14, %v6439_v44  ;;  %6483 = vst.msk [vmem:[%s13492_s5 + $0x8] sm:$0xff] %vm5931_vm14, %v6437_v31 }
 0x499   :  { %v6076_v4 = vadd.f32 %v6075_v41, %v6074_v62  ;;  %v11677_v41 = vld [vmem:[%s13490_s0 + $0x160] sm:$0xff] }
 0x49a   :  { %6908 = vrot.lane.b32.xlu1 %v11677_v41, %s8985_s20 }
 0x49b   :  { %v6077_v29 = vrot.slane %v6076_v4, 4  ;;  %v6441_v36 = vpop.permute.xlu1 %6440  ;;  %v6443_v31 = vpop.permute.xlu0 %6442 }
 0x49c   :  { %6906 = vrot.lane.b32.xlu0 %v11684_v59, %s8985_s20  ;;  %6485 = vst.msk [vmem:[%s13492_s5 + $0x18] sm:$0xff] %vm5931_vm14, %v6441_v36  ;;  %6486 = vst.msk [vmem:[%s13492_s5 + $0x20] sm:$0xff] %vm5931_vm14, %v6443_v31 }
 0x49d   :  { %v6078_v62 = vadd.f32 %v6077_v29, %v6076_v4  ;;  %v11699_v29 = vld [vmem:[%s13490_s0 + $0x180] sm:$0xff] }
 0x49e   :  { %13775 = vst [vmem:[#allocation42_spill] sm:$0xff] %v11699_v29  ;;  %6912 = vrot.lane.b32.xlu1 %v11699_v29, %s8985_s20  ;;  %v11728_v29 = vld [vmem:[%s13490_s0 + $0x190] sm:$0xff] }
 0x49f   :  { %v6079_v44 = vrot.slane %v6078_v62, 2  ;;  %v6445_v19 = vpop.permute.xlu1 %6444  ;;  %13777 = vst [vmem:[#allocation44_spill] sm:$0xff] %v11728_v29 }
 0x4a0   :  { %6910 = vrot.lane.b32.xlu0 %v11706_v3, %s8985_s20  ;;  %6487 = vst.msk [vmem:[%s13492_s5 + $0x28] sm:$0xff] %vm5931_vm14, %v6445_v19 }
 0x4a1   :  { %v6080_v4 = vadd.f32 %v6079_v44, %v6078_v62  ;;  %v11721_v44 = vld [vmem:[%s13490_s0 + $0x1a0] sm:$0xff] }
 0x4a2   :  { %13776 = vst [vmem:[#allocation43_spill] sm:$0xff] %v11721_v44  ;;  %6916 = vrot.lane.b32.xlu1 %v11721_v44, %s8985_s20  ;;  %v8966_v44 = vld [vmem:[%s13490_s0 + $0x18] sm:$0x1] }
 0x4a3   :  { %v6081_v36 = vrot.slane %v6080_v4, 1  ;;  %v6449_v31 = vpop.permute.xlu1 %6448 }
 0x4a4   :  { %6914 = vrot.lane.b32.xlu0 %v11728_v29, %s8985_s20  ;;  %6489 = vst.msk [vmem:[%s13492_s5 + $0x38] sm:$0xff] %vm5931_vm14, %v6449_v31 }
 0x4a5   :  { %v6082_v62 = vadd.f32 %v6081_v36, %v6080_v4  ;;  %v6447_v4 = vpop.permute.xlu0 %6446 }
 0x4a6   :  { %6488 = vst.msk [vmem:[%s13492_s5 + $0x30] sm:$0xff] %vm5931_vm14, %v6447_v4  ;;  %7082 = vrot.lane.b32.xlu1 %v8966_v44, %s8986_s19  ;;  %v8967_v44 = vld [vmem:[%s13490_s0 + $0x28] sm:$0x1] }
 0x4a7   :  { %v6083_v19 = vadd.f32 %v6082_v62, %v11530_v49  ;;  %v6453_v31 = vpop.permute.xlu1 %6452 }
 0x4a8   :  { %7080 = vrot.lane.b32.xlu0 %v11578_v23, %s8986_s19  ;;  %6491 = vst.msk [vmem:[%s13492_s5 + $0x48] sm:$0xff] %vm5931_vm14, %v6453_v31 }
 0x4a9   :  { %v11741_v36 = vmul.f32 0.001953125, %v6083_v19  ;;  %v6451_v4 = vpop.permute.xlu0 %6450 }
 0x4aa   :  { %6490 = vst.msk [vmem:[%s13492_s5 + $0x40] sm:$0xff] %vm5931_vm14, %v6451_v4  ;;  %7086 = vrot.lane.b32.xlu1 %v8967_v44, %s8986_s19 }
 0x4ab   :  { %v6086_v49 = vsub.f32 %v11133_v12, %v11741_v36  ;;  %v6087_v62 = vsub.f32 %v11137_v39, %v11741_v36  ;;  %v6088_v23 = vsub.f32 %v11131_v58, %v11741_v36  ;;  %v6089_v19 = vsub.f32 %v11135_v24, %v11741_v36  ;;  %v6457_v12 = vpop.permute.xlu1 %6456 }
 0x4ac   :  { %7084 = vrot.lane.b32.xlu0 %v11571_v46, %s8986_s19  ;;  %6493 = vst.msk [vmem:[%s13492_s5 + $0x58] sm:$0xff] %vm5931_vm14, %v6457_v12  ;;  %v6090_v46 = vsub.f32 %v11153_v48, %v11741_v36  ;;  %v6091_v12 = vsub.f32 %v11163_v28, %v11741_v36  ;;  %v6156_v28 = vsub.f32 %v11448_v15, %v11741_v36 }
 0x4ad   :  { %v6102_v31 = vmul.f32 %v6086_v49, %v6086_v49  ;;  %v6103_v39 = vmul.f32 %v6087_v62, %v6087_v62  ;;  %v6455_v29 = vpop.permute.xlu0 %6454  ;;  %v6104_v4 = vmul.f32 %v6088_v23, %v6088_v23  ;;  %v8968_v49 = vld [vmem:[%s13490_s0 + $0x38] sm:$0x1]  ;;  %v6105_v62 = vmul.f32 %v6089_v19, %v6089_v19 }
 0x4ae   :  { %6492 = vst.msk [vmem:[%s13492_s5 + $0x50] sm:$0xff] %vm5931_vm14, %v6455_v29  ;;  %7090 = vrot.lane.b32.xlu1 %v8968_v49, %s8986_s19  ;;  %v6106_v19 = vmul.f32 %v6090_v46, %v6090_v46  ;;  %v6101_v15 = vsub.f32 %v11232_v10, %v11741_v36 }
 0x4af   :  { %v6118_v44 = vsel %vm5931_vm14, %v6102_v31, 0.0  ;;  %v6119_v29 = vsel %vm5931_vm14, %v6103_v39, 0.0  ;;  %v6461_v24 = vpop.permute.xlu1 %6460  ;;  %v6121_v31 = vsel %vm5931_vm14, %v6104_v4, 0.0  ;;  %v8969_v39 = vld [vmem:[%s13490_s0 + $0x48] sm:$0x1]  ;;  %v6094_v4 = vsub.f32 %v11188_v9, %v11741_v36 }
 0x4b0   :  { %7088 = vrot.lane.b32.xlu0 %v11600_v27, %s8986_s19  ;;  %v6120_v23 = vadd.f32 %v6119_v29, %v6118_v44  ;;  %6495 = vst.msk [vmem:[%s13492_s5 + $0x68] sm:$0xff] %vm5931_vm14, %v6461_v24  ;;  %v6092_v27 = vsub.f32 %v11151_v22, %v11741_v36  ;;  %v6093_v24 = vsub.f32 %v11159_v6, %v11741_v36  ;;  %v6123_v44 = vsel %vm5931_vm14, %v6105_v62, 0.0 }
 0x4b1   :  { %v6459_v48 = vpop.permute.xlu0 %6458  ;;  %v6125_v62 = vsel %vm5931_vm14, %v6106_v19, 0.0  ;;  %v6099_v19 = vsub.f32 %v11236_v61, %v11741_v36  ;;  %v6159_v61 = vsub.f32 %v11450_v52, %v11741_v36 }
 0x4b2   :  { %6494 = vst.msk [vmem:[%s13492_s5 + $0x60] sm:$0xff] %vm5931_vm14, %v6459_v48  ;;  %7094 = vrot.lane.b32.xlu1 %v8969_v39, %s8986_s19  ;;  %v6122_v49 = vadd.f32 %v6121_v31, %v6120_v23  ;;  %v6107_v48 = vmul.f32 %v6091_v12, %v6091_v12  ;;  %v6108_v12 = vmul.f32 %v6092_v27, %v6092_v27  ;;  %v8970_v31 = vld [vmem:[%s13490_s0 + $0x58] sm:$0x1] }
 0x4b3   :  { %v6465_v29 = vpop.permute.xlu1 %6464  ;;  %v6157_v23 = vsub.f32 %v11452_v38, %v11741_v36  ;;  %v6096_v39 = vsub.f32 %v11186_v54, %v11741_v36  ;;  %v6098_v27 = vsub.f32 %v11224_v17, %v11741_v36  ;;  %v6100_v38 = vsub.f32 %v11222_v25, %v11741_v36 }
 0x4b4   :  { %7092 = vrot.lane.b32.xlu0 %v11593_v60, %s8986_s19  ;;  %v6124_v22 = vadd.f32 %v6123_v44, %v6122_v49  ;;  %6497 = vst.msk [vmem:[%s13492_s5 + $0x78] sm:$0xff] %vm5931_vm14, %v6465_v29  ;;  %v6095_v60 = vsub.f32 %v11200_v11, %v11741_v36  ;;  %v6097_v49 = vsub.f32 %v11196_v0, %v11741_v36 }
 0x4b5   :  { %v6463_v46 = vpop.permute.xlu0 %6462  ;;  %v6109_v29 = vmul.f32 %v6093_v24, %v6093_v24  ;;  %v6173_v24 = vmul.f32 %v6157_v23, %v6157_v23  ;;  %v6112_v25 = vmul.f32 %v6096_v39, %v6096_v39  ;;  %v6175_v39 = vmul.f32 %v6159_v61, %v6159_v61 }
 0x4b6   :  { %6496 = vst.msk [vmem:[%s13492_s5 + $0x70] sm:$0xff] %vm5931_vm14, %v6463_v46  ;;  %7098 = vrot.lane.b32.xlu1 %v8970_v31, %s8986_s19  ;;  %v6126_v44 = vadd.f32 %v6125_v62, %v6124_v22  ;;  %v6127_v46 = vsel %vm5931_vm14, %v6107_v48, 0.0  ;;  %v6158_v31 = vsub.f32 %v11441_v13, %v11741_v36  ;;  %v6172_v22 = vmul.f32 %v6156_v28, %v6156_v28  ;;  %v8971_v48 = vld [vmem:[%s13490_s0 + $0x68] sm:$0x1] }
 0x4b7   :  { %v6110_v62 = vmul.f32 %v6094_v4, %v6094_v4  ;;  %v6111_v13 = vmul.f32 %v6095_v60, %v6095_v60  ;;  %v6113_v0 = vmul.f32 %v6097_v49, %v6097_v49  ;;  %v6114_v28 = vmul.f32 %v6098_v27, %v6098_v27  ;;  %v8972_v49 = vld [vmem:[%s13490_s0 + $0x78] sm:$0x1] }
 0x4b8   :  { %7096 = vrot.lane.b32.xlu0 %v11622_v21, %s8986_s19  ;;  %v6128_v17 = vadd.f32 %v6127_v46, %v6126_v44  ;;  %v6129_v21 = vsel %vm5931_vm14, %v6108_v12, 0.0  ;;  %v6131_v4 = vsel %vm5931_vm14, %v6109_v29, 0.0  ;;  %v6160_v12 = vsub.f32 %v11474_v50, %v11741_v36 }
 0x4b9   :  { %v6174_v23 = vmul.f32 %v6158_v31, %v6158_v31  ;;  %v6115_v44 = vmul.f32 %v6099_v19, %v6099_v19  ;;  %v6116_v46 = vmul.f32 %v6100_v38, %v6100_v38  ;;  %v6188_v10 = vsel %vm5931_vm14, %v6172_v22, 0.0 }
 0x4ba   :  { %7102 = vrot.lane.b32.xlu1 %v8971_v48, %s8986_s19  ;;  %v6130_v54 = vadd.f32 %v6129_v21, %v6128_v17  ;;  %v6133_v60 = vsel %vm5931_vm14, %v6110_v62, 0.0  ;;  %v6161_v17 = vsub.f32 %v11480_v7, %v11741_v36  ;;  %v6117_v27 = vmul.f32 %v6101_v15, %v6101_v15 }
 0x4bb   :  { %v6137_v29 = vsel %vm5931_vm14, %v6112_v25, 0.0  ;;  %v6162_v61 = vsub.f32 %v11467_v42, %v11741_v36  ;;  %v6176_v31 = vmul.f32 %v6160_v12, %v6160_v12  ;;  %v6191_v22 = vsel %vm5931_vm14, %v6174_v23, 0.0 }
 0x4bc   :  { %7100 = vrot.lane.b32.xlu0 %v11615_v40, %s8986_s19  ;;  %v6132_v52 = vadd.f32 %v6131_v4, %v6130_v54  ;;  %v6189_v40 = vsel %vm5931_vm14, %v6173_v24, 0.0  ;;  %v6135_v54 = vsel %vm5931_vm14, %v6111_v13, 0.0  ;;  %v6139_v21 = vsel %vm5931_vm14, %v6113_v0, 0.0  ;;  %v8973_v24 = vld [vmem:[%s13490_s0 + $0x88] sm:$0x1] }
 0x4bd   :  { %v6190_v38 = vadd.f32 %v6189_v40, %v6188_v10  ;;  %v6141_v15 = vsel %vm5931_vm14, %v6114_v28, 0.0  ;;  %v6143_v13 = vsel %vm5931_vm14, %v6115_v44, 0.0  ;;  %v6163_v10 = vsub.f32 %v11478_v14, %v11741_v36 }
 0x4be   :  { %7106 = vrot.lane.b32.xlu1 %v8972_v49, %s8986_s19  ;;  %v6134_v19 = vadd.f32 %v6133_v60, %v6132_v52  ;;  %v6193_v25 = vsel %vm5931_vm14, %v6175_v39, 0.0  ;;  %v6145_v0 = vsel %vm5931_vm14, %v6116_v46, 0.0  ;;  %v6147_v28 = vsel %vm5931_vm14, %v6117_v27, 0.0  ;;  %v11898_v39 = vpop.permute.xlu0 %6627 }
 0x4bf   :  { %v6192_v52 = vadd.f32 %v6191_v22, %v6190_v38  ;;  %v6164_v12 = vsub.f32 %v11496_v45, %v11741_v36  ;;  %v6165_v23 = vsub.f32 %v11502_v47, %v11741_v36  ;;  %v6178_v44 = vmul.f32 %v6162_v61, %v6162_v61  ;;  %13779 = vst [vmem:[#allocation46_spill] sm:$0xff] %v11898_v39 }
 0x4c0   :  { %7104 = vrot.lane.b32.xlu0 %v11644_v2, %s8986_s19  ;;  %v6136_v62 = vadd.f32 %v6135_v54, %v6134_v19  ;;  %v6177_v2 = vmul.f32 %v6161_v17, %v6161_v17  ;;  %v6195_v60 = vsel %vm5931_vm14, %v6176_v31, 0.0  ;;  %v11896_v17 = vpop.permute.xlu1 %6629  ;;  %v6166_v40 = vsub.f32 %v11494_v1, %v11741_v36 }
 0x4c1   :  { %v6194_v4 = vadd.f32 %v6193_v25, %v6192_v52  ;;  %13778 = vst [vmem:[#allocation45_spill] sm:$0xff] %v11896_v17  ;;  %v6167_v27 = vsub.f32 %v11500_v51, %v11741_v36  ;;  %v6179_v19 = vmul.f32 %v6163_v10, %v6163_v10  ;;  %v6227_v38 = vsub.f32 %v11170_v30, %v11741_v36 }
 0x4c2   :  { %7110 = vrot.lane.b32.xlu1 %v8973_v24, %s8986_s19  ;;  %v6138_v48 = vadd.f32 %v6137_v29, %v6136_v62  ;;  %v6197_v54 = vsel %vm5931_vm14, %v6177_v2, 0.0  ;;  %v8974_v29 = vld [vmem:[%s13490_s0 + $0x138] sm:$0x1]  ;;  %v6168_v31 = vsub.f32 %v11513_v35, %v11741_v36  ;;  %v6169_v22 = vsub.f32 %v11520_v34, %v11741_v36 }
 0x4c3   :  { %v6196_v49 = vadd.f32 %v6195_v60, %v6194_v4  ;;  %v6180_v52 = vmul.f32 %v6164_v12, %v6164_v12  ;;  %v6199_v10 = vsel %vm5931_vm14, %v6178_v44, 0.0  ;;  %v6228_v2 = vsub.f32 %v11155_v53, %v11741_v36  ;;  %v11931_v12 = vpop.permute.xlu0 %6631 }
 0x4c4   :  { %7108 = vrot.lane.b32.xlu0 %v11637_v20, %s8986_s19  ;;  %v6140_v46 = vadd.f32 %v6139_v21, %v6138_v48  ;;  %v6226_v20 = vsub.f32 %v11161_v32, %v11741_v36  ;;  %v6170_v21 = vsub.f32 %v11510_v33, %v11741_v36  ;;  %v6171_v25 = vsub.f32 %v11517_v63, %v11741_v36 }
 0x4c5   :  { %v6198_v62 = vadd.f32 %v6197_v54, %v6196_v49  ;;  %v6181_v4 = vmul.f32 %v6165_v23, %v6165_v23  ;;  %v6201_v60 = vsel %vm5931_vm14, %v6179_v19, 0.0  ;;  %v11929_v49 = vpop.permute.xlu1 %6633  ;;  %13781 = vst [vmem:[#allocation48_spill] sm:$0xff] %v11931_v12  ;;  %v6182_v54 = vmul.f32 %v6166_v40, %v6166_v40 }
 0x4c6   :  { %7114 = vrot.lane.b32.xlu1 %v8974_v29, %s8986_s19  ;;  %v6142_v61 = vadd.f32 %v6141_v15, %v6140_v46  ;;  %v6242_v48 = vmul.f32 %v6226_v20, %v6226_v20  ;;  %v6243_v46 = vmul.f32 %v6227_v38, %v6227_v38  ;;  %13780 = vst [vmem:[#allocation47_spill] sm:$0xff] %v11929_v49  ;;  %v6203_v38 = vsel %vm5931_vm14, %v6180_v52, 0.0 }
 0x4c7   :  { %v6200_v24 = vadd.f32 %v6199_v10, %v6198_v62  ;;  %v6183_v20 = vmul.f32 %v6167_v27, %v6167_v27  ;;  %v6184_v19 = vmul.f32 %v6168_v31, %v6168_v31  ;;  %v6230_v29 = vsub.f32 %v11198_v5, %v11741_v36  ;;  %v8976_v31 = vld [vmem:[%s13490_s0 + $0x158] sm:$0x1] }
 0x4c8   :  { %7112 = vrot.lane.b32.xlu0 %v11662_v55, %s8986_s19  ;;  %v6144_v15 = vadd.f32 %v6143_v13, %v6142_v61  ;;  %v6229_v55 = vsub.f32 %v11166_v56, %v11741_v36  ;;  %v8975_v13 = vld [vmem:[%s13490_s0 + $0x148] sm:$0x1]  ;;  %v6244_v61 = vmul.f32 %v6228_v2, %v6228_v2  ;;  %v6185_v10 = vmul.f32 %v6169_v22, %v6169_v22 }
 0x4c9   :  { %v6202_v23 = vadd.f32 %v6201_v60, %v6200_v24  ;;  %v6258_v39 = vsel %vm5931_vm14, %v6242_v48, 0.0  ;;  %v6231_v40 = vsub.f32 %v11208_v37, %v11741_v36  ;;  %v6186_v52 = vmul.f32 %v6170_v21, %v6170_v21  ;;  %v11957_v60 = vpop.permute.xlu1 %6637 }
 0x4ca   :  { %7118 = vrot.lane.b32.xlu1 %v8975_v13, %s8986_s19  ;;  %v6146_v44 = vadd.f32 %v6145_v0, %v6144_v15  ;;  %v6205_v0 = vsel %vm5931_vm14, %v6181_v4, 0.0  ;;  %v6245_v27 = vmul.f32 %v6229_v55, %v6229_v55  ;;  %v6207_v15 = vsel %vm5931_vm14, %v6182_v54, 0.0  ;;  %13782 = vst [vmem:[#allocation49_spill] sm:$0xff] %v11957_v60  ;;  %v11959_v55 = vpop.permute.xlu0 %6635  ;;  %v8977_v54 = vld [vmem:[%s13490_s0 + $0x168] sm:$0x1] }
 0x4cb   :  { %v6204_v17 = vadd.f32 %v6203_v38, %v6202_v23  ;;  %v6232_v24 = vsub.f32 %v11192_v8, %v11741_v36  ;;  %v6246_v48 = vmul.f32 %v6230_v29, %v6230_v29  ;;  %v6261_v4 = vsel %vm5931_vm14, %v6244_v61, 0.0  ;;  %13783 = vst [vmem:[#allocation50_spill] sm:$0xff] %v11959_v55  ;;  %v13793_v55 = vld [vmem:[#allocation13_spill] sm:$0xff] }
 0x4cc   :  { %7116 = vrot.lane.b32.xlu0 %v11655_v26, %s8986_s19  ;;  %v6148_v62 = vadd.f32 %v6147_v28, %v6146_v44  ;;  %v6259_v26 = vsel %vm5931_vm14, %v6243_v46, 0.0  ;;  %v6187_v28 = vmul.f32 %v6171_v25, %v6171_v25  ;;  %v6211_v25 = vsel %vm5931_vm14, %v6184_v19, 0.0 }
 0x4cd   :  { %v6206_v22 = vadd.f32 %v6205_v0, %v6204_v17  ;;  %v6260_v2 = vadd.f32 %v6259_v26, %v6258_v39  ;;  %v6209_v17 = vsel %vm5931_vm14, %v6183_v20, 0.0  ;;  %v6247_v13 = vmul.f32 %v6231_v40, %v6231_v40 }
 0x4ce   :  { %7122 = vrot.lane.b32.xlu1 %v8976_v31, %s8986_s19  ;;  %v6149_v46 = vrot.slane %v6148_v62, 4  ;;  %v6263_v44 = vsel %vm5931_vm14, %v6245_v27, 0.0  ;;  %v6213_v38 = vsel %vm5931_vm14, %v6185_v10, 0.0  ;;  %v6215_v20 = vsel %vm5931_vm14, %v6186_v52, 0.0  ;;  %v13784_v31 = vld [vmem:[#allocation3_spill] sm:$0xff]  ;;  %v13785_v52 = vld [vmem:[#allocation32_spill] sm:$0xff] }
 0x4cf   :  { %v6208_v21 = vadd.f32 %v6207_v15, %v6206_v22  ;;  %v6262_v39 = vadd.f32 %v6261_v4, %v6260_v2  ;;  %v6217_v19 = vsel %vm5931_vm14, %v6187_v28, 0.0  ;;  %v6234_v61 = vsub.f32 %v11234_v57, %v11741_v36  ;;  %v13786_v15 = vld [vmem:[#allocation16_spill] sm:$0xff] }
 0x4d0   :  { %7120 = vrot.lane.b32.xlu0 %v11684_v59, %s8986_s19  ;;  %v6233_v59 = vsub.f32 %v11204_v18, %v11741_v36  ;;  %v6248_v0 = vmul.f32 %v6232_v24, %v6232_v24  ;;  %v6265_v40 = vsel %vm5931_vm14, %v6246_v48, 0.0  ;;  %v6150_v27 = vadd.f32 %v6149_v46, %v6148_v62  ;;  %v11987_v24 = vpop.permute.xlu0 %6639  ;;  %v8978_v62 = vld [vmem:[%s13490_s0 + $0x178] sm:$0x1]  ;;  %v13789_v46 = vld [vmem:[#allocation11_spill] sm:$0xff] }
 0x4d1   :  { %v6210_v23 = vadd.f32 %v6209_v17, %v6208_v21  ;;  %v6264_v29 = vadd.f32 %v6263_v44, %v6262_v39  ;;  %v6235_v22 = vsub.f32 %v13784_v31, %v11741_v36  ;;  %v6236_v2 = vsub.f32 %v13785_v52, %v11741_v36  ;;  %v11985_v21 = vpop.permute.xlu1 %6641  ;;  %13788 = vst [vmem:[#allocation32_spill] sm:$0xff] %v11987_v24 }
 0x4d2   :  { %7126 = vrot.lane.b32.xlu1 %v8977_v54, %s8986_s19  ;;  %v6249_v4 = vmul.f32 %v6233_v59, %v6233_v59  ;;  %v6267_v28 = vsel %vm5931_vm14, %v6247_v13, 0.0  ;;  %13787 = vst [vmem:[#allocation3_spill] sm:$0xff] %v11985_v21  ;;  %v6238_v17 = vsub.f32 %v13789_v46, %v11741_v36  ;;  %v13790_v59 = vld [vmem:[#allocation14_spill] sm:$0xff]  ;;  %v6250_v44 = vmul.f32 %v6234_v61, %v6234_v61 }
 0x4d3   :  { %v6212_v26 = vadd.f32 %v6211_v25, %v6210_v23  ;;  %v6266_v10 = vadd.f32 %v6265_v40, %v6264_v29  ;;  %v6296_v25 = vsub.f32 %v11534_v16, %v11741_v36  ;;  %v6239_v13 = vsub.f32 %v13790_v59, %v11741_v36  ;;  %v13791_v40 = vld [vmem:[#allocation8_spill] sm:$0xff] }
 0x4d4   :  { %7124 = vrot.lane.b32.xlu0 %v11677_v41, %s8986_s19  ;;  %v6237_v41 = vsub.f32 %v13786_v15, %v11741_v36  ;;  %v6269_v54 = vsel %vm5931_vm14, %v6248_v0, 0.0  ;;  %v6297_v23 = vsub.f32 %v11538_v43, %v11741_v36  ;;  %v6251_v60 = vmul.f32 %v6235_v22, %v6235_v22  ;;  %v8979_v0 = vld [vmem:[%s13490_s0 + $0x188] sm:$0x1]  ;;  %v12022_v43 = vpop.permute.xlu0 %6643 }
 0x4d5   :  { %v6214_v48 = vadd.f32 %v6213_v38, %v6212_v26  ;;  %v6268_v39 = vadd.f32 %v6267_v28, %v6266_v10  ;;  %v6151_v38 = vrot.slane %v6150_v27, 2  ;;  %v6240_v26 = vsub.f32 %v13791_v40, %v11741_v36  ;;  %v13792_v28 = vld [vmem:[#allocation17_spill] sm:$0xff]  ;;  %13797 = vst [vmem:[#allocation11_spill] sm:$0xff] %v12022_v43 }
 0x4d6   :  { %7130 = vrot.lane.b32.xlu1 %v8978_v62, %s8986_s19  ;;  %v6241_v62 = vsub.f32 %v13792_v28, %v11741_v36  ;;  %v6298_v61 = vsub.f32 %v13793_v55, %v11741_v36  ;;  %v6312_v24 = vmul.f32 %v6296_v25, %v6296_v25  ;;  %v6273_v22 = vsel %vm5931_vm14, %v6250_v44, 0.0  ;;  %v12020_v55 = vpop.permute.xlu1 %6645  ;;  %v8980_v44 = vld [vmem:[%s13490_s0 + $0x198] sm:$0x1] }
 0x4d7   :  { %v6216_v29 = vadd.f32 %v6215_v20, %v6214_v48  ;;  %v6270_v10 = vadd.f32 %v6269_v54, %v6268_v39  ;;  %v6252_v48 = vmul.f32 %v6236_v2, %v6236_v2  ;;  %v13794_v39 = vld [vmem:[#allocation42_spill] sm:$0xff]  ;;  %v6253_v54 = vmul.f32 %v6237_v41, %v6237_v41  ;;  %13796 = vst [vmem:[#allocation16_spill] sm:$0xff] %v12020_v55 }
 0x4d8   :  { %7128 = vrot.lane.b32.xlu0 %v11706_v3, %s8986_s19  ;;  %v6271_v3 = vsel %vm5931_vm14, %v6249_v4, 0.0  ;;  %v13795_v4 = vld [vmem:[#allocation19_spill] sm:$0xff]  ;;  %v6313_v12 = vmul.f32 %v6297_v23, %v6297_v23  ;;  %v6152_v16 = vadd.f32 %v6151_v38, %v6150_v27  ;;  %v6275_v25 = vsel %vm5931_vm14, %v6251_v60, 0.0 }
 0x4d9   :  { %v6218_v20 = vadd.f32 %v6217_v19, %v6216_v29  ;;  %v6272_v21 = vadd.f32 %v6271_v3, %v6270_v10  ;;  %v6299_v49 = vsub.f32 %v13795_v4, %v11741_v36  ;;  %v6254_v19 = vmul.f32 %v6238_v17, %v6238_v17  ;;  %v13798_v10 = vld [vmem:[#allocation6_spill] sm:$0xff]  ;;  %v13800_v17 = vld [vmem:[#allocation33_spill] sm:$0xff] }
 0x4da   :  { %7134 = vrot.lane.b32.xlu1 %v8979_v0, %s8986_s19  ;;  %v6255_v29 = vmul.f32 %v6239_v13, %v6239_v13  ;;  %v6300_v41 = vsub.f32 %v13798_v10, %v11741_v36  ;;  %v6314_v3 = vmul.f32 %v6298_v61, %v6298_v61  ;;  %v6328_v27 = vsel %vm5931_vm14, %v6312_v24, 0.0 }
 0x4db   :  { %v6219_v0 = vrot.slane %v6218_v20, 4  ;;  %v6274_v2 = vadd.f32 %v6273_v22, %v6272_v21  ;;  %v13799_v21 = vld [vmem:[#allocation44_spill] sm:$0xff]  ;;  %v6277_v60 = vsel %vm5931_vm14, %v6252_v48, 0.0  ;;  %v6301_v13 = vsub.f32 %v13800_v17, %v11741_v36  ;;  %v12044_v48 = vpop.permute.xlu0 %6647 }
 0x4dc   :  { %7132 = vrot.lane.b32.xlu0 %v13794_v39, %s8986_s19  ;;  %v6256_v39 = vmul.f32 %v6240_v26, %v6240_v26  ;;  %v6315_v38 = vmul.f32 %v6299_v49, %v6299_v49  ;;  %v6329_v61 = vsel %vm5931_vm14, %v6313_v12, 0.0  ;;  %v6153_v22 = vrot.slane %v6152_v16, 1  ;;  %13803 = vst [vmem:[#allocation8_spill] sm:$0xff] %v12044_v48  ;;  %v8981_v49 = vld [vmem:[%s13490_s0 + $0x1a8] sm:$0x1] }
 0x4dd   :  { %v6220_v23 = vadd.f32 %v6219_v0, %v6218_v20  ;;  %v6276_v55 = vadd.f32 %v6275_v25, %v6274_v2  ;;  %v6279_v26 = vsel %vm5931_vm14, %v6253_v54, 0.0  ;;  %v13801_v20 = vld [vmem:[#allocation5_spill] sm:$0xff]  ;;  %v6316_v0 = vmul.f32 %v6300_v41, %v6300_v41  ;;  %v12042_v25 = vpop.permute.xlu1 %6649 }
 0x4de   :  { %7138 = vrot.lane.b32.xlu1 %v8980_v44, %s8986_s19  ;;  %v6330_v44 = vadd.f32 %v6329_v61, %v6328_v27  ;;  %v6302_v24 = vsub.f32 %v13801_v20, %v11741_v36  ;;  %v6331_v2 = vsel %vm5931_vm14, %v6314_v3, 0.0  ;;  %13802 = vst [vmem:[#allocation14_spill] sm:$0xff] %v12042_v25  ;;  %v6281_v41 = vsel %vm5931_vm14, %v6254_v19, 0.0  ;;  %v13805_v3 = vld [vmem:[#allocation12_spill] sm:$0xff] }
 0x4df   :  { %v6221_v43 = vrot.slane %v6220_v23, 2  ;;  %v6278_v10 = vadd.f32 %v6277_v60, %v6276_v55  ;;  %v6257_v55 = vmul.f32 %v6241_v62, %v6241_v62  ;;  %v6303_v60 = vsub.f32 %v13805_v3, %v11741_v36  ;;  %v13806_v62 = vld [vmem:[#allocation35_spill] sm:$0xff] }
 0x4e0   :  { %7136 = vrot.lane.b32.xlu0 %v13799_v21, %s8986_s19  ;;  %v6332_v54 = vadd.f32 %v6331_v2, %v6330_v44  ;;  %v13804_v21 = vld [vmem:[#allocation43_spill] sm:$0xff]  ;;  %v6317_v61 = vmul.f32 %v6301_v13, %v6301_v13  ;;  %v6333_v25 = vsel %vm5931_vm14, %v6315_v38, 0.0  ;;  %v6154_v48 = vadd.f32 %v6153_v22, %v6152_v16  ;;  %v13807_v13 = vld [vmem:[#allocation37_spill] sm:$0xff] }
 0x4e1   :  { %v6222_v12 = vadd.f32 %v6221_v43, %v6220_v23  ;;  %v6280_v27 = vadd.f32 %v6279_v26, %v6278_v10  ;;  %v6283_v43 = vsel %vm5931_vm14, %v6255_v29, 0.0  ;;  %v6304_v10 = vsub.f32 %v13806_v62, %v11741_v36  ;;  %v12066_v29 = vpop.permute.xlu0 %6651 }
 0x4e2   :  { %7142 = vrot.lane.b32.xlu1 %v8981_v49, %s8986_s19  ;;  %v6334_v4 = vadd.f32 %v6333_v25, %v6332_v54  ;;  %v6318_v23 = vmul.f32 %v6302_v24, %v6302_v24  ;;  %v6335_v44 = vsel %vm5931_vm14, %v6316_v0, 0.0  ;;  %v6285_v49 = vsel %vm5931_vm14, %v6256_v39, 0.0  ;;  %v12064_v25 = vpop.permute.xlu1 %6653  ;;  %13809 = vst [vmem:[#allocation42_spill] sm:$0xff] %v12066_v29 }
 0x4e3   :  { %v6223_v20 = vrot.slane %v6222_v12, 1  ;;  %v6282_v17 = vadd.f32 %v6281_v41, %v6280_v27  ;;  %v6305_v38 = vsub.f32 %v13807_v13, %v11741_v36  ;;  %v6319_v16 = vmul.f32 %v6303_v60, %v6303_v60  ;;  %13808 = vst [vmem:[#allocation17_spill] sm:$0xff] %v12064_v25  ;;  %v13811_v41 = vld [vmem:[#allocation36_spill] sm:$0xff] }
 0x4e4   :  { %7140 = vrot.lane.b32.xlu0 %v13804_v21, %s8986_s19  ;;  %v6336_v2 = vadd.f32 %v6335_v44, %v6334_v4  ;;  %v6337_v22 = vsel %vm5931_vm14, %v6317_v61, 0.0  ;;  %v6287_v0 = vsel %vm5931_vm14, %v6257_v55, 0.0  ;;  %v6339_v39 = vsel %vm5931_vm14, %v6318_v23, 0.0 }
 0x4e5   :  { %v6224_v26 = vadd.f32 %v6223_v20, %v6222_v12  ;;  %v6284_v19 = vadd.f32 %v6283_v43, %v6282_v17  ;;  %v13810_v17 = vld [vmem:[#allocation34_spill] sm:$0xff]  ;;  %v6320_v20 = vmul.f32 %v6304_v10, %v6304_v10  ;;  %v6307_v60 = vsub.f32 %v13811_v41, %v11741_v36  ;;  %v12080_v10 = vpop.permute.xlu0 %6655 }
 0x4e6   :  { %v6338_v24 = vadd.f32 %v6337_v22, %v6336_v2  ;;  %v6306_v4 = vsub.f32 %v13810_v17, %v11741_v36  ;;  %v6321_v61 = vmul.f32 %v6305_v38, %v6305_v38  ;;  %v6341_v43 = vsel %vm5931_vm14, %v6319_v16, 0.0  ;;  %13814 = vst [vmem:[#allocation43_spill] sm:$0xff] %v12080_v10 }
 0x4e7   :  { %v6225_v27 = vadd.f32 %v6224_v26, %v6154_v48  ;;  %v6286_v54 = vadd.f32 %v6285_v49, %v6284_v19  ;;  %v13812_v26 = vld [vmem:[#allocation39_spill] sm:$0xff]  ;;  %v6343_v2 = vsel %vm5931_vm14, %v6320_v20, 0.0  ;;  %v12078_v49 = vpop.permute.xlu1 %6657  ;;  %v6323_v38 = vmul.f32 %v6307_v60, %v6307_v60 }
 0x4e8   :  { %v6340_v21 = vadd.f32 %v6339_v39, %v6338_v24  ;;  %v6308_v19 = vsub.f32 %v13812_v26, %v11741_v36  ;;  %v6322_v55 = vmul.f32 %v6306_v4, %v6306_v4  ;;  %13813 = vst [vmem:[#allocation44_spill] sm:$0xff] %v12078_v49  ;;  %v6345_v16 = vsel %vm5931_vm14, %v6321_v61, 0.0  ;;  %v13817_v49 = vld [vmem:[#allocation40_spill] sm:$0xff] }
 0x4e9   :  { %v6288_v12 = vadd.f32 %v6287_v0, %v6286_v54  ;;  %v13815_v54 = vld [vmem:[#allocation41_spill] sm:$0xff]  ;;  %v12093_v60 = vpop.permute.xlu0 %6659 }
 0x4ea   :  { %v6342_v48 = vadd.f32 %v6341_v43, %v6340_v21  ;;  %v6309_v24 = vsub.f32 %v13815_v54, %v11741_v36  ;;  %v13816_v21 = vld [vmem:[#allocation38_spill] sm:$0xff]  ;;  %v6324_v4 = vmul.f32 %v6308_v19, %v6308_v19  ;;  %v6347_v20 = vsel %vm5931_vm14, %v6322_v55, 0.0  ;;  %13819 = vst [vmem:[#allocation35_spill] sm:$0xff] %v12093_v60 }
 0x4eb   :  { %v6289_v44 = vrot.slane %v6288_v12, 4  ;;  %v6310_v43 = vsub.f32 %v13816_v21, %v11741_v36 }
 0x4ec   :  { %v6344_v22 = vadd.f32 %v6343_v2, %v6342_v48  ;;  %v6349_v48 = vsel %vm5931_vm14, %v6323_v38, 0.0  ;;  %v12091_v2 = vpop.permute.xlu1 %6661  ;;  %v6351_v10 = vsel %vm5931_vm14, %v6324_v4, 0.0 }
 0x4ed   :  { %v6290_v23 = vadd.f32 %v6289_v44, %v6288_v12  ;;  %v6311_v12 = vsub.f32 %v13817_v49, %v11741_v36  ;;  %v6325_v44 = vmul.f32 %v6309_v24, %v6309_v24  ;;  %13818 = vst [vmem:[#allocation12_spill] sm:$0xff] %v12091_v2  ;;  %v12100_v38 = vpop.permute.xlu0 %6663 }
 0x4ee   :  { %v6346_v39 = vadd.f32 %v6345_v16, %v6344_v22  ;;  %v6326_v16 = vmul.f32 %v6310_v43, %v6310_v43  ;;  %13821 = vst [vmem:[#allocation34_spill] sm:$0xff] %v12100_v38  ;;  %v13854_v38 = vld [vmem:[#allocation7_spill] sm:$0xff] }
 0x4ef   :  { %v6291_v0 = vrot.slane %v6290_v23, 2  ;;  %v6327_v55 = vmul.f32 %v6311_v12, %v6311_v12 }
 0x4f0   :  { %v6348_v29 = vadd.f32 %v6347_v20, %v6346_v39  ;;  %v6355_v24 = vsel %vm5931_vm14, %v6326_v16, 0.0  ;;  %v12098_v20 = vpop.permute.xlu1 %6665 }
 0x4f1   :  { %v6292_v25 = vadd.f32 %v6291_v0, %v6290_v23  ;;  %v6353_v23 = vsel %vm5931_vm14, %v6325_v44, 0.0  ;;  %13820 = vst [vmem:[#allocation37_spill] sm:$0xff] %v12098_v20  ;;  %v6357_v60 = vsel %vm5931_vm14, %v6327_v55, 0.0  ;;  %v6375_v55 = vlaneseq  ;;  %v13853_v20 = vld [vmem:[#allocation4_spill] sm:$0xff] }
 0x4f2   :  { %v6350_v22 = vadd.f32 %v6349_v48, %v6348_v29 }
 0x4f3   :  { %v6293_v61 = vrot.slane %v6292_v25, 1 }
 0x4f4   :  { %v6352_v21 = vadd.f32 %v6351_v10, %v6350_v22  ;;  %v12103_v48 = vpop.permute.xlu1 %6669 }
 0x4f5   :  { %v6294_v19 = vadd.f32 %v6293_v61, %v6292_v25  ;;  %13822 = vst [vmem:[#allocation36_spill] sm:$0xff] %v12103_v48  ;;  %v12105_v25 = vpop.permute.xlu0 %6667 }
 0x4f6   :  { %v6354_v39 = vadd.f32 %v6353_v23, %v6352_v21  ;;  %13823 = vst [vmem:[#allocation39_spill] sm:$0xff] %v12105_v25 }
 0x4f7   :  { %v6295_v0 = vadd.f32 %v6294_v19, %v6225_v27 }
 0x4f8   :  { %v6356_v2 = vadd.f32 %v6355_v24, %v6354_v39  ;;  %v12107_v27 = vpop.permute.xlu1 %6673  ;;  %v6376_v24 = vshrl.u32 %v6375_v55, 7 }
 0x4f9   :  { %13824 = vst [vmem:[#allocation41_spill] sm:$0xff] %v12107_v27  ;;  %v12109_v21 = vpop.permute.xlu0 %6671 }
 0x4fa   :  { %v6358_v29 = vadd.f32 %v6357_v60, %v6356_v2  ;;  %13825 = vst [vmem:[#allocation40_spill] sm:$0xff] %v12109_v21  ;;  %v13852_v21 = vld [vmem:[#allocation9_spill] sm:$0xff] }
 0x4fc   :  { %v6359_v43 = vrot.slane %v6358_v29, 4  ;;  %v12111_v16 = vpop.permute.xlu1 %6677 }
 0x4fd   :  { %13826 = vst [vmem:[#allocation51_spill] sm:$0xff] %v12111_v16  ;;  %v12113_v19 = vpop.permute.xlu0 %6675 }
 0x4fe   :  { %v6360_v10 = vadd.f32 %v6359_v43, %v6358_v29  ;;  %13827 = vst [vmem:[#allocation52_spill] sm:$0xff] %v12113_v19  ;;  %v13844_v19 = vld [vmem:[#allocation29_spill] sm:$0xff] }
 0x500   :  { %v6361_v4 = vrot.slane %v6360_v10, 2  ;;  %v12115_v23 = vpop.permute.xlu1 %6681 }
 0x501   :  { %13828 = vst [vmem:[#allocation53_spill] sm:$0xff] %v12115_v23  ;;  %v12117_v39 = vpop.permute.xlu0 %6679 }
 0x502   :  { %v6362_v12 = vadd.f32 %v6361_v4, %v6360_v10  ;;  %13829 = vst [vmem:[#allocation54_spill] sm:$0xff] %v12117_v39  ;;  %v6377_v10 = vsub.s32 0, %v6376_v24 }
 0x504   :  { %v6363_v44 = vrot.slane %v6362_v12, 1  ;;  %v12119_v29 = vpop.permute.xlu1 %6685 }
 0x505   :  { %13830 = vst [vmem:[#allocation55_spill] sm:$0xff] %v12119_v29  ;;  %v12121_v43 = vpop.permute.xlu0 %6683 }
 0x506   :  { %v6364_v61 = vadd.f32 %v6363_v44, %v6362_v12  ;;  %13831 = vst [vmem:[#allocation56_spill] sm:$0xff] %v12121_v43  ;;  %v6371_v44 = vld [vmem:[%s13494_s4] sm:$0x1]  ;;  %v13834_v43 = vld [vmem:[#allocation21_spill] sm:$0xff]  ;;  %s8988_s4 = smov 20  }
 0x508   :  { %v6365_v22 = vadd.f32 %v6364_v61, %v6295_v0  ;;  %v6367_v0 = vld [vmem:[%s13493_s3] sm:$0x1]  ;;  %s8987_s3 = smov 4  }
 0x50a   :  { %v6366_v2 = vmul.f32 0.001953125, %v6365_v22 }
 0x50c   :  { %v6368_v60 = vadd.f32 1e-05, %v6366_v2  ;;  %v12132_v2 = vpop.permute.xlu1 %6689 }
 0x50d   :  { %13832 = vst [vmem:[#allocation57_spill] sm:$0xff] %v12132_v2 }
 0x50e   :  { %8887 = vrsqrt.f32 %v6368_v60  ;;  %v12134_v60 = vpop.permute.xlu0 %6687 }
 0x50f   :  { %13833 = vst [vmem:[#allocation58_spill] sm:$0xff] %v12134_v60 }
 0x512   :  { %v12209_v27 = vpop.permute.xlu0 %6886 }
 0x518   :  { %v8888_v4 = vpop.eup %8887 }
 0x519   :  { %v6370_v12 = vmul.f32 %v8888_v4, %v6367_v0  ;;  %v13836_v0 = vld [vmem:[#allocation23_spill] sm:$0xff] }
 0x51b   :  { %v6372_v61 = vmul.f32 %v6370_v12, %v11741_v36  ;;  %v12130_v22 = vrot.slane %v6370_v12, %v6377_v10  ;;  %v13838_v12 = vld [vmem:[#allocation18_spill] sm:$0xff] }
 0x51d   :  { %v6373_v55 = vsub.f32 %v6371_v44, %v6372_v61  ;;  %v7045_v29 = vmul.f32 %v12130_v22, %v13815_v54  ;;  %v12140_v24 = vmul.f32 %v12130_v22, %v13834_v43  ;;  %v12144_v4 = vmul.f32 %v12130_v22, %v13836_v0  ;;  %v13839_v44 = vld [vmem:[#allocation24_spill] sm:$0xff]  ;;  %v13840_v54 = vld [vmem:[#allocation27_spill] sm:$0xff]  ;;  %v13841_v0 = vld [vmem:[#allocation22_spill] sm:$0xff] }
 0x51e   :  { %v12148_v36 = vmul.f32 %v11131_v58, %v12130_v22  ;;  %v12152_v2 = vmul.f32 %v13838_v12, %v12130_v22  ;;  %v12156_v61 = vmul.f32 %v12130_v22, %v13839_v44  ;;  %v12160_v43 = vmul.f32 %v12130_v22, %v13840_v54  ;;  %v13842_v54 = vld [vmem:[#allocation26_spill] sm:$0xff]  ;;  %13850 = vst [vmem:[#allocation27_spill] sm:$0xff] %v12209_v27 }
 0x51f   :  { %13835 = vst [vmem:[#allocation21_spill] sm:$0xff] %v12140_v24  ;;  %13837 = vst [vmem:[#allocation23_spill] sm:$0xff] %v12144_v4  ;;  %v12162_v60 = vrot.slane %v6373_v55, %v6377_v10  ;;  %v12166_v16 = vmul.f32 %v13841_v0, %v12130_v22  ;;  %v12170_v58 = vmul.f32 %v11159_v6, %v12130_v22  ;;  %v13843_v55 = vld [vmem:[#allocation25_spill] sm:$0xff]  ;;  %v13863_v4 = vld [vmem:[#allocation19_spill] sm:$0xff] }
 0x520   :  { %v12174_v12 = vmul.f32 %v12130_v22, %v11188_v9  ;;  %v12178_v44 = vmul.f32 %v12130_v22, %v11200_v11  ;;  %v12182_v10 = vmul.f32 %v13842_v54, %v12130_v22  ;;  %v12186_v0 = vmul.f32 %v13843_v55, %v12130_v22  ;;  %v13846_v9 = vld [vmem:[#allocation31_spill] sm:$0xff]  ;;  %v13847_v11 = vld [vmem:[#allocation28_spill] sm:$0xff]  ;;  %v13848_v54 = vld [vmem:[#allocation30_spill] sm:$0xff]  ;;  %v12207_v55 = vpop.permute.xlu1 %6888 }
 0x521   :  { %v12190_v6 = vmul.f32 %v12130_v22, %v13844_v19  ;;  %v12193_v23 = vadd.f32 %v7045_v29, %v12162_v60  ;;  %v12197_v39 = vmul.f32 %v12130_v22, %v13846_v9  ;;  %v12201_v48 = vmul.f32 %v13847_v11, %v12130_v22  ;;  %13849 = vst [vmem:[#allocation24_spill] sm:$0xff] %v12207_v55  ;;  %v13851_v19 = vld [vmem:[#allocation10_spill] sm:$0xff]  ;;  %v13862_v24 = vld [vmem:[#allocation13_spill] sm:$0xff] }
 0x522   :  { %v12205_v25 = vmul.f32 %v13848_v54, %v12130_v22  ;;  %v12213_v29 = vmul.f32 %v12130_v22, %v13851_v19  ;;  %v12217_v9 = vmul.f32 %v12130_v22, %v13852_v21  ;;  %v12221_v11 = vmul.f32 %v13853_v20, %v12130_v22 }
 0x523   :  { %13845 = vst [vmem:[#allocation18_spill] sm:$0xff] %v12193_v23  ;;  %v12225_v54 = vmul.f32 %v13854_v38, %v12130_v22  ;;  %v12229_v55 = vmul.f32 %v12130_v22, %v11474_v50  ;;  %v12233_v19 = vmul.f32 %v12130_v22, %v11480_v7  ;;  %v12237_v21 = vmul.f32 %v11467_v42, %v12130_v22  ;;  %v13861_v23 = vld [vmem:[#allocation20_spill] sm:$0xff] }
 0x524   :  { %v12241_v20 = vmul.f32 %v11478_v14, %v12130_v22  ;;  %v12245_v38 = vmul.f32 %v12130_v22, %v11496_v45  ;;  %v12249_v50 = vmul.f32 %v12130_v22, %v11502_v47  ;;  %v12253_v7 = vmul.f32 %v11494_v1, %v12130_v22  ;;  %v12307_v27 = vpop.permute.xlu1 %6892 }
 0x525   :  { %v12257_v42 = vmul.f32 %v11500_v51, %v12130_v22  ;;  %v12261_v14 = vmul.f32 %v12130_v22, %v11513_v35  ;;  %v12265_v45 = vmul.f32 %v12130_v22, %v11520_v34  ;;  %v12269_v47 = vmul.f32 %v11510_v33, %v12130_v22  ;;  %13855 = vst [vmem:[#allocation22_spill] sm:$0xff] %v12307_v27 }
 0x526   :  { %v12273_v1 = vmul.f32 %v11517_v63, %v12130_v22  ;;  %v12277_v51 = vmul.f32 %v12130_v22, %v11161_v32  ;;  %v12281_v35 = vmul.f32 %v12130_v22, %v11170_v30  ;;  %v12285_v34 = vmul.f32 %v11155_v53, %v12130_v22 }
 0x527   :  { %v12289_v33 = vmul.f32 %v11166_v56, %v12130_v22  ;;  %v12293_v63 = vmul.f32 %v12130_v22, %v11198_v5  ;;  %v12297_v32 = vmul.f32 %v12130_v22, %v11208_v37  ;;  %v12301_v30 = vmul.f32 %v11192_v8, %v12130_v22  ;;  %v12309_v56 = vpop.permute.xlu0 %6890 }
 0x528   :  { %v12305_v53 = vmul.f32 %v11204_v18, %v12130_v22  ;;  %13856 = vst [vmem:[#allocation26_spill] sm:$0xff] %v12309_v56  ;;  %v12313_v5 = vmul.f32 %v12130_v22, %v11234_v57  ;;  %v12317_v37 = vmul.f32 %v12130_v22, %v13784_v31  ;;  %v12321_v8 = vmul.f32 %v13785_v52, %v12130_v22  ;;  %v13859_v56 = vld [vmem:[#allocation15_spill] sm:$0xff] }
 0x529   :  { %v12325_v18 = vmul.f32 %v13786_v15, %v12130_v22  ;;  %v12329_v27 = vmul.f32 %v12130_v22, %v13789_v46  ;;  %v12333_v57 = vmul.f32 %v12130_v22, %v13790_v59  ;;  %v12337_v31 = vmul.f32 %v13791_v40, %v12130_v22 }
 0x52a   :  { %v12341_v52 = vmul.f32 %v13792_v28, %v12130_v22  ;;  %v12345_v15 = vmul.f32 %v12130_v22, %v13859_v56  ;;  %v12349_v46 = vmul.f32 %v12130_v22, %v13861_v23  ;;  %v12353_v59 = vmul.f32 %v13862_v24, %v12130_v22 }
 0x52b   :  { %13857 = vst [vmem:[#allocation25_spill] sm:$0xff] %v12337_v31  ;;  %v12357_v40 = vmul.f32 %v13863_v4, %v12130_v22  ;;  %v13864_v31 = vld [vmem:[#allocation6_spill] sm:$0xff]  ;;  %v12373_v24 = vmul.f32 %v13805_v3, %v12130_v22  ;;  %v12377_v4 = vmul.f32 %v12130_v22, %v13806_v62  ;;  %v12393_v3 = vmul.f32 %v12130_v22, %v13812_v26 }
 0x52c   :  { %13858 = vst [vmem:[#allocation29_spill] sm:$0xff] %v12341_v52  ;;  %13860 = vst [vmem:[#allocation31_spill] sm:$0xff] %v12345_v15  ;;  %v12361_v28 = vmul.f32 %v12130_v22, %v13864_v31  ;;  %v13865_v52 = vld [vmem:[#allocation33_spill] sm:$0xff]  ;;  %v12381_v31 = vmul.f32 %v12130_v22, %v13807_v13  ;;  %v12401_v13 = vmul.f32 %v13817_v49, %v12130_v22 }
 0x52d   :  { %v12365_v56 = vmul.f32 %v12130_v22, %v13865_v52  ;;  %v13866_v15 = vld [vmem:[#allocation5_spill] sm:$0xff]  ;;  %13867 = vst [vmem:[#allocation28_spill] sm:$0xff] %v12373_v24  ;;  %v12385_v52 = vmul.f32 %v13810_v17, %v12130_v22  ;;  %v13869_v24 = vld [vmem:[#allocation38_spill] sm:$0xff]  ;;  %v12405_v17 = vadd.f32 %v12162_v60, %v12148_v36  ;;  %v12413_v26 = vadd.f32 %v12162_v60, %v12152_v2 }
 0x52e   :  { %v12369_v23 = vmul.f32 %v13866_v15, %v12130_v22  ;;  %v12389_v15 = vmul.f32 %v13811_v41, %v12130_v22  ;;  %v12397_v62 = vmul.f32 %v13869_v24, %v12130_v22  ;;  %v12409_v41 = vpop.permute.xlu0 %6894  ;;  %v12417_v24 = vadd.f32 %v12162_v60, %v12156_v61 }
 0x52f   :  { %13868 = vst [vmem:[#allocation30_spill] sm:$0xff] %v12385_v52  ;;  %v12407_v52 = vpop.permute.xlu1 %6896  ;;  %13871 = vst [vmem:[#allocation9_spill] sm:$0xff] %v12409_v41  ;;  %v12421_v49 = vadd.f32 %v12162_v60, %v12160_v43  ;;  %v12425_v22 = vadd.f32 %v12162_v60, %v12166_v16  ;;  %v12429_v36 = vadd.f32 %v12162_v60, %v12170_v58 }
 0x530   :  { %13870 = vst [vmem:[#allocation10_spill] sm:$0xff] %v12407_v52  ;;  %v12433_v2 = vadd.f32 %v12162_v60, %v12174_v12  ;;  %v12437_v61 = vadd.f32 %v12162_v60, %v12178_v44  ;;  %v12441_v43 = vadd.f32 %v12162_v60, %v12182_v10  ;;  %v12445_v16 = vadd.f32 %v12162_v60, %v12186_v0 }
 0x531   :  { %v12449_v58 = vadd.f32 %v12162_v60, %v12190_v6  ;;  %v12453_v12 = vadd.f32 %v12162_v60, %v12197_v39  ;;  %v12457_v44 = vadd.f32 %v12162_v60, %v12201_v48  ;;  %v12461_v10 = vadd.f32 %v12162_v60, %v12205_v25 }
 0x532   :  { %v12465_v0 = vadd.f32 %v12213_v29, %v12162_v60  ;;  %v12469_v6 = vadd.f32 %v12217_v9, %v12162_v60  ;;  %v12473_v39 = vadd.f32 %v12221_v11, %v12162_v60  ;;  %v12477_v48 = vadd.f32 %v12225_v54, %v12162_v60 }
 0x533   :  { %v12481_v25 = vadd.f32 %v12229_v55, %v12162_v60  ;;  %v12485_v29 = vadd.f32 %v12233_v19, %v12162_v60  ;;  %v12489_v9 = vadd.f32 %v12237_v21, %v12162_v60  ;;  %v12493_v11 = vadd.f32 %v12241_v20, %v12162_v60  ;;  %v12507_v52 = vpop.permute.xlu1 %6900  ;;  %v12509_v21 = vpop.permute.xlu0 %6898  ;;  %v13877_v41 = vld [vmem:[#allocation29_spill] sm:$0xff] }
 0x534   :  { %v12497_v54 = vadd.f32 %v12245_v38, %v12162_v60  ;;  %v12501_v55 = vadd.f32 %v12249_v50, %v12162_v60  ;;  %v12505_v19 = vadd.f32 %v12253_v7, %v12162_v60  ;;  %13872 = vst [vmem:[#allocation4_spill] sm:$0xff] %v12507_v52  ;;  %13873 = vst [vmem:[#allocation7_spill] sm:$0xff] %v12509_v21  ;;  %v13876_v21 = vld [vmem:[#allocation25_spill] sm:$0xff] }
 0x535   :  { %v12513_v20 = vadd.f32 %v12257_v42, %v12162_v60  ;;  %v12517_v38 = vadd.f32 %v12261_v14, %v12162_v60  ;;  %v12521_v50 = vadd.f32 %v12265_v45, %v12162_v60  ;;  %v12525_v7 = vadd.f32 %v12269_v47, %v12162_v60 }
 0x536   :  { %v12529_v52 = vadd.f32 %v12273_v1, %v12162_v60  ;;  %v12533_v42 = vadd.f32 %v12277_v51, %v12162_v60  ;;  %v12537_v14 = vadd.f32 %v12281_v35, %v12162_v60  ;;  %v12541_v45 = vadd.f32 %v12285_v34, %v12162_v60 }
 0x537   :  { %v12545_v47 = vadd.f32 %v12289_v33, %v12162_v60  ;;  %v12549_v1 = vadd.f32 %v12293_v63, %v12162_v60  ;;  %v12553_v51 = vadd.f32 %v12297_v32, %v12162_v60  ;;  %v12557_v35 = vadd.f32 %v12301_v30, %v12162_v60 }
 0x538   :  { %v12561_v34 = vadd.f32 %v12305_v53, %v12162_v60  ;;  %v12565_v33 = vadd.f32 %v12313_v5, %v12162_v60  ;;  %v12569_v63 = vadd.f32 %v12317_v37, %v12162_v60  ;;  %v12573_v32 = vadd.f32 %v12321_v8, %v12162_v60 }
 0x539   :  { %v12577_v30 = vadd.f32 %v12325_v18, %v12162_v60  ;;  %v12581_v53 = vadd.f32 %v12329_v27, %v12162_v60  ;;  %v12585_v5 = vadd.f32 %v12333_v57, %v12162_v60  ;;  %v12589_v37 = vadd.f32 %v13876_v21, %v12162_v60  ;;  %v12609_v21 = vpop.permute.xlu0 %6902 }
 0x53a   :  { %13874 = vst [vmem:[#allocation15_spill] sm:$0xff] %v12573_v32  ;;  %v12593_v8 = vadd.f32 %v13877_v41, %v12162_v60  ;;  %v13878_v32 = vld [vmem:[#allocation31_spill] sm:$0xff]  ;;  %v12601_v27 = vadd.f32 %v12349_v46, %v12162_v60  ;;  %v12605_v57 = vadd.f32 %v12353_v59, %v12162_v60  ;;  %13881 = vst [vmem:[#allocation6_spill] sm:$0xff] %v12609_v21  ;;  %v13885_v21 = vld [vmem:[#allocation30_spill] sm:$0xff] }
 0x53b   :  { %13875 = vst [vmem:[#allocation20_spill] sm:$0xff] %v12581_v53  ;;  %v12597_v18 = vadd.f32 %v13878_v32, %v12162_v60  ;;  %v12607_v53 = vpop.permute.xlu1 %6904  ;;  %v12613_v41 = vadd.f32 %v12357_v40, %v12162_v60  ;;  %v12617_v32 = vadd.f32 %v12361_v28, %v12162_v60  ;;  %v12621_v46 = vadd.f32 %v12365_v56, %v12162_v60 }
 0x53c   :  { %13879 = vst [vmem:[#allocation13_spill] sm:$0xff] %v12605_v57  ;;  %13880 = vst [vmem:[#allocation19_spill] sm:$0xff] %v12607_v53  ;;  %v12625_v59 = vadd.f32 %v12369_v23, %v12162_v60  ;;  %v13882_v53 = vld [vmem:[#allocation28_spill] sm:$0xff]  ;;  %v12633_v40 = vadd.f32 %v12377_v4, %v12162_v60  ;;  %v12637_v28 = vadd.f32 %v12381_v31, %v12162_v60 }
 0x53d   :  { %v12629_v57 = vadd.f32 %v13882_v53, %v12162_v60  ;;  %v12641_v56 = vadd.f32 %v13885_v21, %v12162_v60  ;;  %v12645_v23 = vadd.f32 %v12389_v15, %v12162_v60  ;;  %v12649_v53 = vadd.f32 %v12393_v3, %v12162_v60  ;;  %v12665_v3 = vpop.permute.xlu0 %6906 }
 0x53e   :  { %13883 = vst [vmem:[#allocation33_spill] sm:$0xff] %v12633_v40  ;;  %13884 = vst [vmem:[#allocation5_spill] sm:$0xff] %v12637_v28  ;;  %v12653_v4 = vadd.f32 %v12397_v62, %v12162_v60  ;;  %v12657_v31 = vadd.f32 %v12401_v13, %v12162_v60  ;;  %v13887_v40 = vld [vmem:[#allocation23_spill] sm:$0xff] }
 0x53f   :  { %13886 = vst [vmem:[#allocation38_spill] sm:$0xff] %v12641_v56  ;;  %v6403_v21 = vadd.f32 %v12162_v60, %v13887_v40  ;;  %v13888_v56 = vld [vmem:[#allocation21_spill] sm:$0xff]  ;;  %v12663_v15 = vpop.permute.xlu1 %6908 }
 0x540   :  { %v6402_v28 = vadd.f32 %v12162_v60, %v13888_v56 }
 0x541   :  { %6516 = vrot.lane.b32.xlu1 %v6403_v21, %s8987_s3  ;;  %v12671_v13 = vpop.permute.xlu0 %6910  ;;  %v13905_v21 = vld [vmem:[#allocation14_spill] sm:$0xff] }
 0x542   :  { %6514 = vrot.lane.b32.xlu0 %v6402_v28, %s8987_s3 }
 0x543   :  { %v12669_v62 = vpop.permute.xlu1 %6912 }
 0x545   :  { %6520 = vrot.lane.b32.xlu1 %v12413_v26, %s8987_s3  ;;  %v12679_v40 = vpop.permute.xlu0 %6914 }
 0x546   :  { %6518 = vrot.lane.b32.xlu0 %v12405_v17, %s8987_s3 }
 0x547   :  { %v12677_v60 = vpop.permute.xlu1 %6916 }
 0x549   :  { %6524 = vrot.lane.b32.xlu1 %v12421_v49, %s8987_s3  ;;  %v12685_v26 = vpop.permute.xlu0 %7080 }
 0x54a   :  { %6522 = vrot.lane.b32.xlu0 %v12417_v24, %s8987_s3 }
 0x54b   :  { %v12683_v17 = vpop.permute.xlu1 %7082 }
 0x54d   :  { %6528 = vrot.lane.b32.xlu1 %v12429_v36, %s8987_s3  ;;  %v12693_v49 = vpop.permute.xlu0 %7084 }
 0x54e   :  { %6526 = vrot.lane.b32.xlu0 %v12425_v22, %s8987_s3 }
 0x54f   :  { %v12691_v24 = vpop.permute.xlu1 %7086 }
 0x551   :  { %6532 = vrot.lane.b32.xlu1 %v12437_v61, %s8987_s3  ;;  %v12699_v36 = vpop.permute.xlu0 %7088 }
 0x552   :  { %6530 = vrot.lane.b32.xlu0 %v12433_v2, %s8987_s3 }
 0x553   :  { %v12697_v22 = vpop.permute.xlu1 %7090 }
 0x555   :  { %6536 = vrot.lane.b32.xlu1 %v12445_v16, %s8987_s3  ;;  %v12711_v61 = vpop.permute.xlu0 %7092 }
 0x556   :  { %6534 = vrot.lane.b32.xlu0 %v12441_v43, %s8987_s3 }
 0x557   :  { %v12709_v2 = vpop.permute.xlu1 %7094 }
 0x559   :  { %6540 = vrot.lane.b32.xlu1 %v12453_v12, %s8987_s3  ;;  %v12719_v16 = vpop.permute.xlu0 %7096 }
 0x55a   :  { %6538 = vrot.lane.b32.xlu0 %v12449_v58, %s8987_s3 }
 0x55b   :  { %v12717_v43 = vpop.permute.xlu1 %7098 }
 0x55d   :  { %6544 = vrot.lane.b32.xlu1 %v12461_v10, %s8987_s3  ;;  %v12731_v12 = vpop.permute.xlu0 %7100 }
 0x55e   :  { %6542 = vrot.lane.b32.xlu0 %v12457_v44, %s8987_s3 }
 0x55f   :  { %v12729_v58 = vpop.permute.xlu1 %7102 }
 0x561   :  { %6775 = vrot.lane.b32.xlu1 %v12469_v6, %s8985_s20  ;;  %v12739_v10 = vpop.permute.xlu0 %7104 }
 0x562   :  { %6773 = vrot.lane.b32.xlu0 %v12465_v0, %s8985_s20 }
 0x563   :  { %v12737_v44 = vpop.permute.xlu1 %7106 }
 0x565   :  { %6779 = vrot.lane.b32.xlu1 %v12477_v48, %s8985_s20  ;;  %v12751_v6 = vpop.permute.xlu0 %7108 }
 0x566   :  { %6777 = vrot.lane.b32.xlu0 %v12473_v39, %s8985_s20 }
 0x567   :  { %v12749_v0 = vpop.permute.xlu1 %7110 }
 0x569   :  { %6783 = vrot.lane.b32.xlu1 %v12485_v29, %s8985_s20  ;;  %v12757_v48 = vpop.permute.xlu0 %7112 }
 0x56a   :  { %6781 = vrot.lane.b32.xlu0 %v12481_v25, %s8985_s20 }
 0x56b   :  { %v12755_v39 = vpop.permute.xlu1 %7114 }
 0x56d   :  { %6787 = vrot.lane.b32.xlu1 %v12493_v11, %s8985_s20  ;;  %v12765_v25 = vpop.permute.xlu0 %7116  ;;  %v13889_v11 = vld [vmem:[#allocation15_spill] sm:$0xff] }
 0x56e   :  { %6785 = vrot.lane.b32.xlu0 %v12489_v9, %s8985_s20 }
 0x571   :  { %6791 = vrot.lane.b32.xlu1 %v12501_v55, %s8985_s20  ;;  %v12771_v9 = vpop.permute.xlu0 %7120 }
 0x572   :  { %6789 = vrot.lane.b32.xlu0 %v12497_v54, %s8985_s20 }
 0x575   :  { %6795 = vrot.lane.b32.xlu1 %v12513_v20, %s8985_s20  ;;  %v12779_v55 = vpop.permute.xlu0 %7124 }
 0x576   :  { %6793 = vrot.lane.b32.xlu0 %v12505_v19, %s8985_s20  ;;  %v13890_v19 = vld [vmem:[#allocation20_spill] sm:$0xff] }
 0x579   :  { %6799 = vrot.lane.b32.xlu1 %v12521_v50, %s8985_s20 }
 0x57a   :  { %6797 = vrot.lane.b32.xlu0 %v12517_v38, %s8985_s20  ;;  %v12785_v38 = vpop.permute.xlu0 %7128 }
 0x57d   :  { %6803 = vrot.lane.b32.xlu1 %v12529_v52, %s8985_s20  ;;  %v12763_v52 = vpop.permute.xlu1 %7118 }
 0x57e   :  { %6801 = vrot.lane.b32.xlu0 %v12525_v7, %s8985_s20  ;;  %s8989_s20 = smov 28   ;;  %v12795_v7 = vpop.permute.xlu0 %7132 }
 0x581   :  { %6969 = vrot.lane.b32.xlu1 %v12537_v14, %s8988_s4  ;;  %v12769_v29 = vpop.permute.xlu1 %7122 }
 0x582   :  { %6967 = vrot.lane.b32.xlu0 %v12533_v42, %s8988_s4  ;;  %v13891_v42 = vld [vmem:[#allocation13_spill] sm:$0xff] }
 0x585   :  { %6973 = vrot.lane.b32.xlu1 %v12545_v47, %s8988_s4  ;;  %v12777_v54 = vpop.permute.xlu1 %7126 }
 0x586   :  { %6971 = vrot.lane.b32.xlu0 %v12541_v45, %s8988_s4  ;;  %v12803_v45 = vpop.permute.xlu0 %7136 }
 0x589   :  { %6977 = vrot.lane.b32.xlu1 %v12553_v51, %s8988_s4  ;;  %v12783_v20 = vpop.permute.xlu1 %7130  ;;  %v13892_v51 = vld [vmem:[#allocation5_spill] sm:$0xff] }
 0x58a   :  { %6975 = vrot.lane.b32.xlu0 %v12549_v1, %s8988_s4  ;;  %v12815_v1 = vpop.permute.xlu0 %7140 }
 0x58d   :  { %6981 = vrot.lane.b32.xlu1 %v12561_v34, %s8988_s4  ;;  %v12793_v50 = vpop.permute.xlu1 %7134 }
 0x58e   :  { %6979 = vrot.lane.b32.xlu0 %v12557_v35, %s8988_s4  ;;  %v13893_v35 = vld [vmem:[#allocation33_spill] sm:$0xff] }
 0x591   :  { %6985 = vrot.lane.b32.xlu1 %v12569_v63, %s8988_s4  ;;  %v12801_v14 = vpop.permute.xlu1 %7138  ;;  %v13894_v63 = vld [vmem:[#allocation48_spill] sm:$0xff] }
 0x592   :  { %6983 = vrot.lane.b32.xlu0 %v12565_v33, %s8988_s4 }
 0x595   :  { %6989 = vrot.lane.b32.xlu1 %v12577_v30, %s8988_s4  ;;  %v12813_v47 = vpop.permute.xlu1 %7142  ;;  %v13895_v30 = vld [vmem:[#allocation47_spill] sm:$0xff] }
 0x596   :  { %6987 = vrot.lane.b32.xlu0 %v13889_v11, %s8988_s4  ;;  %v13907_v11 = vld [vmem:[#allocation16_spill] sm:$0xff] }
 0x599   :  { %6993 = vrot.lane.b32.xlu1 %v12585_v5, %s8988_s4  ;;  %v13896_v5 = vld [vmem:[#allocation46_spill] sm:$0xff] }
 0x59a   :  { %6991 = vrot.lane.b32.xlu0 %v13890_v19, %s8988_s4 }
 0x59d   :  { %6997 = vrot.lane.b32.xlu1 %v12593_v8, %s8988_s4  ;;  %v13898_v8 = vld [vmem:[#allocation38_spill] sm:$0xff] }
 0x59e   :  { %6995 = vrot.lane.b32.xlu0 %v12589_v37, %s8988_s4  ;;  %v13897_v37 = vld [vmem:[#allocation45_spill] sm:$0xff] }
 0x5a1   :  { %7228 = vrot.lane.b32.xlu1 %v12601_v27, %s8989_s20 }
 0x5a2   :  { %7226 = vrot.lane.b32.xlu0 %v12597_v18, %s8989_s20 }
 0x5a5   :  { %7232 = vrot.lane.b32.xlu1 %v12613_v41, %s8989_s20  ;;  %v13900_v41 = vld [vmem:[#allocation3_spill] sm:$0xff] }
 0x5a6   :  { %7230 = vrot.lane.b32.xlu0 %v13891_v42, %s8989_s20 }
 0x5a9   :  { %7236 = vrot.lane.b32.xlu1 %v12621_v46, %s8989_s20  ;;  %v13902_v46 = vld [vmem:[#allocation49_spill] sm:$0xff] }
 0x5aa   :  { %7234 = vrot.lane.b32.xlu0 %v12617_v32, %s8989_s20  ;;  %v13901_v32 = vld [vmem:[#allocation50_spill] sm:$0xff] }
 0x5ad   :  { %7240 = vrot.lane.b32.xlu1 %v12629_v57, %s8989_s20  ;;  %v13899_v57 = vld [vmem:[#allocation32_spill] sm:$0xff] }
 0x5ae   :  { %7238 = vrot.lane.b32.xlu0 %v12625_v59, %s8989_s20  ;;  %v13903_v59 = vld [vmem:[#allocation18_spill] sm:$0xff] }
 0x5b1   :  { %7244 = vrot.lane.b32.xlu1 %v13892_v51, %s8989_s20  ;;  %v13908_v51 = vld [vmem:[#allocation43_spill] sm:$0xff] }
 0x5b2   :  { %7242 = vrot.lane.b32.xlu0 %v13893_v35, %s8989_s20  ;;  %v13911_v35 = vld [vmem:[#allocation17_spill] sm:$0xff] }
 0x5b3   :  { %v6517_v34 = vpop.permute.xlu1 %6516 }
 0x5b4   :  { %v6515_v33 = vpop.permute.xlu0 %6514  ;;  %6564 = vst.msk [vmem:[%s13492_s5 + $0x8] sm:$0xff] %vm6562_vm0, %v6517_v34 }
 0x5b5   :  { %6563 = vst.msk [vmem:[%s13492_s5] sm:$0xff] %vm6562_vm0, %v6515_v33  ;;  %7248 = vrot.lane.b32.xlu1 %v12645_v23, %s8989_s20  ;;  %v13904_v23 = vld [vmem:[#allocation8_spill] sm:$0xff] }
 0x5b6   :  { %6727 = vst.msk [vmem:[%s13492_s5 + $0x7] sm:$0xfe] %vm6723_vm13, %v13894_v63  ;;  %6724 = vst.msk [vmem:[%s13492_s5 - $0x1] sm:$0xfe] %vm6723_vm13, %v13896_v5  ;;  %7246 = vrot.lane.b32.xlu0 %v13898_v8, %s8989_s20  ;;  %v13912_v63 = vld [vmem:[#allocation34_spill] sm:$0xff]  ;;  %v13914_v5 = vld [vmem:[#allocation35_spill] sm:$0xff] }
 0x5b7   :  { %6728 = vst.msk [vmem:[%s13492_s5 + $0xf] sm:$0x1] %vm6725_vm6, %v13895_v30  ;;  %6726 = vst.msk [vmem:[%s13492_s5 + $0x7] sm:$0x1] %vm6725_vm6, %v13897_v37  ;;  %v6521_v18 = vpop.permute.xlu1 %6520  ;;  %v13913_v30 = vld [vmem:[#allocation37_spill] sm:$0xff]  ;;  %v13915_v37 = vld [vmem:[#allocation12_spill] sm:$0xff] }
 0x5b8   :  { %v6519_v27 = vpop.permute.xlu0 %6518  ;;  %6566 = vst.msk [vmem:[%s13492_s5 + $0x18] sm:$0xff] %vm6562_vm0, %v6521_v18 }
 0x5b9   :  { %6565 = vst.msk [vmem:[%s13492_s5 + $0x10] sm:$0xff] %vm6562_vm0, %v6519_v27  ;;  %7252 = vrot.lane.b32.xlu1 %v13903_v59, %s8989_s20  ;;  %v13916_v27 = vld [vmem:[#allocation40_spill] sm:$0xff] }
 0x5ba   :  { %6731 = vst.msk [vmem:[%s13492_s5 + $0x17] sm:$0xfe] %vm6723_vm13, %v13899_v57  ;;  %6729 = vst.msk [vmem:[%s13492_s5 + $0xf] sm:$0xfe] %vm6723_vm13, %v13901_v32  ;;  %7250 = vrot.lane.b32.xlu0 %v12649_v53, %s8989_s20  ;;  %v13906_v53 = vld [vmem:[#allocation11_spill] sm:$0xff]  ;;  %v13917_v57 = vld [vmem:[#allocation41_spill] sm:$0xff] }
 0x5bb   :  { %6732 = vst.msk [vmem:[%s13492_s5 + $0x1f] sm:$0x1] %vm6725_vm6, %v13900_v41  ;;  %6730 = vst.msk [vmem:[%s13492_s5 + $0x17] sm:$0x1] %vm6725_vm6, %v13902_v46  ;;  %v6525_v28 = vpop.permute.xlu1 %6524  ;;  %v13918_v41 = vld [vmem:[#allocation39_spill] sm:$0xff]  ;;  %v13919_v32 = vld [vmem:[#allocation36_spill] sm:$0xff] }
 0x5bc   :  { %v6523_v56 = vpop.permute.xlu0 %6522  ;;  %6568 = vst.msk [vmem:[%s13492_s5 + $0x28] sm:$0xff] %vm6562_vm0, %v6525_v28  ;;  %v13920_v28 = vld [vmem:[#allocation54_spill] sm:$0xff] }
 0x5bd   :  { %6567 = vst.msk [vmem:[%s13492_s5 + $0x20] sm:$0xff] %vm6562_vm0, %v6523_v56  ;;  %7256 = vrot.lane.b32.xlu1 %v12657_v31, %s8989_s20  ;;  %v13909_v31 = vld [vmem:[#allocation44_spill] sm:$0xff]  ;;  %v13921_v56 = vld [vmem:[#allocation53_spill] sm:$0xff] }
 0x5be   :  { %6735 = vst.msk [vmem:[%s13492_s5 + $0x27] sm:$0xfe] %vm6723_vm13, %v13904_v23  ;;  %6733 = vst.msk [vmem:[%s13492_s5 + $0x1f] sm:$0xfe] %vm6723_vm13, %v13906_v53  ;;  %7254 = vrot.lane.b32.xlu0 %v12653_v4, %s8989_s20  ;;  %v13910_v4 = vld [vmem:[#allocation42_spill] sm:$0xff]  ;;  %v13922_v23 = vld [vmem:[#allocation52_spill] sm:$0xff] }
 0x5bf   :  { %6736 = vst.msk [vmem:[%s13492_s5 + $0x2f] sm:$0x1] %vm6725_vm6, %v13905_v21  ;;  %6734 = vst.msk [vmem:[%s13492_s5 + $0x27] sm:$0x1] %vm6725_vm6, %v13907_v11  ;;  %v6529_v19 = vpop.permute.xlu1 %6528  ;;  %v13923_v21 = vld [vmem:[#allocation51_spill] sm:$0xff] }
 0x5c0   :  { %v6527_v42 = vpop.permute.xlu0 %6526  ;;  %6570 = vst.msk [vmem:[%s13492_s5 + $0x38] sm:$0xff] %vm6562_vm0, %v6529_v19  ;;  %v13924_v19 = vld [vmem:[#allocation58_spill] sm:$0xff] }
 0x5c1   :  { %6569 = vst.msk [vmem:[%s13492_s5 + $0x30] sm:$0xff] %vm6562_vm0, %v6527_v42  ;;  %v13925_v42 = vld [vmem:[#allocation57_spill] sm:$0xff] }
 0x5c2   :  { %6739 = vst.msk [vmem:[%s13492_s5 + $0x37] sm:$0xfe] %vm6723_vm13, %v13908_v51  ;;  %6737 = vst.msk [vmem:[%s13492_s5 + $0x2f] sm:$0xfe] %vm6723_vm13, %v13910_v4  ;;  %v13926_v51 = vld [vmem:[#allocation56_spill] sm:$0xff] }
 0x5c3   :  { %6740 = vst.msk [vmem:[%s13492_s5 + $0x3f] sm:$0x1] %vm6725_vm6, %v13909_v31  ;;  %6738 = vst.msk [vmem:[%s13492_s5 + $0x37] sm:$0x1] %vm6725_vm6, %v13911_v35  ;;  %v6533_v34 = vpop.permute.xlu1 %6532  ;;  %v13927_v31 = vld [vmem:[#allocation55_spill] sm:$0xff] }
 0x5c4   :  { %v6531_v33 = vpop.permute.xlu0 %6530  ;;  %6572 = vst.msk [vmem:[%s13492_s5 + $0x48] sm:$0xff] %vm6562_vm0, %v6533_v34  ;;  %v13928_v34 = vld [vmem:[#allocation24_spill] sm:$0xff] }
 0x5c5   :  { %6571 = vst.msk [vmem:[%s13492_s5 + $0x40] sm:$0xff] %vm6562_vm0, %v6531_v33  ;;  %v13929_v33 = vld [vmem:[#allocation27_spill] sm:$0xff] }
 0x5c6   :  { %6743 = vst.msk [vmem:[%s13492_s5 + $0x47] sm:$0xfe] %vm6723_vm13, %v13912_v63  ;;  %6741 = vst.msk [vmem:[%s13492_s5 + $0x3f] sm:$0xfe] %vm6723_vm13, %v13914_v5  ;;  %v13930_v5 = vld [vmem:[#allocation26_spill] sm:$0xff] }
 0x5c7   :  { %6744 = vst.msk [vmem:[%s13492_s5 + $0x4f] sm:$0x1] %vm6725_vm6, %v13913_v30  ;;  %6742 = vst.msk [vmem:[%s13492_s5 + $0x47] sm:$0x1] %vm6725_vm6, %v13915_v37  ;;  %v6537_v8 = vpop.permute.xlu1 %6536  ;;  %v13931_v37 = vld [vmem:[#allocation22_spill] sm:$0xff] }
 0x5c8   :  { %v6535_v18 = vpop.permute.xlu0 %6534  ;;  %6574 = vst.msk [vmem:[%s13492_s5 + $0x58] sm:$0xff] %vm6562_vm0, %v6537_v8 }
 0x5c9   :  { %6573 = vst.msk [vmem:[%s13492_s5 + $0x50] sm:$0xff] %vm6562_vm0, %v6535_v18 }
 0x5ca   :  { %6747 = vst.msk [vmem:[%s13492_s5 + $0x57] sm:$0xfe] %vm6723_vm13, %v13916_v27  ;;  %6745 = vst.msk [vmem:[%s13492_s5 + $0x4f] sm:$0xfe] %vm6723_vm13, %v13918_v41  ;;  %v13932_v27 = vld [vmem:[#allocation9_spill] sm:$0xff] }
 0x5cb   :  { %6748 = vst.msk [vmem:[%s13492_s5 + $0x5f] sm:$0x1] %vm6725_vm6, %v13917_v57  ;;  %6746 = vst.msk [vmem:[%s13492_s5 + $0x57] sm:$0x1] %vm6725_vm6, %v13919_v32  ;;  %v6541_v46 = vpop.permute.xlu1 %6540  ;;  %v13933_v57 = vld [vmem:[#allocation10_spill] sm:$0xff] }
 0x5cc   :  { %v6539_v59 = vpop.permute.xlu0 %6538  ;;  %6576 = vst.msk [vmem:[%s13492_s5 + $0x68] sm:$0xff] %vm6562_vm0, %v6541_v46  ;;  %v13934_v46 = vld [vmem:[#allocation7_spill] sm:$0xff] }
 0x5cd   :  { %6575 = vst.msk [vmem:[%s13492_s5 + $0x60] sm:$0xff] %vm6562_vm0, %v6539_v59  ;;  %v13935_v59 = vld [vmem:[#allocation4_spill] sm:$0xff] }
 0x5ce   :  { %6751 = vst.msk [vmem:[%s13492_s5 + $0x67] sm:$0xfe] %vm6723_vm13, %v13920_v28  ;;  %6749 = vst.msk [vmem:[%s13492_s5 + $0x5f] sm:$0xfe] %vm6723_vm13, %v13922_v23  ;;  %v13936_v23 = vld [vmem:[#allocation6_spill] sm:$0xff] }
 0x5cf   :  { %6752 = vst.msk [vmem:[%s13492_s5 + $0x6f] sm:$0x1] %vm6725_vm6, %v13921_v56  ;;  %6750 = vst.msk [vmem:[%s13492_s5 + $0x67] sm:$0x1] %vm6725_vm6, %v13923_v21  ;;  %v6545_v53 = vpop.permute.xlu1 %6544  ;;  %v13937_v21 = vld [vmem:[#allocation19_spill] sm:$0xff] }
 0x5d0   :  { %v6543_v11 = vpop.permute.xlu0 %6542  ;;  %6578 = vst.msk [vmem:[%s13492_s5 + $0x78] sm:$0xff] %vm6562_vm0, %v6545_v53 }
 0x5d1   :  { %6577 = vst.msk [vmem:[%s13492_s5 + $0x70] sm:$0xff] %vm6562_vm0, %v6543_v11 }
 0x5d2   :  { %6755 = vst.msk [vmem:[%s13492_s5 + $0x77] sm:$0xfe] %vm6723_vm13, %v13924_v19  ;;  %6753 = vst.msk [vmem:[%s13492_s5 + $0x6f] sm:$0xfe] %vm6723_vm13, %v13926_v51 }
 0x5d3   :  { %6756 = vst.msk [vmem:[%s13492_s5 + $0x7f] sm:$0x1] %vm6725_vm6, %v13925_v42  ;;  %6754 = vst.msk [vmem:[%s13492_s5 + $0x77] sm:$0x1] %vm6725_vm6, %v13927_v31  ;;  %v6776_v4 = vpop.permute.xlu1 %6775 }
 0x5d4   :  { %v6774_v35 = vpop.permute.xlu0 %6773  ;;  %6823 = vst.msk [vmem:[%s13492_s5 + $0x8] sm:$0xff] %vm6821_vm7, %v6776_v4 }
 0x5d5   :  { %6822 = vst.msk [vmem:[%s13492_s5] sm:$0xff] %vm6821_vm7, %v6774_v35 }
 0x5d6   :  { %6936 = vst.msk [vmem:[%s13492_s5 + $0x8] sm:$0xff] %vm6934_vm8, %v13928_v34  ;;  %6935 = vst.msk [vmem:[%s13492_s5] sm:$0xff] %vm6934_vm8, %v13929_v33 }
 0x5d7   :  { %v6780_v63 = vpop.permute.xlu1 %6779 }
 0x5d8   :  { %v6778_v30 = vpop.permute.xlu0 %6777  ;;  %6825 = vst.msk [vmem:[%s13492_s5 + $0x18] sm:$0xff] %vm6821_vm7, %v6780_v63 }
 0x5d9   :  { %6824 = vst.msk [vmem:[%s13492_s5 + $0x10] sm:$0xff] %vm6821_vm7, %v6778_v30 }
 0x5da   :  { %6937 = vst.msk [vmem:[%s13492_s5 + $0x10] sm:$0xff] %vm6934_vm8, %v13930_v5  ;;  %6938 = vst.msk [vmem:[%s13492_s5 + $0x18] sm:$0xff] %vm6934_vm8, %v13931_v37 }
 0x5db   :  { %v6784_v8 = vpop.permute.xlu1 %6783 }
 0x5dc   :  { %v6782_v18 = vpop.permute.xlu0 %6781  ;;  %6827 = vst.msk [vmem:[%s13492_s5 + $0x28] sm:$0xff] %vm6821_vm7, %v6784_v8 }
 0x5dd   :  { %6826 = vst.msk [vmem:[%s13492_s5 + $0x20] sm:$0xff] %vm6821_vm7, %v6782_v18 }
 0x5de   :  { %6939 = vst.msk [vmem:[%s13492_s5 + $0x20] sm:$0xff] %vm6934_vm8, %v13932_v27  ;;  %6940 = vst.msk [vmem:[%s13492_s5 + $0x28] sm:$0xff] %vm6934_vm8, %v13933_v57 }
 0x5df   :  { %v6788_v41 = vpop.permute.xlu1 %6787 }
 0x5e0   :  { %v6786_v32 = vpop.permute.xlu0 %6785  ;;  %6829 = vst.msk [vmem:[%s13492_s5 + $0x38] sm:$0xff] %vm6821_vm7, %v6788_v41 }
 0x5e1   :  { %6828 = vst.msk [vmem:[%s13492_s5 + $0x30] sm:$0xff] %vm6821_vm7, %v6786_v32 }
 0x5e2   :  { %6941 = vst.msk [vmem:[%s13492_s5 + $0x30] sm:$0xff] %vm6934_vm8, %v13934_v46  ;;  %6942 = vst.msk [vmem:[%s13492_s5 + $0x38] sm:$0xff] %vm6934_vm8, %v13935_v59 }
 0x5e3   :  { %v6792_v28 = vpop.permute.xlu1 %6791 }
 0x5e4   :  { %v6790_v56 = vpop.permute.xlu0 %6789  ;;  %6831 = vst.msk [vmem:[%s13492_s5 + $0x48] sm:$0xff] %vm6821_vm7, %v6792_v28 }
 0x5e5   :  { %6830 = vst.msk [vmem:[%s13492_s5 + $0x40] sm:$0xff] %vm6821_vm7, %v6790_v56 }
 0x5e6   :  { %6943 = vst.msk [vmem:[%s13492_s5 + $0x40] sm:$0xff] %vm6934_vm8, %v13936_v23  ;;  %6944 = vst.msk [vmem:[%s13492_s5 + $0x48] sm:$0xff] %vm6934_vm8, %v13937_v21 }
 0x5e7   :  { %v6796_v53 = vpop.permute.xlu1 %6795 }
 0x5e8   :  { %v6794_v11 = vpop.permute.xlu0 %6793  ;;  %6833 = vst.msk [vmem:[%s13492_s5 + $0x58] sm:$0xff] %vm6821_vm7, %v6796_v53 }
 0x5e9   :  { %6832 = vst.msk [vmem:[%s13492_s5 + $0x50] sm:$0xff] %vm6821_vm7, %v6794_v11 }
 0x5ea   :  { %6945 = vst.msk [vmem:[%s13492_s5 + $0x50] sm:$0xff] %vm6934_vm8, %v12665_v3  ;;  %6946 = vst.msk [vmem:[%s13492_s5 + $0x58] sm:$0xff] %vm6934_vm8, %v12663_v15 }
 0x5eb   :  { %v6800_v19 = vpop.permute.xlu1 %6799 }
 0x5ec   :  { %v6798_v42 = vpop.permute.xlu0 %6797  ;;  %6835 = vst.msk [vmem:[%s13492_s5 + $0x68] sm:$0xff] %vm6821_vm7, %v6800_v19 }
 0x5ed   :  { %6834 = vst.msk [vmem:[%s13492_s5 + $0x60] sm:$0xff] %vm6821_vm7, %v6798_v42 }
 0x5ee   :  { %6947 = vst.msk [vmem:[%s13492_s5 + $0x60] sm:$0xff] %vm6934_vm8, %v12671_v13  ;;  %6948 = vst.msk [vmem:[%s13492_s5 + $0x68] sm:$0xff] %vm6934_vm8, %v12669_v62 }
 0x5ef   :  { %v6804_v15 = vpop.permute.xlu1 %6803 }
 0x5f0   :  { %v6802_v3 = vpop.permute.xlu0 %6801  ;;  %6837 = vst.msk [vmem:[%s13492_s5 + $0x78] sm:$0xff] %vm6821_vm7, %v6804_v15 }
 0x5f1   :  { %6836 = vst.msk [vmem:[%s13492_s5 + $0x70] sm:$0xff] %vm6821_vm7, %v6802_v3 }
 0x5f2   :  { %6949 = vst.msk [vmem:[%s13492_s5 + $0x70] sm:$0xff] %vm6934_vm8, %v12679_v40  ;;  %6950 = vst.msk [vmem:[%s13492_s5 + $0x78] sm:$0xff] %vm6934_vm8, %v12677_v60 }
 0x5f3   :  { %v6970_v62 = vpop.permute.xlu1 %6969 }
 0x5f4   :  { %v6968_v13 = vpop.permute.xlu0 %6967  ;;  %7017 = vst.msk [vmem:[%s13492_s5 + $0x8] sm:$0xff] %vm7015_vm9, %v6970_v62 }
 0x5f5   :  { %7016 = vst.msk [vmem:[%s13492_s5] sm:$0xff] %vm7015_vm9, %v6968_v13 }
 0x5f6   :  { %7180 = vst.msk [vmem:[%s13492_s5 + $0x7] sm:$0xfe] %vm7176_vm10, %v12693_v49  ;;  %7177 = vst.msk [vmem:[%s13492_s5 - $0x1] sm:$0xfe] %vm7176_vm10, %v12685_v26 }
 0x5f7   :  { %7181 = vst.msk [vmem:[%s13492_s5 + $0xf] sm:$0x1] %vm7178_vm11, %v12691_v24  ;;  %7179 = vst.msk [vmem:[%s13492_s5 + $0x7] sm:$0x1] %vm7178_vm11, %v12683_v17  ;;  %v6974_v60 = vpop.permute.xlu1 %6973 }
 0x5f8   :  { %v6972_v40 = vpop.permute.xlu0 %6971  ;;  %7019 = vst.msk [vmem:[%s13492_s5 + $0x18] sm:$0xff] %vm7015_vm9, %v6974_v60 }
 0x5f9   :  { %7018 = vst.msk [vmem:[%s13492_s5 + $0x10] sm:$0xff] %vm7015_vm9, %v6972_v40 }
 0x5fa   :  { %7184 = vst.msk [vmem:[%s13492_s5 + $0x17] sm:$0xfe] %vm7176_vm10, %v12711_v61  ;;  %7182 = vst.msk [vmem:[%s13492_s5 + $0xf] sm:$0xfe] %vm7176_vm10, %v12699_v36 }
 0x5fb   :  { %7185 = vst.msk [vmem:[%s13492_s5 + $0x1f] sm:$0x1] %vm7178_vm11, %v12709_v2  ;;  %7183 = vst.msk [vmem:[%s13492_s5 + $0x17] sm:$0x1] %vm7178_vm11, %v12697_v22  ;;  %v6978_v17 = vpop.permute.xlu1 %6977 }
 0x5fc   :  { %v6976_v26 = vpop.permute.xlu0 %6975  ;;  %7021 = vst.msk [vmem:[%s13492_s5 + $0x28] sm:$0xff] %vm7015_vm9, %v6978_v17 }
 0x5fd   :  { %7020 = vst.msk [vmem:[%s13492_s5 + $0x20] sm:$0xff] %vm7015_vm9, %v6976_v26 }
 0x5fe   :  { %7188 = vst.msk [vmem:[%s13492_s5 + $0x27] sm:$0xfe] %vm7176_vm10, %v12731_v12  ;;  %7186 = vst.msk [vmem:[%s13492_s5 + $0x1f] sm:$0xfe] %vm7176_vm10, %v12719_v16 }
 0x5ff   :  { %7189 = vst.msk [vmem:[%s13492_s5 + $0x2f] sm:$0x1] %vm7178_vm11, %v12729_v58  ;;  %7187 = vst.msk [vmem:[%s13492_s5 + $0x27] sm:$0x1] %vm7178_vm11, %v12717_v43  ;;  %v6982_v24 = vpop.permute.xlu1 %6981 }
 0x600   :  { %v6980_v49 = vpop.permute.xlu0 %6979  ;;  %7023 = vst.msk [vmem:[%s13492_s5 + $0x38] sm:$0xff] %vm7015_vm9, %v6982_v24 }
 0x601   :  { %7022 = vst.msk [vmem:[%s13492_s5 + $0x30] sm:$0xff] %vm7015_vm9, %v6980_v49 }
 0x602   :  { %7192 = vst.msk [vmem:[%s13492_s5 + $0x37] sm:$0xfe] %vm7176_vm10, %v12751_v6  ;;  %7190 = vst.msk [vmem:[%s13492_s5 + $0x2f] sm:$0xfe] %vm7176_vm10, %v12739_v10 }
 0x603   :  { %7193 = vst.msk [vmem:[%s13492_s5 + $0x3f] sm:$0x1] %vm7178_vm11, %v12749_v0  ;;  %7191 = vst.msk [vmem:[%s13492_s5 + $0x37] sm:$0x1] %vm7178_vm11, %v12737_v44  ;;  %v6986_v22 = vpop.permute.xlu1 %6985 }
 0x604   :  { %v6984_v36 = vpop.permute.xlu0 %6983  ;;  %7025 = vst.msk [vmem:[%s13492_s5 + $0x48] sm:$0xff] %vm7015_vm9, %v6986_v22 }
 0x605   :  { %7024 = vst.msk [vmem:[%s13492_s5 + $0x40] sm:$0xff] %vm7015_vm9, %v6984_v36 }
 0x606   :  { %7196 = vst.msk [vmem:[%s13492_s5 + $0x47] sm:$0xfe] %vm7176_vm10, %v12765_v25  ;;  %7194 = vst.msk [vmem:[%s13492_s5 + $0x3f] sm:$0xfe] %vm7176_vm10, %v12757_v48 }
 0x607   :  { %7197 = vst.msk [vmem:[%s13492_s5 + $0x4f] sm:$0x1] %vm7178_vm11, %v12763_v52  ;;  %7195 = vst.msk [vmem:[%s13492_s5 + $0x47] sm:$0x1] %vm7178_vm11, %v12755_v39  ;;  %v6990_v2 = vpop.permute.xlu1 %6989 }
 0x608   :  { %v6988_v61 = vpop.permute.xlu0 %6987  ;;  %7027 = vst.msk [vmem:[%s13492_s5 + $0x58] sm:$0xff] %vm7015_vm9, %v6990_v2 }
 0x609   :  { %7026 = vst.msk [vmem:[%s13492_s5 + $0x50] sm:$0xff] %vm7015_vm9, %v6988_v61 }
 0x60a   :  { %7200 = vst.msk [vmem:[%s13492_s5 + $0x57] sm:$0xfe] %vm7176_vm10, %v12779_v55  ;;  %7198 = vst.msk [vmem:[%s13492_s5 + $0x4f] sm:$0xfe] %vm7176_vm10, %v12771_v9 }
 0x60b   :  { %7201 = vst.msk [vmem:[%s13492_s5 + $0x5f] sm:$0x1] %vm7178_vm11, %v12777_v54  ;;  %7199 = vst.msk [vmem:[%s13492_s5 + $0x57] sm:$0x1] %vm7178_vm11, %v12769_v29  ;;  %v6994_v43 = vpop.permute.xlu1 %6993 }
 0x60c   :  { %v6992_v16 = vpop.permute.xlu0 %6991  ;;  %7029 = vst.msk [vmem:[%s13492_s5 + $0x68] sm:$0xff] %vm7015_vm9, %v6994_v43 }
 0x60d   :  { %7028 = vst.msk [vmem:[%s13492_s5 + $0x60] sm:$0xff] %vm7015_vm9, %v6992_v16 }
 0x60e   :  { %7204 = vst.msk [vmem:[%s13492_s5 + $0x67] sm:$0xfe] %vm7176_vm10, %v12795_v7  ;;  %7202 = vst.msk [vmem:[%s13492_s5 + $0x5f] sm:$0xfe] %vm7176_vm10, %v12785_v38 }
 0x60f   :  { %7205 = vst.msk [vmem:[%s13492_s5 + $0x6f] sm:$0x1] %vm7178_vm11, %v12793_v50  ;;  %7203 = vst.msk [vmem:[%s13492_s5 + $0x67] sm:$0x1] %vm7178_vm11, %v12783_v20  ;;  %v6998_v58 = vpop.permute.xlu1 %6997 }
 0x610   :  { %v6996_v12 = vpop.permute.xlu0 %6995  ;;  %7031 = vst.msk [vmem:[%s13492_s5 + $0x78] sm:$0xff] %vm7015_vm9, %v6998_v58 }
 0x611   :  { %7030 = vst.msk [vmem:[%s13492_s5 + $0x70] sm:$0xff] %vm7015_vm9, %v6996_v12 }
 0x612   :  { %7208 = vst.msk [vmem:[%s13492_s5 + $0x77] sm:$0xfe] %vm7176_vm10, %v12815_v1  ;;  %7206 = vst.msk [vmem:[%s13492_s5 + $0x6f] sm:$0xfe] %vm7176_vm10, %v12803_v45 }
 0x613   :  { %7209 = vst.msk [vmem:[%s13492_s5 + $0x7f] sm:$0x1] %vm7178_vm11, %v12813_v47  ;;  %7207 = vst.msk [vmem:[%s13492_s5 + $0x77] sm:$0x1] %vm7178_vm11, %v12801_v14  ;;  %v7229_v44 = vpop.permute.xlu1 %7228 }
 0x614   :  { %v7227_v10 = vpop.permute.xlu0 %7226  ;;  %7276 = vst.msk [vmem:[%s13492_s5 + $0x8] sm:$0xff] %vm7274_vm12, %v7229_v44 }
 0x615   :  { %7275 = vst.msk [vmem:[%s13492_s5] sm:$0xff] %vm7274_vm12, %v7227_v10 }
 0x617   :  { %v7233_v0 = vpop.permute.xlu1 %7232 }
 0x618   :  { %v7231_v6 = vpop.permute.xlu0 %7230  ;;  %7278 = vst.msk [vmem:[%s13492_s5 + $0x18] sm:$0xff] %vm7274_vm12, %v7233_v0 }
 0x619   :  { %7277 = vst.msk [vmem:[%s13492_s5 + $0x10] sm:$0xff] %vm7274_vm12, %v7231_v6 }
 0x61b   :  { %v7237_v39 = vpop.permute.xlu1 %7236 }
 0x61c   :  { %v7235_v48 = vpop.permute.xlu0 %7234  ;;  %7280 = vst.msk [vmem:[%s13492_s5 + $0x28] sm:$0xff] %vm7274_vm12, %v7237_v39 }
 0x61d   :  { %7279 = vst.msk [vmem:[%s13492_s5 + $0x20] sm:$0xff] %vm7274_vm12, %v7235_v48 }
 0x61f   :  { %v7241_v52 = vpop.permute.xlu1 %7240 }
 0x620   :  { %v7239_v25 = vpop.permute.xlu0 %7238  ;;  %7282 = vst.msk [vmem:[%s13492_s5 + $0x38] sm:$0xff] %vm7274_vm12, %v7241_v52 }
 0x621   :  { %7281 = vst.msk [vmem:[%s13492_s5 + $0x30] sm:$0xff] %vm7274_vm12, %v7239_v25 }
 0x623   :  { %v7245_v29 = vpop.permute.xlu1 %7244 }
 0x624   :  { %v7243_v9 = vpop.permute.xlu0 %7242  ;;  %7284 = vst.msk [vmem:[%s13492_s5 + $0x48] sm:$0xff] %vm7274_vm12, %v7245_v29 }
 0x625   :  { %7283 = vst.msk [vmem:[%s13492_s5 + $0x40] sm:$0xff] %vm7274_vm12, %v7243_v9 }
 0x627   :  { %v7249_v54 = vpop.permute.xlu1 %7248 }
 0x628   :  { %v7247_v55 = vpop.permute.xlu0 %7246  ;;  %7286 = vst.msk [vmem:[%s13492_s5 + $0x58] sm:$0xff] %vm7274_vm12, %v7249_v54 }
 0x629   :  { %7285 = vst.msk [vmem:[%s13492_s5 + $0x50] sm:$0xff] %vm7274_vm12, %v7247_v55 }
 0x62b   :  { %v7253_v20 = vpop.permute.xlu1 %7252 }
 0x62c   :  { %v7251_v38 = vpop.permute.xlu0 %7250  ;;  %7288 = vst.msk [vmem:[%s13492_s5 + $0x68] sm:$0xff] %vm7274_vm12, %v7253_v20 }
 0x62d   :  { %7287 = vst.msk [vmem:[%s13492_s5 + $0x60] sm:$0xff] %vm7274_vm12, %v7251_v38 }
 0x62f   :  { %v7257_v50 = vpop.permute.xlu1 %7256 }
 0x630   :  { %v7255_v7 = vpop.permute.xlu0 %7254  ;;  %7290 = vst.msk [vmem:[%s13492_s5 + $0x78] sm:$0xff] %vm7274_vm12, %v7257_v50 }
 0x631   :  { %7289 = vst.msk [vmem:[%s13492_s5 + $0x70] sm:$0xff] %vm7274_vm12, %v7255_v7 }

</bundles_post_ra>
